<compile_context>
chip_gen: v7x
topology: tpu7x:2x2x1
jax: 0.10.0
libtpu: 0.0.40
codegen_flags: <defaults>
</compile_context>

<pallas_src>
import functools

import jax
import jax.numpy as jnp
from jax.experimental import pallas as pl
from jax.experimental.pallas import tpu as pltpu

F_DIM = 2048          # in_features of the classifier head (fixed by the module)
N_CLASSES = 10        # n_classes for this synthetic instantiation
N_CLASSES_PAD = 128   # pad class dim to a full lane so the output tile is lane-dense

TILE_S = 128          # spatial tile (lane-dense x DMA)
F_STRIP = 256         # feature strip for in-kernel fusion (bounds the live intermediate)


def _fused_forward_kernel(x_ref, w1_ref, b1_ref, w2_ref, out_ref, acc_ref,
                          *, n_chan, tile_b, tile_s, f_shard, s_valid, s_tiles):
    """One (feature-shard, batch block, spatial block) grid step.

    x_ref   : (tile_b, C, tile_s)        f32   input tile, spatial axis lane-dense
    w1_ref  : (C, f_shard)               f32   1x1-conv weight shard (synthetic backbone)
    b1_ref  : (1, f_shard)               f32   1x1-conv bias shard
    w2_ref  : (f_shard, N_CLASSES_PAD)   bf16  classifier weight shard (transposed, padded)
    out_ref : (1, tile_b, N_CLASSES_PAD) f32   partial logits (resident across spatial steps)
    acc_ref : (tile_b, f_shard)          f32   running spatial sum of relu(conv) features
    """
    s = pl.program_id(2)
    s_padded = s_tiles * tile_s            # static

    @pl.when(s == 0)
    def _init():
        acc_ref[...] = jnp.zeros_like(acc_ref)

    # Per-channel x slices, loaded once per tile (no swapaxes relayout of the x tile,
    # no wasteful (tile_b, tile_s, C) layout with only C/128 lanes used).
    if s_padded != s_valid:
        pos = s * tile_s + jax.lax.broadcasted_iota(jnp.int32, (tile_b, tile_s), 1)
        valid = pos < s_valid
    xc = []
    for c in range(n_chan):
        v = x_ref[:, c, :].astype(jnp.float32)              # (tile_b, tile_s)
        if s_padded != s_valid:
            v = jnp.where(valid, v, 0.0)                     # zero the ragged spatial tail
        xc.append(v.reshape(tile_b, tile_s, 1))

    # Strip-fused channel FMAs + ReLU + partial spatial sum: the live intermediate is
    # (tile_b, tile_s, F_STRIP) per strip instead of the full 2048-feature slab.
    for f0 in range(0, f_shard, F_STRIP):
        w1s = w1_ref[:, f0:f0 + F_STRIP]                     # (C, F_STRIP)
        h = b1_ref[:, f0:f0 + F_STRIP].reshape(1, 1, F_STRIP)
        for c in range(n_chan):                              # C tiny: VPU broadcast-FMAs
            h = h + xc[c] * w1s[c:c + 1, :].reshape(1, 1, F_STRIP)
        h = jnp.maximum(h, 0.0)                              # ReLU
        acc_ref[:, f0:f0 + F_STRIP] += jnp.sum(h, axis=1)    # partial global-avg-pool

    @pl.when(s == pl.num_programs(2) - 1)
    def _finalize():
        acc = acc_ref[...]
        if s_padded != s_valid:
            # Zeroed (padded) spatial positions each contributed exactly ReLU(b1):
            # one-time constant correction instead of a per-tile mask over h.
            acc = acc - float(s_padded - s_valid) * jnp.maximum(b1_ref[...], 0.0)
        feat = acc * (1.0 / s_valid)                         # mean pool, (tile_b, f_shard)
        # nn.Dropout(p=0.2) is the identity at inference.
        # TODO(synk): training-mode dropout (random mask + 1/(1-p) scaling) not emitted.
        logits = jnp.dot(feat.astype(jnp.bfloat16), w2_ref[...],
                         preferred_element_type=jnp.float32)
        out_ref[...] = logits[None].astype(out_ref.dtype)


@functools.partial(jax.jit, static_argnames=("n_classes",))
def multilabel_classifier_forward(x_nchw, w1, b1, w2_pad, b2, *, n_classes):
    """NCHW input -> {'label': (B, n_classes) logits} via one fused Pallas kernel."""
    B, C, H, W = x_nchw.shape
    S = H * W

    # (B, C, H, W) -> (B, C, S): metadata-only reshape; x stays f32 in HBM
    # (no wrapper-side cast/pad pass over the dominant stream).
    x = x_nchw.reshape(B, C, S)

    # Batch tiling: never pad x unless the batch is both large and ragged.
    if B % 8 == 0:
        tile_b = 16 if (B % 16 == 0 and B >= 16) else 8
        b_pad = B
    elif B <= 16:
        tile_b, b_pad = B, B
    else:
        tile_b = 8
        b_pad = pl.cdiv(B, 8) * 8
        x = jnp.pad(x, ((0, b_pad - B), (0, 0), (0, 0)))    # rare ragged-large-batch fallback

    tile_s = min(TILE_S, S)
    n_b = b_pad // tile_b
    n_s = pl.cdiv(S, tile_s)

    # v7x: with a single batch block the second TensorCore would idle; split the feature
    # dim over a leading "parallel" grid axis instead and sum partial logits outside.
    n_fs = 2 if n_b < 2 else 1
    f_shard = F_DIM // n_fs

    grid = (n_fs, n_b, n_s)
    kernel = functools.partial(_fused_forward_kernel, n_chan=C, tile_b=tile_b,
                               tile_s=tile_s, f_shard=f_shard, s_valid=S, s_tiles=n_s)

    partial_logits = pl.pallas_call(
        kernel,
        out_shape=jax.ShapeDtypeStruct((n_fs, b_pad, N_CLASSES_PAD), jnp.float32),
        grid=grid,
        in_specs=[
            pl.BlockSpec((tile_b, C, tile_s), lambda f, b, s: (b, 0, s)),
            pl.BlockSpec((C, f_shard), lambda f, b, s: (0, f)),         # resident weights
            pl.BlockSpec((1, f_shard), lambda f, b, s: (0, f)),
            pl.BlockSpec((f_shard, N_CLASSES_PAD), lambda f, b, s: (f, 0)),
        ],
        out_specs=pl.BlockSpec((1, tile_b, N_CLASSES_PAD), lambda f, b, s: (f, b, 0)),
        scratch_shapes=[pltpu.VMEM((tile_b, f_shard), jnp.float32)],
        compiler_params=pltpu.CompilerParams(
            dimension_semantics=("parallel", "parallel", "arbitrary"),
            vmem_limit_bytes=32 << 20,
        ),
    )(x, w1, b1, w2_pad.astype(jnp.bfloat16))   # astype is a no-op: w2_pad pre-cast to bf16

    logits = jnp.sum(partial_logits, axis=0)[:B, :n_classes] + b2[:, :n_classes]
    return {"label": logits}


def _reference(x_nchw, w1, b1, w2_pad, b2, n_classes):
    """Pure-JAX f32 reference for the synthetic-backbone forward pass."""
    B, C, H, W = x_nchw.shape
    x = x_nchw.reshape(B, C, H * W)
    h = jnp.maximum(jnp.einsum("bcs,cf->bsf", x, w1) + b1[0], 0.0)
    feat = jnp.mean(h, axis=1)                               # global average pool
    return feat @ w2_pad[:, :n_classes].astype(jnp.float32) + b2[0, :n_classes]


def make_params(key, in_channels):
    """Deterministic synthetic parameters (shapes dictated by the module)."""
    k1, k2, k3, k4 = jax.random.split(key, 4)
    # Synthetic backbone: 1x1 conv C -> 2048.
    w1 = jax.random.normal(k1, (in_channels, F_DIM), jnp.float32) * 0.05
    b1 = jax.random.normal(k2, (1, F_DIM), jnp.float32) * 0.01
    # Classifier head: nn.Linear(2048, n_classes); stored transposed (F, n_cls),
    # zero-padded to N_CLASSES_PAD lanes, and pre-cast to bf16 outside the per-call jit.
    w2 = jax.random.normal(k3, (F_DIM, N_CLASSES), jnp.float32) * 0.02
    b2 = jax.random.normal(k4, (1, N_CLASSES), jnp.float32) * 0.01
    w2_pad = jnp.zeros((F_DIM, N_CLASSES_PAD), jnp.float32).at[:, :N_CLASSES].set(w2)
    return w1, b1, w2_pad.astype(jnp.bfloat16), b2


if __name__ == "__main__":
    key = jax.random.PRNGKey(0)
    kx, kp = jax.random.split(key)

    # Small NCHW input consistent with the module's conv-backbone interface.
    B, C, H, W = 2, 4, 16, 16
    x = jax.random.normal(kx, (B, C, H, W), jnp.float32)

    w1, b1, w2_pad, b2 = make_params(kp, C)

    out = multilabel_classifier_forward(x, w1, b1, w2_pad, b2, n_classes=N_CLASSES)
    jax.block_until_ready(out["label"])
    assert out["label"].shape == (B, N_CLASSES)
    assert bool(jnp.all(jnp.isfinite(out["label"])))

    ref = _reference(x, w1, b1, w2_pad, b2, N_CLASSES)
    max_err = float(jnp.max(jnp.abs(out["label"] - ref)))
    assert bool(jnp.allclose(out["label"], ref, atol=2e-2, rtol=2e-2)), max_err
    print("KERNEL_OK")
</pallas_src>

<mosaic_0001>
module attributes {stable_mosaic.version = 11 : i64} {
  func.func @_fused_forward_kernel(%arg0: i32, %arg1: i32, %arg2: i32, %arg3: memref<2x4x128xf32, #tpu.memory_space<vmem>>, %arg4: memref<4x1024xf32, #tpu.memory_space<vmem>>, %arg5: memref<1x1024xf32, #tpu.memory_space<vmem>>, %arg6: memref<1024x128xbf16, #tpu.memory_space<vmem>>, %arg7: memref<1x2x128xf32, #tpu.memory_space<vmem>>, %arg8: memref<2x1024xf32, #tpu.memory_space<vmem>>) attributes {dimension_semantics = [#tpu.dimension_semantics<parallel>, #tpu.dimension_semantics<parallel>, #tpu.dimension_semantics<arbitrary>], iteration_bounds = array<i64: 2, 1, 2>, scalar_prefetch = 0 : i64, scratch_operands = 1 : i64, tpu.core_type = #tpu.core_type<tc>, window_params = [{transform_indices = @transform_0, window_bounds = array<i64: 2, 4, 128>}, {transform_indices = @transform_1, window_bounds = array<i64: 4, 1024>}, {transform_indices = @transform_2, window_bounds = array<i64: 1, 1024>}, {transform_indices = @transform_3, window_bounds = array<i64: 1024, 128>}, {transform_indices = @transform_4, window_bounds = array<i64: 1, 2, 128>}]} {
    %c0_i32 = arith.constant 0 : i32
    %0 = arith.cmpi eq, %arg2, %c0_i32 : i32
    %1 = arith.extui %0 : i1 to i32
    %c0_i32_0 = arith.constant 0 : i32
    %2 = arith.cmpi ne, %1, %c0_i32_0 : i32
    scf.if %2 {
      %cst_46 = arith.constant 0.000000e+00 : f32
      %154 = vector.broadcast %cst_46 : f32 to vector<2x1024xf32>
      %c0_47 = arith.constant 0 : index
      %c0_48 = arith.constant 0 : index
      %155 = vector.load %arg8[%c0_47, %c0_48] : memref<2x1024xf32, #tpu.memory_space<vmem>>, vector<2x1024xf32>
      tpu.vector_store %arg8[%c0_47, %c0_48], %154 {strides = array<i32>} : memref<2x1024xf32, #tpu.memory_space<vmem>>, vector<2x1024xf32>,
    } else {
    }
    %c0 = arith.constant 0 : index
    %c0_1 = arith.constant 0 : index
    %c0_2 = arith.constant 0 : index
    %3 = vector.load %arg3[%c0, %c0_1, %c0_2] : memref<2x4x128xf32, #tpu.memory_space<vmem>>, vector<2x1x128xf32>
    %4 = vector.shape_cast %3 : vector<2x1x128xf32> to vector<2x128xf32>
    %5 = vector.shape_cast %4 : vector<2x128xf32> to vector<2x128x1xf32>
    %c0_3 = arith.constant 0 : index
    %c1 = arith.constant 1 : index
    %c0_4 = arith.constant 0 : index
    %6 = vector.load %arg3[%c0_3, %c1, %c0_4] : memref<2x4x128xf32, #tpu.memory_space<vmem>>, vector<2x1x128xf32>
    %7 = vector.shape_cast %6 : vector<2x1x128xf32> to vector<2x128xf32>
    %8 = vector.shape_cast %7 : vector<2x128xf32> to vector<2x128x1xf32>
    %c0_5 = arith.constant 0 : index
    %c2 = arith.constant 2 : index
    %c0_6 = arith.constant 0 : index
    %9 = vector.load %arg3[%c0_5, %c2, %c0_6] : memref<2x4x128xf32, #tpu.memory_space<vmem>>, vector<2x1x128xf32>
    %10 = vector.shape_cast %9 : vector<2x1x128xf32> to vector<2x128xf32>
    %11 = vector.shape_cast %10 : vector<2x128xf32> to vector<2x128x1xf32>
    %c0_7 = arith.constant 0 : index
    %c3 = arith.constant 3 : index
    %c0_8 = arith.constant 0 : index
    %12 = vector.load %arg3[%c0_7, %c3, %c0_8] : memref<2x4x128xf32, #tpu.memory_space<vmem>>, vector<2x1x128xf32>
    %13 = vector.shape_cast %12 : vector<2x1x128xf32> to vector<2x128xf32>
    %14 = vector.shape_cast %13 : vector<2x128xf32> to vector<2x128x1xf32>
    %c0_9 = arith.constant 0 : index
    %c0_10 = arith.constant 0 : index
    %15 = vector.load %arg4[%c0_9, %c0_10] : memref<4x1024xf32, #tpu.memory_space<vmem>>, vector<4x256xf32>
    %c0_11 = arith.constant 0 : index
    %c0_12 = arith.constant 0 : index
    %16 = vector.load %arg5[%c0_11, %c0_12] : memref<1x1024xf32, #tpu.memory_space<vmem>>, vector<1x256xf32>
    %17 = vector.shape_cast %16 : vector<1x256xf32> to vector<1x1x256xf32>
    %18 = vector.extract_strided_slice %15 {offsets = [0, 0], sizes = [1, 256], strides = [1, 1]} : vector<4x256xf32> to vector<1x256xf32>
    %19 = vector.shape_cast %18 : vector<1x256xf32> to vector<1x1x256xf32>
    %20 = vector.broadcast %5 : vector<2x128x1xf32> to vector<2x128x256xf32>
    %21 = vector.broadcast %19 : vector<1x1x256xf32> to vector<2x128x256xf32>
    %22 = arith.mulf %20, %21 : vector<2x128x256xf32>
    %23 = vector.broadcast %17 : vector<1x1x256xf32> to vector<2x128x256xf32>
    %24 = arith.addf %23, %22 : vector<2x128x256xf32>
    %25 = vector.extract_strided_slice %15 {offsets = [1, 0], sizes = [1, 256], strides = [1, 1]} : vector<4x256xf32> to vector<1x256xf32>
    %26 = vector.shape_cast %25 : vector<1x256xf32> to vector<1x1x256xf32>
    %27 = vector.broadcast %8 : vector<2x128x1xf32> to vector<2x128x256xf32>
    %28 = vector.broadcast %26 : vector<1x1x256xf32> to vector<2x128x256xf32>
    %29 = arith.mulf %27, %28 : vector<2x128x256xf32>
    %30 = arith.addf %24, %29 : vector<2x128x256xf32>
    %31 = vector.extract_strided_slice %15 {offsets = [2, 0], sizes = [1, 256], strides = [1, 1]} : vector<4x256xf32> to vector<1x256xf32>
    %32 = vector.shape_cast %31 : vector<1x256xf32> to vector<1x1x256xf32>
    %33 = vector.broadcast %11 : vector<2x128x1xf32> to vector<2x128x256xf32>
    %34 = vector.broadcast %32 : vector<1x1x256xf32> to vector<2x128x256xf32>
    %35 = arith.mulf %33, %34 : vector<2x128x256xf32>
    %36 = arith.addf %30, %35 : vector<2x128x256xf32>
    %37 = vector.extract_strided_slice %15 {offsets = [3, 0], sizes = [1, 256], strides = [1, 1]} : vector<4x256xf32> to vector<1x256xf32>
    %38 = vector.shape_cast %37 : vector<1x256xf32> to vector<1x1x256xf32>
    %39 = vector.broadcast %14 : vector<2x128x1xf32> to vector<2x128x256xf32>
    %40 = vector.broadcast %38 : vector<1x1x256xf32> to vector<2x128x256xf32>
    %41 = arith.mulf %39, %40 : vector<2x128x256xf32>
    %42 = arith.addf %36, %41 : vector<2x128x256xf32>
    %cst = arith.constant 0.000000e+00 : f32
    %43 = vector.broadcast %cst : f32 to vector<2x128x256xf32>
    %44 = arith.maximumf %42, %43 : vector<2x128x256xf32>
    %c0_13 = arith.constant 0 : index
    %c0_14 = arith.constant 0 : index
    %45 = vector.load %arg8[%c0_13, %c0_14] : memref<2x1024xf32, #tpu.memory_space<vmem>>, vector<2x256xf32>
    %cst_15 = arith.constant dense<0.000000e+00> : vector<2x256xf32>
    %46 = vector.multi_reduction <add>, %44, %cst_15 [1] : vector<2x128x256xf32> to vector<2x256xf32>
    %47 = arith.addf %45, %46 : vector<2x256xf32>
    %c0_16 = arith.constant 0 : index
    %c0_17 = arith.constant 0 : index
    %48 = vector.load %arg8[%c0_16, %c0_17] : memref<2x1024xf32, #tpu.memory_space<vmem>>, vector<2x256xf32>
    tpu.vector_store %arg8[%c0_16, %c0_17], %47 {strides = array<i32>} : memref<2x1024xf32, #tpu.memory_space<vmem>>, vector<2x256xf32>,
    %c0_18 = arith.constant 0 : index
    %c256 = arith.constant 256 : index
    %49 = vector.load %arg4[%c0_18, %c256] : memref<4x1024xf32, #tpu.memory_space<vmem>>, vector<4x256xf32>
    %c0_19 = arith.constant 0 : index
    %c256_20 = arith.constant 256 : index
    %50 = vector.load %arg5[%c0_19, %c256_20] : memref<1x1024xf32, #tpu.memory_space<vmem>>, vector<1x256xf32>
    %51 = vector.shape_cast %50 : vector<1x256xf32> to vector<1x1x256xf32>
    %52 = vector.extract_strided_slice %49 {offsets = [0, 0], sizes = [1, 256], strides = [1, 1]} : vector<4x256xf32> to vector<1x256xf32>
    %53 = vector.shape_cast %52 : vector<1x256xf32> to vector<1x1x256xf32>
    %54 = vector.broadcast %5 : vector<2x128x1xf32> to vector<2x128x256xf32>
    %55 = vector.broadcast %53 : vector<1x1x256xf32> to vector<2x128x256xf32>
    %56 = arith.mulf %54, %55 : vector<2x128x256xf32>
    %57 = vector.broadcast %51 : vector<1x1x256xf32> to vector<2x128x256xf32>
    %58 = arith.addf %57, %56 : vector<2x128x256xf32>
    %59 = vector.extract_strided_slice %49 {offsets = [1, 0], sizes = [1, 256], strides = [1, 1]} : vector<4x256xf32> to vector<1x256xf32>
    %60 = vector.shape_cast %59 : vector<1x256xf32> to vector<1x1x256xf32>
    %61 = vector.broadcast %8 : vector<2x128x1xf32> to vector<2x128x256xf32>
    %62 = vector.broadcast %60 : vector<1x1x256xf32> to vector<2x128x256xf32>
    %63 = arith.mulf %61, %62 : vector<2x128x256xf32>
    %64 = arith.addf %58, %63 : vector<2x128x256xf32>
    %65 = vector.extract_strided_slice %49 {offsets = [2, 0], sizes = [1, 256], strides = [1, 1]} : vector<4x256xf32> to vector<1x256xf32>
    %66 = vector.shape_cast %65 : vector<1x256xf32> to vector<1x1x256xf32>
    %67 = vector.broadcast %11 : vector<2x128x1xf32> to vector<2x128x256xf32>
    %68 = vector.broadcast %66 : vector<1x1x256xf32> to vector<2x128x256xf32>
    %69 = arith.mulf %67, %68 : vector<2x128x256xf32>
    %70 = arith.addf %64, %69 : vector<2x128x256xf32>
    %71 = vector.extract_strided_slice %49 {offsets = [3, 0], sizes = [1, 256], strides = [1, 1]} : vector<4x256xf32> to vector<1x256xf32>
    %72 = vector.shape_cast %71 : vector<1x256xf32> to vector<1x1x256xf32>
    %73 = vector.broadcast %14 : vector<2x128x1xf32> to vector<2x128x256xf32>
    %74 = vector.broadcast %72 : vector<1x1x256xf32> to vector<2x128x256xf32>
    %75 = arith.mulf %73, %74 : vector<2x128x256xf32>
    %76 = arith.addf %70, %75 : vector<2x128x256xf32>
    %cst_21 = arith.constant 0.000000e+00 : f32
    %77 = vector.broadcast %cst_21 : f32 to vector<2x128x256xf32>
    %78 = arith.maximumf %76, %77 : vector<2x128x256xf32>
    %c0_22 = arith.constant 0 : index
    %c256_23 = arith.constant 256 : index
    %79 = vector.load %arg8[%c0_22, %c256_23] : memref<2x1024xf32, #tpu.memory_space<vmem>>, vector<2x256xf32>
    %cst_24 = arith.constant dense<0.000000e+00> : vector<2x256xf32>
    %80 = vector.multi_reduction <add>, %78, %cst_24 [1] : vector<2x128x256xf32> to vector<2x256xf32>
    %81 = arith.addf %79, %80 : vector<2x256xf32>
    %c0_25 = arith.constant 0 : index
    %c256_26 = arith.constant 256 : index
    %82 = vector.load %arg8[%c0_25, %c256_26] : memref<2x1024xf32, #tpu.memory_space<vmem>>, vector<2x256xf32>
    tpu.vector_store %arg8[%c0_25, %c256_26], %81 {strides = array<i32>} : memref<2x1024xf32, #tpu.memory_space<vmem>>, vector<2x256xf32>,
    %c0_27 = arith.constant 0 : index
    %c512 = arith.constant 512 : index
    %83 = vector.load %arg4[%c0_27, %c512] : memref<4x1024xf32, #tpu.memory_space<vmem>>, vector<4x256xf32>
    %c0_28 = arith.constant 0 : index
    %c512_29 = arith.constant 512 : index
    %84 = vector.load %arg5[%c0_28, %c512_29] : memref<1x1024xf32, #tpu.memory_space<vmem>>, vector<1x256xf32>
    %85 = vector.shape_cast %84 : vector<1x256xf32> to vector<1x1x256xf32>
    %86 = vector.extract_strided_slice %83 {offsets = [0, 0], sizes = [1, 256], strides = [1, 1]} : vector<4x256xf32> to vector<1x256xf32>
    %87 = vector.shape_cast %86 : vector<1x256xf32> to vector<1x1x256xf32>
    %88 = vector.broadcast %5 : vector<2x128x1xf32> to vector<2x128x256xf32>
    %89 = vector.broadcast %87 : vector<1x1x256xf32> to vector<2x128x256xf32>
    %90 = arith.mulf %88, %89 : vector<2x128x256xf32>
    %91 = vector.broadcast %85 : vector<1x1x256xf32> to vector<2x128x256xf32>
    %92 = arith.addf %91, %90 : vector<2x128x256xf32>
    %93 = vector.extract_strided_slice %83 {offsets = [1, 0], sizes = [1, 256], strides = [1, 1]} : vector<4x256xf32> to vector<1x256xf32>
    %94 = vector.shape_cast %93 : vector<1x256xf32> to vector<1x1x256xf32>
    %95 = vector.broadcast %8 : vector<2x128x1xf32> to vector<2x128x256xf32>
    %96 = vector.broadcast %94 : vector<1x1x256xf32> to vector<2x128x256xf32>
    %97 = arith.mulf %95, %96 : vector<2x128x256xf32>
    %98 = arith.addf %92, %97 : vector<2x128x256xf32>
    %99 = vector.extract_strided_slice %83 {offsets = [2, 0], sizes = [1, 256], strides = [1, 1]} : vector<4x256xf32> to vector<1x256xf32>
    %100 = vector.shape_cast %99 : vector<1x256xf32> to vector<1x1x256xf32>
    %101 = vector.broadcast %11 : vector<2x128x1xf32> to vector<2x128x256xf32>
    %102 = vector.broadcast %100 : vector<1x1x256xf32> to vector<2x128x256xf32>
    %103 = arith.mulf %101, %102 : vector<2x128x256xf32>
    %104 = arith.addf %98, %103 : vector<2x128x256xf32>
    %105 = vector.extract_strided_slice %83 {offsets = [3, 0], sizes = [1, 256], strides = [1, 1]} : vector<4x256xf32> to vector<1x256xf32>
    %106 = vector.shape_cast %105 : vector<1x256xf32> to vector<1x1x256xf32>
    %107 = vector.broadcast %14 : vector<2x128x1xf32> to vector<2x128x256xf32>
    %108 = vector.broadcast %106 : vector<1x1x256xf32> to vector<2x128x256xf32>
    %109 = arith.mulf %107, %108 : vector<2x128x256xf32>
    %110 = arith.addf %104, %109 : vector<2x128x256xf32>
    %cst_30 = arith.constant 0.000000e+00 : f32
    %111 = vector.broadcast %cst_30 : f32 to vector<2x128x256xf32>
    %112 = arith.maximumf %110, %111 : vector<2x128x256xf32>
    %c0_31 = arith.constant 0 : index
    %c512_32 = arith.constant 512 : index
    %113 = vector.load %arg8[%c0_31, %c512_32] : memref<2x1024xf32, #tpu.memory_space<vmem>>, vector<2x256xf32>
    %cst_33 = arith.constant dense<0.000000e+00> : vector<2x256xf32>
    %114 = vector.multi_reduction <add>, %112, %cst_33 [1] : vector<2x128x256xf32> to vector<2x256xf32>
    %115 = arith.addf %113, %114 : vector<2x256xf32>
    %c0_34 = arith.constant 0 : index
    %c512_35 = arith.constant 512 : index
    %116 = vector.load %arg8[%c0_34, %c512_35] : memref<2x1024xf32, #tpu.memory_space<vmem>>, vector<2x256xf32>
    tpu.vector_store %arg8[%c0_34, %c512_35], %115 {strides = array<i32>} : memref<2x1024xf32, #tpu.memory_space<vmem>>, vector<2x256xf32>,
    %c0_36 = arith.constant 0 : index
    %c768 = arith.constant 768 : index
    %117 = vector.load %arg4[%c0_36, %c768] : memref<4x1024xf32, #tpu.memory_space<vmem>>, vector<4x256xf32>
    %c0_37 = arith.constant 0 : index
    %c768_38 = arith.constant 768 : index
    %118 = vector.load %arg5[%c0_37, %c768_38] : memref<1x1024xf32, #tpu.memory_space<vmem>>, vector<1x256xf32>
    %119 = vector.shape_cast %118 : vector<1x256xf32> to vector<1x1x256xf32>
    %120 = vector.extract_strided_slice %117 {offsets = [0, 0], sizes = [1, 256], strides = [1, 1]} : vector<4x256xf32> to vector<1x256xf32>
    %121 = vector.shape_cast %120 : vector<1x256xf32> to vector<1x1x256xf32>
    %122 = vector.broadcast %5 : vector<2x128x1xf32> to vector<2x128x256xf32>
    %123 = vector.broadcast %121 : vector<1x1x256xf32> to vector<2x128x256xf32>
    %124 = arith.mulf %122, %123 : vector<2x128x256xf32>
    %125 = vector.broadcast %119 : vector<1x1x256xf32> to vector<2x128x256xf32>
    %126 = arith.addf %125, %124 : vector<2x128x256xf32>
    %127 = vector.extract_strided_slice %117 {offsets = [1, 0], sizes = [1, 256], strides = [1, 1]} : vector<4x256xf32> to vector<1x256xf32>
    %128 = vector.shape_cast %127 : vector<1x256xf32> to vector<1x1x256xf32>
    %129 = vector.broadcast %8 : vector<2x128x1xf32> to vector<2x128x256xf32>
    %130 = vector.broadcast %128 : vector<1x1x256xf32> to vector<2x128x256xf32>
    %131 = arith.mulf %129, %130 : vector<2x128x256xf32>
    %132 = arith.addf %126, %131 : vector<2x128x256xf32>
    %133 = vector.extract_strided_slice %117 {offsets = [2, 0], sizes = [1, 256], strides = [1, 1]} : vector<4x256xf32> to vector<1x256xf32>
    %134 = vector.shape_cast %133 : vector<1x256xf32> to vector<1x1x256xf32>
    %135 = vector.broadcast %11 : vector<2x128x1xf32> to vector<2x128x256xf32>
    %136 = vector.broadcast %134 : vector<1x1x256xf32> to vector<2x128x256xf32>
    %137 = arith.mulf %135, %136 : vector<2x128x256xf32>
    %138 = arith.addf %132, %137 : vector<2x128x256xf32>
    %139 = vector.extract_strided_slice %117 {offsets = [3, 0], sizes = [1, 256], strides = [1, 1]} : vector<4x256xf32> to vector<1x256xf32>
    %140 = vector.shape_cast %139 : vector<1x256xf32> to vector<1x1x256xf32>
    %141 = vector.broadcast %14 : vector<2x128x1xf32> to vector<2x128x256xf32>
    %142 = vector.broadcast %140 : vector<1x1x256xf32> to vector<2x128x256xf32>
    %143 = arith.mulf %141, %142 : vector<2x128x256xf32>
    %144 = arith.addf %138, %143 : vector<2x128x256xf32>
    %cst_39 = arith.constant 0.000000e+00 : f32
    %145 = vector.broadcast %cst_39 : f32 to vector<2x128x256xf32>
    %146 = arith.maximumf %144, %145 : vector<2x128x256xf32>
    %c0_40 = arith.constant 0 : index
    %c768_41 = arith.constant 768 : index
    %147 = vector.load %arg8[%c0_40, %c768_41] : memref<2x1024xf32, #tpu.memory_space<vmem>>, vector<2x256xf32>
    %cst_42 = arith.constant dense<0.000000e+00> : vector<2x256xf32>
    %148 = vector.multi_reduction <add>, %146, %cst_42 [1] : vector<2x128x256xf32> to vector<2x256xf32>
    %149 = arith.addf %147, %148 : vector<2x256xf32>
    %c0_43 = arith.constant 0 : index
    %c768_44 = arith.constant 768 : index
    %150 = vector.load %arg8[%c0_43, %c768_44] : memref<2x1024xf32, #tpu.memory_space<vmem>>, vector<2x256xf32>
    tpu.vector_store %arg8[%c0_43, %c768_44], %149 {strides = array<i32>} : memref<2x1024xf32, #tpu.memory_space<vmem>>, vector<2x256xf32>,
    %c1_i32 = arith.constant 1 : i32
    %151 = arith.cmpi eq, %arg2, %c1_i32 : i32
    %152 = arith.extui %151 : i1 to i32
    %c0_i32_45 = arith.constant 0 : i32
    %153 = arith.cmpi ne, %152, %c0_i32_45 : i32
    scf.if %153 {
      %c0_46 = arith.constant 0 : index
      %c0_47 = arith.constant 0 : index
      %154 = vector.load %arg8[%c0_46, %c0_47] : memref<2x1024xf32, #tpu.memory_space<vmem>>, vector<2x1024xf32>
      %cst_48 = arith.constant 3.906250e-03 : f32
      %155 = vector.broadcast %cst_48 : f32 to vector<2x1024xf32>
      %156 = arith.mulf %154, %155 : vector<2x1024xf32>
      %157 = arith.truncf %156 : vector<2x1024xf32> to vector<2x1024xbf16>
      %c0_49 = arith.constant 0 : index
      %c0_50 = arith.constant 0 : index
      %158 = vector.load %arg6[%c0_49, %c0_50] : memref<1024x128xbf16, #tpu.memory_space<vmem>>, vector<1024x128xbf16>
      %cst_51 = arith.constant dense<0.000000e+00> : vector<2x128xf32>
      %159 = tpu.matmul %157, %158, %cst_51 {dimension_numbers = #tpu.dot_dimension_numbers<[1], [0], [0], [1], [0, 0, 1, 1], [], []>} : vector<2x1024xbf16>, vector<1024x128xbf16>, vector<2x128xf32> -> vector<2x128xf32>
      %160 = vector.shape_cast %159 : vector<2x128xf32> to vector<1x2x128xf32>
      %c0_52 = arith.constant 0 : index
      %c0_53 = arith.constant 0 : index
      %c0_54 = arith.constant 0 : index
      %161 = vector.load %arg7[%c0_52, %c0_53, %c0_54] : memref<1x2x128xf32, #tpu.memory_space<vmem>>, vector<1x2x128xf32>
      tpu.vector_store %arg7[%c0_52, %c0_53, %c0_54], %160 {strides = array<i32>} : memref<1x2x128xf32, #tpu.memory_space<vmem>>, vector<1x2x128xf32>,
    } else {
    }
    return
  }
  func.func @transform_0(%arg0: i32, %arg1: i32, %arg2: i32) -> (i32, i32, i32) {
    %c0_i32 = arith.constant 0 : i32
    %c0_i32_0 = arith.constant 0 : i32
    return %arg1, %c0_i32, %arg2 : i32, i32, i32
  }
  func.func @transform_1(%arg0: i32, %arg1: i32, %arg2: i32) -> (i32, i32) {
    %c0_i32 = arith.constant 0 : i32
    %c0_i32_0 = arith.constant 0 : i32
    return %c0_i32, %arg0 : i32, i32
  }
  func.func @transform_2(%arg0: i32, %arg1: i32, %arg2: i32) -> (i32, i32) {
    %c0_i32 = arith.constant 0 : i32
    %c0_i32_0 = arith.constant 0 : i32
    return %c0_i32, %arg0 : i32, i32
  }
  func.func @transform_3(%arg0: i32, %arg1: i32, %arg2: i32) -> (i32, i32) {
    %c0_i32 = arith.constant 0 : i32
    %c0_i32_0 = arith.constant 0 : i32
    return %arg0, %c0_i32 : i32, i32
  }
  func.func @transform_4(%arg0: i32, %arg1: i32, %arg2: i32) -> (i32, i32, i32) {
    %c0_i32 = arith.constant 0 : i32
    %c0_i32_0 = arith.constant 0 : i32
    return %arg0, %arg1, %c0_i32 : i32, i32, i32
  }
}

</mosaic_0001>

<bundles_post_ra>
// kernel: multilabel_classifier_forward.1
= control target key start
LH: loop header
LB: loop body
LE: loop exit
PB: predicated region body
PF: predicated region fallthrough
CT: control target
= control target key end

     0   :  { %9 = vsyncpa [#allocation5], 0  ;;  %s10462_s0 = inlined_call_operand.vmem [shape: f32[2,4,256], index: 0, kind: input, shape index: {}]   ;;  %s10463_s1 = inlined_call_operand.vmem [shape: f32[4,2048], index: 1, kind: input, shape index: {}]   ;;  %s10464_s2 = inlined_call_operand.vmem [shape: f32[1,2048], index: 2, kind: input, shape index: {}]   ;;  %s10465_s3 = inlined_call_operand.hbm [shape: bf16[2048,128], index: 3, kind: input, shape index: {}]   ;;  %s10466_s4 = inlined_call_operand.vmem [shape: f32[2,2,128], index: 4, kind: output, shape index: {}]  }
   0x1   :  { %11 = vsyncpa [#allocation5 + $0x1], 0  ;;  %s5364_s15 = smov 0   ;;  %s5366_s16 = smov 0  }
   0x2   :  { %s5368_s17 = smov 0   ;;  %s5370_s18 = smov 0  }
   0x3   :  { %s5372_s19 = smov 0   ;;  %s5374_s20 = smov 0  }
   0x4   :  { %s5376_s21 = smov 0   ;;  %s5378_s22 = smov 0  }
   0x5   :  { %s5380_s23 = smov 0   ;;  %s5382_s24 = smov 0  }
   0x6 LB: > { %s4884_s25 = sadd.s32 4294967295, %s5332_s24   ;;  %s29_s26 = sadd.s32 1, %s5324_s22  ;;  %s5332_s24 = sphi %s5382_s24, %s17_s24   ;;  %s5328_s23 = sphi %s5380_s23, %s12104_s23   ;;  %s5324_s22 = sphi %s5378_s22, %s12103_s22   ;;  %s5320_s21 = sphi %s5376_s21, %s12102_s21   ;;  %s5316_s20 = sphi %s5374_s20, %s12101_s20   ;;  %s5312_s19 = sphi %s5372_s19, %s12100_s19   ;;  %s5308_s18 = sphi %s5370_s18, %s12099_s18   ;;  %s5304_s17 = sphi %s5368_s17, %s12098_s17   ;;  %s5300_s16 = sphi %s5366_s16, %s12097_s16   ;;  %s5296_s15 = sphi %s5364_s15, %s12096_s15  }
   0x7   : > { %p30_p0 = scmp.ge.s32.totalorder %s29_s26, 2  ;;  %s36_s27 = sadd.s32 1, %s5328_s23 }
   0x8   : > { %s45_s28 = sadd.s32 1, %s5312_s19  ;;  %p52_p1 = scmp.ne.s32.totalorder %s5312_s19, %s5308_s18 }
   0x9   : > { %s12106_s26 = smov (%p30_p0, %s29_s26), 0  ;;  %s12108_s27 = smov (!%p30_p0, %s36_s27), %s5328_s23 }
   0xa   : > { %s41_s29 = ssub.s32 %s5324_s22, %s12106_s26  ;;  %p53_p2 = scmp.eq.s32.totalorder %s5332_s24, 0 }
   0xb   : > { %p38_p3 = scmp.ge.s32.totalorder %s12108_s27, 2  ;;  %p43_p4 = scmp.eq.s32.totalorder %s41_s29, 0 }
   0xc   : > { %p5426_p5 = por %p53_p2, %p52_p1  ;;  %s123_s5 = sadd.s32 1, %s5304_s17 }
   0xd   : > { %s12110_s27 = smov (%p38_p3, %s12108_s27), 0  ;;  %p130_p6 = scmp.ne.s32.totalorder %s5304_s17, %s5300_s16 }
   0xe   : > { %10548 = sst [smem:[#allocation7_spill]] %s12110_s27  ;;  %s120_s7 = ssub.s32 %s5328_s23, %s12110_s27 }
   0xf   : > { %s5434_s6 = scalar_select %p43_p4, %s5312_s19, %s45_s28  }
  0x10   : > { %p121_p7 = scmp.eq.s32.totalorder %s120_s7, 0  ;;  %p136_p8 = scmp.ne.s32.totalorder %s5300_s16, %s5296_s15 }
  0x11   : > { %p5442_p9 = por %p130_p6, %p53_p2  ;;  %p137_p10 = scmp.eq.s32.totalorder %s4884_s25, 0 }
  0x12   : > { %s5447_s9 = scalar_select %p121_p7, %s5304_s17, %s123_s5  }
  0x13   : > { %p5449_p11 = por %p137_p10, %p136_p8  ;;  %p4887_p12 = scmp.ge.s32.totalorder %s5332_s24, 4 }
  0x15   : > { %184 = sbr.rel (%p4887_p12) target bundleno = 61 (0x3d), region = 16 }
  0x1c   : > { %187 = sbr.rel (!%p5426_p5) target bundleno = 35 (0x23), region = 20  ;;  %s189_s11 = sand.u32 (%p5426_p5), 1, %s5312_s19  }
  0x1d   : > { %s4889_s12 = sshll.u32 (%p5426_p5), %s5324_s22, 2  ;;  %s4888_s13 = sshll.u32 (%p5426_p5), %s189_s11, 3 }
  0x1e   : > { %s196_s25 = scalar_lea.vmem (%p5426_p5), %s10462_s0, %s4889_s12  ;;  %s191_s28 = scalar_lea.vmem (%p5426_p5), [#allocation3], %s4888_s13 }
  0x1f   : > { %v212_v0 = vld [vmem:[%s196_s25] sm:$0xf] (%p5426_p5)  ;;  %v214_v1 = vld [vmem:[%s196_s25 + $0x8] sm:$0xf] (%p5426_p5) }
  0x20   : > { %213 = vst [vmem:[%s191_s28] sm:$0xf] (%p5426_p5), %v212_v0  ;;  %215 = vst [vmem:[%s191_s28 + $0x4] sm:$0xf] (%p5426_p5), %v214_v1 }
  0x23 PF: > { %s260_s29 = sand.u32 1, %s5304_s17   ;;  %s4976_s30 = sshll.u32 %s5328_s23, 13 }
  0x24   : > { %s4890_s5 = sshll.u32 %s260_s29, 9  ;;  %s5466_s11 = scalar_lea.hbm %s10465_s3, %s4976_s30 }
  0x25   : > { %s264_s12 = scalar_lea.vmem [#allocation4], %s4890_s5  ;;  %s5470_s14 = scalar_lea.sflag [#allocation5], %s260_s29 }
  0x26   : > { %s271_s13 = sshll.u32 %s264_s12, 4  ;;  %s5222_s15 = scalar_lea.hbm %s5466_s11, 8192  ;;  %s5468_s13 = int_to_ptr.vmem [resolvable:$true] %s271_s13 }
  0x27   : > { %p5223_p13 = scmp.ne.s32.totalorder %s5466_s11, %s5222_s15  ;;  %s5226_s27 = scalar_lea.hbm %s10465_s3, 16384 }
  0x28   : > { %p5227_p2 = scmp.lt.u32.totalorder %s5466_s11, %s10465_s3  ;;  %p5228_p3 = scmp.lt.u32.totalorder %s5226_s27, %s5222_s15 }
  0x29   : > { %p5224_p0 = pnand %p5223_p13, %p5442_p9  ;;  %p5230_p5 = scmp.lt.u32.totalorder %s5222_s15, %s5466_s11 }
  0x2a   : > { %p5229_p4 = por %p5228_p3, %p5227_p2 }
  0x2b   : > { %p5225_p1 = pneg %p5224_p0 }
  0x2c   : > { %p5231_p6 = por %p5230_p5, %p5229_p4 }
  0x2e   : > { %p5232_p7 = pnand %p5231_p6, %p5225_p1 }
  0x30   : > { %5235 = shalt.err (!%p5232_p7)
}
  0x31   : > { %s5236_s29 = scalar_lea.vmem %s5468_s13, 8192  ;;  %s5334_s5 = smov [#allocation4]  }
  0x32   : > { %p5237_p8 = scmp.ne.s32.totalorder %s5468_s13, %s5236_s29  ;;  %s5240_s12 = sshll.u32 %s5334_s5, 4  ;;  %s5241_s12 = int_to_ptr.vmem [resolvable:$false] %s5240_s12 }
  0x33   : > { %s5242_s25 = scalar_lea.vmem %s5241_s12, 16384  ;;  %p5243_p13 = scmp.lt.s32.totalorder %s5468_s13, %s5241_s12 }
  0x34   : > { %p5238_p10 = pnand %p5237_p8, %p5442_p9  ;;  %p5244_p0 = scmp.lt.s32.totalorder %s5242_s25, %s5236_s29 }
  0x36   : > { %p5239_p12 = pneg %p5238_p10  ;;  %p5245_p2 = por %p5244_p0, %p5243_p13 }
  0x38   : > { %p5246_p3 = pnand %p5245_p2, %p5239_p12 }
  0x3a   : > { %5249 = shalt.err (!%p5246_p3)
}
  0x3b   : > { %s5335_s15 = smov 64   ;;  %s5336_s28 = smov 4  }
  0x3c   : > { %5065 = dma.hbm_to_vmem [thread:$0]  (%p5442_p9), %s5466_s11, 8192, %s5468_s13, %s5470_s14, %s5335_s15, %s5335_s15, %s5336_s28  }
  0x3d PF: > { %p4893_p1 = scmp.ge.s32.totalorder %s5332_s24, 1  ;;  %p279_p4 = scmp.lt.s32.totalorder %s5332_s24, 5 }
  0x3f   : > { %p280_p5 = pnand %p4893_p1, %p279_p4 }
  0x41   : > { %283 = sbr.rel (%p280_p5) target bundleno = 1265 (0x4f1), region = 73 }
  0x48   : > { %s286_s27 = sand.u32 1, %s5308_s18   ;;  %s292_s30 = sand.u32 1, %s5300_s16  }
  0x49   : > { %s4894_s7 = sshll.u32 %s286_s27, 3  ;;  %s4895_s29 = sshll.u32 %s292_s30, 9 }
  0x4a   : > { %s5498_s5 = scalar_lea.vmem [#allocation3], %s4894_s7  ;;  %s293_s12 = scalar_lea.sflag [#allocation5], %s292_s30 }
  0x4b   : > { %s5500_s25 = scalar_lea.vmem [#allocation4], %s4895_s29 }
  0x4c   : > { %5291 = dma.done.wait (%p5449_p11), %s293_s12, 8192  }
  0x4d   : > { %5293 = vsyncadd (%p5449_p11), %s293_s12, 4294959104  ;;  %s4896_s8 = sshll.u32 %s5320_s21, 3  ;;  %p349_p9 = scmp.lt.s32.totalorder %s5320_s21, 1 }
  0x4e   : > { %p338_p6 = scmp.lt.s32.totalorder %s4896_s8, 15  ;;  %p4900_p11 = scmp.ne.s32.totalorder %s5316_s20, 0 }
  0x4f   : > { %s12112_s21 = smov (!%p349_p9, %s5320_s21), 1  ;;  %v5337_v2 = vmov (!%p4900_p11), 0.0  }
  0x50   : > { %s12114_s8 = smov (!%p338_p6, %s4896_s8), 15  ;;  %s4899_s18 = sshll.u32 %s12112_s21, 1  ;;  %361 = vst [vmem:[#allocation2] sm:$0xff] (!%p4900_p11), %v5337_v2  ;;  %362 = vst [vmem:[#allocation2 + $0x8] sm:$0xff] (!%p4900_p11), %v5337_v2 }
  0x51   : > { %s4897_s11 = sshll.u32 %s12114_s8, 2  ;;  %s5512_s15 = scalar_lea.vmem %s10464_s2, %s12114_s8 }
  0x52   : > { %s5517_s10 = scalar_lea.vmem %s10463_s1, %s4897_s11  ;;  %s5522_s29 = scalar_lea.vmem %s10466_s4, %s4899_s18 }
  0x53   : > { %360 = sbr.rel (%p4900_p11) target bundleno = 90 (0x5a), region = 85 }
  0x5a PF: > { %v4901_v3 = vld [vmem:[%s5498_s5] ss:$0 sm:$0xff]  ;;  %v4902_v4 = vld [vmem:[%s5498_s5 + $0x4] ss:$0 sm:$0xff]  ;;  %v4903_v5 = vld [vmem:[%s5498_s5 + $0x1] ss:$0 sm:$0xff]  ;;  %v910_v7 = vlaneseq }
  0x5b   : > { %378 = vbcast.lane.b32.xlu1 %v4901_v3, 272  ;;  %370 = vbcast.lane.b32.xlu0 %v4901_v3, 256  ;;  %v5529_v6 = vld [vmem:[%s5498_s5 + $0x5] ss:$0 sm:$0xff]  ;;  %v907_v10 = vld [vmem:[%s5517_s10] sm:$0xff]  ;;  %v1690_v12 = vld [vmem:[%s5517_s10 + $0x8] sm:$0xff] }
  0x5c   : > { %v5533_v8 = vshrl.u32 %v910_v7, 7  ;;  %v2467_v13 = vld [vmem:[%s5517_s10 + $0x10] sm:$0xff]  ;;  %v3244_v14 = vld [vmem:[%s5517_s10 + $0x18] sm:$0xff]  ;;  %v908_v33 = vld [vmem:[%s5512_s15] sm:$0x3]  ;;  %vm1679_vm0 = vcmask 1041409  }
  0x5d   : > { %v1691_v34 = vld [vmem:[%s5512_s15 + $0x2] sm:$0x3]  ;;  %v2468_v36 = vld [vmem:[%s5512_s15 + $0x4] sm:$0x3]  ;;  %v3245_v37 = vld [vmem:[%s5512_s15 + $0x6] sm:$0x3] }
  0x5e   : > { %10551 = vst [vmem:[#allocation8_spill] sm:$0xff] %v5533_v8  ;;  %v912_v9 = vsub.s32 0, %v5533_v8  ;;  %v916_v11 = vsub.s32 4, %v5533_v8  ;;  %v1073_v23 = vsub.s32 5, %v5533_v8  ;;  %v999_v25 = vsub.s32 1, %v5533_v8  ;;  %p4909_p7 = scmp.ne.s32.totalorder %s5316_s20, 1 }
  0x5f   : > { %382 = vbcast.lane.b32.xlu1 %v4901_v3, 280  ;;  %374 = vbcast.lane.b32.xlu0 %v4901_v3, 264  ;;  %vm1681_vm1 = vcmask 1043459   ;;  %vm1683_vm2 = vcmask 1045509   ;;  %vm1685_vm3 = vcmask 1047559  }
  0x60   : > { %v913_v15 = vrot.slane %v907_v10, %v912_v9  ;;  %v917_v16 = vrot.slane %v907_v10, %v916_v11  ;;  %v1696_v17 = vrot.slane %v1690_v12, %v912_v9  ;;  %v1700_v18 = vrot.slane %v1690_v12, %v916_v11 }
  0x61   : > { %v2473_v19 = vrot.slane %v2467_v13, %v912_v9  ;;  %v2477_v20 = vrot.slane %v2467_v13, %v916_v11  ;;  %v3250_v21 = vrot.slane %v3244_v14, %v912_v9  ;;  %v3254_v22 = vrot.slane %v3244_v14, %v916_v11 }
  0x62   : > { %v5548_v24 = vrot.slane %v913_v15, %v912_v9  ;;  %v5551_v26 = vrot.slane %v917_v16, %v912_v9  ;;  %v5553_v27 = vrot.slane %v1696_v17, %v912_v9  ;;  %v5555_v28 = vrot.slane %v1700_v18, %v912_v9 }
  0x63   : > { %390 = vbcast.lane.b32.xlu1 %v4901_v3, 296  ;;  %386 = vbcast.lane.b32.xlu0 %v4901_v3, 288  ;;  %v5557_v29 = vrot.slane %v2473_v19, %v912_v9  ;;  %v5559_v30 = vrot.slane %v2477_v20, %v912_v9  ;;  %v5561_v31 = vrot.slane %v3250_v21, %v912_v9 }
  0x64   : > { %v5563_v32 = vrot.slane %v3254_v22, %v912_v9  ;;  %v1070_v35 = vrot.slane %v907_v10, %v999_v25  ;;  %v1074_v38 = vrot.slane %v907_v10, %v1073_v23  ;;  %v1853_v39 = vrot.slane %v1690_v12, %v999_v25 }
  0x65   : > { %v1857_v40 = vrot.slane %v1690_v12, %v1073_v23  ;;  %v2630_v41 = vrot.slane %v2467_v13, %v999_v25  ;;  %v2634_v42 = vrot.slane %v2467_v13, %v1073_v23  ;;  %v3407_v43 = vrot.slane %v3244_v14, %v999_v25 }
  0x66   : > { %v3411_v44 = vrot.slane %v3244_v14, %v1073_v23  ;;  %v5571_v47 = vrot.slane %v908_v33, %v912_v9  ;;  %v5573_v48 = vrot.slane %v908_v33, %v999_v25  ;;  %v5575_v49 = vrot.slane %v1691_v34, %v912_v9 }
  0x67   : > { %398 = vbcast.lane.b32.xlu1 %v4901_v3, 312  ;;  %394 = vbcast.lane.b32.xlu0 %v4901_v3, 304  ;;  %v5577_v50 = vrot.slane %v1691_v34, %v999_v25  ;;  %v5579_v51 = vrot.slane %v2468_v36, %v912_v9  ;;  %v5581_v52 = vrot.slane %v2468_v36, %v999_v25 }
  0x68   : > { %10552 = vst [vmem:[#allocation9_spill] sm:$0xff] %v5571_v47  ;;  %10553 = vst [vmem:[#allocation10_spill] sm:$0xff] %v5573_v48  ;;  %v5583_v53 = vrot.slane %v3245_v37, %v912_v9  ;;  %v5585_v54 = vrot.slane %v3245_v37, %v999_v25  ;;  %v5588_v55 = vrot.slane %v1070_v35, %v999_v25 }
  0x69   : > { %10554 = vst [vmem:[#allocation11_spill] sm:$0xff] %v5575_v49  ;;  %10555 = vst [vmem:[#allocation12_spill] sm:$0xff] %v5577_v50  ;;  %v5590_v56 = vrot.slane %v1074_v38, %v999_v25  ;;  %v5592_v57 = vrot.slane %v1853_v39, %v999_v25  ;;  %v5594_v58 = vrot.slane %v1857_v40, %v999_v25 }
  0x6a   : > { %10556 = vst [vmem:[#allocation13_spill] sm:$0xff] %v5579_v51  ;;  %10557 = vst [vmem:[#allocation14_spill] sm:$0xff] %v5581_v52  ;;  %v5597_v59 = vrot.slane %v2630_v41, %v999_v25  ;;  %v5599_v60 = vrot.slane %v2634_v42, %v999_v25  ;;  %v5601_v61 = vrot.slane %v3407_v43, %v999_v25 }
  0x6b   : > { %406 = vbcast.lane.b32.xlu1 %v4901_v3, 328  ;;  %402 = vbcast.lane.b32.xlu0 %v4901_v3, 320  ;;  %10558 = vst [vmem:[#allocation15_spill] sm:$0xff] %v5583_v53  ;;  %10559 = vst [vmem:[#allocation16_spill] sm:$0xff] %v5585_v54  ;;  %v5603_v62 = vrot.slane %v3411_v44, %v999_v25 }
  0x6f   : > { %414 = vbcast.lane.b32.xlu1 %v4901_v3, 344  ;;  %410 = vbcast.lane.b32.xlu0 %v4901_v3, 336 }
  0x73   : > { %422 = vbcast.lane.b32.xlu1 %v4901_v3, 360  ;;  %418 = vbcast.lane.b32.xlu0 %v4901_v3, 352 }
  0x77   : > { %430 = vbcast.lane.b32.xlu1 %v4901_v3, 376  ;;  %426 = vbcast.lane.b32.xlu0 %v4901_v3, 368 }
  0x7b   : > { %441 = vbcast.lane.b32.xlu1 %v4902_v4, 264  ;;  %437 = vbcast.lane.b32.xlu0 %v4902_v4, 256 }
  0x7f   : > { %449 = vbcast.lane.b32.xlu1 %v4902_v4, 280  ;;  %445 = vbcast.lane.b32.xlu0 %v4902_v4, 272 }
  0x83   : > { %457 = vbcast.lane.b32.xlu1 %v4902_v4, 296  ;;  %453 = vbcast.lane.b32.xlu0 %v4902_v4, 288 }
  0x87   : > { %465 = vbcast.lane.b32.xlu1 %v4902_v4, 312  ;;  %461 = vbcast.lane.b32.xlu0 %v4902_v4, 304 }
  0x8b   : > { %473 = vbcast.lane.b32.xlu1 %v4902_v4, 328  ;;  %469 = vbcast.lane.b32.xlu0 %v4902_v4, 320 }
  0x8f   : > { %481 = vbcast.lane.b32.xlu1 %v4902_v4, 344  ;;  %477 = vbcast.lane.b32.xlu0 %v4902_v4, 336 }
  0x93   : > { %489 = vbcast.lane.b32.xlu1 %v4902_v4, 360  ;;  %485 = vbcast.lane.b32.xlu0 %v4902_v4, 352 }
  0x97   : > { %497 = vbcast.lane.b32.xlu1 %v4902_v4, 376  ;;  %493 = vbcast.lane.b32.xlu0 %v4902_v4, 368 }
  0x9b   : > { %510 = vbcast.lane.b32.xlu1 %v4903_v5, 264  ;;  %506 = vbcast.lane.b32.xlu0 %v4903_v5, 256 }
  0x9f   : > { %518 = vbcast.lane.b32.xlu1 %v4903_v5, 280  ;;  %514 = vbcast.lane.b32.xlu0 %v4903_v5, 272 }
  0xa3   : > { %526 = vbcast.lane.b32.xlu1 %v4903_v5, 296  ;;  %522 = vbcast.lane.b32.xlu0 %v4903_v5, 288 }
  0xa7   : > { %534 = vbcast.lane.b32.xlu1 %v4903_v5, 312  ;;  %530 = vbcast.lane.b32.xlu0 %v4903_v5, 304 }
  0xab   : > { %542 = vbcast.lane.b32.xlu1 %v4903_v5, 328  ;;  %538 = vbcast.lane.b32.xlu0 %v4903_v5, 320 }
  0xaf   : > { %550 = vbcast.lane.b32.xlu1 %v4903_v5, 344  ;;  %546 = vbcast.lane.b32.xlu0 %v4903_v5, 336 }
  0xb3   : > { %558 = vbcast.lane.b32.xlu1 %v4903_v5, 360  ;;  %554 = vbcast.lane.b32.xlu0 %v4903_v5, 352 }
  0xb7   : > { %566 = vbcast.lane.b32.xlu1 %v4903_v5, 376  ;;  %562 = vbcast.lane.b32.xlu0 %v4903_v5, 368 }
  0xbb   : > { %577 = vbcast.lane.b32.xlu1 %v5529_v6, 264  ;;  %573 = vbcast.lane.b32.xlu0 %v5529_v6, 256 }
  0xbf   : > { %585 = vbcast.lane.b32.xlu1 %v5529_v6, 280  ;;  %581 = vbcast.lane.b32.xlu0 %v5529_v6, 272 }
  0xc3   : > { %593 = vbcast.lane.b32.xlu1 %v5529_v6, 296  ;;  %589 = vbcast.lane.b32.xlu0 %v5529_v6, 288 }
  0xc7   : > { %601 = vbcast.lane.b32.xlu1 %v5529_v6, 312  ;;  %597 = vbcast.lane.b32.xlu0 %v5529_v6, 304 }
  0xcb   : > { %609 = vbcast.lane.b32.xlu1 %v5529_v6, 328  ;;  %605 = vbcast.lane.b32.xlu0 %v5529_v6, 320 }
  0xcd   : > { %v379_v45 = vpop.permute.xlu1 %378  ;;  %v371_v46 = vpop.permute.xlu0 %370 }
  0xce   : > { %v5606_v63 = vmul.f32 %v5548_v24, %v379_v45  ;;  %v5609_v0 = vmul.f32 %v5551_v26, %v379_v45  ;;  %v5612_v1 = vmul.f32 %v5553_v27, %v379_v45  ;;  %v5615_v2 = vmul.f32 %v5555_v28, %v379_v45 }
  0xcf   : > { %617 = vbcast.lane.b32.xlu1 %v5529_v6, 344  ;;  %613 = vbcast.lane.b32.xlu0 %v5529_v6, 336  ;;  %v5618_v5 = vmul.f32 %v5557_v29, %v379_v45  ;;  %v5621_v7 = vmul.f32 %v5559_v30, %v379_v45  ;;  %v5624_v9 = vmul.f32 %v5561_v31, %v379_v45 }
  0xd0   : > { %10560 = vst [vmem:[#allocation17_spill] sm:$0xff] %v5606_v63  ;;  %10561 = vst [vmem:[#allocation18_spill] sm:$0xff] %v5609_v0  ;;  %v5627_v10 = vmul.f32 %v5563_v32, %v379_v45  ;;  %v5630_v11 = vmul.f32 %v5548_v24, %v371_v46  ;;  %v5633_v12 = vmul.f32 %v5551_v26, %v371_v46  ;;  %v5706_v45 = vld [vmem:[%s5498_s5 + $0x2] ss:$0 sm:$0xff] }
  0xd1   : > { %10562 = vst [vmem:[#allocation19_spill] sm:$0xff] %v5612_v1  ;;  %10563 = vst [vmem:[#allocation20_spill] sm:$0xff] %v5615_v2  ;;  %v383_v3 = vpop.permute.xlu1 %382  ;;  %v375_v4 = vpop.permute.xlu0 %374  ;;  %v5636_v13 = vmul.f32 %v5553_v27, %v371_v46  ;;  %v5639_v14 = vmul.f32 %v5555_v28, %v371_v46  ;;  %v5643_v15 = vmul.f32 %v5557_v29, %v371_v46 }
  0xd2   : > { %10564 = vst [vmem:[#allocation21_spill] sm:$0xff] %v5618_v5  ;;  %10565 = vst [vmem:[#allocation22_spill] sm:$0xff] %v5621_v7  ;;  %v5646_v16 = vmul.f32 %v5559_v30, %v371_v46  ;;  %v5649_v17 = vmul.f32 %v5561_v31, %v371_v46  ;;  %v5652_v18 = vmul.f32 %v5563_v32, %v371_v46 }
  0xd3   : > { %10566 = vst [vmem:[#allocation23_spill] sm:$0xff] %v5624_v9  ;;  %10567 = vst [vmem:[#allocation24_spill] sm:$0xff] %v5627_v10  ;;  %625 = vbcast.lane.b32.xlu1 %v5529_v6, 360  ;;  %621 = vbcast.lane.b32.xlu0 %v5529_v6, 352  ;;  %v5656_v19 = vmul.f32 %v5548_v24, %v383_v3  ;;  %v5659_v20 = vmul.f32 %v5551_v26, %v383_v3 }
  0xd4   : > { %v5662_v21 = vmul.f32 %v5553_v27, %v383_v3  ;;  %v5665_v22 = vmul.f32 %v5555_v28, %v383_v3  ;;  %v5668_v33 = vmul.f32 %v5557_v29, %v383_v3  ;;  %v5671_v34 = vmul.f32 %v5559_v30, %v383_v3 }
  0xd5   : > { %v391_v23 = vpop.permute.xlu1 %390  ;;  %v387_v25 = vpop.permute.xlu0 %386  ;;  %v5674_v35 = vmul.f32 %v5561_v31, %v383_v3  ;;  %v5677_v36 = vmul.f32 %v5563_v32, %v383_v3  ;;  %v5680_v37 = vmul.f32 %v5548_v24, %v375_v4  ;;  %v5683_v38 = vmul.f32 %v5551_v26, %v375_v4 }
  0xd6   : > { %10568 = vst [vmem:[#allocation25_spill] sm:$0xff] %v5665_v22  ;;  %10569 = vst [vmem:[#allocation26_spill] sm:$0xff] %v5668_v33  ;;  %v5686_v39 = vmul.f32 %v5553_v27, %v375_v4  ;;  %v5689_v40 = vmul.f32 %v5555_v28, %v375_v4  ;;  %v5693_v41 = vmul.f32 %v5557_v29, %v375_v4 }
  0xd7   : > { %10570 = vst [vmem:[#allocation27_spill] sm:$0xff] %v5671_v34  ;;  %10571 = vst [vmem:[#allocation28_spill] sm:$0xff] %v5674_v35  ;;  %633 = vbcast.lane.b32.xlu1 %v5529_v6, 376  ;;  %v5696_v42 = vmul.f32 %v5559_v30, %v375_v4  ;;  %v5699_v43 = vmul.f32 %v5561_v31, %v375_v4  ;;  %v5702_v44 = vmul.f32 %v5563_v32, %v375_v4 }
  0xd8   : > { %10572 = vst [vmem:[#allocation29_spill] sm:$0xff] %v5677_v36  ;;  %629 = vbcast.lane.b32.xlu0 %v5529_v6, 368  ;;  %v5709_v46 = vmul.f32 %v5548_v24, %v391_v23  ;;  %v5712_v3 = vmul.f32 %v5551_v26, %v391_v23  ;;  %v5715_v8 = vmul.f32 %v5553_v27, %v391_v23 }
  0xd9   : > { %v5718_v10 = vmul.f32 %v5555_v28, %v391_v23  ;;  %v399_v9 = vpop.permute.xlu1 %398  ;;  %v395_v7 = vpop.permute.xlu0 %394  ;;  %v5721_v4 = vmul.f32 %v5557_v29, %v391_v23  ;;  %v5724_v6 = vmul.f32 %v5559_v30, %v391_v23  ;;  %v5727_v5 = vmul.f32 %v5561_v31, %v391_v23 }
  0xda   : > { %10573 = vst [vmem:[#allocation30_spill] sm:$0xff] %v5709_v46  ;;  %10574 = vst [vmem:[#allocation31_spill] sm:$0xff] %v5712_v3  ;;  %v5730_v46 = vmul.f32 %v5563_v32, %v391_v23  ;;  %v5733_v3 = vmul.f32 %v5548_v24, %v387_v25  ;;  %v5749_v23 = vmul.f32 %v5559_v30, %v387_v25 }
  0xdb   : > { %10575 = vst [vmem:[#allocation32_spill] sm:$0xff] %v5715_v8  ;;  %10576 = vst [vmem:[#allocation33_spill] sm:$0xff] %v5718_v10  ;;  %v5736_v8 = vmul.f32 %v5551_v26, %v387_v25  ;;  %v5739_v10 = vmul.f32 %v5553_v27, %v387_v25  ;;  %646 = vbcast.lane.b32.xlu1 %v5706_v45, 264 }
  0xdc   : > { %10577 = vst [vmem:[#allocation34_spill] sm:$0xff] %v5721_v4  ;;  %10578 = vst [vmem:[#allocation35_spill] sm:$0xff] %v5724_v6  ;;  %v5742_v4 = vmul.f32 %v5555_v28, %v387_v25  ;;  %v5746_v6 = vmul.f32 %v5557_v29, %v387_v25  ;;  %642 = vbcast.lane.b32.xlu0 %v5706_v45, 256 }
  0xdd   : > { %10579 = vst [vmem:[#allocation36_spill] sm:$0xff] %v5727_v5  ;;  %10580 = vst [vmem:[#allocation37_spill] sm:$0xff] %v5730_v46  ;;  %v5752_v46 = vmul.f32 %v5561_v31, %v387_v25  ;;  %v5789_v5 = vmul.f32 %v5553_v27, %v395_v7 }
  0xde   : > { %10581 = vst [vmem:[#allocation38_spill] sm:$0xff] %v5733_v3  ;;  %10582 = vst [vmem:[#allocation39_spill] sm:$0xff] %v5736_v8  ;;  %v5755_v3 = vmul.f32 %v5563_v32, %v387_v25  ;;  %v5765_v8 = vmul.f32 %v5553_v27, %v399_v9  ;;  %v5771_v25 = vmul.f32 %v5557_v29, %v399_v9 }
  0xdf   : > { %10583 = vst [vmem:[#allocation40_spill] sm:$0xff] %v5739_v10  ;;  %10584 = vst [vmem:[#allocation41_spill] sm:$0xff] %v5742_v4  ;;  %v5759_v10 = vmul.f32 %v5548_v24, %v399_v9  ;;  %v5762_v4 = vmul.f32 %v5551_v26, %v399_v9  ;;  %654 = vbcast.lane.b32.xlu1 %v5706_v45, 280 }
  0xe0   : > { %10585 = vst [vmem:[#allocation42_spill] sm:$0xff] %v5746_v6  ;;  %10586 = vst [vmem:[#allocation43_spill] sm:$0xff] %v5749_v23  ;;  %v5768_v6 = vmul.f32 %v5555_v28, %v399_v9  ;;  %v407_v23 = vpop.permute.xlu1 %406  ;;  %650 = vbcast.lane.b32.xlu0 %v5706_v45, 272 }
  0xe1   : > { %10587 = vst [vmem:[#allocation44_spill] sm:$0xff] %v5752_v46  ;;  %10588 = vst [vmem:[#allocation45_spill] sm:$0xff] %v5755_v3  ;;  %v403_v46 = vpop.permute.xlu0 %402  ;;  %v5774_v3 = vmul.f32 %v5559_v30, %v399_v9 }
  0xe2   : > { %10589 = vst [vmem:[#allocation46_spill] sm:$0xff] %v5759_v10  ;;  %10590 = vst [vmem:[#allocation47_spill] sm:$0xff] %v5762_v4  ;;  %v5777_v10 = vmul.f32 %v5561_v31, %v399_v9  ;;  %v5780_v4 = vmul.f32 %v5563_v32, %v399_v9  ;;  %v5799_v9 = vmul.f32 %v5559_v30, %v395_v7 }
  0xe3   : > { %10591 = vst [vmem:[#allocation48_spill] sm:$0xff] %v5765_v8  ;;  %10592 = vst [vmem:[#allocation49_spill] sm:$0xff] %v5768_v6  ;;  %v5783_v8 = vmul.f32 %v5548_v24, %v395_v7  ;;  %v5786_v6 = vmul.f32 %v5551_v26, %v395_v7  ;;  %v5842_v2 = vmul.f32 %v5553_v27, %v403_v46 }
  0xe4   : > { %10593 = vst [vmem:[#allocation50_spill] sm:$0xff] %v5771_v25  ;;  %10594 = vst [vmem:[#allocation51_spill] sm:$0xff] %v5774_v3  ;;  %v5792_v25 = vmul.f32 %v5555_v28, %v395_v7  ;;  %v5796_v3 = vmul.f32 %v5557_v29, %v395_v7 }
  0xe5   : > { %10595 = vst [vmem:[#allocation52_spill] sm:$0xff] %v5777_v10  ;;  %10596 = vst [vmem:[#allocation53_spill] sm:$0xff] %v5780_v4  ;;  %v5802_v4 = vmul.f32 %v5561_v31, %v395_v7  ;;  %v5827_v10 = vmul.f32 %v5559_v30, %v407_v23 }
  0xe6   : > { %10597 = vst [vmem:[#allocation54_spill] sm:$0xff] %v5783_v8  ;;  %10598 = vst [vmem:[#allocation55_spill] sm:$0xff] %v5786_v6  ;;  %v5805_v8 = vmul.f32 %v5563_v32, %v395_v7  ;;  %v5815_v6 = vmul.f32 %v5551_v26, %v407_v23  ;;  %v411_v7 = vpop.permute.xlu0 %410 }
  0xe7   : > { %10599 = vst [vmem:[#allocation56_spill] sm:$0xff] %v5789_v5  ;;  %10600 = vst [vmem:[#allocation57_spill] sm:$0xff] %v5792_v25  ;;  %v5809_v5 = vld [vmem:[%s5498_s5 + $0x6] ss:$0 sm:$0xff]  ;;  %v5812_v25 = vmul.f32 %v5548_v24, %v407_v23 }
  0xe8   : > { %10601 = vst [vmem:[#allocation58_spill] sm:$0xff] %v5796_v3  ;;  %10602 = vst [vmem:[#allocation59_spill] sm:$0xff] %v5799_v9  ;;  %v5818_v3 = vmul.f32 %v5553_v27, %v407_v23  ;;  %v5821_v9 = vmul.f32 %v5555_v28, %v407_v23  ;;  %713 = vbcast.lane.b32.xlu1 %v5809_v5, 264  ;;  %709 = vbcast.lane.b32.xlu0 %v5809_v5, 256 }
  0xe9   : > { %10603 = vst [vmem:[#allocation60_spill] sm:$0xff] %v5802_v4  ;;  %10604 = vst [vmem:[#allocation61_spill] sm:$0xff] %v5805_v8  ;;  %v415_v4 = vpop.permute.xlu1 %414  ;;  %v5824_v8 = vmul.f32 %v5557_v29, %v407_v23 }
  0xea   : > { %10605 = vst [vmem:[#allocation62_spill] sm:$0xff] %v5812_v25  ;;  %10606 = vst [vmem:[#allocation63_spill] sm:$0xff] %v5815_v6  ;;  %v5830_v25 = vmul.f32 %v5561_v31, %v407_v23  ;;  %v5833_v6 = vmul.f32 %v5563_v32, %v407_v23  ;;  %v5852_v23 = vmul.f32 %v5559_v30, %v403_v46 }
  0xeb   : > { %10607 = vst [vmem:[#allocation64_spill] sm:$0xff] %v5818_v3  ;;  %10608 = vst [vmem:[#allocation65_spill] sm:$0xff] %v5821_v9  ;;  %v5836_v3 = vmul.f32 %v5548_v24, %v403_v46  ;;  %v5839_v9 = vmul.f32 %v5551_v26, %v403_v46  ;;  %v5883_v1 = vmul.f32 %v5561_v31, %v415_v4 }
  0xec   : > { %10609 = vst [vmem:[#allocation66_spill] sm:$0xff] %v5824_v8  ;;  %10610 = vst [vmem:[#allocation67_spill] sm:$0xff] %v5827_v10  ;;  %v5845_v8 = vmul.f32 %v5555_v28, %v403_v46  ;;  %v5849_v10 = vmul.f32 %v5557_v29, %v403_v46  ;;  %717 = vbcast.lane.b32.xlu0 %v5809_v5, 272 }
  0xed   : > { %10611 = vst [vmem:[#allocation68_spill] sm:$0xff] %v5830_v25  ;;  %10612 = vst [vmem:[#allocation69_spill] sm:$0xff] %v5833_v6  ;;  %v5855_v6 = vmul.f32 %v5561_v31, %v403_v46  ;;  %v419_v25 = vpop.permute.xlu0 %418 }
  0xee   : > { %10613 = vst [vmem:[#allocation70_spill] sm:$0xff] %v5836_v3  ;;  %10614 = vst [vmem:[#allocation71_spill] sm:$0xff] %v5839_v9  ;;  %v5858_v3 = vmul.f32 %v5563_v32, %v403_v46  ;;  %v5868_v9 = vmul.f32 %v5551_v26, %v415_v4  ;;  %v5877_v46 = vmul.f32 %v5557_v29, %v415_v4 }
  0xef   : > { %10615 = vst [vmem:[#allocation72_spill] sm:$0xff] %v5842_v2  ;;  %10616 = vst [vmem:[#allocation73_spill] sm:$0xff] %v5845_v8  ;;  %v5862_v2 = vld [vmem:[%s5498_s5 + $0x7] ss:$0 sm:$0xff]  ;;  %v5865_v8 = vmul.f32 %v5548_v24, %v415_v4 }
  0xf0   : > { %10617 = vst [vmem:[#allocation74_spill] sm:$0xff] %v5849_v10  ;;  %10618 = vst [vmem:[#allocation75_spill] sm:$0xff] %v5852_v23  ;;  %v5871_v10 = vmul.f32 %v5553_v27, %v415_v4  ;;  %v5874_v23 = vmul.f32 %v5555_v28, %v415_v4  ;;  %845 = vbcast.lane.b32.xlu1 %v5862_v2, 256  ;;  %849 = vbcast.lane.b32.xlu0 %v5862_v2, 264 }
  0xf1   : > { %10619 = vst [vmem:[#allocation76_spill] sm:$0xff] %v5855_v6  ;;  %10620 = vst [vmem:[#allocation77_spill] sm:$0xff] %v5858_v3  ;;  %v423_v6 = vpop.permute.xlu1 %422  ;;  %v5880_v3 = vmul.f32 %v5559_v30, %v415_v4 }
  0xf2   : > { %10621 = vst [vmem:[#allocation78_spill] sm:$0xff] %v5865_v8  ;;  %10622 = vst [vmem:[#allocation79_spill] sm:$0xff] %v5868_v9  ;;  %v5886_v8 = vmul.f32 %v5563_v32, %v415_v4  ;;  %v5889_v9 = vmul.f32 %v5548_v24, %v411_v7  ;;  %v5905_v4 = vmul.f32 %v5559_v30, %v411_v7 }
  0xf3   : > { %10623 = vst [vmem:[#allocation80_spill] sm:$0xff] %v5871_v10  ;;  %10624 = vst [vmem:[#allocation81_spill] sm:$0xff] %v5874_v23  ;;  %v5892_v10 = vmul.f32 %v5551_v26, %v411_v7  ;;  %v5895_v23 = vmul.f32 %v5553_v27, %v411_v7 }
  0xf4   : > { %10625 = vst [vmem:[#allocation82_spill] sm:$0xff] %v5877_v46  ;;  %10626 = vst [vmem:[#allocation83_spill] sm:$0xff] %v5880_v3  ;;  %v5898_v46 = vmul.f32 %v5555_v28, %v411_v7  ;;  %v5902_v3 = vmul.f32 %v5557_v29, %v411_v7  ;;  %721 = vbcast.lane.b32.xlu1 %v5809_v5, 280 }
  0xf5   : > { %10627 = vst [vmem:[#allocation84_spill] sm:$0xff] %v5883_v1  ;;  %10628 = vst [vmem:[#allocation85_spill] sm:$0xff] %v5886_v8  ;;  %v5908_v8 = vmul.f32 %v5561_v31, %v411_v7  ;;  %v5945_v1 = vmul.f32 %v5553_v27, %v419_v25 }
  0xf6   : > { %10629 = vst [vmem:[#allocation86_spill] sm:$0xff] %v5889_v9  ;;  %10630 = vst [vmem:[#allocation87_spill] sm:$0xff] %v5892_v10  ;;  %v5911_v9 = vmul.f32 %v5563_v32, %v411_v7  ;;  %v5921_v10 = vmul.f32 %v5553_v27, %v423_v6  ;;  %v5927_v7 = vmul.f32 %v5557_v29, %v423_v6 }
  0xf7   : > { %10631 = vst [vmem:[#allocation88_spill] sm:$0xff] %v5895_v23  ;;  %10632 = vst [vmem:[#allocation89_spill] sm:$0xff] %v5898_v46  ;;  %v5915_v23 = vmul.f32 %v5548_v24, %v423_v6  ;;  %v5918_v46 = vmul.f32 %v5551_v26, %v423_v6 }
  0xf8   : > { %10633 = vst [vmem:[#allocation90_spill] sm:$0xff] %v5902_v3  ;;  %10634 = vst [vmem:[#allocation91_spill] sm:$0xff] %v5905_v4  ;;  %v5924_v3 = vmul.f32 %v5555_v28, %v423_v6  ;;  %v431_v4 = vpop.permute.xlu1 %430 }
  0xf9   : > { %10635 = vst [vmem:[#allocation92_spill] sm:$0xff] %v5908_v8  ;;  %10636 = vst [vmem:[#allocation93_spill] sm:$0xff] %v5911_v9  ;;  %v427_v8 = vpop.permute.xlu0 %426  ;;  %v5930_v9 = vmul.f32 %v5559_v30, %v423_v6  ;;  %v5986_v0 = vmul.f32 %v5561_v31, %v431_v4 }
  0xfa   : > { %10637 = vst [vmem:[#allocation94_spill] sm:$0xff] %v5915_v23  ;;  %10638 = vst [vmem:[#allocation95_spill] sm:$0xff] %v5918_v46  ;;  %v5933_v23 = vmul.f32 %v5561_v31, %v423_v6  ;;  %v5936_v46 = vmul.f32 %v5563_v32, %v423_v6  ;;  %v5955_v6 = vmul.f32 %v5559_v30, %v419_v25 }
  0xfb   : > { %10639 = vst [vmem:[#allocation96_spill] sm:$0xff] %v5921_v10  ;;  %10640 = vst [vmem:[#allocation97_spill] sm:$0xff] %v5924_v3  ;;  %v5939_v10 = vmul.f32 %v5548_v24, %v419_v25  ;;  %v5942_v3 = vmul.f32 %v5551_v26, %v419_v25 }
  0xfc   : > { %10641 = vst [vmem:[#allocation98_spill] sm:$0xff] %v5927_v7  ;;  %10642 = vst [vmem:[#allocation99_spill] sm:$0xff] %v5930_v9  ;;  %v5948_v7 = vmul.f32 %v5555_v28, %v419_v25  ;;  %v5952_v9 = vmul.f32 %v5557_v29, %v419_v25 }
  0xfd   : > { %10643 = vst [vmem:[#allocation100_spill] sm:$0xff] %v5933_v23  ;;  %10644 = vst [vmem:[#allocation101_spill] sm:$0xff] %v5936_v46  ;;  %v5958_v46 = vmul.f32 %v5561_v31, %v419_v25  ;;  %v438_v23 = vpop.permute.xlu0 %437 }
  0xfe   : > { %10645 = vst [vmem:[#allocation102_spill] sm:$0xff] %v5939_v10  ;;  %10646 = vst [vmem:[#allocation103_spill] sm:$0xff] %v5942_v3  ;;  %v5961_v10 = vmul.f32 %v5563_v32, %v419_v25  ;;  %v5971_v3 = vmul.f32 %v5551_v26, %v431_v4  ;;  %v5980_v25 = vmul.f32 %v5557_v29, %v431_v4 }
  0xff   : > { %10647 = vst [vmem:[#allocation104_spill] sm:$0xff] %v5945_v1  ;;  %10648 = vst [vmem:[#allocation105_spill] sm:$0xff] %v5948_v7  ;;  %v5965_v1 = vld [vmem:[%s5498_s5 + $0x3] ss:$0 sm:$0xff]  ;;  %v5968_v7 = vmul.f32 %v5548_v24, %v431_v4 }
 0x100   : > { %10649 = vst [vmem:[#allocation106_spill] sm:$0xff] %v5952_v9  ;;  %10650 = vst [vmem:[#allocation107_spill] sm:$0xff] %v5955_v6  ;;  %v5974_v9 = vmul.f32 %v5553_v27, %v431_v4  ;;  %v5977_v6 = vmul.f32 %v5555_v28, %v431_v4  ;;  %782 = vbcast.lane.b32.xlu1 %v5965_v1, 264  ;;  %778 = vbcast.lane.b32.xlu0 %v5965_v1, 256 }
 0x101   : > { %10651 = vst [vmem:[#allocation108_spill] sm:$0xff] %v5958_v46  ;;  %10652 = vst [vmem:[#allocation109_spill] sm:$0xff] %v5961_v10  ;;  %v442_v46 = vpop.permute.xlu1 %441  ;;  %v5983_v10 = vmul.f32 %v5559_v30, %v431_v4 }
 0x102   : > { %10653 = vst [vmem:[#allocation110_spill] sm:$0xff] %v5968_v7  ;;  %10654 = vst [vmem:[#allocation111_spill] sm:$0xff] %v5971_v3  ;;  %v5989_v7 = vmul.f32 %v5563_v32, %v431_v4  ;;  %v5992_v3 = vmul.f32 %v5548_v24, %v427_v8  ;;  %v6008_v4 = vmul.f32 %v5559_v30, %v427_v8 }
 0x103   : > { %10655 = vst [vmem:[#allocation112_spill] sm:$0xff] %v5974_v9  ;;  %10656 = vst [vmem:[#allocation113_spill] sm:$0xff] %v5977_v6  ;;  %v5995_v9 = vmul.f32 %v5551_v26, %v427_v8  ;;  %v5998_v6 = vmul.f32 %v5553_v27, %v427_v8 }
 0x104   : > { %10657 = vst [vmem:[#allocation114_spill] sm:$0xff] %v5980_v25  ;;  %10658 = vst [vmem:[#allocation115_spill] sm:$0xff] %v5983_v10  ;;  %v6001_v25 = vmul.f32 %v5555_v28, %v427_v8  ;;  %v6005_v10 = vmul.f32 %v5557_v29, %v427_v8  ;;  %725 = vbcast.lane.b32.xlu1 %v5809_v5, 288  ;;  %853 = vbcast.lane.b32.xlu0 %v5862_v2, 272 }
 0x105   : > { %10659 = vst [vmem:[#allocation116_spill] sm:$0xff] %v5986_v0  ;;  %10660 = vst [vmem:[#allocation117_spill] sm:$0xff] %v5989_v7  ;;  %v6011_v7 = vmul.f32 %v5561_v31, %v427_v8  ;;  %v6014_v0 = vmul.f32 %v5563_v32, %v427_v8  ;;  %v6033_v8 = vmul.f32 %v5559_v30, %v442_v46 }
 0x106   : > { %10661 = vst [vmem:[#allocation118_spill] sm:$0xff] %v5992_v3  ;;  %10662 = vst [vmem:[#allocation119_spill] sm:$0xff] %v5995_v9  ;;  %v6024_v9 = vmul.f32 %v5553_v27, %v442_v46  ;;  %v446_v3 = vpop.permute.xlu0 %445 }
 0x107   : > { %10663 = vst [vmem:[#allocation120_spill] sm:$0xff] %v5998_v6  ;;  %10664 = vst [vmem:[#allocation121_spill] sm:$0xff] %v6001_v25  ;;  %v6018_v6 = vmul.f32 %v5548_v24, %v442_v46  ;;  %v6021_v25 = vmul.f32 %v5551_v26, %v442_v46 }
 0x108   : > { %10665 = vst [vmem:[#allocation122_spill] sm:$0xff] %v6005_v10  ;;  %10666 = vst [vmem:[#allocation123_spill] sm:$0xff] %v6008_v4  ;;  %v6027_v10 = vmul.f32 %v5555_v28, %v442_v46  ;;  %v450_v4 = vpop.permute.xlu1 %449  ;;  %857 = vbcast.lane.b32.xlu1 %v5862_v2, 280  ;;  %786 = vbcast.lane.b32.xlu0 %v5965_v1, 272 }
 0x109   : > { %10667 = vst [vmem:[#allocation124_spill] sm:$0xff] %v6011_v7  ;;  %10668 = vst [vmem:[#allocation125_spill] sm:$0xff] %v6014_v0  ;;  %v6030_v7 = vmul.f32 %v5557_v29, %v442_v46  ;;  %v6036_v0 = vmul.f32 %v5561_v31, %v442_v46 }
 0x10a   : > { %10669 = vst [vmem:[#allocation126_spill] sm:$0xff] %v6018_v6  ;;  %10670 = vst [vmem:[#allocation127_spill] sm:$0xff] %v6021_v25  ;;  %v6039_v6 = vmul.f32 %v5563_v32, %v442_v46  ;;  %v6042_v25 = vmul.f32 %v5548_v24, %v438_v23  ;;  %v6058_v46 = vmul.f32 %v5559_v30, %v438_v23 }
 0x10b   : > { %10671 = vst [vmem:[#allocation128_spill] sm:$0xff] %v6024_v9  ;;  %10672 = vst [vmem:[#allocation129_spill] sm:$0xff] %v6027_v10  ;;  %v6045_v9 = vmul.f32 %v5551_v26, %v438_v23  ;;  %v6048_v10 = vmul.f32 %v5553_v27, %v438_v23 }
 0x10c   : > { %10673 = vst [vmem:[#allocation130_spill] sm:$0xff] %v6030_v7  ;;  %10674 = vst [vmem:[#allocation131_spill] sm:$0xff] %v6033_v8  ;;  %v6051_v7 = vmul.f32 %v5555_v28, %v438_v23  ;;  %v6055_v8 = vmul.f32 %v5557_v29, %v438_v23  ;;  %729 = vbcast.lane.b32.xlu1 %v5809_v5, 296  ;;  %658 = vbcast.lane.b32.xlu0 %v5706_v45, 288 }
 0x10d   : > { %10675 = vst [vmem:[#allocation132_spill] sm:$0xff] %v6036_v0  ;;  %10676 = vst [vmem:[#allocation133_spill] sm:$0xff] %v6039_v6  ;;  %v6061_v6 = vmul.f32 %v5561_v31, %v438_v23  ;;  %v454_v0 = vpop.permute.xlu0 %453 }
 0x10e   : > { %10677 = vst [vmem:[#allocation134_spill] sm:$0xff] %v6042_v25  ;;  %10678 = vst [vmem:[#allocation135_spill] sm:$0xff] %v6045_v9  ;;  %v6064_v25 = vmul.f32 %v5563_v32, %v438_v23  ;;  %v6074_v9 = vmul.f32 %v5553_v27, %v450_v4  ;;  %v6083_v23 = vmul.f32 %v5559_v30, %v450_v4 }
 0x10f   : > { %10679 = vst [vmem:[#allocation136_spill] sm:$0xff] %v6048_v10  ;;  %10680 = vst [vmem:[#allocation137_spill] sm:$0xff] %v6051_v7  ;;  %v6068_v10 = vmul.f32 %v5548_v24, %v450_v4  ;;  %v6071_v7 = vmul.f32 %v5551_v26, %v450_v4 }
 0x110   : > { %10681 = vst [vmem:[#allocation138_spill] sm:$0xff] %v6055_v8  ;;  %10682 = vst [vmem:[#allocation139_spill] sm:$0xff] %v6058_v46  ;;  %v6077_v8 = vmul.f32 %v5555_v28, %v450_v4  ;;  %v458_v46 = vpop.permute.xlu1 %457  ;;  %861 = vbcast.lane.b32.xlu1 %v5862_v2, 288  ;;  %790 = vbcast.lane.b32.xlu0 %v5965_v1, 280 }
 0x111   : > { %10683 = vst [vmem:[#allocation140_spill] sm:$0xff] %v6061_v6  ;;  %10684 = vst [vmem:[#allocation141_spill] sm:$0xff] %v6064_v25  ;;  %v6080_v6 = vmul.f32 %v5557_v29, %v450_v4  ;;  %v6086_v25 = vmul.f32 %v5561_v31, %v450_v4 }
 0x112   : > { %10685 = vst [vmem:[#allocation142_spill] sm:$0xff] %v6068_v10  ;;  %10686 = vst [vmem:[#allocation143_spill] sm:$0xff] %v6071_v7  ;;  %v6089_v10 = vmul.f32 %v5563_v32, %v450_v4  ;;  %v6092_v7 = vmul.f32 %v5548_v24, %v446_v3  ;;  %v6108_v4 = vmul.f32 %v5559_v30, %v446_v3 }
 0x113   : > { %10687 = vst [vmem:[#allocation144_spill] sm:$0xff] %v6074_v9  ;;  %10688 = vst [vmem:[#allocation145_spill] sm:$0xff] %v6077_v8  ;;  %v6095_v9 = vmul.f32 %v5551_v26, %v446_v3  ;;  %v6098_v8 = vmul.f32 %v5553_v27, %v446_v3 }
 0x114   : > { %10689 = vst [vmem:[#allocation146_spill] sm:$0xff] %v6080_v6  ;;  %10690 = vst [vmem:[#allocation147_spill] sm:$0xff] %v6083_v23  ;;  %v6101_v6 = vmul.f32 %v5555_v28, %v446_v3  ;;  %v6105_v23 = vmul.f32 %v5557_v29, %v446_v3  ;;  %733 = vbcast.lane.b32.xlu1 %v5809_v5, 304  ;;  %662 = vbcast.lane.b32.xlu0 %v5706_v45, 296 }
 0x115   : > { %10691 = vst [vmem:[#allocation148_spill] sm:$0xff] %v6086_v25  ;;  %10692 = vst [vmem:[#allocation149_spill] sm:$0xff] %v6089_v10  ;;  %v6111_v10 = vmul.f32 %v5561_v31, %v446_v3  ;;  %v462_v25 = vpop.permute.xlu0 %461 }
 0x116   : > { %10693 = vst [vmem:[#allocation150_spill] sm:$0xff] %v6092_v7  ;;  %10694 = vst [vmem:[#allocation151_spill] sm:$0xff] %v6095_v9  ;;  %v6114_v7 = vmul.f32 %v5563_v32, %v446_v3  ;;  %v6124_v9 = vmul.f32 %v5553_v27, %v458_v46  ;;  %v6133_v3 = vmul.f32 %v5559_v30, %v458_v46 }
 0x117   : > { %10695 = vst [vmem:[#allocation152_spill] sm:$0xff] %v6098_v8  ;;  %10696 = vst [vmem:[#allocation153_spill] sm:$0xff] %v6101_v6  ;;  %v6118_v8 = vmul.f32 %v5548_v24, %v458_v46  ;;  %v6121_v6 = vmul.f32 %v5551_v26, %v458_v46 }
 0x118   : > { %10697 = vst [vmem:[#allocation154_spill] sm:$0xff] %v6105_v23  ;;  %10698 = vst [vmem:[#allocation155_spill] sm:$0xff] %v6108_v4  ;;  %v6127_v23 = vmul.f32 %v5555_v28, %v458_v46  ;;  %v466_v4 = vpop.permute.xlu1 %465  ;;  %865 = vbcast.lane.b32.xlu1 %v5862_v2, 296  ;;  %794 = vbcast.lane.b32.xlu0 %v5965_v1, 288 }
 0x119   : > { %10699 = vst [vmem:[#allocation156_spill] sm:$0xff] %v6111_v10  ;;  %10700 = vst [vmem:[#allocation157_spill] sm:$0xff] %v6114_v7  ;;  %v6130_v10 = vmul.f32 %v5557_v29, %v458_v46  ;;  %v6136_v7 = vmul.f32 %v5561_v31, %v458_v46 }
 0x11a   : > { %10701 = vst [vmem:[#allocation158_spill] sm:$0xff] %v6118_v8  ;;  %10702 = vst [vmem:[#allocation159_spill] sm:$0xff] %v6121_v6  ;;  %v6139_v8 = vmul.f32 %v5563_v32, %v458_v46  ;;  %v6142_v6 = vmul.f32 %v5548_v24, %v454_v0  ;;  %v6158_v46 = vmul.f32 %v5559_v30, %v454_v0 }
 0x11b   : > { %10703 = vst [vmem:[#allocation160_spill] sm:$0xff] %v6124_v9  ;;  %10704 = vst [vmem:[#allocation161_spill] sm:$0xff] %v6127_v23  ;;  %v6145_v9 = vmul.f32 %v5551_v26, %v454_v0  ;;  %v6148_v23 = vmul.f32 %v5553_v27, %v454_v0 }
 0x11c   : > { %10705 = vst [vmem:[#allocation162_spill] sm:$0xff] %v6130_v10  ;;  %10706 = vst [vmem:[#allocation163_spill] sm:$0xff] %v6133_v3  ;;  %v6151_v10 = vmul.f32 %v5555_v28, %v454_v0  ;;  %v6155_v3 = vmul.f32 %v5557_v29, %v454_v0  ;;  %737 = vbcast.lane.b32.xlu1 %v5809_v5, 312  ;;  %666 = vbcast.lane.b32.xlu0 %v5706_v45, 304 }
 0x11d   : > { %10707 = vst [vmem:[#allocation164_spill] sm:$0xff] %v6136_v7  ;;  %10708 = vst [vmem:[#allocation165_spill] sm:$0xff] %v6139_v8  ;;  %v6161_v8 = vmul.f32 %v5561_v31, %v454_v0  ;;  %v470_v7 = vpop.permute.xlu0 %469 }
 0x11e   : > { %10709 = vst [vmem:[#allocation166_spill] sm:$0xff] %v6142_v6  ;;  %10710 = vst [vmem:[#allocation167_spill] sm:$0xff] %v6145_v9  ;;  %v6164_v6 = vmul.f32 %v5563_v32, %v454_v0  ;;  %v6174_v9 = vmul.f32 %v5553_v27, %v466_v4  ;;  %v6183_v0 = vmul.f32 %v5559_v30, %v466_v4 }
 0x11f   : > { %10711 = vst [vmem:[#allocation168_spill] sm:$0xff] %v6148_v23  ;;  %10712 = vst [vmem:[#allocation169_spill] sm:$0xff] %v6151_v10  ;;  %v6168_v23 = vmul.f32 %v5548_v24, %v466_v4  ;;  %v6171_v10 = vmul.f32 %v5551_v26, %v466_v4 }
 0x120   : > { %10713 = vst [vmem:[#allocation170_spill] sm:$0xff] %v6155_v3  ;;  %10714 = vst [vmem:[#allocation171_spill] sm:$0xff] %v6158_v46  ;;  %v6177_v3 = vmul.f32 %v5555_v28, %v466_v4  ;;  %v474_v46 = vpop.permute.xlu1 %473  ;;  %869 = vbcast.lane.b32.xlu1 %v5862_v2, 304  ;;  %798 = vbcast.lane.b32.xlu0 %v5965_v1, 296 }
 0x121   : > { %10715 = vst [vmem:[#allocation172_spill] sm:$0xff] %v6161_v8  ;;  %10716 = vst [vmem:[#allocation173_spill] sm:$0xff] %v6164_v6  ;;  %v6180_v8 = vmul.f32 %v5557_v29, %v466_v4  ;;  %v6186_v6 = vmul.f32 %v5561_v31, %v466_v4 }
 0x122   : > { %10717 = vst [vmem:[#allocation174_spill] sm:$0xff] %v6168_v23  ;;  %10718 = vst [vmem:[#allocation175_spill] sm:$0xff] %v6171_v10  ;;  %v6189_v23 = vmul.f32 %v5563_v32, %v466_v4  ;;  %v6192_v10 = vmul.f32 %v5548_v24, %v462_v25  ;;  %v6208_v4 = vmul.f32 %v5559_v30, %v462_v25 }
 0x123   : > { %10719 = vst [vmem:[#allocation176_spill] sm:$0xff] %v6174_v9  ;;  %10720 = vst [vmem:[#allocation177_spill] sm:$0xff] %v6177_v3  ;;  %v6195_v9 = vmul.f32 %v5551_v26, %v462_v25  ;;  %v6198_v3 = vmul.f32 %v5553_v27, %v462_v25 }
 0x124   : > { %10721 = vst [vmem:[#allocation178_spill] sm:$0xff] %v6180_v8  ;;  %10722 = vst [vmem:[#allocation179_spill] sm:$0xff] %v6183_v0  ;;  %v6201_v8 = vmul.f32 %v5555_v28, %v462_v25  ;;  %v6205_v0 = vmul.f32 %v5557_v29, %v462_v25  ;;  %741 = vbcast.lane.b32.xlu1 %v5809_v5, 320  ;;  %670 = vbcast.lane.b32.xlu0 %v5706_v45, 312 }
 0x125   : > { %10723 = vst [vmem:[#allocation180_spill] sm:$0xff] %v6186_v6  ;;  %10724 = vst [vmem:[#allocation181_spill] sm:$0xff] %v6189_v23  ;;  %v6211_v23 = vmul.f32 %v5561_v31, %v462_v25  ;;  %v478_v6 = vpop.permute.xlu0 %477 }
 0x126   : > { %10725 = vst [vmem:[#allocation182_spill] sm:$0xff] %v6192_v10  ;;  %10726 = vst [vmem:[#allocation183_spill] sm:$0xff] %v6195_v9  ;;  %v6214_v10 = vmul.f32 %v5563_v32, %v462_v25  ;;  %v6224_v9 = vmul.f32 %v5553_v27, %v474_v46  ;;  %v6233_v25 = vmul.f32 %v5559_v30, %v474_v46 }
 0x127   : > { %10727 = vst [vmem:[#allocation184_spill] sm:$0xff] %v6198_v3  ;;  %10728 = vst [vmem:[#allocation185_spill] sm:$0xff] %v6201_v8  ;;  %v6218_v3 = vmul.f32 %v5548_v24, %v474_v46  ;;  %v6221_v8 = vmul.f32 %v5551_v26, %v474_v46 }
 0x128   : > { %10729 = vst [vmem:[#allocation186_spill] sm:$0xff] %v6205_v0  ;;  %10730 = vst [vmem:[#allocation187_spill] sm:$0xff] %v6208_v4  ;;  %v6227_v0 = vmul.f32 %v5555_v28, %v474_v46  ;;  %v482_v4 = vpop.permute.xlu1 %481  ;;  %873 = vbcast.lane.b32.xlu1 %v5862_v2, 312  ;;  %802 = vbcast.lane.b32.xlu0 %v5965_v1, 304 }
 0x129   : > { %10731 = vst [vmem:[#allocation188_spill] sm:$0xff] %v6211_v23  ;;  %10732 = vst [vmem:[#allocation189_spill] sm:$0xff] %v6214_v10  ;;  %v6230_v23 = vmul.f32 %v5557_v29, %v474_v46  ;;  %v6236_v10 = vmul.f32 %v5561_v31, %v474_v46 }
 0x12a   : > { %10733 = vst [vmem:[#allocation190_spill] sm:$0xff] %v6218_v3  ;;  %10734 = vst [vmem:[#allocation191_spill] sm:$0xff] %v6221_v8  ;;  %v6239_v3 = vmul.f32 %v5563_v32, %v474_v46  ;;  %v6242_v8 = vmul.f32 %v5548_v24, %v470_v7  ;;  %v6258_v46 = vmul.f32 %v5559_v30, %v470_v7 }
 0x12b   : > { %10735 = vst [vmem:[#allocation192_spill] sm:$0xff] %v6224_v9  ;;  %10736 = vst [vmem:[#allocation193_spill] sm:$0xff] %v6227_v0  ;;  %v6245_v9 = vmul.f32 %v5551_v26, %v470_v7  ;;  %v6248_v0 = vmul.f32 %v5553_v27, %v470_v7 }
 0x12c   : > { %10737 = vst [vmem:[#allocation194_spill] sm:$0xff] %v6230_v23  ;;  %10738 = vst [vmem:[#allocation195_spill] sm:$0xff] %v6233_v25  ;;  %v6251_v23 = vmul.f32 %v5555_v28, %v470_v7  ;;  %v6255_v25 = vmul.f32 %v5557_v29, %v470_v7  ;;  %745 = vbcast.lane.b32.xlu1 %v5809_v5, 328  ;;  %674 = vbcast.lane.b32.xlu0 %v5706_v45, 320 }
 0x12d   : > { %10739 = vst [vmem:[#allocation196_spill] sm:$0xff] %v6236_v10  ;;  %10740 = vst [vmem:[#allocation197_spill] sm:$0xff] %v6239_v3  ;;  %v6261_v3 = vmul.f32 %v5561_v31, %v470_v7  ;;  %v6292_v10 = vmul.f32 %v5548_v24, %v478_v6 }
 0x12e   : > { %10741 = vst [vmem:[#allocation198_spill] sm:$0xff] %v6242_v8  ;;  %10742 = vst [vmem:[#allocation199_spill] sm:$0xff] %v6245_v9  ;;  %v6264_v8 = vmul.f32 %v5563_v32, %v470_v7  ;;  %v6274_v9 = vmul.f32 %v5553_v27, %v482_v4  ;;  %v6283_v7 = vmul.f32 %v5559_v30, %v482_v4 }
 0x12f   : > { %10743 = vst [vmem:[#allocation200_spill] sm:$0xff] %v6248_v0  ;;  %10744 = vst [vmem:[#allocation201_spill] sm:$0xff] %v6251_v23  ;;  %v6268_v0 = vmul.f32 %v5548_v24, %v482_v4  ;;  %v6271_v23 = vmul.f32 %v5551_v26, %v482_v4 }
 0x130   : > { %10745 = vst [vmem:[#allocation202_spill] sm:$0xff] %v6255_v25  ;;  %10746 = vst [vmem:[#allocation203_spill] sm:$0xff] %v6258_v46  ;;  %v6277_v25 = vmul.f32 %v5555_v28, %v482_v4  ;;  %v490_v46 = vpop.permute.xlu1 %489  ;;  %877 = vbcast.lane.b32.xlu1 %v5862_v2, 320  ;;  %806 = vbcast.lane.b32.xlu0 %v5965_v1, 312 }
 0x131   : > { %10747 = vst [vmem:[#allocation204_spill] sm:$0xff] %v6261_v3  ;;  %10748 = vst [vmem:[#allocation205_spill] sm:$0xff] %v6264_v8  ;;  %v6280_v3 = vmul.f32 %v5557_v29, %v482_v4  ;;  %v6286_v8 = vmul.f32 %v5561_v31, %v482_v4 }
 0x132   : > { %10749 = vst [vmem:[#allocation206_spill] sm:$0xff] %v6268_v0  ;;  %10750 = vst [vmem:[#allocation207_spill] sm:$0xff] %v6271_v23  ;;  %v6289_v0 = vmul.f32 %v5563_v32, %v482_v4  ;;  %v486_v23 = vpop.permute.xlu0 %485  ;;  %v6308_v4 = vmul.f32 %v5559_v30, %v478_v6 }
 0x133   : > { %10751 = vst [vmem:[#allocation208_spill] sm:$0xff] %v6274_v9  ;;  %10752 = vst [vmem:[#allocation209_spill] sm:$0xff] %v6277_v25  ;;  %v6295_v9 = vmul.f32 %v5551_v26, %v478_v6  ;;  %v6298_v25 = vmul.f32 %v5553_v27, %v478_v6  ;;  %v6368_v36 = vmul.f32 %v5561_v31, %v486_v23 }
 0x134   : > { %10753 = vst [vmem:[#allocation210_spill] sm:$0xff] %v6280_v3  ;;  %10754 = vst [vmem:[#allocation211_spill] sm:$0xff] %v6283_v7  ;;  %v6301_v3 = vmul.f32 %v5555_v28, %v478_v6  ;;  %v6363_v7 = vmul.f32 %v5559_v30, %v486_v23  ;;  %749 = vbcast.lane.b32.xlu1 %v5809_v5, 336  ;;  %678 = vbcast.lane.b32.xlu0 %v5706_v45, 328 }
 0x135   : > { %10755 = vst [vmem:[#allocation212_spill] sm:$0xff] %v6286_v8  ;;  %10756 = vst [vmem:[#allocation213_spill] sm:$0xff] %v6289_v0  ;;  %v6305_v8 = vmul.f32 %v5557_v29, %v478_v6  ;;  %v6311_v0 = vmul.f32 %v5561_v31, %v478_v6 }
 0x136   : > { %10757 = vst [vmem:[#allocation214_spill] sm:$0xff] %v6292_v10  ;;  %10758 = vst [vmem:[#allocation215_spill] sm:$0xff] %v6295_v9  ;;  %v6314_v10 = vmul.f32 %v5563_v32, %v478_v6  ;;  %v6324_v9 = vmul.f32 %v5553_v27, %v490_v46  ;;  %v6333_v6 = vmul.f32 %v5559_v30, %v490_v46 }
 0x137   : > { %10759 = vst [vmem:[#allocation216_spill] sm:$0xff] %v6298_v25  ;;  %10760 = vst [vmem:[#allocation217_spill] sm:$0xff] %v6301_v3  ;;  %v6318_v25 = vmul.f32 %v5548_v24, %v490_v46  ;;  %v6321_v3 = vmul.f32 %v5551_v26, %v490_v46 }
 0x138   : > { %10761 = vst [vmem:[#allocation218_spill] sm:$0xff] %v6305_v8  ;;  %10762 = vst [vmem:[#allocation219_spill] sm:$0xff] %v6308_v4  ;;  %v6327_v8 = vmul.f32 %v5555_v28, %v490_v46  ;;  %v6330_v4 = vmul.f32 %v5557_v29, %v490_v46  ;;  %881 = vbcast.lane.b32.xlu1 %v5862_v2, 328  ;;  %810 = vbcast.lane.b32.xlu0 %v5965_v1, 320 }
 0x139   : > { %10763 = vst [vmem:[#allocation220_spill] sm:$0xff] %v6311_v0  ;;  %10764 = vst [vmem:[#allocation221_spill] sm:$0xff] %v6314_v10  ;;  %v6336_v10 = vmul.f32 %v5561_v31, %v490_v46  ;;  %v498_v0 = vpop.permute.xlu1 %497 }
 0x13a   : > { %10765 = vst [vmem:[#allocation222_spill] sm:$0xff] %v6318_v25  ;;  %10766 = vst [vmem:[#allocation223_spill] sm:$0xff] %v6321_v3  ;;  %v6339_v25 = vmul.f32 %v5563_v32, %v490_v46  ;;  %v6342_v3 = vmul.f32 %v5548_v24, %v486_v23  ;;  %v1773_v46 = vmul.f32 %v5553_v27, %v498_v0 }
 0x13b   : > { %10767 = vst [vmem:[#allocation224_spill] sm:$0xff] %v6324_v9  ;;  %10768 = vst [vmem:[#allocation225_spill] sm:$0xff] %v6327_v8  ;;  %v6345_v9 = vmul.f32 %v5551_v26, %v486_v23  ;;  %v990_v8 = vmul.f32 %v5548_v24, %v498_v0  ;;  %v2550_v63 = vmul.f32 %v5557_v29, %v498_v0 }
 0x13c   : > { %10769 = vst [vmem:[#allocation226_spill] sm:$0xff] %v6330_v4  ;;  %10770 = vst [vmem:[#allocation227_spill] sm:$0xff] %v6333_v6  ;;  %v991_v4 = vmul.f32 %v5551_v26, %v498_v0  ;;  %v6351_v6 = vmul.f32 %v5553_v27, %v486_v23  ;;  %v3327_v35 = vmul.f32 %v5561_v31, %v498_v0  ;;  %753 = vbcast.lane.b32.xlu1 %v5809_v5, 344 }
 0x13d   : > { %10771 = vst [vmem:[#allocation228_spill] sm:$0xff] %v6336_v10  ;;  %10772 = vst [vmem:[#allocation229_spill] sm:$0xff] %v6339_v25  ;;  %v6354_v10 = vmul.f32 %v5555_v28, %v486_v23  ;;  %v1774_v25 = vmul.f32 %v5555_v28, %v498_v0  ;;  %v3328_v34 = vmul.f32 %v5563_v32, %v498_v0  ;;  %682 = vbcast.lane.b32.xlu0 %v5706_v45, 336 }
 0x13e   : > { %10773 = vst [vmem:[#allocation230_spill] sm:$0xff] %v6342_v3  ;;  %10774 = vst [vmem:[#allocation231_spill] sm:$0xff] %v6345_v9  ;;  %v494_v3 = vpop.permute.xlu0 %493  ;;  %v6360_v9 = vmul.f32 %v5557_v29, %v486_v23  ;;  %v6376_v33 = vadd.f32 %v5571_v47, %v990_v8 }
 0x13f   : > { %10775 = vst [vmem:[#allocation232_spill] sm:$0xff] %v6351_v6  ;;  %10776 = vst [vmem:[#allocation233_spill] sm:$0xff] %v6354_v10  ;;  %v2551_v6 = vmul.f32 %v5559_v30, %v498_v0  ;;  %v6371_v10 = vmul.f32 %v5563_v32, %v486_v23  ;;  %v989_v22 = vmul.f32 %v5551_v26, %v494_v3 }
 0x140   : > { %10777 = vst [vmem:[#allocation234_spill] sm:$0xff] %v6360_v9  ;;  %10778 = vst [vmem:[#allocation235_spill] sm:$0xff] %v6363_v7  ;;  %v6379_v9 = vadd.f32 %v5573_v48, %v991_v4  ;;  %v988_v7 = vmul.f32 %v5548_v24, %v494_v3  ;;  %v6388_v23 = vadd.f32 %v5577_v50, %v1774_v25  ;;  %885 = vbcast.lane.b32.xlu1 %v5862_v2, 336 }
 0x141   : > { %10779 = vst [vmem:[#allocation236_spill] sm:$0xff] %v6368_v36  ;;  %10780 = vst [vmem:[#allocation237_spill] sm:$0xff] %v6376_v33  ;;  %v6385_v36 = vadd.f32 %v5575_v49, %v1773_v46  ;;  %v1771_v0 = vmul.f32 %v5553_v27, %v494_v3  ;;  %v1772_v8 = vmul.f32 %v5555_v28, %v494_v3  ;;  %v511_v33 = vpop.permute.xlu1 %510  ;;  %814 = vbcast.lane.b32.xlu0 %v5965_v1, 328 }
 0x142   : > { %10781 = vst [vmem:[#allocation238_spill] sm:$0xff] %v6379_v9  ;;  %10783 = vst [vmem:[#allocation240_spill] sm:$0xff] %v6388_v23  ;;  %v6394_v4 = vadd.f32 %v5579_v51, %v2550_v63  ;;  %v6397_v24 = vadd.f32 %v5581_v52, %v2551_v6  ;;  %v2548_v26 = vmul.f32 %v5557_v29, %v494_v3 }
 0x143   : > { %10782 = vst [vmem:[#allocation239_spill] sm:$0xff] %v6385_v36  ;;  %v2549_v46 = vmul.f32 %v5559_v30, %v494_v3  ;;  %v6402_v25 = vadd.f32 %v5583_v53, %v3327_v35  ;;  %v6405_v27 = vadd.f32 %v5585_v54, %v3328_v34  ;;  %v3325_v28 = vmul.f32 %v5561_v31, %v494_v3  ;;  %v507_v36 = vpop.permute.xlu0 %506 }
 0x144   : > { %10784 = vst [vmem:[#allocation241_spill] sm:$0xff] %v6394_v4  ;;  %10785 = vst [vmem:[#allocation242_spill] sm:$0xff] %v6397_v24  ;;  %v3326_v23 = vmul.f32 %v5563_v32, %v494_v3  ;;  %v6410_v63 = vadd.f32 %v5571_v47, %v988_v7  ;;  %v6413_v6 = vadd.f32 %v5573_v48, %v989_v22  ;;  %757 = vbcast.lane.b32.xlu1 %v5809_v5, 352 }
 0x145   : > { %10786 = vst [vmem:[#allocation243_spill] sm:$0xff] %v6402_v25  ;;  %10787 = vst [vmem:[#allocation244_spill] sm:$0xff] %v6405_v27  ;;  %v1087_v29 = vmul.f32 %v5588_v55, %v511_v33  ;;  %v1088_v30 = vmul.f32 %v5590_v56, %v511_v33  ;;  %v6419_v35 = vadd.f32 %v5575_v49, %v1771_v0  ;;  %686 = vbcast.lane.b32.xlu0 %v5706_v45, 344 }
 0x146   : > { %v6422_v34 = vadd.f32 %v5577_v50, %v1772_v8  ;;  %v1870_v31 = vmul.f32 %v5592_v57, %v511_v33  ;;  %v1871_v32 = vmul.f32 %v5594_v58, %v511_v33  ;;  %v6428_v22 = vadd.f32 %v5579_v51, %v2548_v26 }
 0x147   : > { %v6431_v3 = vadd.f32 %v5581_v52, %v2549_v46  ;;  %v1005_v7 = vadd.f32 %v5571_v47, %v5680_v37  ;;  %v1006_v0 = vadd.f32 %v5573_v48, %v5683_v38  ;;  %v1788_v8 = vadd.f32 %v5575_v49, %v5686_v39 }
 0x148   : > { %v1789_v27 = vadd.f32 %v5577_v50, %v5689_v40  ;;  %v2647_v25 = vmul.f32 %v5597_v59, %v511_v33  ;;  %v2648_v26 = vmul.f32 %v5599_v60, %v511_v33  ;;  %v6444_v24 = vadd.f32 %v5583_v53, %v3325_v28  ;;  %889 = vbcast.lane.b32.xlu1 %v5862_v2, 344 }
 0x149   : > { %v6447_v46 = vadd.f32 %v5585_v54, %v3326_v23  ;;  %v6449_v37 = vadd.f32 %v1087_v29, %v1005_v7  ;;  %v6451_v4 = vadd.f32 %v1088_v30, %v1006_v0  ;;  %v6454_v38 = vadd.f32 %v1870_v31, %v1788_v8  ;;  %818 = vbcast.lane.b32.xlu0 %v5965_v1, 336 }
 0x14a   : > { %v6456_v39 = vadd.f32 %v1871_v32, %v1789_v27  ;;  %v2565_v40 = vadd.f32 %v5579_v51, %v5693_v41  ;;  %v2566_v28 = vadd.f32 %v5581_v52, %v5696_v42  ;;  %v3342_v23 = vadd.f32 %v5583_v53, %v5699_v43 }
 0x14b   : > { %v3343_v29 = vadd.f32 %v5585_v54, %v5702_v44  ;;  %v3424_v30 = vmul.f32 %v5601_v61, %v511_v33  ;;  %v3425_v27 = vmul.f32 %v5603_v62, %v511_v33  ;;  %v1003_v41 = vadd.f32 %v5571_v47, %v5630_v11 }
 0x14c   : > { %v6469_v31 = vadd.f32 %v2647_v25, %v2565_v40  ;;  %v6471_v32 = vadd.f32 %v2648_v26, %v2566_v28  ;;  %v1004_v42 = vadd.f32 %v5573_v48, %v5633_v12  ;;  %v1085_v7 = vmul.f32 %v5588_v55, %v507_v36  ;;  %761 = vbcast.lane.b32.xlu1 %v5809_v5, 360 }
 0x14d   : > { %v1086_v43 = vmul.f32 %v5590_v56, %v507_v36  ;;  %v1868_v44 = vmul.f32 %v5592_v57, %v507_v36  ;;  %v1869_v0 = vmul.f32 %v5594_v58, %v507_v36  ;;  %v2645_v33 = vmul.f32 %v5597_v59, %v507_v36  ;;  %690 = vbcast.lane.b32.xlu0 %v5706_v45, 352 }
 0x14e   : > { %10788 = vst [vmem:[#allocation245_spill] sm:$0xff] %v6471_v32  ;;  %v2646_v25 = vmul.f32 %v5599_v60, %v507_v36  ;;  %v3422_v8 = vmul.f32 %v5601_v61, %v507_v36  ;;  %v3423_v11 = vmul.f32 %v5603_v62, %v507_v36  ;;  %v6487_v12 = vadd.f32 %v3424_v30, %v3342_v23 }
 0x14f   : > { %v6489_v26 = vadd.f32 %v3425_v27, %v3343_v29  ;;  %v1786_v40 = vadd.f32 %v5575_v49, %v5636_v13  ;;  %v1787_v28 = vadd.f32 %v5577_v50, %v5639_v14  ;;  %v2563_v9 = vadd.f32 %v5579_v51, %v5643_v15  ;;  %v519_v29 = vpop.permute.xlu1 %518 }
 0x150   : > { %v2564_v32 = vadd.f32 %v5581_v52, %v5646_v16  ;;  %v3340_v36 = vadd.f32 %v5583_v53, %v5649_v17  ;;  %v3341_v23 = vadd.f32 %v5585_v54, %v5652_v18  ;;  %v6503_v30 = vadd.f32 %v1085_v7, %v1003_v41  ;;  %893 = vbcast.lane.b32.xlu1 %v5862_v2, 352 }
 0x151   : > { %10789 = vst [vmem:[#allocation246_spill] sm:$0xff] %v6489_v26  ;;  %v6505_v27 = vadd.f32 %v1086_v43, %v1004_v42  ;;  %v6507_v13 = vadd.f32 %v1868_v44, %v1786_v40  ;;  %v6509_v14 = vadd.f32 %v1869_v0, %v1787_v28  ;;  %v6512_v15 = vadd.f32 %v2645_v33, %v2563_v9  ;;  %v10797_v40 = vld [vmem:[#allocation26_spill] sm:$0xff] }
 0x152   : > { %v6514_v16 = vadd.f32 %v2646_v25, %v2564_v32  ;;  %v6516_v26 = vadd.f32 %v3422_v8, %v3340_v36  ;;  %v6518_v17 = vadd.f32 %v3423_v11, %v3341_v23  ;;  %v1091_v18 = vmul.f32 %v5588_v55, %v519_v29  ;;  %v10796_v8 = vld [vmem:[#allocation25_spill] sm:$0xff]  ;;  %v10798_v36 = vld [vmem:[#allocation27_spill] sm:$0xff]  ;;  %822 = vbcast.lane.b32.xlu0 %v5965_v1, 344 }
 0x153   : > { %10790 = vst [vmem:[#allocation247_spill] sm:$0xff] %v6507_v13  ;;  %10791 = vst [vmem:[#allocation248_spill] sm:$0xff] %v6509_v14  ;;  %v1092_v41 = vmul.f32 %v5590_v56, %v519_v29  ;;  %v1874_v42 = vmul.f32 %v5592_v57, %v519_v29  ;;  %v1875_v7 = vmul.f32 %v5594_v58, %v519_v29 }
 0x154   : > { %10792 = vst [vmem:[#allocation249_spill] sm:$0xff] %v6512_v15  ;;  %10793 = vst [vmem:[#allocation250_spill] sm:$0xff] %v6514_v16  ;;  %v2651_v43 = vmul.f32 %v5597_v59, %v519_v29  ;;  %v2652_v9 = vmul.f32 %v5599_v60, %v519_v29  ;;  %v3428_v32 = vmul.f32 %v5601_v61, %v519_v29  ;;  %765 = vbcast.lane.b32.xlu1 %v5809_v5, 368 }
 0x155   : > { %10794 = vst [vmem:[#allocation251_spill] sm:$0xff] %v6516_v26  ;;  %10795 = vst [vmem:[#allocation252_spill] sm:$0xff] %v6518_v17  ;;  %v3429_v44 = vmul.f32 %v5603_v62, %v519_v29  ;;  %v1009_v0 = vadd.f32 %v5571_v47, %v5656_v19  ;;  %v1010_v33 = vadd.f32 %v5573_v48, %v5659_v20  ;;  %v10799_v29 = vld [vmem:[#allocation28_spill] sm:$0xff]  ;;  %v10800_v17 = vld [vmem:[#allocation29_spill] sm:$0xff]  ;;  %v515_v26 = vpop.permute.xlu0 %514 }
 0x156   : > { %v1792_v25 = vadd.f32 %v5575_v49, %v5662_v21  ;;  %v1793_v11 = vadd.f32 %v5577_v50, %v10796_v8  ;;  %v2569_v28 = vadd.f32 %v5579_v51, %v10797_v40  ;;  %v2570_v23 = vadd.f32 %v5581_v52, %v10798_v36 }
 0x157   : > { %v3346_v19 = vadd.f32 %v5583_v53, %v10799_v29  ;;  %v3347_v20 = vadd.f32 %v5585_v54, %v10800_v17  ;;  %v6547_v21 = vadd.f32 %v1091_v18, %v1009_v0  ;;  %v6549_v8 = vadd.f32 %v1092_v41, %v1010_v33  ;;  %v10810_v0 = vld [vmem:[#allocation18_spill] sm:$0xff] }
 0x158   : > { %v6551_v16 = vadd.f32 %v1874_v42, %v1792_v25  ;;  %v6553_v15 = vadd.f32 %v1875_v7, %v1793_v11  ;;  %v6555_v40 = vadd.f32 %v2651_v43, %v2569_v28  ;;  %v6557_v36 = vadd.f32 %v2652_v9, %v2570_v23  ;;  %v10811_v25 = vld [vmem:[#allocation19_spill] sm:$0xff]  ;;  %v10812_v28 = vld [vmem:[#allocation20_spill] sm:$0xff]  ;;  %897 = vbcast.lane.b32.xlu1 %v5862_v2, 360 }
 0x159   : > { %10801 = vst [vmem:[#allocation25_spill] sm:$0xff] %v6547_v21  ;;  %10802 = vst [vmem:[#allocation26_spill] sm:$0xff] %v6549_v8  ;;  %v6559_v14 = vadd.f32 %v3428_v32, %v3346_v19  ;;  %v6561_v29 = vadd.f32 %v3429_v44, %v3347_v20  ;;  %v1089_v17 = vmul.f32 %v5588_v55, %v515_v26  ;;  %v10809_v32 = vld [vmem:[#allocation17_spill] sm:$0xff] }
 0x15a   : > { %10803 = vst [vmem:[#allocation27_spill] sm:$0xff] %v6551_v16  ;;  %10804 = vst [vmem:[#allocation28_spill] sm:$0xff] %v6553_v15  ;;  %v1090_v13 = vmul.f32 %v5590_v56, %v515_v26  ;;  %v1872_v18 = vmul.f32 %v5592_v57, %v515_v26  ;;  %v1873_v41 = vmul.f32 %v5594_v58, %v515_v26  ;;  %v10813_v19 = vld [vmem:[#allocation21_spill] sm:$0xff]  ;;  %v527_v15 = vpop.permute.xlu1 %526 }
 0x15b   : > { %10805 = vst [vmem:[#allocation29_spill] sm:$0xff] %v6555_v40  ;;  %10806 = vst [vmem:[#allocation253_spill] sm:$0xff] %v6557_v36  ;;  %v2649_v42 = vmul.f32 %v5597_v59, %v515_v26  ;;  %v2650_v7 = vmul.f32 %v5599_v60, %v515_v26  ;;  %v3426_v43 = vmul.f32 %v5601_v61, %v515_v26  ;;  %v10816_v40 = vld [vmem:[#allocation24_spill] sm:$0xff] }
 0x15c   : > { %10807 = vst [vmem:[#allocation254_spill] sm:$0xff] %v6559_v14  ;;  %10808 = vst [vmem:[#allocation255_spill] sm:$0xff] %v6561_v29  ;;  %v3427_v9 = vmul.f32 %v5603_v62, %v515_v26  ;;  %v1007_v44 = vadd.f32 %v5571_v47, %v10809_v32  ;;  %v1008_v33 = vadd.f32 %v5573_v48, %v10810_v0  ;;  %v10814_v29 = vld [vmem:[#allocation22_spill] sm:$0xff]  ;;  %v10815_v14 = vld [vmem:[#allocation23_spill] sm:$0xff] }
 0x15d   : > { %v1790_v11 = vadd.f32 %v5575_v49, %v10811_v25  ;;  %v1791_v23 = vadd.f32 %v5577_v50, %v10812_v28  ;;  %v2567_v20 = vadd.f32 %v5579_v51, %v10813_v19  ;;  %v2568_v26 = vadd.f32 %v5581_v52, %v10814_v29 }
 0x15e   : > { %v3344_v36 = vadd.f32 %v5583_v53, %v10815_v14  ;;  %v3345_v32 = vadd.f32 %v5585_v54, %v10816_v40  ;;  %v6589_v0 = vadd.f32 %v1089_v17, %v1007_v44  ;;  %v6591_v16 = vadd.f32 %v1090_v13, %v1008_v33  ;;  %v10826_v44 = vld [vmem:[#allocation31_spill] sm:$0xff] }
 0x15f   : > { %v6593_v25 = vadd.f32 %v1872_v18, %v1790_v11  ;;  %v6595_v28 = vadd.f32 %v1873_v41, %v1791_v23  ;;  %v6598_v19 = vadd.f32 %v2649_v42, %v2567_v20  ;;  %v6600_v29 = vadd.f32 %v2650_v7, %v2568_v26  ;;  %v10827_v11 = vld [vmem:[#allocation32_spill] sm:$0xff]  ;;  %v10828_v20 = vld [vmem:[#allocation33_spill] sm:$0xff] }
 0x160   : > { %10817 = vst [vmem:[#allocation17_spill] sm:$0xff] %v6589_v0  ;;  %10818 = vst [vmem:[#allocation18_spill] sm:$0xff] %v6591_v16  ;;  %v6602_v8 = vadd.f32 %v3426_v43, %v3344_v36  ;;  %v6604_v14 = vadd.f32 %v3427_v9, %v3345_v32  ;;  %v1095_v40 = vmul.f32 %v5588_v55, %v527_v15  ;;  %v10825_v43 = vld [vmem:[#allocation30_spill] sm:$0xff] }
 0x161   : > { %10819 = vst [vmem:[#allocation19_spill] sm:$0xff] %v6593_v25  ;;  %10820 = vst [vmem:[#allocation20_spill] sm:$0xff] %v6595_v28  ;;  %v1096_v13 = vmul.f32 %v5590_v56, %v527_v15  ;;  %v1878_v17 = vmul.f32 %v5592_v57, %v527_v15  ;;  %v1879_v18 = vmul.f32 %v5594_v58, %v527_v15  ;;  %v10829_v32 = vld [vmem:[#allocation34_spill] sm:$0xff]  ;;  %v523_v28 = vpop.permute.xlu0 %522 }
 0x162   : > { %10821 = vst [vmem:[#allocation21_spill] sm:$0xff] %v6598_v19  ;;  %10822 = vst [vmem:[#allocation22_spill] sm:$0xff] %v6600_v29  ;;  %v2655_v41 = vmul.f32 %v5597_v59, %v527_v15  ;;  %v2656_v42 = vmul.f32 %v5599_v60, %v527_v15  ;;  %v3432_v7 = vmul.f32 %v5601_v61, %v527_v15  ;;  %v10831_v29 = vld [vmem:[#allocation36_spill] sm:$0xff]  ;;  %v10832_v19 = vld [vmem:[#allocation37_spill] sm:$0xff] }
 0x163   : > { %10823 = vst [vmem:[#allocation23_spill] sm:$0xff] %v6602_v8  ;;  %10824 = vst [vmem:[#allocation24_spill] sm:$0xff] %v6604_v14  ;;  %v3433_v36 = vmul.f32 %v5603_v62, %v527_v15  ;;  %v1013_v9 = vadd.f32 %v5571_v47, %v10825_v43  ;;  %v1014_v33 = vadd.f32 %v5573_v48, %v10826_v44  ;;  %v10830_v8 = vld [vmem:[#allocation35_spill] sm:$0xff] }
 0x164   : > { %v1796_v23 = vadd.f32 %v5575_v49, %v10827_v11  ;;  %v1797_v26 = vadd.f32 %v5577_v50, %v10828_v20  ;;  %v2573_v14 = vadd.f32 %v5579_v51, %v10829_v32  ;;  %v2574_v15 = vadd.f32 %v5581_v52, %v10830_v8 }
 0x165   : > { %v3350_v43 = vadd.f32 %v5583_v53, %v10831_v29  ;;  %v3351_v44 = vadd.f32 %v5585_v54, %v10832_v19  ;;  %v6633_v11 = vadd.f32 %v1095_v40, %v1013_v9  ;;  %v6635_v20 = vadd.f32 %v1096_v13, %v1014_v33  ;;  %v10843_v33 = vld [vmem:[#allocation40_spill] sm:$0xff] }
 0x166   : > { %v6637_v25 = vadd.f32 %v1878_v17, %v1796_v23  ;;  %v6639_v16 = vadd.f32 %v1879_v18, %v1797_v26  ;;  %v6641_v32 = vadd.f32 %v2655_v41, %v2573_v14  ;;  %v6643_v8 = vadd.f32 %v2656_v42, %v2574_v15  ;;  %v10841_v42 = vld [vmem:[#allocation38_spill] sm:$0xff]  ;;  %v10844_v26 = vld [vmem:[#allocation41_spill] sm:$0xff] }
 0x167   : > { %10833 = vst [vmem:[#allocation30_spill] sm:$0xff] %v6633_v11  ;;  %10834 = vst [vmem:[#allocation31_spill] sm:$0xff] %v6635_v20  ;;  %v6645_v0 = vadd.f32 %v3432_v7, %v3350_v43  ;;  %v6647_v29 = vadd.f32 %v3433_v36, %v3351_v44  ;;  %v1093_v19 = vmul.f32 %v5588_v55, %v523_v28  ;;  %v10842_v36 = vld [vmem:[#allocation39_spill] sm:$0xff]  ;;  %v10845_v43 = vld [vmem:[#allocation42_spill] sm:$0xff] }
 0x168   : > { %10835 = vst [vmem:[#allocation32_spill] sm:$0xff] %v6637_v25  ;;  %10836 = vst [vmem:[#allocation33_spill] sm:$0xff] %v6639_v16  ;;  %v1094_v21 = vmul.f32 %v5590_v56, %v523_v28  ;;  %v1876_v40 = vmul.f32 %v5592_v57, %v523_v28  ;;  %v1877_v13 = vmul.f32 %v5594_v58, %v523_v28  ;;  %v535_v16 = vpop.permute.xlu1 %534 }
 0x169   : > { %10837 = vst [vmem:[#allocation34_spill] sm:$0xff] %v6641_v32  ;;  %10838 = vst [vmem:[#allocation35_spill] sm:$0xff] %v6643_v8  ;;  %v2653_v17 = vmul.f32 %v5597_v59, %v523_v28  ;;  %v2654_v14 = vmul.f32 %v5599_v60, %v523_v28  ;;  %v3430_v18 = vmul.f32 %v5601_v61, %v523_v28  ;;  %v10848_v32 = vld [vmem:[#allocation45_spill] sm:$0xff] }
 0x16a   : > { %10839 = vst [vmem:[#allocation36_spill] sm:$0xff] %v6645_v0  ;;  %10840 = vst [vmem:[#allocation37_spill] sm:$0xff] %v6647_v29  ;;  %v3431_v41 = vmul.f32 %v5603_v62, %v523_v28  ;;  %v1011_v7 = vadd.f32 %v5571_v47, %v10841_v42  ;;  %v1012_v9 = vadd.f32 %v5573_v48, %v10842_v36  ;;  %v10846_v29 = vld [vmem:[#allocation43_spill] sm:$0xff]  ;;  %v10847_v0 = vld [vmem:[#allocation44_spill] sm:$0xff] }
 0x16b   : > { %v1794_v23 = vadd.f32 %v5575_v49, %v10843_v33  ;;  %v1795_v15 = vadd.f32 %v5577_v50, %v10844_v26  ;;  %v2571_v44 = vadd.f32 %v5579_v51, %v10845_v43  ;;  %v2572_v28 = vadd.f32 %v5581_v52, %v10846_v29 }
 0x16c   : > { %v3348_v8 = vadd.f32 %v5583_v53, %v10847_v0  ;;  %v3349_v42 = vadd.f32 %v5585_v54, %v10848_v32  ;;  %v6675_v36 = vadd.f32 %v1093_v19, %v1011_v7  ;;  %v6677_v25 = vadd.f32 %v1094_v21, %v1012_v9  ;;  %v10858_v7 = vld [vmem:[#allocation47_spill] sm:$0xff] }
 0x16d   : > { %v6679_v33 = vadd.f32 %v1876_v40, %v1794_v23  ;;  %v6681_v26 = vadd.f32 %v1877_v13, %v1795_v15  ;;  %v6684_v43 = vadd.f32 %v2653_v17, %v2571_v44  ;;  %v6686_v29 = vadd.f32 %v2654_v14, %v2572_v28  ;;  %v10859_v23 = vld [vmem:[#allocation48_spill] sm:$0xff]  ;;  %v10860_v44 = vld [vmem:[#allocation49_spill] sm:$0xff] }
 0x16e   : > { %10849 = vst [vmem:[#allocation38_spill] sm:$0xff] %v6675_v36  ;;  %10850 = vst [vmem:[#allocation39_spill] sm:$0xff] %v6677_v25  ;;  %v6688_v20 = vadd.f32 %v3430_v18, %v3348_v8  ;;  %v6690_v0 = vadd.f32 %v3431_v41, %v3349_v42  ;;  %v1099_v32 = vmul.f32 %v5588_v55, %v535_v16  ;;  %v10857_v18 = vld [vmem:[#allocation46_spill] sm:$0xff]  ;;  %v11028_v36 = vld [vmem:[#allocation141_spill] sm:$0xff] }
 0x16f   : > { %10851 = vst [vmem:[#allocation40_spill] sm:$0xff] %v6679_v33  ;;  %10852 = vst [vmem:[#allocation41_spill] sm:$0xff] %v6681_v26  ;;  %v1100_v21 = vmul.f32 %v5590_v56, %v535_v16  ;;  %v1882_v19 = vmul.f32 %v5592_v57, %v535_v16  ;;  %v1883_v40 = vmul.f32 %v5594_v58, %v535_v16  ;;  %v10861_v42 = vld [vmem:[#allocation50_spill] sm:$0xff] }
 0x170   : > { %10853 = vst [vmem:[#allocation42_spill] sm:$0xff] %v6684_v43  ;;  %10854 = vst [vmem:[#allocation43_spill] sm:$0xff] %v6686_v29  ;;  %v2659_v13 = vmul.f32 %v5597_v59, %v535_v16  ;;  %v2660_v17 = vmul.f32 %v5599_v60, %v535_v16  ;;  %v3436_v14 = vmul.f32 %v5601_v61, %v535_v16  ;;  %v10864_v29 = vld [vmem:[#allocation53_spill] sm:$0xff]  ;;  %v531_v43 = vpop.permute.xlu0 %530 }
 0x171   : > { %10855 = vst [vmem:[#allocation44_spill] sm:$0xff] %v6688_v20  ;;  %10856 = vst [vmem:[#allocation45_spill] sm:$0xff] %v6690_v0  ;;  %v3437_v8 = vmul.f32 %v5603_v62, %v535_v16  ;;  %v1017_v41 = vadd.f32 %v5571_v47, %v10857_v18  ;;  %v1018_v9 = vadd.f32 %v5573_v48, %v10858_v7  ;;  %v10862_v0 = vld [vmem:[#allocation51_spill] sm:$0xff]  ;;  %v10863_v20 = vld [vmem:[#allocation52_spill] sm:$0xff] }
 0x172   : > { %v1800_v15 = vadd.f32 %v5575_v49, %v10859_v23  ;;  %v1801_v28 = vadd.f32 %v5577_v50, %v10860_v44  ;;  %v2577_v11 = vadd.f32 %v5579_v51, %v10861_v42  ;;  %v2578_v16 = vadd.f32 %v5581_v52, %v10862_v0 }
 0x173   : > { %v3354_v18 = vadd.f32 %v5583_v53, %v10863_v20  ;;  %v3355_v7 = vadd.f32 %v5585_v54, %v10864_v29  ;;  %v6719_v23 = vadd.f32 %v1099_v32, %v1017_v41  ;;  %v6721_v44 = vadd.f32 %v1100_v21, %v1018_v9  ;;  %v10875_v9 = vld [vmem:[#allocation56_spill] sm:$0xff] }
 0x174   : > { %v6723_v26 = vadd.f32 %v1882_v19, %v1800_v15  ;;  %v6725_v33 = vadd.f32 %v1883_v40, %v1801_v28  ;;  %v6727_v42 = vadd.f32 %v2659_v13, %v2577_v11  ;;  %v6729_v0 = vadd.f32 %v2660_v17, %v2578_v16  ;;  %v10873_v17 = vld [vmem:[#allocation54_spill] sm:$0xff]  ;;  %v10876_v28 = vld [vmem:[#allocation57_spill] sm:$0xff] }
 0x175   : > { %10865 = vst [vmem:[#allocation46_spill] sm:$0xff] %v6719_v23  ;;  %10866 = vst [vmem:[#allocation47_spill] sm:$0xff] %v6721_v44  ;;  %v6731_v25 = vadd.f32 %v3436_v14, %v3354_v18  ;;  %v6733_v20 = vadd.f32 %v3437_v8, %v3355_v7  ;;  %v1097_v29 = vmul.f32 %v5588_v55, %v531_v43  ;;  %v10874_v8 = vld [vmem:[#allocation55_spill] sm:$0xff]  ;;  %v10877_v18 = vld [vmem:[#allocation58_spill] sm:$0xff] }
 0x176   : > { %10867 = vst [vmem:[#allocation48_spill] sm:$0xff] %v6723_v26  ;;  %10868 = vst [vmem:[#allocation49_spill] sm:$0xff] %v6725_v33  ;;  %v1098_v45 = vmul.f32 %v5590_v56, %v531_v43  ;;  %v1880_v32 = vmul.f32 %v5592_v57, %v531_v43  ;;  %v1881_v21 = vmul.f32 %v5594_v58, %v531_v43 }
 0x177   : > { %10869 = vst [vmem:[#allocation50_spill] sm:$0xff] %v6727_v42  ;;  %10870 = vst [vmem:[#allocation51_spill] sm:$0xff] %v6729_v0  ;;  %v2657_v19 = vmul.f32 %v5597_v59, %v531_v43  ;;  %v2658_v11 = vmul.f32 %v5599_v60, %v531_v43  ;;  %v3434_v40 = vmul.f32 %v5601_v61, %v531_v43 }
 0x178   : > { %10871 = vst [vmem:[#allocation52_spill] sm:$0xff] %v6731_v25  ;;  %10872 = vst [vmem:[#allocation53_spill] sm:$0xff] %v6733_v20  ;;  %v3435_v13 = vmul.f32 %v5603_v62, %v531_v43  ;;  %v1015_v14 = vadd.f32 %v5571_v47, %v10873_v17  ;;  %v1016_v41 = vadd.f32 %v5573_v48, %v10874_v8  ;;  %v10878_v20 = vld [vmem:[#allocation59_spill] sm:$0xff]  ;;  %v10879_v25 = vld [vmem:[#allocation60_spill] sm:$0xff]  ;;  %v543_v8 = vpop.permute.xlu1 %542 }
 0x179   : > { %v1798_v15 = vadd.f32 %v5575_v49, %v10875_v9  ;;  %v1799_v16 = vadd.f32 %v5577_v50, %v10876_v28  ;;  %v2575_v7 = vadd.f32 %v5579_v51, %v10877_v18  ;;  %v2576_v43 = vadd.f32 %v5581_v52, %v10878_v20  ;;  %v10880_v17 = vld [vmem:[#allocation61_spill] sm:$0xff] }
 0x17a   : > { %v3352_v0 = vadd.f32 %v5583_v53, %v10879_v25  ;;  %v3353_v42 = vadd.f32 %v5585_v54, %v10880_v17  ;;  %v6761_v33 = vadd.f32 %v1097_v29, %v1015_v14  ;;  %v6763_v9 = vadd.f32 %v1098_v45, %v1016_v41  ;;  %v6779_v17 = vld [vmem:[%s5498_s5 + $0x2] ss:$0 sm:$0xff]  ;;  %v10891_v41 = vld [vmem:[#allocation64_spill] sm:$0xff] }
 0x17b   : > { %v6765_v26 = vadd.f32 %v1880_v32, %v1798_v15  ;;  %v6767_v28 = vadd.f32 %v1881_v21, %v1799_v16  ;;  %v6770_v18 = vadd.f32 %v2657_v19, %v2575_v7  ;;  %v6772_v20 = vadd.f32 %v2658_v11, %v2576_v43  ;;  %694 = vbcast.lane.b32.xlu0 %v6779_v17, 360  ;;  %v10889_v11 = vld [vmem:[#allocation62_spill] sm:$0xff]  ;;  %v10892_v16 = vld [vmem:[#allocation65_spill] sm:$0xff] }
 0x17c   : > { %10881 = vst [vmem:[#allocation54_spill] sm:$0xff] %v6761_v33  ;;  %10882 = vst [vmem:[#allocation55_spill] sm:$0xff] %v6763_v9  ;;  %v6774_v44 = vadd.f32 %v3434_v40, %v3352_v0  ;;  %v6776_v25 = vadd.f32 %v3435_v13, %v3353_v42  ;;  %v1103_v29 = vmul.f32 %v5588_v55, %v543_v8  ;;  %v10890_v13 = vld [vmem:[#allocation63_spill] sm:$0xff]  ;;  %v10893_v43 = vld [vmem:[#allocation66_spill] sm:$0xff] }
 0x17d   : > { %10883 = vst [vmem:[#allocation56_spill] sm:$0xff] %v6765_v26  ;;  %10884 = vst [vmem:[#allocation57_spill] sm:$0xff] %v6767_v28  ;;  %v1104_v45 = vmul.f32 %v5590_v56, %v543_v8  ;;  %v1886_v32 = vmul.f32 %v5592_v57, %v543_v8  ;;  %v1887_v5 = vmul.f32 %v5594_v58, %v543_v8  ;;  %v11027_v33 = vld [vmem:[#allocation140_spill] sm:$0xff] }
 0x17e   : > { %10885 = vst [vmem:[#allocation58_spill] sm:$0xff] %v6770_v18  ;;  %10886 = vst [vmem:[#allocation59_spill] sm:$0xff] %v6772_v20  ;;  %v2663_v21 = vmul.f32 %v5597_v59, %v543_v8  ;;  %v2664_v19 = vmul.f32 %v5599_v60, %v543_v8  ;;  %v3440_v0 = vmul.f32 %v5601_v61, %v543_v8  ;;  %v10896_v20 = vld [vmem:[#allocation69_spill] sm:$0xff]  ;;  %v539_v18 = vpop.permute.xlu0 %538 }
 0x17f   : > { %10887 = vst [vmem:[#allocation60_spill] sm:$0xff] %v6774_v44  ;;  %10888 = vst [vmem:[#allocation61_spill] sm:$0xff] %v6776_v25  ;;  %v3441_v42 = vmul.f32 %v5603_v62, %v543_v8  ;;  %v1021_v40 = vadd.f32 %v5571_v47, %v10889_v11  ;;  %v1022_v14 = vadd.f32 %v5573_v48, %v10890_v13  ;;  %v10894_v25 = vld [vmem:[#allocation67_spill] sm:$0xff]  ;;  %v10895_v44 = vld [vmem:[#allocation68_spill] sm:$0xff]  ;;  %826 = vbcast.lane.b32.xlu0 %v5965_v1, 352 }
 0x180   : > { %v1804_v15 = vadd.f32 %v5575_v49, %v10891_v41  ;;  %v1805_v7 = vadd.f32 %v5577_v50, %v10892_v16  ;;  %v2581_v23 = vadd.f32 %v5579_v51, %v10893_v43  ;;  %v2582_v8 = vadd.f32 %v5581_v52, %v10894_v25 }
 0x181   : > { %v3358_v11 = vadd.f32 %v5583_v53, %v10895_v44  ;;  %v3359_v13 = vadd.f32 %v5585_v54, %v10896_v20  ;;  %v6808_v41 = vadd.f32 %v1103_v29, %v1021_v40  ;;  %v6810_v16 = vadd.f32 %v1104_v45, %v1022_v14  ;;  %v10906_v40 = vld [vmem:[#allocation71_spill] sm:$0xff] }
 0x182   : > { %v6812_v2 = vadd.f32 %v1886_v32, %v1804_v15  ;;  %v6814_v43 = vadd.f32 %v1887_v5, %v1805_v7  ;;  %v6816_v28 = vadd.f32 %v2663_v21, %v2581_v23  ;;  %v6818_v25 = vadd.f32 %v2664_v19, %v2582_v8  ;;  %v5152_v32 = vld [vmem:[%s5498_s5 + $0x6] ss:$0 sm:$0xff]  ;;  %v10907_v15 = vld [vmem:[#allocation72_spill] sm:$0xff]  ;;  %v10908_v8 = vld [vmem:[#allocation73_spill] sm:$0xff] }
 0x183   : > { %10897 = vst [vmem:[#allocation62_spill] sm:$0xff] %v6808_v41  ;;  %10898 = vst [vmem:[#allocation63_spill] sm:$0xff] %v6810_v16  ;;  %v6820_v44 = vadd.f32 %v3440_v0, %v3358_v11  ;;  %v6822_v26 = vadd.f32 %v3441_v42, %v3359_v13  ;;  %v1101_v20 = vmul.f32 %v5588_v55, %v539_v18  ;;  %769 = vbcast.lane.b32.xlu1 %v5152_v32, 376  ;;  %v10905_v0 = vld [vmem:[#allocation70_spill] sm:$0xff] }
 0x184   : > { %10899 = vst [vmem:[#allocation64_spill] sm:$0xff] %v6812_v2  ;;  %10900 = vst [vmem:[#allocation65_spill] sm:$0xff] %v6814_v43  ;;  %v1102_v9 = vmul.f32 %v5590_v56, %v539_v18  ;;  %v1884_v29 = vmul.f32 %v5592_v57, %v539_v18  ;;  %v1885_v45 = vmul.f32 %v5594_v58, %v539_v18  ;;  %698 = vbcast.lane.b32.xlu0 %v6779_v17, 368  ;;  %v10909_v13 = vld [vmem:[#allocation74_spill] sm:$0xff]  ;;  %v551_v43 = vpop.permute.xlu1 %550 }
 0x185   : > { %10901 = vst [vmem:[#allocation66_spill] sm:$0xff] %v6816_v28  ;;  %10902 = vst [vmem:[#allocation67_spill] sm:$0xff] %v6818_v25  ;;  %v2661_v5 = vmul.f32 %v5597_v59, %v539_v18  ;;  %v2662_v23 = vmul.f32 %v5599_v60, %v539_v18  ;;  %v3438_v21 = vmul.f32 %v5601_v61, %v539_v18  ;;  %v10912_v28 = vld [vmem:[#allocation77_spill] sm:$0xff]  ;;  %v5153_v16 = vld [vmem:[%s5498_s5 + $0x7] ss:$0 sm:$0xff] }
 0x186   : > { %10903 = vst [vmem:[#allocation68_spill] sm:$0xff] %v6820_v44  ;;  %10904 = vst [vmem:[#allocation69_spill] sm:$0xff] %v6822_v26  ;;  %v3439_v19 = vmul.f32 %v5603_v62, %v539_v18  ;;  %v1019_v42 = vadd.f32 %v5571_v47, %v10905_v0  ;;  %v1020_v14 = vadd.f32 %v5573_v48, %v10906_v40  ;;  %v10910_v26 = vld [vmem:[#allocation75_spill] sm:$0xff]  ;;  %v10911_v44 = vld [vmem:[#allocation76_spill] sm:$0xff] }
 0x187   : > { %v1802_v7 = vadd.f32 %v5575_v49, %v10907_v15  ;;  %v1803_v11 = vadd.f32 %v5577_v50, %v10908_v8  ;;  %v2579_v32 = vadd.f32 %v5579_v51, %v10909_v13  ;;  %v2580_v18 = vadd.f32 %v5581_v52, %v10910_v26  ;;  %901 = vbcast.lane.b32.xlu1 %v5153_v16, 368 }
 0x188   : > { %v3356_v25 = vadd.f32 %v5583_v53, %v10911_v44  ;;  %v3357_v0 = vadd.f32 %v5585_v54, %v10912_v28  ;;  %v6850_v40 = vadd.f32 %v1101_v20, %v1019_v42  ;;  %v6852_v2 = vadd.f32 %v1102_v9, %v1020_v14  ;;  %830 = vbcast.lane.b32.xlu0 %v5965_v1, 360  ;;  %v10922_v42 = vld [vmem:[#allocation79_spill] sm:$0xff] }
 0x189   : > { %v6854_v15 = vadd.f32 %v1884_v29, %v1802_v7  ;;  %v6856_v8 = vadd.f32 %v1885_v45, %v1803_v11  ;;  %v6859_v13 = vadd.f32 %v2661_v5, %v2579_v32  ;;  %v6861_v26 = vadd.f32 %v2662_v23, %v2580_v18  ;;  %v10923_v7 = vld [vmem:[#allocation80_spill] sm:$0xff]  ;;  %v10924_v32 = vld [vmem:[#allocation81_spill] sm:$0xff] }
 0x18a   : > { %10913 = vst [vmem:[#allocation70_spill] sm:$0xff] %v6850_v40  ;;  %10914 = vst [vmem:[#allocation71_spill] sm:$0xff] %v6852_v2  ;;  %v6863_v41 = vadd.f32 %v3438_v21, %v3356_v25  ;;  %v6865_v44 = vadd.f32 %v3439_v19, %v3357_v0  ;;  %v1107_v28 = vmul.f32 %v5588_v55, %v551_v43  ;;  %v10921_v21 = vld [vmem:[#allocation78_spill] sm:$0xff] }
 0x18b   : > { %10915 = vst [vmem:[#allocation72_spill] sm:$0xff] %v6854_v15  ;;  %10916 = vst [vmem:[#allocation73_spill] sm:$0xff] %v6856_v8  ;;  %v1108_v9 = vmul.f32 %v5590_v56, %v551_v43  ;;  %v1890_v20 = vmul.f32 %v5592_v57, %v551_v43  ;;  %v1891_v29 = vmul.f32 %v5594_v58, %v551_v43  ;;  %834 = vbcast.lane.b32.xlu1 %v5965_v1, 368  ;;  %v10925_v0 = vld [vmem:[#allocation82_spill] sm:$0xff]  ;;  %v547_v8 = vpop.permute.xlu0 %546 }
 0x18c   : > { %10917 = vst [vmem:[#allocation74_spill] sm:$0xff] %v6859_v13  ;;  %10918 = vst [vmem:[#allocation75_spill] sm:$0xff] %v6861_v26  ;;  %v2667_v45 = vmul.f32 %v5597_v59, %v551_v43  ;;  %v2668_v5 = vmul.f32 %v5599_v60, %v551_v43  ;;  %v3444_v23 = vmul.f32 %v5601_v61, %v551_v43  ;;  %v10927_v26 = vld [vmem:[#allocation84_spill] sm:$0xff]  ;;  %v10928_v13 = vld [vmem:[#allocation85_spill] sm:$0xff]  ;;  %702 = vbcast.lane.b32.xlu0 %v6779_v17, 376 }
 0x18d   : > { %10919 = vst [vmem:[#allocation76_spill] sm:$0xff] %v6863_v41  ;;  %10920 = vst [vmem:[#allocation77_spill] sm:$0xff] %v6865_v44  ;;  %v3445_v25 = vmul.f32 %v5603_v62, %v551_v43  ;;  %v1025_v19 = vadd.f32 %v5571_v47, %v10921_v21  ;;  %v1026_v14 = vadd.f32 %v5573_v48, %v10922_v42  ;;  %v10926_v41 = vld [vmem:[#allocation83_spill] sm:$0xff] }
 0x18e   : > { %v1808_v11 = vadd.f32 %v5575_v49, %v10923_v7  ;;  %v1809_v18 = vadd.f32 %v5577_v50, %v10924_v32  ;;  %v2585_v44 = vadd.f32 %v5579_v51, %v10925_v0  ;;  %v2586_v43 = vadd.f32 %v5581_v52, %v10926_v41 }
 0x18f   : > { %v3362_v21 = vadd.f32 %v5583_v53, %v10927_v26  ;;  %v3363_v42 = vadd.f32 %v5585_v54, %v10928_v13  ;;  %v6894_v7 = vadd.f32 %v1107_v28, %v1025_v19  ;;  %v6896_v32 = vadd.f32 %v1108_v9, %v1026_v14  ;;  %838 = vbcast.lane.b32.xlu1 %v5965_v1, 376  ;;  %v10939_v14 = vld [vmem:[#allocation88_spill] sm:$0xff] }
 0x190   : > { %v6898_v15 = vadd.f32 %v1890_v20, %v1808_v11  ;;  %v6900_v2 = vadd.f32 %v1891_v29, %v1809_v18  ;;  %v6902_v0 = vadd.f32 %v2667_v45, %v2585_v44  ;;  %v6904_v41 = vadd.f32 %v2668_v5, %v2586_v43  ;;  %905 = vbcast.lane.b32.xlu0 %v5153_v16, 376  ;;  %v10937_v5 = vld [vmem:[#allocation86_spill] sm:$0xff]  ;;  %v10940_v18 = vld [vmem:[#allocation89_spill] sm:$0xff] }
 0x191   : > { %10929 = vst [vmem:[#allocation78_spill] sm:$0xff] %v6894_v7  ;;  %10930 = vst [vmem:[#allocation79_spill] sm:$0xff] %v6896_v32  ;;  %v6906_v40 = vadd.f32 %v3444_v23, %v3362_v21  ;;  %v6908_v26 = vadd.f32 %v3445_v25, %v3363_v42  ;;  %v1105_v13 = vmul.f32 %v5588_v55, %v547_v8  ;;  %v10938_v25 = vld [vmem:[#allocation87_spill] sm:$0xff]  ;;  %v10941_v43 = vld [vmem:[#allocation90_spill] sm:$0xff] }
 0x192   : > { %10931 = vst [vmem:[#allocation80_spill] sm:$0xff] %v6898_v15  ;;  %10932 = vst [vmem:[#allocation81_spill] sm:$0xff] %v6900_v2  ;;  %v1106_v17 = vmul.f32 %v5590_v56, %v547_v8  ;;  %v1888_v28 = vmul.f32 %v5592_v57, %v547_v8  ;;  %v1889_v9 = vmul.f32 %v5594_v58, %v547_v8  ;;  %v10942_v42 = vld [vmem:[#allocation91_spill] sm:$0xff] }
 0x193   : > { %10933 = vst [vmem:[#allocation82_spill] sm:$0xff] %v6902_v0  ;;  %10934 = vst [vmem:[#allocation83_spill] sm:$0xff] %v6904_v41  ;;  %v2665_v20 = vmul.f32 %v5597_v59, %v547_v8  ;;  %v2666_v44 = vmul.f32 %v5599_v60, %v547_v8  ;;  %v3442_v29 = vmul.f32 %v5601_v61, %v547_v8  ;;  %v559_v41 = vpop.permute.xlu1 %558  ;;  %v10958_v32 = vld [vmem:[#allocation99_spill] sm:$0xff] }
 0x194   : > { %10935 = vst [vmem:[#allocation84_spill] sm:$0xff] %v6906_v40  ;;  %10936 = vst [vmem:[#allocation85_spill] sm:$0xff] %v6908_v26  ;;  %v3443_v45 = vmul.f32 %v5603_v62, %v547_v8  ;;  %v1023_v23 = vadd.f32 %v5571_v47, %v10937_v5  ;;  %v1024_v19 = vadd.f32 %v5573_v48, %v10938_v25  ;;  %v10943_v8 = vld [vmem:[#allocation92_spill] sm:$0xff]  ;;  %v10944_v40 = vld [vmem:[#allocation93_spill] sm:$0xff] }
 0x195   : > { %v1806_v11 = vadd.f32 %v5575_v49, %v10939_v14  ;;  %v1807_v1 = vadd.f32 %v5577_v50, %v10940_v18  ;;  %v2583_v21 = vadd.f32 %v5579_v51, %v10941_v43  ;;  %v2584_v26 = vadd.f32 %v5581_v52, %v10942_v42 }
 0x196   : > { %v3360_v16 = vadd.f32 %v5583_v53, %v10943_v8  ;;  %v3361_v5 = vadd.f32 %v5585_v54, %v10944_v40  ;;  %v6935_v25 = vadd.f32 %v1105_v13, %v1023_v23  ;;  %v6937_v0 = vadd.f32 %v1106_v17, %v1024_v19  ;;  %v10955_v19 = vld [vmem:[#allocation96_spill] sm:$0xff] }
 0x197   : > { %v6939_v14 = vadd.f32 %v1888_v28, %v1806_v11  ;;  %v6941_v18 = vadd.f32 %v1889_v9, %v1807_v1  ;;  %v6943_v2 = vadd.f32 %v2665_v20, %v2583_v21  ;;  %v6945_v43 = vadd.f32 %v2666_v44, %v2584_v26  ;;  %v10953_v44 = vld [vmem:[#allocation94_spill] sm:$0xff]  ;;  %v10956_v1 = vld [vmem:[#allocation97_spill] sm:$0xff] }
 0x198   : > { %10945 = vst [vmem:[#allocation86_spill] sm:$0xff] %v6935_v25  ;;  %10946 = vst [vmem:[#allocation87_spill] sm:$0xff] %v6937_v0  ;;  %v6947_v42 = vadd.f32 %v3442_v29, %v3360_v16  ;;  %v6949_v15 = vadd.f32 %v3443_v45, %v3361_v5  ;;  %v1111_v8 = vmul.f32 %v5588_v55, %v559_v41  ;;  %v10954_v45 = vld [vmem:[#allocation95_spill] sm:$0xff]  ;;  %v10957_v16 = vld [vmem:[#allocation98_spill] sm:$0xff] }
 0x199   : > { %10947 = vst [vmem:[#allocation88_spill] sm:$0xff] %v6939_v14  ;;  %10948 = vst [vmem:[#allocation89_spill] sm:$0xff] %v6941_v18  ;;  %v1112_v40 = vmul.f32 %v5590_v56, %v559_v41  ;;  %v1894_v13 = vmul.f32 %v5592_v57, %v559_v41  ;;  %v1895_v17 = vmul.f32 %v5594_v58, %v559_v41  ;;  %v11026_v0 = vld [vmem:[#allocation139_spill] sm:$0xff] }
 0x19a   : > { %10949 = vst [vmem:[#allocation90_spill] sm:$0xff] %v6943_v2  ;;  %10950 = vst [vmem:[#allocation91_spill] sm:$0xff] %v6945_v43  ;;  %v2671_v28 = vmul.f32 %v5597_v59, %v559_v41  ;;  %v2672_v9 = vmul.f32 %v5599_v60, %v559_v41  ;;  %v3448_v20 = vmul.f32 %v5601_v61, %v559_v41  ;;  %v555_v43 = vpop.permute.xlu0 %554 }
 0x19b   : > { %10951 = vst [vmem:[#allocation92_spill] sm:$0xff] %v6947_v42  ;;  %10952 = vst [vmem:[#allocation93_spill] sm:$0xff] %v6949_v15  ;;  %v3449_v26 = vmul.f32 %v5603_v62, %v559_v41  ;;  %v1029_v29 = vadd.f32 %v5571_v47, %v10953_v44  ;;  %v1030_v23 = vadd.f32 %v5573_v48, %v10954_v45  ;;  %v10959_v15 = vld [vmem:[#allocation100_spill] sm:$0xff]  ;;  %v10960_v42 = vld [vmem:[#allocation101_spill] sm:$0xff] }
 0x19c   : > { %v1812_v11 = vadd.f32 %v5575_v49, %v10955_v19  ;;  %v1813_v21 = vadd.f32 %v5577_v50, %v10956_v1  ;;  %v2589_v5 = vadd.f32 %v5579_v51, %v10957_v16  ;;  %v2590_v7 = vadd.f32 %v5581_v52, %v10958_v32 }
 0x19d   : > { %v3366_v41 = vadd.f32 %v5583_v53, %v10959_v15  ;;  %v3367_v44 = vadd.f32 %v5585_v54, %v10960_v42  ;;  %v6975_v45 = vadd.f32 %v1111_v8, %v1029_v29  ;;  %v6977_v2 = vadd.f32 %v1112_v40, %v1030_v23  ;;  %v10971_v23 = vld [vmem:[#allocation104_spill] sm:$0xff] }
 0x19e   : > { %v6979_v19 = vadd.f32 %v1894_v13, %v1812_v11  ;;  %v6981_v1 = vadd.f32 %v1895_v17, %v1813_v21  ;;  %v6983_v18 = vadd.f32 %v2671_v28, %v2589_v5  ;;  %v6985_v16 = vadd.f32 %v2672_v9, %v2590_v7  ;;  %v10969_v9 = vld [vmem:[#allocation102_spill] sm:$0xff]  ;;  %v10972_v21 = vld [vmem:[#allocation105_spill] sm:$0xff] }
 0x19f   : > { %10961 = vst [vmem:[#allocation94_spill] sm:$0xff] %v6975_v45  ;;  %10962 = vst [vmem:[#allocation95_spill] sm:$0xff] %v6977_v2  ;;  %v6987_v32 = vadd.f32 %v3448_v20, %v3366_v41  ;;  %v6989_v14 = vadd.f32 %v3449_v26, %v3367_v44  ;;  %v1109_v15 = vmul.f32 %v5588_v55, %v555_v43  ;;  %v10970_v26 = vld [vmem:[#allocation103_spill] sm:$0xff]  ;;  %v10973_v41 = vld [vmem:[#allocation106_spill] sm:$0xff] }
 0x1a0   : > { %10963 = vst [vmem:[#allocation96_spill] sm:$0xff] %v6979_v19  ;;  %10964 = vst [vmem:[#allocation97_spill] sm:$0xff] %v6981_v1  ;;  %v1110_v42 = vmul.f32 %v5590_v56, %v555_v43  ;;  %v1892_v8 = vmul.f32 %v5592_v57, %v555_v43  ;;  %v1893_v40 = vmul.f32 %v5594_v58, %v555_v43  ;;  %v567_v1 = vpop.permute.xlu1 %566 }
 0x1a1   : > { %10965 = vst [vmem:[#allocation98_spill] sm:$0xff] %v6983_v18  ;;  %10966 = vst [vmem:[#allocation99_spill] sm:$0xff] %v6985_v16  ;;  %v2669_v13 = vmul.f32 %v5597_v59, %v555_v43  ;;  %v2670_v17 = vmul.f32 %v5599_v60, %v555_v43  ;;  %v3446_v28 = vmul.f32 %v5601_v61, %v555_v43  ;;  %v10975_v16 = vld [vmem:[#allocation108_spill] sm:$0xff]  ;;  %v10976_v18 = vld [vmem:[#allocation109_spill] sm:$0xff] }
 0x1a2   : > { %10967 = vst [vmem:[#allocation100_spill] sm:$0xff] %v6987_v32  ;;  %10968 = vst [vmem:[#allocation101_spill] sm:$0xff] %v6989_v14  ;;  %v3447_v7 = vmul.f32 %v5603_v62, %v555_v43  ;;  %v1027_v20 = vadd.f32 %v5571_v47, %v10969_v9  ;;  %v1028_v29 = vadd.f32 %v5573_v48, %v10970_v26  ;;  %v10974_v14 = vld [vmem:[#allocation107_spill] sm:$0xff] }
 0x1a3   : > { %v1810_v11 = vadd.f32 %v5575_v49, %v10971_v23  ;;  %v1811_v5 = vadd.f32 %v5577_v50, %v10972_v21  ;;  %v2587_v44 = vadd.f32 %v5579_v51, %v10973_v41  ;;  %v2588_v32 = vadd.f32 %v5581_v52, %v10974_v14 }
 0x1a4   : > { %v3364_v43 = vadd.f32 %v5583_v53, %v10975_v16  ;;  %v3365_v9 = vadd.f32 %v5585_v54, %v10976_v18  ;;  %v7015_v26 = vadd.f32 %v1109_v15, %v1027_v20  ;;  %v7017_v19 = vadd.f32 %v1110_v42, %v1028_v29  ;;  %v563_v16 = vpop.permute.xlu0 %562 }
 0x1a5   : > { %v7019_v23 = vadd.f32 %v1892_v8, %v1810_v11  ;;  %v7021_v21 = vadd.f32 %v1893_v40, %v1811_v5  ;;  %v7023_v2 = vadd.f32 %v2669_v13, %v2587_v44  ;;  %v7025_v41 = vadd.f32 %v2670_v17, %v2588_v32 }
 0x1a6   : > { %10977 = vst [vmem:[#allocation102_spill] sm:$0xff] %v7015_v26  ;;  %10978 = vst [vmem:[#allocation103_spill] sm:$0xff] %v7017_v19  ;;  %v7027_v14 = vadd.f32 %v3446_v28, %v3364_v43  ;;  %v7029_v45 = vadd.f32 %v3447_v7, %v3365_v9  ;;  %v7032_v18 = vmul.f32 %v5588_v55, %v567_v1  ;;  %v10993_v9 = vld [vmem:[#allocation118_spill] sm:$0xff] }
 0x1a7   : > { %10979 = vst [vmem:[#allocation104_spill] sm:$0xff] %v7019_v23  ;;  %10980 = vst [vmem:[#allocation105_spill] sm:$0xff] %v7021_v21  ;;  %v7035_v15 = vmul.f32 %v5590_v56, %v567_v1  ;;  %v7038_v42 = vmul.f32 %v5592_v57, %v567_v1  ;;  %v7041_v8 = vmul.f32 %v5594_v58, %v567_v1  ;;  %v578_v21 = vpop.permute.xlu1 %577 }
 0x1a8   : > { %10981 = vst [vmem:[#allocation106_spill] sm:$0xff] %v7023_v2  ;;  %10982 = vst [vmem:[#allocation107_spill] sm:$0xff] %v7025_v41  ;;  %v7044_v32 = vmul.f32 %v5597_v59, %v567_v1  ;;  %v7047_v40 = vmul.f32 %v5599_v60, %v567_v1  ;;  %v7050_v13 = vmul.f32 %v5601_v61, %v567_v1  ;;  %v10999_v41 = vld [vmem:[#allocation124_spill] sm:$0xff]  ;;  %v11000_v2 = vld [vmem:[#allocation125_spill] sm:$0xff] }
 0x1a9   : > { %10983 = vst [vmem:[#allocation108_spill] sm:$0xff] %v7027_v14  ;;  %10984 = vst [vmem:[#allocation109_spill] sm:$0xff] %v7029_v45  ;;  %v7053_v17 = vmul.f32 %v5603_v62, %v567_v1  ;;  %v1113_v28 = vmul.f32 %v5588_v55, %v563_v16  ;;  %v1114_v7 = vmul.f32 %v5590_v56, %v563_v16  ;;  %v10998_v45 = vld [vmem:[#allocation123_spill] sm:$0xff] }
 0x1aa   : > { %10985 = vst [vmem:[#allocation256_spill] sm:$0xff] %v7032_v18  ;;  %10986 = vst [vmem:[#allocation257_spill] sm:$0xff] %v7035_v15  ;;  %v1896_v20 = vmul.f32 %v5592_v57, %v563_v16  ;;  %v1897_v29 = vmul.f32 %v5594_v58, %v563_v16  ;;  %v2673_v11 = vmul.f32 %v5597_v59, %v563_v16  ;;  %v10997_v15 = vld [vmem:[#allocation122_spill] sm:$0xff] }
 0x1ab   : > { %10987 = vst [vmem:[#allocation258_spill] sm:$0xff] %v7038_v42  ;;  %10988 = vst [vmem:[#allocation259_spill] sm:$0xff] %v7041_v8  ;;  %v2674_v5 = vmul.f32 %v5599_v60, %v563_v16  ;;  %v3450_v44 = vmul.f32 %v5601_v61, %v563_v16  ;;  %v3451_v43 = vmul.f32 %v5603_v62, %v563_v16  ;;  %v10996_v8 = vld [vmem:[#allocation121_spill] sm:$0xff] }
 0x1ac   : > { %10989 = vst [vmem:[#allocation260_spill] sm:$0xff] %v7044_v32  ;;  %10990 = vst [vmem:[#allocation261_spill] sm:$0xff] %v7047_v40  ;;  %v1031_v1 = vadd.f32 %v5571_v47, %v10993_v9  ;;  %v10995_v40 = vld [vmem:[#allocation120_spill] sm:$0xff]  ;;  %v1815_v42 = vadd.f32 %v5577_v50, %v10996_v8  ;;  %v2591_v18 = vadd.f32 %v5579_v51, %v10997_v15 }
 0x1ad   : > { %10991 = vst [vmem:[#allocation262_spill] sm:$0xff] %v7050_v13  ;;  %10992 = vst [vmem:[#allocation263_spill] sm:$0xff] %v7053_v17  ;;  %v10994_v17 = vld [vmem:[#allocation119_spill] sm:$0xff]  ;;  %v1814_v32 = vadd.f32 %v5575_v49, %v10995_v40  ;;  %v2592_v14 = vadd.f32 %v5581_v52, %v10998_v45  ;;  %v3368_v16 = vadd.f32 %v5583_v53, %v10999_v41 }
 0x1ae   : > { %v1032_v13 = vadd.f32 %v5573_v48, %v10994_v17  ;;  %v3369_v9 = vadd.f32 %v5585_v54, %v11000_v2  ;;  %v7079_v17 = vadd.f32 %v1113_v28, %v1031_v1  ;;  %v7085_v8 = vadd.f32 %v1897_v29, %v1815_v42  ;;  %v11010_v29 = vld [vmem:[#allocation127_spill] sm:$0xff] }
 0x1af   : > { %v7083_v40 = vadd.f32 %v1896_v20, %v1814_v32  ;;  %v7087_v19 = vadd.f32 %v2673_v11, %v2591_v18  ;;  %v7089_v15 = vadd.f32 %v2674_v5, %v2592_v14  ;;  %v7091_v45 = vadd.f32 %v3450_v44, %v3368_v16  ;;  %v11011_v5 = vld [vmem:[#allocation128_spill] sm:$0xff]  ;;  %v11013_v16 = vld [vmem:[#allocation130_spill] sm:$0xff] }
 0x1b0   : > { %11001 = vst [vmem:[#allocation118_spill] sm:$0xff] %v7079_v17  ;;  %v7081_v23 = vadd.f32 %v1114_v7, %v1032_v13  ;;  %11004 = vst [vmem:[#allocation121_spill] sm:$0xff] %v7085_v8  ;;  %v7093_v26 = vadd.f32 %v3451_v43, %v3369_v9  ;;  %v1119_v41 = vmul.f32 %v5588_v55, %v578_v21  ;;  %v11009_v7 = vld [vmem:[#allocation126_spill] sm:$0xff]  ;;  %v11012_v43 = vld [vmem:[#allocation129_spill] sm:$0xff]  ;;  %v574_v8 = vpop.permute.xlu0 %573 }
 0x1b1   : > { %11003 = vst [vmem:[#allocation120_spill] sm:$0xff] %v7083_v40  ;;  %11005 = vst [vmem:[#allocation122_spill] sm:$0xff] %v7087_v19  ;;  %v1120_v2 = vmul.f32 %v5590_v56, %v578_v21  ;;  %v1902_v28 = vmul.f32 %v5592_v57, %v578_v21  ;;  %v1903_v13 = vmul.f32 %v5594_v58, %v578_v21  ;;  %v11016_v19 = vld [vmem:[#allocation133_spill] sm:$0xff] }
 0x1b2   : > { %11002 = vst [vmem:[#allocation119_spill] sm:$0xff] %v7081_v23  ;;  %11006 = vst [vmem:[#allocation123_spill] sm:$0xff] %v7089_v15  ;;  %v2679_v32 = vmul.f32 %v5597_v59, %v578_v21  ;;  %v2680_v42 = vmul.f32 %v5599_v60, %v578_v21  ;;  %v3456_v18 = vmul.f32 %v5601_v61, %v578_v21  ;;  %v11015_v15 = vld [vmem:[#allocation132_spill] sm:$0xff] }
 0x1b3   : > { %11007 = vst [vmem:[#allocation124_spill] sm:$0xff] %v7091_v45  ;;  %11008 = vst [vmem:[#allocation125_spill] sm:$0xff] %v7093_v26  ;;  %v3457_v14 = vmul.f32 %v5603_v62, %v578_v21  ;;  %v1037_v20 = vadd.f32 %v5571_v47, %v11009_v7  ;;  %v1038_v11 = vadd.f32 %v5573_v48, %v11010_v29  ;;  %v11014_v26 = vld [vmem:[#allocation131_spill] sm:$0xff] }
 0x1b4   : > { %v1820_v44 = vadd.f32 %v5575_v49, %v11011_v5  ;;  %v1821_v1 = vadd.f32 %v5577_v50, %v11012_v43  ;;  %v2597_v9 = vadd.f32 %v5579_v51, %v11013_v16  ;;  %v2598_v45 = vadd.f32 %v5581_v52, %v11014_v26 }
 0x1b5   : > { %v3374_v21 = vadd.f32 %v5583_v53, %v11015_v15  ;;  %v3375_v7 = vadd.f32 %v5585_v54, %v11016_v19  ;;  %v7119_v29 = vadd.f32 %v1119_v41, %v1037_v20  ;;  %v7121_v40 = vadd.f32 %v1120_v2, %v1038_v11  ;;  %v11023_v11 = vld [vmem:[#allocation136_spill] sm:$0xff] }
 0x1b6   : > { %v7123_v5 = vadd.f32 %v1902_v28, %v1820_v44  ;;  %v7125_v43 = vadd.f32 %v1903_v13, %v1821_v1  ;;  %v7127_v23 = vadd.f32 %v2679_v32, %v2597_v9  ;;  %v7129_v16 = vadd.f32 %v2680_v42, %v2598_v45  ;;  %v11021_v42 = vld [vmem:[#allocation134_spill] sm:$0xff]  ;;  %v11024_v1 = vld [vmem:[#allocation137_spill] sm:$0xff] }
 0x1b7   : > { %v7131_v26 = vadd.f32 %v3456_v18, %v3374_v21  ;;  %v7133_v17 = vadd.f32 %v3457_v14, %v3375_v7  ;;  %v1117_v15 = vmul.f32 %v5588_v55, %v574_v8  ;;  %v1118_v19 = vmul.f32 %v5590_v56, %v574_v8  ;;  %v11022_v14 = vld [vmem:[#allocation135_spill] sm:$0xff]  ;;  %v11025_v21 = vld [vmem:[#allocation138_spill] sm:$0xff] }
 0x1b8   : > { %11017 = vst [vmem:[#allocation126_spill] sm:$0xff] %v7127_v23  ;;  %11018 = vst [vmem:[#allocation127_spill] sm:$0xff] %v7129_v16  ;;  %v1900_v41 = vmul.f32 %v5592_v57, %v574_v8  ;;  %v1901_v2 = vmul.f32 %v5594_v58, %v574_v8  ;;  %v2677_v28 = vmul.f32 %v5597_v59, %v574_v8 }
 0x1b9   : > { %11019 = vst [vmem:[#allocation128_spill] sm:$0xff] %v7131_v26  ;;  %11020 = vst [vmem:[#allocation129_spill] sm:$0xff] %v7133_v17  ;;  %v2678_v13 = vmul.f32 %v5599_v60, %v574_v8  ;;  %v3454_v32 = vmul.f32 %v5601_v61, %v574_v8  ;;  %v3455_v45 = vmul.f32 %v5603_v62, %v574_v8  ;;  %v586_v17 = vpop.permute.xlu1 %585 }
 0x1ba   : > { %v1035_v18 = vadd.f32 %v5571_v47, %v11021_v42  ;;  %v1036_v20 = vadd.f32 %v5573_v48, %v11022_v14  ;;  %v1818_v44 = vadd.f32 %v5575_v49, %v11023_v11  ;;  %v1819_v9 = vadd.f32 %v5577_v50, %v11024_v1 }
 0x1bb   : > { %v2595_v7 = vadd.f32 %v5579_v51, %v11025_v21  ;;  %v2596_v25 = vadd.f32 %v5581_v52, %v11026_v0  ;;  %v3372_v8 = vadd.f32 %v5583_v53, %v11027_v33  ;;  %v3373_v42 = vadd.f32 %v5585_v54, %v11028_v36 }
 0x1bc   : > { %v7159_v14 = vadd.f32 %v1117_v15, %v1035_v18  ;;  %v7161_v26 = vadd.f32 %v1118_v19, %v1036_v20  ;;  %v7163_v11 = vadd.f32 %v1900_v41, %v1818_v44  ;;  %v7165_v1 = vadd.f32 %v1901_v2, %v1819_v9  ;;  %v11039_v20 = vld [vmem:[#allocation144_spill] sm:$0xff]  ;;  %v11040_v9 = vld [vmem:[#allocation145_spill] sm:$0xff] }
 0x1bd   : > { %v7167_v16 = vadd.f32 %v2677_v28, %v2595_v7  ;;  %v7169_v21 = vadd.f32 %v2678_v13, %v2596_v25  ;;  %v7171_v0 = vadd.f32 %v3454_v32, %v3372_v8  ;;  %v7173_v23 = vadd.f32 %v3455_v45, %v3373_v42  ;;  %v11037_v13 = vld [vmem:[#allocation142_spill] sm:$0xff]  ;;  %v11038_v45 = vld [vmem:[#allocation143_spill] sm:$0xff] }
 0x1be   : > { %11029 = vst [vmem:[#allocation130_spill] sm:$0xff] %v7159_v14  ;;  %11030 = vst [vmem:[#allocation131_spill] sm:$0xff] %v7161_v26  ;;  %v1123_v33 = vmul.f32 %v5588_v55, %v586_v17  ;;  %v1124_v36 = vmul.f32 %v5590_v56, %v586_v17  ;;  %v1906_v15 = vmul.f32 %v5592_v57, %v586_v17  ;;  %v11041_v8 = vld [vmem:[#allocation146_spill] sm:$0xff] }
 0x1bf   : > { %11031 = vst [vmem:[#allocation132_spill] sm:$0xff] %v7163_v11  ;;  %11032 = vst [vmem:[#allocation133_spill] sm:$0xff] %v7165_v1  ;;  %v1907_v19 = vmul.f32 %v5594_v58, %v586_v17  ;;  %v2683_v41 = vmul.f32 %v5597_v59, %v586_v17  ;;  %v2684_v2 = vmul.f32 %v5599_v60, %v586_v17  ;;  %v582_v1 = vpop.permute.xlu0 %581 }
 0x1c0   : > { %11033 = vst [vmem:[#allocation134_spill] sm:$0xff] %v7167_v16  ;;  %11034 = vst [vmem:[#allocation135_spill] sm:$0xff] %v7169_v21  ;;  %v3460_v28 = vmul.f32 %v5601_v61, %v586_v17  ;;  %v3461_v25 = vmul.f32 %v5603_v62, %v586_v17  ;;  %v1041_v32 = vadd.f32 %v5571_v47, %v11037_v13  ;;  %v11043_v21 = vld [vmem:[#allocation148_spill] sm:$0xff]  ;;  %v11044_v16 = vld [vmem:[#allocation149_spill] sm:$0xff] }
 0x1c1   : > { %11035 = vst [vmem:[#allocation136_spill] sm:$0xff] %v7171_v0  ;;  %11036 = vst [vmem:[#allocation137_spill] sm:$0xff] %v7173_v23  ;;  %v1042_v18 = vadd.f32 %v5573_v48, %v11038_v45  ;;  %v1824_v44 = vadd.f32 %v5575_v49, %v11039_v20  ;;  %v1825_v7 = vadd.f32 %v5577_v50, %v11040_v9  ;;  %v11042_v23 = vld [vmem:[#allocation147_spill] sm:$0xff] }
 0x1c2   : > { %v2601_v42 = vadd.f32 %v5579_v51, %v11041_v8  ;;  %v2602_v0 = vadd.f32 %v5581_v52, %v11042_v23  ;;  %v3378_v17 = vadd.f32 %v5583_v53, %v11043_v21  ;;  %v3379_v13 = vadd.f32 %v5585_v54, %v11044_v16 }
 0x1c3   : > { %v7199_v45 = vadd.f32 %v1123_v33, %v1041_v32  ;;  %v7201_v11 = vadd.f32 %v1124_v36, %v1042_v18  ;;  %v7203_v20 = vadd.f32 %v1906_v15, %v1824_v44  ;;  %v7205_v9 = vadd.f32 %v1907_v19, %v1825_v7  ;;  %v11055_v18 = vld [vmem:[#allocation152_spill] sm:$0xff]  ;;  %v11056_v7 = vld [vmem:[#allocation153_spill] sm:$0xff] }
 0x1c4   : > { %v7207_v26 = vadd.f32 %v2683_v41, %v2601_v42  ;;  %v7209_v8 = vadd.f32 %v2684_v2, %v2602_v0  ;;  %v7211_v23 = vadd.f32 %v3460_v28, %v3378_v17  ;;  %v7213_v14 = vadd.f32 %v3461_v25, %v3379_v13  ;;  %v11053_v2 = vld [vmem:[#allocation150_spill] sm:$0xff]  ;;  %v11054_v25 = vld [vmem:[#allocation151_spill] sm:$0xff] }
 0x1c5   : > { %11045 = vst [vmem:[#allocation138_spill] sm:$0xff] %v7199_v45  ;;  %11046 = vst [vmem:[#allocation139_spill] sm:$0xff] %v7201_v11  ;;  %v1121_v21 = vmul.f32 %v5588_v55, %v582_v1  ;;  %v1122_v16 = vmul.f32 %v5590_v56, %v582_v1  ;;  %v1904_v33 = vmul.f32 %v5592_v57, %v582_v1  ;;  %v11057_v17 = vld [vmem:[#allocation154_spill] sm:$0xff] }
 0x1c6   : > { %11047 = vst [vmem:[#allocation140_spill] sm:$0xff] %v7203_v20  ;;  %11048 = vst [vmem:[#allocation141_spill] sm:$0xff] %v7205_v9  ;;  %v1905_v36 = vmul.f32 %v5594_v58, %v582_v1  ;;  %v2681_v15 = vmul.f32 %v5597_v59, %v582_v1  ;;  %v2682_v19 = vmul.f32 %v5599_v60, %v582_v1  ;;  %v594_v9 = vpop.permute.xlu1 %593 }
 0x1c7   : > { %11049 = vst [vmem:[#allocation142_spill] sm:$0xff] %v7207_v26  ;;  %11050 = vst [vmem:[#allocation143_spill] sm:$0xff] %v7209_v8  ;;  %v3458_v41 = vmul.f32 %v5601_v61, %v582_v1  ;;  %v3459_v0 = vmul.f32 %v5603_v62, %v582_v1  ;;  %v1039_v28 = vadd.f32 %v5571_v47, %v11053_v2  ;;  %v11059_v8 = vld [vmem:[#allocation156_spill] sm:$0xff]  ;;  %v11060_v26 = vld [vmem:[#allocation157_spill] sm:$0xff] }
 0x1c8   : > { %11051 = vst [vmem:[#allocation144_spill] sm:$0xff] %v7211_v23  ;;  %11052 = vst [vmem:[#allocation145_spill] sm:$0xff] %v7213_v14  ;;  %v1040_v32 = vadd.f32 %v5573_v48, %v11054_v25  ;;  %v1822_v44 = vadd.f32 %v5575_v49, %v11055_v18  ;;  %v1823_v42 = vadd.f32 %v5577_v50, %v11056_v7  ;;  %v11058_v14 = vld [vmem:[#allocation155_spill] sm:$0xff] }
 0x1c9   : > { %v2599_v13 = vadd.f32 %v5579_v51, %v11057_v17  ;;  %v2600_v23 = vadd.f32 %v5581_v52, %v11058_v14  ;;  %v3376_v1 = vadd.f32 %v5583_v53, %v11059_v8  ;;  %v3377_v2 = vadd.f32 %v5585_v54, %v11060_v26 }
 0x1ca   : > { %v7239_v25 = vadd.f32 %v1121_v21, %v1039_v28  ;;  %v7241_v20 = vadd.f32 %v1122_v16, %v1040_v32  ;;  %v7243_v18 = vadd.f32 %v1904_v33, %v1822_v44  ;;  %v7245_v7 = vadd.f32 %v1905_v36, %v1823_v42  ;;  %v11071_v32 = vld [vmem:[#allocation160_spill] sm:$0xff]  ;;  %v11072_v42 = vld [vmem:[#allocation161_spill] sm:$0xff] }
 0x1cb   : > { %v7247_v11 = vadd.f32 %v2681_v15, %v2599_v13  ;;  %v7249_v17 = vadd.f32 %v2682_v19, %v2600_v23  ;;  %v7251_v14 = vadd.f32 %v3458_v41, %v3376_v1  ;;  %v7253_v45 = vadd.f32 %v3459_v0, %v3377_v2  ;;  %v11069_v19 = vld [vmem:[#allocation158_spill] sm:$0xff]  ;;  %v11070_v0 = vld [vmem:[#allocation159_spill] sm:$0xff] }
 0x1cc   : > { %11061 = vst [vmem:[#allocation146_spill] sm:$0xff] %v7239_v25  ;;  %11062 = vst [vmem:[#allocation147_spill] sm:$0xff] %v7241_v20  ;;  %v1127_v8 = vmul.f32 %v5588_v55, %v594_v9  ;;  %v1128_v26 = vmul.f32 %v5590_v56, %v594_v9  ;;  %v1910_v21 = vmul.f32 %v5592_v57, %v594_v9  ;;  %v11073_v1 = vld [vmem:[#allocation162_spill] sm:$0xff] }
 0x1cd   : > { %11063 = vst [vmem:[#allocation148_spill] sm:$0xff] %v7243_v18  ;;  %11064 = vst [vmem:[#allocation149_spill] sm:$0xff] %v7245_v7  ;;  %v1911_v16 = vmul.f32 %v5594_v58, %v594_v9  ;;  %v2687_v33 = vmul.f32 %v5597_v59, %v594_v9  ;;  %v2688_v36 = vmul.f32 %v5599_v60, %v594_v9  ;;  %v590_v7 = vpop.permute.xlu0 %589 }
 0x1ce   : > { %11065 = vst [vmem:[#allocation150_spill] sm:$0xff] %v7247_v11  ;;  %11066 = vst [vmem:[#allocation151_spill] sm:$0xff] %v7249_v17  ;;  %v3464_v15 = vmul.f32 %v5601_v61, %v594_v9  ;;  %v3465_v23 = vmul.f32 %v5603_v62, %v594_v9  ;;  %v1045_v41 = vadd.f32 %v5571_v47, %v11069_v19  ;;  %v11075_v17 = vld [vmem:[#allocation164_spill] sm:$0xff]  ;;  %v11076_v11 = vld [vmem:[#allocation165_spill] sm:$0xff] }
 0x1cf   : > { %11067 = vst [vmem:[#allocation152_spill] sm:$0xff] %v7251_v14  ;;  %11068 = vst [vmem:[#allocation153_spill] sm:$0xff] %v7253_v45  ;;  %v1046_v28 = vadd.f32 %v5573_v48, %v11070_v0  ;;  %v1828_v44 = vadd.f32 %v5575_v49, %v11071_v32  ;;  %v1829_v13 = vadd.f32 %v5577_v50, %v11072_v42  ;;  %v11074_v45 = vld [vmem:[#allocation163_spill] sm:$0xff] }
 0x1d0   : > { %v2605_v2 = vadd.f32 %v5579_v51, %v11073_v1  ;;  %v2606_v14 = vadd.f32 %v5581_v52, %v11074_v45  ;;  %v3382_v9 = vadd.f32 %v5583_v53, %v11075_v17  ;;  %v3383_v19 = vadd.f32 %v5585_v54, %v11076_v11 }
 0x1d1   : > { %v7279_v0 = vadd.f32 %v1127_v8, %v1045_v41  ;;  %v7281_v18 = vadd.f32 %v1128_v26, %v1046_v28  ;;  %v7283_v32 = vadd.f32 %v1910_v21, %v1828_v44  ;;  %v7285_v42 = vadd.f32 %v1911_v16, %v1829_v13  ;;  %v11087_v28 = vld [vmem:[#allocation168_spill] sm:$0xff]  ;;  %v11088_v13 = vld [vmem:[#allocation169_spill] sm:$0xff] }
 0x1d2   : > { %v7287_v20 = vadd.f32 %v2687_v33, %v2605_v2  ;;  %v7289_v1 = vadd.f32 %v2688_v36, %v2606_v14  ;;  %v7291_v45 = vadd.f32 %v3464_v15, %v3382_v9  ;;  %v7293_v25 = vadd.f32 %v3465_v23, %v3383_v19  ;;  %v11085_v36 = vld [vmem:[#allocation166_spill] sm:$0xff]  ;;  %v11086_v23 = vld [vmem:[#allocation167_spill] sm:$0xff] }
 0x1d3   : > { %11077 = vst [vmem:[#allocation154_spill] sm:$0xff] %v7279_v0  ;;  %11078 = vst [vmem:[#allocation155_spill] sm:$0xff] %v7281_v18  ;;  %v1125_v17 = vmul.f32 %v5588_v55, %v590_v7  ;;  %v1126_v11 = vmul.f32 %v5590_v56, %v590_v7  ;;  %v1908_v8 = vmul.f32 %v5592_v57, %v590_v7  ;;  %v11089_v9 = vld [vmem:[#allocation170_spill] sm:$0xff] }
 0x1d4   : > { %11079 = vst [vmem:[#allocation156_spill] sm:$0xff] %v7283_v32  ;;  %11080 = vst [vmem:[#allocation157_spill] sm:$0xff] %v7285_v42  ;;  %v1909_v26 = vmul.f32 %v5594_v58, %v590_v7  ;;  %v2685_v21 = vmul.f32 %v5597_v59, %v590_v7  ;;  %v2686_v16 = vmul.f32 %v5599_v60, %v590_v7  ;;  %v602_v42 = vpop.permute.xlu1 %601 }
 0x1d5   : > { %11081 = vst [vmem:[#allocation158_spill] sm:$0xff] %v7287_v20  ;;  %11082 = vst [vmem:[#allocation159_spill] sm:$0xff] %v7289_v1  ;;  %v3462_v33 = vmul.f32 %v5601_v61, %v590_v7  ;;  %v3463_v14 = vmul.f32 %v5603_v62, %v590_v7  ;;  %v1043_v15 = vadd.f32 %v5571_v47, %v11085_v36  ;;  %v11091_v1 = vld [vmem:[#allocation172_spill] sm:$0xff]  ;;  %v11092_v20 = vld [vmem:[#allocation173_spill] sm:$0xff] }
 0x1d6   : > { %11083 = vst [vmem:[#allocation160_spill] sm:$0xff] %v7291_v45  ;;  %11084 = vst [vmem:[#allocation161_spill] sm:$0xff] %v7293_v25  ;;  %v1044_v41 = vadd.f32 %v5573_v48, %v11086_v23  ;;  %v1826_v44 = vadd.f32 %v5575_v49, %v11087_v28  ;;  %v1827_v2 = vadd.f32 %v5577_v50, %v11088_v13  ;;  %v11090_v25 = vld [vmem:[#allocation171_spill] sm:$0xff] }
 0x1d7   : > { %v2603_v19 = vadd.f32 %v5579_v51, %v11089_v9  ;;  %v2604_v45 = vadd.f32 %v5581_v52, %v11090_v25  ;;  %v3380_v7 = vadd.f32 %v5583_v53, %v11091_v1  ;;  %v3381_v36 = vadd.f32 %v5585_v54, %v11092_v20 }
 0x1d8   : > { %v7319_v23 = vadd.f32 %v1125_v17, %v1043_v15  ;;  %v7321_v32 = vadd.f32 %v1126_v11, %v1044_v41  ;;  %v7323_v28 = vadd.f32 %v1908_v8, %v1826_v44  ;;  %v7325_v13 = vadd.f32 %v1909_v26, %v1827_v2  ;;  %v11103_v41 = vld [vmem:[#allocation176_spill] sm:$0xff]  ;;  %v11104_v2 = vld [vmem:[#allocation177_spill] sm:$0xff] }
 0x1d9   : > { %v7327_v18 = vadd.f32 %v2685_v21, %v2603_v19  ;;  %v7329_v9 = vadd.f32 %v2686_v16, %v2604_v45  ;;  %v7331_v25 = vadd.f32 %v3462_v33, %v3380_v7  ;;  %v7333_v0 = vadd.f32 %v3463_v14, %v3381_v36  ;;  %v11101_v16 = vld [vmem:[#allocation174_spill] sm:$0xff]  ;;  %v11102_v14 = vld [vmem:[#allocation175_spill] sm:$0xff] }
 0x1da   : > { %11093 = vst [vmem:[#allocation162_spill] sm:$0xff] %v7319_v23  ;;  %11094 = vst [vmem:[#allocation163_spill] sm:$0xff] %v7321_v32  ;;  %v1131_v1 = vmul.f32 %v5588_v55, %v602_v42  ;;  %v1132_v20 = vmul.f32 %v5590_v56, %v602_v42  ;;  %v1914_v17 = vmul.f32 %v5592_v57, %v602_v42  ;;  %v11105_v7 = vld [vmem:[#allocation178_spill] sm:$0xff] }
 0x1db   : > { %11095 = vst [vmem:[#allocation164_spill] sm:$0xff] %v7323_v28  ;;  %11096 = vst [vmem:[#allocation165_spill] sm:$0xff] %v7325_v13  ;;  %v1915_v11 = vmul.f32 %v5594_v58, %v602_v42  ;;  %v2691_v8 = vmul.f32 %v5597_v59, %v602_v42  ;;  %v2692_v26 = vmul.f32 %v5599_v60, %v602_v42  ;;  %v598_v13 = vpop.permute.xlu0 %597 }
 0x1dc   : > { %11097 = vst [vmem:[#allocation166_spill] sm:$0xff] %v7327_v18  ;;  %11098 = vst [vmem:[#allocation167_spill] sm:$0xff] %v7329_v9  ;;  %v3468_v21 = vmul.f32 %v5601_v61, %v602_v42  ;;  %v3469_v45 = vmul.f32 %v5603_v62, %v602_v42  ;;  %v1049_v33 = vadd.f32 %v5571_v47, %v11101_v16  ;;  %v11107_v9 = vld [vmem:[#allocation180_spill] sm:$0xff]  ;;  %v11108_v18 = vld [vmem:[#allocation181_spill] sm:$0xff] }
 0x1dd   : > { %11099 = vst [vmem:[#allocation168_spill] sm:$0xff] %v7331_v25  ;;  %11100 = vst [vmem:[#allocation169_spill] sm:$0xff] %v7333_v0  ;;  %v1050_v15 = vadd.f32 %v5573_v48, %v11102_v14  ;;  %v1832_v44 = vadd.f32 %v5575_v49, %v11103_v41  ;;  %v1833_v19 = vadd.f32 %v5577_v50, %v11104_v2  ;;  %v11106_v0 = vld [vmem:[#allocation179_spill] sm:$0xff] }
 0x1de   : > { %v2609_v36 = vadd.f32 %v5579_v51, %v11105_v7  ;;  %v2610_v25 = vadd.f32 %v5581_v52, %v11106_v0  ;;  %v3386_v42 = vadd.f32 %v5583_v53, %v11107_v9  ;;  %v3387_v16 = vadd.f32 %v5585_v54, %v11108_v18 }
 0x1df   : > { %v7359_v14 = vadd.f32 %v1131_v1, %v1049_v33  ;;  %v7361_v28 = vadd.f32 %v1132_v20, %v1050_v15  ;;  %v7363_v41 = vadd.f32 %v1914_v17, %v1832_v44  ;;  %v7365_v2 = vadd.f32 %v1915_v11, %v1833_v19  ;;  %v11119_v15 = vld [vmem:[#allocation184_spill] sm:$0xff]  ;;  %v11120_v19 = vld [vmem:[#allocation185_spill] sm:$0xff] }
 0x1e0   : > { %v7367_v32 = vadd.f32 %v2691_v8, %v2609_v36  ;;  %v7369_v7 = vadd.f32 %v2692_v26, %v2610_v25  ;;  %v7371_v0 = vadd.f32 %v3468_v21, %v3386_v42  ;;  %v7373_v23 = vadd.f32 %v3469_v45, %v3387_v16  ;;  %v11117_v26 = vld [vmem:[#allocation182_spill] sm:$0xff]  ;;  %v11118_v45 = vld [vmem:[#allocation183_spill] sm:$0xff] }
 0x1e1   : > { %11109 = vst [vmem:[#allocation170_spill] sm:$0xff] %v7359_v14  ;;  %11110 = vst [vmem:[#allocation171_spill] sm:$0xff] %v7361_v28  ;;  %v1129_v9 = vmul.f32 %v5588_v55, %v598_v13  ;;  %v1130_v18 = vmul.f32 %v5590_v56, %v598_v13  ;;  %v1912_v1 = vmul.f32 %v5592_v57, %v598_v13  ;;  %v11121_v42 = vld [vmem:[#allocation186_spill] sm:$0xff] }
 0x1e2   : > { %11111 = vst [vmem:[#allocation172_spill] sm:$0xff] %v7363_v41  ;;  %11112 = vst [vmem:[#allocation173_spill] sm:$0xff] %v7365_v2  ;;  %v1913_v20 = vmul.f32 %v5594_v58, %v598_v13  ;;  %v2689_v17 = vmul.f32 %v5597_v59, %v598_v13  ;;  %v2690_v11 = vmul.f32 %v5599_v60, %v598_v13  ;;  %v610_v2 = vpop.permute.xlu1 %609 }
 0x1e3   : > { %11113 = vst [vmem:[#allocation174_spill] sm:$0xff] %v7367_v32  ;;  %11114 = vst [vmem:[#allocation175_spill] sm:$0xff] %v7369_v7  ;;  %v3466_v8 = vmul.f32 %v5601_v61, %v598_v13  ;;  %v3467_v25 = vmul.f32 %v5603_v62, %v598_v13  ;;  %v1047_v21 = vadd.f32 %v5571_v47, %v11117_v26  ;;  %v11123_v7 = vld [vmem:[#allocation188_spill] sm:$0xff]  ;;  %v11124_v32 = vld [vmem:[#allocation189_spill] sm:$0xff] }
 0x1e4   : > { %11115 = vst [vmem:[#allocation176_spill] sm:$0xff] %v7371_v0  ;;  %11116 = vst [vmem:[#allocation177_spill] sm:$0xff] %v7373_v23  ;;  %v1048_v33 = vadd.f32 %v5573_v48, %v11118_v45  ;;  %v1830_v44 = vadd.f32 %v5575_v49, %v11119_v15  ;;  %v1831_v36 = vadd.f32 %v5577_v50, %v11120_v19  ;;  %v11122_v23 = vld [vmem:[#allocation187_spill] sm:$0xff] }
 0x1e5   : > { %v2607_v16 = vadd.f32 %v5579_v51, %v11121_v42  ;;  %v2608_v0 = vadd.f32 %v5581_v52, %v11122_v23  ;;  %v3384_v13 = vadd.f32 %v5583_v53, %v11123_v7  ;;  %v3385_v26 = vadd.f32 %v5585_v54, %v11124_v32 }
 0x1e6   : > { %v7399_v45 = vadd.f32 %v1129_v9, %v1047_v21  ;;  %v7401_v41 = vadd.f32 %v1130_v18, %v1048_v33  ;;  %v7403_v15 = vadd.f32 %v1912_v1, %v1830_v44  ;;  %v7405_v19 = vadd.f32 %v1913_v20, %v1831_v36  ;;  %v11135_v33 = vld [vmem:[#allocation192_spill] sm:$0xff]  ;;  %v11136_v36 = vld [vmem:[#allocation193_spill] sm:$0xff] }
 0x1e7   : > { %v7407_v28 = vadd.f32 %v2689_v17, %v2607_v16  ;;  %v7409_v42 = vadd.f32 %v2690_v11, %v2608_v0  ;;  %v7411_v23 = vadd.f32 %v3466_v8, %v3384_v13  ;;  %v7413_v14 = vadd.f32 %v3467_v25, %v3385_v26  ;;  %v11133_v11 = vld [vmem:[#allocation190_spill] sm:$0xff]  ;;  %v11134_v25 = vld [vmem:[#allocation191_spill] sm:$0xff] }
 0x1e8   : > { %11125 = vst [vmem:[#allocation178_spill] sm:$0xff] %v7399_v45  ;;  %11126 = vst [vmem:[#allocation179_spill] sm:$0xff] %v7401_v41  ;;  %v1135_v7 = vmul.f32 %v5588_v55, %v610_v2  ;;  %v1136_v32 = vmul.f32 %v5590_v56, %v610_v2  ;;  %v1918_v9 = vmul.f32 %v5592_v57, %v610_v2  ;;  %v11137_v13 = vld [vmem:[#allocation194_spill] sm:$0xff] }
 0x1e9   : > { %11127 = vst [vmem:[#allocation180_spill] sm:$0xff] %v7403_v15  ;;  %11128 = vst [vmem:[#allocation181_spill] sm:$0xff] %v7405_v19  ;;  %v1919_v18 = vmul.f32 %v5594_v58, %v610_v2  ;;  %v2695_v1 = vmul.f32 %v5597_v59, %v610_v2  ;;  %v2696_v20 = vmul.f32 %v5599_v60, %v610_v2  ;;  %v606_v19 = vpop.permute.xlu0 %605 }
 0x1ea   : > { %11129 = vst [vmem:[#allocation182_spill] sm:$0xff] %v7407_v28  ;;  %11130 = vst [vmem:[#allocation183_spill] sm:$0xff] %v7409_v42  ;;  %v3472_v17 = vmul.f32 %v5601_v61, %v610_v2  ;;  %v3473_v0 = vmul.f32 %v5603_v62, %v610_v2  ;;  %v1053_v8 = vadd.f32 %v5571_v47, %v11133_v11  ;;  %v11139_v42 = vld [vmem:[#allocation196_spill] sm:$0xff]  ;;  %v11140_v28 = vld [vmem:[#allocation197_spill] sm:$0xff] }
 0x1eb   : > { %11131 = vst [vmem:[#allocation184_spill] sm:$0xff] %v7411_v23  ;;  %11132 = vst [vmem:[#allocation185_spill] sm:$0xff] %v7413_v14  ;;  %v1054_v21 = vadd.f32 %v5573_v48, %v11134_v25  ;;  %v1836_v44 = vadd.f32 %v5575_v49, %v11135_v33  ;;  %v1837_v16 = vadd.f32 %v5577_v50, %v11136_v36  ;;  %v11138_v14 = vld [vmem:[#allocation195_spill] sm:$0xff] }
 0x1ec   : > { %v2613_v26 = vadd.f32 %v5579_v51, %v11137_v13  ;;  %v2614_v23 = vadd.f32 %v5581_v52, %v11138_v14  ;;  %v3390_v2 = vadd.f32 %v5583_v53, %v11139_v42  ;;  %v3391_v11 = vadd.f32 %v5585_v54, %v11140_v28 }
 0x1ed   : > { %v7439_v25 = vadd.f32 %v1135_v7, %v1053_v8  ;;  %v7441_v15 = vadd.f32 %v1136_v32, %v1054_v21  ;;  %v7443_v33 = vadd.f32 %v1918_v9, %v1836_v44  ;;  %v7445_v36 = vadd.f32 %v1919_v18, %v1837_v16  ;;  %v11151_v21 = vld [vmem:[#allocation200_spill] sm:$0xff]  ;;  %v11152_v16 = vld [vmem:[#allocation201_spill] sm:$0xff] }
 0x1ee   : > { %v7447_v41 = vadd.f32 %v2695_v1, %v2613_v26  ;;  %v7449_v13 = vadd.f32 %v2696_v20, %v2614_v23  ;;  %v7451_v14 = vadd.f32 %v3472_v17, %v3390_v2  ;;  %v7453_v45 = vadd.f32 %v3473_v0, %v3391_v11  ;;  %v11149_v20 = vld [vmem:[#allocation198_spill] sm:$0xff]  ;;  %v11150_v0 = vld [vmem:[#allocation199_spill] sm:$0xff] }
 0x1ef   : > { %11141 = vst [vmem:[#allocation186_spill] sm:$0xff] %v7439_v25  ;;  %11142 = vst [vmem:[#allocation187_spill] sm:$0xff] %v7441_v15  ;;  %v1133_v42 = vmul.f32 %v5588_v55, %v606_v19  ;;  %v1134_v28 = vmul.f32 %v5590_v56, %v606_v19  ;;  %v1916_v7 = vmul.f32 %v5592_v57, %v606_v19  ;;  %v11153_v2 = vld [vmem:[#allocation202_spill] sm:$0xff] }
 0x1f0   : > { %11143 = vst [vmem:[#allocation188_spill] sm:$0xff] %v7443_v33  ;;  %11144 = vst [vmem:[#allocation189_spill] sm:$0xff] %v7445_v36  ;;  %v1917_v32 = vmul.f32 %v5594_v58, %v606_v19  ;;  %v2693_v9 = vmul.f32 %v5597_v59, %v606_v19  ;;  %v2694_v18 = vmul.f32 %v5599_v60, %v606_v19  ;;  %v618_v36 = vpop.permute.xlu1 %617 }
 0x1f1   : > { %11145 = vst [vmem:[#allocation190_spill] sm:$0xff] %v7447_v41  ;;  %11146 = vst [vmem:[#allocation191_spill] sm:$0xff] %v7449_v13  ;;  %v3470_v1 = vmul.f32 %v5601_v61, %v606_v19  ;;  %v3471_v23 = vmul.f32 %v5603_v62, %v606_v19  ;;  %v1051_v17 = vadd.f32 %v5571_v47, %v11149_v20  ;;  %v11155_v13 = vld [vmem:[#allocation204_spill] sm:$0xff]  ;;  %v11156_v41 = vld [vmem:[#allocation205_spill] sm:$0xff] }
 0x1f2   : > { %11147 = vst [vmem:[#allocation192_spill] sm:$0xff] %v7451_v14  ;;  %11148 = vst [vmem:[#allocation193_spill] sm:$0xff] %v7453_v45  ;;  %v1052_v8 = vadd.f32 %v5573_v48, %v11150_v0  ;;  %v1834_v44 = vadd.f32 %v5575_v49, %v11151_v21  ;;  %v1835_v26 = vadd.f32 %v5577_v50, %v11152_v16  ;;  %v11154_v45 = vld [vmem:[#allocation203_spill] sm:$0xff] }
 0x1f3   : > { %v2611_v11 = vadd.f32 %v5579_v51, %v11153_v2  ;;  %v2612_v14 = vadd.f32 %v5581_v52, %v11154_v45  ;;  %v3388_v19 = vadd.f32 %v5583_v53, %v11155_v13  ;;  %v3389_v20 = vadd.f32 %v5585_v54, %v11156_v41 }
 0x1f4   : > { %v7479_v0 = vadd.f32 %v1133_v42, %v1051_v17  ;;  %v7481_v33 = vadd.f32 %v1134_v28, %v1052_v8  ;;  %v7483_v21 = vadd.f32 %v1916_v7, %v1834_v44  ;;  %v7485_v16 = vadd.f32 %v1917_v32, %v1835_v26  ;;  %v11167_v8 = vld [vmem:[#allocation208_spill] sm:$0xff]  ;;  %v11168_v26 = vld [vmem:[#allocation209_spill] sm:$0xff] }
 0x1f5   : > { %v7487_v15 = vadd.f32 %v2693_v9, %v2611_v11  ;;  %v7489_v2 = vadd.f32 %v2694_v18, %v2612_v14  ;;  %v7491_v45 = vadd.f32 %v3470_v1, %v3388_v19  ;;  %v7493_v25 = vadd.f32 %v3471_v23, %v3389_v20  ;;  %v11165_v18 = vld [vmem:[#allocation206_spill] sm:$0xff]  ;;  %v11166_v23 = vld [vmem:[#allocation207_spill] sm:$0xff] }
 0x1f6   : > { %11157 = vst [vmem:[#allocation194_spill] sm:$0xff] %v7479_v0  ;;  %11158 = vst [vmem:[#allocation195_spill] sm:$0xff] %v7481_v33  ;;  %v1139_v13 = vmul.f32 %v5588_v55, %v618_v36  ;;  %v1140_v41 = vmul.f32 %v5590_v56, %v618_v36  ;;  %v1922_v42 = vmul.f32 %v5592_v57, %v618_v36  ;;  %v11169_v19 = vld [vmem:[#allocation210_spill] sm:$0xff] }
 0x1f7   : > { %11159 = vst [vmem:[#allocation196_spill] sm:$0xff] %v7483_v21  ;;  %11160 = vst [vmem:[#allocation197_spill] sm:$0xff] %v7485_v16  ;;  %v1923_v28 = vmul.f32 %v5594_v58, %v618_v36  ;;  %v2699_v7 = vmul.f32 %v5597_v59, %v618_v36  ;;  %v2700_v32 = vmul.f32 %v5599_v60, %v618_v36  ;;  %v614_v16 = vpop.permute.xlu0 %613 }
 0x1f8   : > { %11161 = vst [vmem:[#allocation198_spill] sm:$0xff] %v7487_v15  ;;  %11162 = vst [vmem:[#allocation199_spill] sm:$0xff] %v7489_v2  ;;  %v3476_v9 = vmul.f32 %v5601_v61, %v618_v36  ;;  %v3477_v14 = vmul.f32 %v5603_v62, %v618_v36  ;;  %v1057_v1 = vadd.f32 %v5571_v47, %v11165_v18  ;;  %v11171_v2 = vld [vmem:[#allocation212_spill] sm:$0xff]  ;;  %v11172_v15 = vld [vmem:[#allocation213_spill] sm:$0xff] }
 0x1f9   : > { %11163 = vst [vmem:[#allocation200_spill] sm:$0xff] %v7491_v45  ;;  %11164 = vst [vmem:[#allocation201_spill] sm:$0xff] %v7493_v25  ;;  %v1058_v17 = vadd.f32 %v5573_v48, %v11166_v23  ;;  %v1840_v44 = vadd.f32 %v5575_v49, %v11167_v8  ;;  %v1841_v11 = vadd.f32 %v5577_v50, %v11168_v26  ;;  %v11170_v25 = vld [vmem:[#allocation211_spill] sm:$0xff] }
 0x1fa   : > { %v2617_v20 = vadd.f32 %v5579_v51, %v11169_v19  ;;  %v2618_v45 = vadd.f32 %v5581_v52, %v11170_v25  ;;  %v3394_v36 = vadd.f32 %v5583_v53, %v11171_v2  ;;  %v3395_v18 = vadd.f32 %v5585_v54, %v11172_v15 }
 0x1fb   : > { %v7519_v23 = vadd.f32 %v1139_v13, %v1057_v1  ;;  %v7521_v21 = vadd.f32 %v1140_v41, %v1058_v17  ;;  %v7523_v8 = vadd.f32 %v1922_v42, %v1840_v44  ;;  %v7525_v26 = vadd.f32 %v1923_v28, %v1841_v11  ;;  %v11183_v17 = vld [vmem:[#allocation216_spill] sm:$0xff]  ;;  %v11184_v11 = vld [vmem:[#allocation217_spill] sm:$0xff] }
 0x1fc   : > { %v7527_v33 = vadd.f32 %v2699_v7, %v2617_v20  ;;  %v7529_v19 = vadd.f32 %v2700_v32, %v2618_v45  ;;  %v7531_v25 = vadd.f32 %v3476_v9, %v3394_v36  ;;  %v7533_v0 = vadd.f32 %v3477_v14, %v3395_v18  ;;  %v11181_v32 = vld [vmem:[#allocation214_spill] sm:$0xff]  ;;  %v11182_v14 = vld [vmem:[#allocation215_spill] sm:$0xff] }
 0x1fd   : > { %11173 = vst [vmem:[#allocation202_spill] sm:$0xff] %v7519_v23  ;;  %11174 = vst [vmem:[#allocation203_spill] sm:$0xff] %v7521_v21  ;;  %v1137_v2 = vmul.f32 %v5588_v55, %v614_v16  ;;  %v1138_v15 = vmul.f32 %v5590_v56, %v614_v16  ;;  %v1920_v13 = vmul.f32 %v5592_v57, %v614_v16  ;;  %v11185_v36 = vld [vmem:[#allocation218_spill] sm:$0xff] }
 0x1fe   : > { %11175 = vst [vmem:[#allocation204_spill] sm:$0xff] %v7523_v8  ;;  %11176 = vst [vmem:[#allocation205_spill] sm:$0xff] %v7525_v26  ;;  %v1921_v41 = vmul.f32 %v5594_v58, %v614_v16  ;;  %v2697_v42 = vmul.f32 %v5597_v59, %v614_v16  ;;  %v2698_v28 = vmul.f32 %v5599_v60, %v614_v16  ;;  %v626_v26 = vpop.permute.xlu1 %625 }
 0x1ff   : > { %11177 = vst [vmem:[#allocation206_spill] sm:$0xff] %v7527_v33  ;;  %11178 = vst [vmem:[#allocation207_spill] sm:$0xff] %v7529_v19  ;;  %v3474_v7 = vmul.f32 %v5601_v61, %v614_v16  ;;  %v3475_v45 = vmul.f32 %v5603_v62, %v614_v16  ;;  %v1055_v9 = vadd.f32 %v5571_v47, %v11181_v32  ;;  %v11187_v19 = vld [vmem:[#allocation220_spill] sm:$0xff]  ;;  %v11188_v33 = vld [vmem:[#allocation221_spill] sm:$0xff] }
 0x200   : > { %11179 = vst [vmem:[#allocation208_spill] sm:$0xff] %v7531_v25  ;;  %11180 = vst [vmem:[#allocation209_spill] sm:$0xff] %v7533_v0  ;;  %v1056_v1 = vadd.f32 %v5573_v48, %v11182_v14  ;;  %v1838_v44 = vadd.f32 %v5575_v49, %v11183_v17  ;;  %v1839_v20 = vadd.f32 %v5577_v50, %v11184_v11  ;;  %v11186_v0 = vld [vmem:[#allocation219_spill] sm:$0xff] }
 0x201   : > { %v2615_v18 = vadd.f32 %v5579_v51, %v11185_v36  ;;  %v2616_v25 = vadd.f32 %v5581_v52, %v11186_v0  ;;  %v3392_v16 = vadd.f32 %v5583_v53, %v11187_v19  ;;  %v3393_v32 = vadd.f32 %v5585_v54, %v11188_v33 }
 0x202   : > { %v7559_v14 = vadd.f32 %v1137_v2, %v1055_v9  ;;  %v7561_v8 = vadd.f32 %v1138_v15, %v1056_v1  ;;  %v7563_v17 = vadd.f32 %v1920_v13, %v1838_v44  ;;  %v7565_v11 = vadd.f32 %v1921_v41, %v1839_v20  ;;  %v11199_v1 = vld [vmem:[#allocation224_spill] sm:$0xff]  ;;  %v11200_v20 = vld [vmem:[#allocation225_spill] sm:$0xff] }
 0x203   : > { %v7567_v21 = vadd.f32 %v2697_v42, %v2615_v18  ;;  %v7569_v36 = vadd.f32 %v2698_v28, %v2616_v25  ;;  %v7571_v0 = vadd.f32 %v3474_v7, %v3392_v16  ;;  %v7573_v23 = vadd.f32 %v3475_v45, %v3393_v32  ;;  %v11197_v28 = vld [vmem:[#allocation222_spill] sm:$0xff]  ;;  %v11198_v45 = vld [vmem:[#allocation223_spill] sm:$0xff] }
 0x204   : > { %11189 = vst [vmem:[#allocation210_spill] sm:$0xff] %v7559_v14  ;;  %11190 = vst [vmem:[#allocation211_spill] sm:$0xff] %v7561_v8  ;;  %v1143_v19 = vmul.f32 %v5588_v55, %v626_v26  ;;  %v1144_v33 = vmul.f32 %v5590_v56, %v626_v26  ;;  %v1926_v2 = vmul.f32 %v5592_v57, %v626_v26  ;;  %v11201_v16 = vld [vmem:[#allocation226_spill] sm:$0xff] }
 0x205   : > { %11191 = vst [vmem:[#allocation212_spill] sm:$0xff] %v7563_v17  ;;  %11192 = vst [vmem:[#allocation213_spill] sm:$0xff] %v7565_v11  ;;  %v1927_v15 = vmul.f32 %v5594_v58, %v626_v26  ;;  %v2703_v13 = vmul.f32 %v5597_v59, %v626_v26  ;;  %v2704_v41 = vmul.f32 %v5599_v60, %v626_v26  ;;  %v622_v11 = vpop.permute.xlu0 %621 }
 0x206   : > { %11193 = vst [vmem:[#allocation214_spill] sm:$0xff] %v7567_v21  ;;  %11194 = vst [vmem:[#allocation215_spill] sm:$0xff] %v7569_v36  ;;  %v3480_v42 = vmul.f32 %v5601_v61, %v626_v26  ;;  %v3481_v25 = vmul.f32 %v5603_v62, %v626_v26  ;;  %v1061_v7 = vadd.f32 %v5571_v47, %v11197_v28  ;;  %v11203_v36 = vld [vmem:[#allocation228_spill] sm:$0xff]  ;;  %v11204_v21 = vld [vmem:[#allocation229_spill] sm:$0xff] }
 0x207   : > { %11195 = vst [vmem:[#allocation216_spill] sm:$0xff] %v7571_v0  ;;  %11196 = vst [vmem:[#allocation217_spill] sm:$0xff] %v7573_v23  ;;  %v1062_v9 = vadd.f32 %v5573_v48, %v11198_v45  ;;  %v1844_v44 = vadd.f32 %v5575_v49, %v11199_v1  ;;  %v1845_v18 = vadd.f32 %v5577_v50, %v11200_v20  ;;  %v11202_v23 = vld [vmem:[#allocation227_spill] sm:$0xff] }
 0x208   : > { %v2621_v32 = vadd.f32 %v5579_v51, %v11201_v16  ;;  %v2622_v0 = vadd.f32 %v5581_v52, %v11202_v23  ;;  %v3398_v26 = vadd.f32 %v5583_v53, %v11203_v36  ;;  %v3399_v28 = vadd.f32 %v5585_v54, %v11204_v21 }
 0x209   : > { %v7599_v45 = vadd.f32 %v1143_v19, %v1061_v7  ;;  %v7601_v17 = vadd.f32 %v1144_v33, %v1062_v9  ;;  %v7603_v1 = vadd.f32 %v1926_v2, %v1844_v44  ;;  %v7605_v20 = vadd.f32 %v1927_v15, %v1845_v18  ;;  %v11215_v9 = vld [vmem:[#allocation232_spill] sm:$0xff]  ;;  %v11216_v18 = vld [vmem:[#allocation233_spill] sm:$0xff] }
 0x20a   : > { %v7607_v8 = vadd.f32 %v2703_v13, %v2621_v32  ;;  %v7609_v16 = vadd.f32 %v2704_v41, %v2622_v0  ;;  %v7611_v23 = vadd.f32 %v3480_v42, %v3398_v26  ;;  %v7613_v14 = vadd.f32 %v3481_v25, %v3399_v28  ;;  %v11213_v41 = vld [vmem:[#allocation230_spill] sm:$0xff]  ;;  %v11214_v25 = vld [vmem:[#allocation231_spill] sm:$0xff] }
 0x20b   : > { %11205 = vst [vmem:[#allocation218_spill] sm:$0xff] %v7599_v45  ;;  %11206 = vst [vmem:[#allocation219_spill] sm:$0xff] %v7601_v17  ;;  %v1141_v36 = vmul.f32 %v5588_v55, %v622_v11  ;;  %v1142_v21 = vmul.f32 %v5590_v56, %v622_v11  ;;  %v1924_v19 = vmul.f32 %v5592_v57, %v622_v11  ;;  %v11217_v26 = vld [vmem:[#allocation234_spill] sm:$0xff]  ;;  %v11264_v45 = vld [vmem:[#allocation251_spill] sm:$0xff] }
 0x20c   : > { %11207 = vst [vmem:[#allocation220_spill] sm:$0xff] %v7603_v1  ;;  %11208 = vst [vmem:[#allocation221_spill] sm:$0xff] %v7605_v20  ;;  %v1925_v33 = vmul.f32 %v5594_v58, %v622_v11  ;;  %v2701_v2 = vmul.f32 %v5597_v59, %v622_v11  ;;  %v2702_v15 = vmul.f32 %v5599_v60, %v622_v11  ;;  %v11262_v1 = vld [vmem:[#allocation250_spill] sm:$0xff] }
 0x20d   : > { %11209 = vst [vmem:[#allocation222_spill] sm:$0xff] %v7607_v8  ;;  %11210 = vst [vmem:[#allocation223_spill] sm:$0xff] %v7609_v16  ;;  %v3478_v13 = vmul.f32 %v5601_v61, %v622_v11  ;;  %v3479_v0 = vmul.f32 %v5603_v62, %v622_v11  ;;  %v1059_v42 = vadd.f32 %v5571_v47, %v11213_v41  ;;  %v11219_v16 = vld [vmem:[#allocation236_spill] sm:$0xff]  ;;  %v634_v47 = vpop.permute.xlu1 %633 }
 0x20e   : > { %11211 = vst [vmem:[#allocation224_spill] sm:$0xff] %v7611_v23  ;;  %11212 = vst [vmem:[#allocation225_spill] sm:$0xff] %v7613_v14  ;;  %v1060_v7 = vadd.f32 %v5573_v48, %v11214_v25  ;;  %v1842_v44 = vadd.f32 %v5575_v49, %v11215_v9  ;;  %v1843_v32 = vadd.f32 %v5577_v50, %v11216_v18  ;;  %v11218_v14 = vld [vmem:[#allocation235_spill] sm:$0xff]  ;;  %v630_v25 = vpop.permute.xlu0 %629 }
 0x20f   : > { %v2619_v28 = vadd.f32 %v5579_v51, %v11217_v26  ;;  %v2620_v23 = vadd.f32 %v5581_v52, %v11218_v14  ;;  %v3396_v11 = vadd.f32 %v5583_v53, %v11219_v16  ;;  %v3397_v41 = vadd.f32 %v5585_v54, %v6371_v10 }
 0x210   : > { %v7639_v48 = vadd.f32 %v1141_v36, %v1059_v42  ;;  %v7641_v9 = vadd.f32 %v1142_v21, %v1060_v7  ;;  %v7643_v49 = vadd.f32 %v1924_v19, %v1842_v44  ;;  %v7645_v18 = vadd.f32 %v1925_v33, %v1843_v32  ;;  %v11236_v44 = vld [vmem:[#allocation8_spill] sm:$0xff] }
 0x211   : > { %v7647_v26 = vadd.f32 %v2701_v2, %v2619_v28  ;;  %v7649_v51 = vadd.f32 %v2702_v15, %v2620_v23  ;;  %v7651_v14 = vadd.f32 %v3478_v13, %v3396_v11  ;;  %v7653_v16 = vadd.f32 %v3479_v0, %v3397_v41 }
 0x212   : > { %11220 = vst [vmem:[#allocation226_spill] sm:$0xff] %v7639_v48  ;;  %11221 = vst [vmem:[#allocation227_spill] sm:$0xff] %v7641_v9  ;;  %v7656_v10 = vmul.f32 %v5588_v55, %v634_v47  ;;  %v7659_v36 = vmul.f32 %v5590_v56, %v634_v47  ;;  %v1145_v21 = vmul.f32 %v5588_v55, %v630_v25  ;;  %v1215_v32 = vsub.s32 2, %v11236_v44  ;;  %v643_v20 = vpop.permute.xlu0 %642  ;;  %v11288_v48 = vld [vmem:[#allocation19_spill] sm:$0xff] }
 0x213   : > { %11222 = vst [vmem:[#allocation228_spill] sm:$0xff] %v7643_v49  ;;  %11223 = vst [vmem:[#allocation229_spill] sm:$0xff] %v7645_v18  ;;  %v1146_v19 = vmul.f32 %v5590_v56, %v630_v25  ;;  %v7664_v33 = vmul.f32 %v5592_v57, %v634_v47  ;;  %v7667_v23 = vmul.f32 %v5594_v58, %v634_v47  ;;  %v1219_v28 = vsub.s32 6, %v11236_v44  ;;  %v11284_v18 = vld [vmem:[#allocation17_spill] sm:$0xff] }
 0x214   : > { %11224 = vst [vmem:[#allocation230_spill] sm:$0xff] %v7647_v26  ;;  %11225 = vst [vmem:[#allocation231_spill] sm:$0xff] %v7649_v51  ;;  %v7670_v2 = vmul.f32 %v5597_v59, %v634_v47  ;;  %v7673_v15 = vmul.f32 %v5599_v60, %v634_v47  ;;  %v7676_v13 = vmul.f32 %v5601_v61, %v634_v47 }
 0x215   : > { %11226 = vst [vmem:[#allocation232_spill] sm:$0xff] %v7651_v14  ;;  %11227 = vst [vmem:[#allocation233_spill] sm:$0xff] %v7653_v16  ;;  %v7679_v55 = vmul.f32 %v5603_v62, %v634_v47  ;;  %v1928_v56 = vmul.f32 %v5592_v57, %v630_v25  ;;  %v1929_v0 = vmul.f32 %v5594_v58, %v630_v25  ;;  %v7696_v58 = vld [vmem:[%s5517_s10] sm:$0xff] }
 0x216   : > { %11228 = vst [vmem:[#allocation234_spill] sm:$0xff] %v7656_v10  ;;  %11229 = vst [vmem:[#allocation235_spill] sm:$0xff] %v7659_v36  ;;  %v2705_v42 = vmul.f32 %v5597_v59, %v630_v25  ;;  %v2706_v7 = vmul.f32 %v5599_v60, %v630_v25  ;;  %v7688_v11 = vadd.f32 %v1145_v21, %v6410_v63  ;;  %v7706_v21 = vld [vmem:[%s5517_s10 + $0x10] sm:$0xff] }
 0x217   : > { %11230 = vst [vmem:[#allocation236_spill] sm:$0xff] %v7664_v33  ;;  %11231 = vst [vmem:[#allocation264_spill] sm:$0xff] %v7667_v23  ;;  %v7691_v47 = vadd.f32 %v1146_v19, %v6413_v6  ;;  %v3482_v57 = vmul.f32 %v5601_v61, %v630_v25  ;;  %v3483_v41 = vmul.f32 %v5603_v62, %v630_v25  ;;  %v7711_v19 = vld [vmem:[%s5517_s10 + $0x18] sm:$0xff] }
 0x218   : > { %11232 = vst [vmem:[#allocation265_spill] sm:$0xff] %v7670_v2  ;;  %11233 = vst [vmem:[#allocation266_spill] sm:$0xff] %v7673_v15  ;;  %v1216_v59 = vrot.slane %v7696_v58, %v1215_v32  ;;  %v1220_v60 = vrot.slane %v7696_v58, %v1219_v28  ;;  %v2776_v6 = vrot.slane %v7706_v21, %v1215_v32  ;;  %v647_v15 = vpop.permute.xlu1 %646 }
 0x219   : > { %11234 = vst [vmem:[#allocation267_spill] sm:$0xff] %v7676_v13  ;;  %11235 = vst [vmem:[#allocation268_spill] sm:$0xff] %v7679_v55  ;;  %v7701_v55 = vld [vmem:[%s5517_s10 + $0x8] sm:$0xff]  ;;  %v2780_v61 = vrot.slane %v7706_v21, %v1219_v28  ;;  %v3553_v62 = vrot.slane %v7711_v19, %v1215_v32  ;;  %v3557_v25 = vrot.slane %v7711_v19, %v1219_v28 }
 0x21a   : > { %11237 = vst [vmem:[#allocation269_spill] sm:$0xff] %v7688_v11  ;;  %11238 = vst [vmem:[#allocation270_spill] sm:$0xff] %v7691_v47  ;;  %v1999_v13 = vrot.slane %v7701_v55, %v1215_v32  ;;  %v2003_v63 = vrot.slane %v7701_v55, %v1219_v28  ;;  %v7715_v2 = vrot.slane %v1216_v59, %v1215_v32 }
 0x21b   : > { %v7717_v23 = vrot.slane %v1220_v60, %v1215_v32  ;;  %v7723_v10 = vrot.slane %v2776_v6, %v1215_v32  ;;  %v7725_v54 = vrot.slane %v2780_v61, %v1215_v32  ;;  %v7727_v53 = vrot.slane %v3553_v62, %v1215_v32 }
 0x21c   : > { %v7719_v33 = vrot.slane %v1999_v13, %v1215_v32  ;;  %v7721_v36 = vrot.slane %v2003_v63, %v1215_v32  ;;  %v7729_v52 = vrot.slane %v3557_v25, %v1215_v32  ;;  %v1233_v50 = vmul.f32 %v7715_v2, %v647_v15 }
 0x21d   : > { %11239 = vst [vmem:[#allocation271_spill] sm:$0xff] %v7723_v10  ;;  %11240 = vst [vmem:[#allocation272_spill] sm:$0xff] %v7725_v54  ;;  %v1234_v28 = vmul.f32 %v7717_v23, %v647_v15  ;;  %v2793_v13 = vmul.f32 %v7723_v10, %v647_v15  ;;  %v2794_v63 = vmul.f32 %v7725_v54, %v647_v15 }
 0x21e   : > { %11241 = vst [vmem:[#allocation273_spill] sm:$0xff] %v7727_v53  ;;  %11242 = vst [vmem:[#allocation274_spill] sm:$0xff] %v7729_v52  ;;  %v2016_v59 = vmul.f32 %v7719_v33, %v647_v15  ;;  %v2017_v60 = vmul.f32 %v7721_v36, %v647_v15  ;;  %v3570_v6 = vmul.f32 %v7727_v53, %v647_v15 }
 0x21f   : > { %v3571_v61 = vmul.f32 %v7729_v52, %v647_v15  ;;  %v7740_v62 = vadd.f32 %v1928_v56, %v6419_v35  ;;  %v7743_v32 = vadd.f32 %v1929_v0, %v6422_v34  ;;  %v7746_v25 = vadd.f32 %v2705_v42, %v6428_v22  ;;  %v11249_v56 = vld [vmem:[#allocation245_spill] sm:$0xff] }
 0x220   : > { %v7749_v47 = vadd.f32 %v2706_v7, %v6431_v3  ;;  %v7752_v11 = vadd.f32 %v3482_v57, %v6444_v24  ;;  %v7755_v8 = vadd.f32 %v3483_v41, %v6447_v46  ;;  %v7758_v15 = vsub.s32 3, %v11236_v44 }
 0x221   : > { %11243 = vst [vmem:[#allocation275_spill] sm:$0xff] %v7740_v62  ;;  %11244 = vst [vmem:[#allocation276_spill] sm:$0xff] %v7743_v32  ;;  %v7761_v35 = vsub.s32 7, %v11236_v44  ;;  %v7764_v34 = vadd.f32 %v1233_v50, %v6449_v37  ;;  %v7767_v22 = vadd.f32 %v1234_v28, %v6451_v4  ;;  %v7770_v3 = vadd.f32 %v2016_v59, %v6454_v38  ;;  %v11252_v50 = vld [vmem:[#allocation246_spill] sm:$0xff]  ;;  %v655_v4 = vpop.permute.xlu1 %654  ;;  %v11260_v32 = vld [vmem:[#allocation249_spill] sm:$0xff] }
 0x222   : > { %11245 = vst [vmem:[#allocation277_spill] sm:$0xff] %v7746_v25  ;;  %11246 = vst [vmem:[#allocation278_spill] sm:$0xff] %v7749_v47  ;;  %v7773_v24 = vadd.f32 %v2017_v60, %v6456_v39  ;;  %v7776_v46 = vadd.f32 %v2793_v13, %v6469_v31  ;;  %v7779_v0 = vadd.f32 %v2794_v63, %v11249_v56  ;;  %v11258_v47 = vld [vmem:[#allocation248_spill] sm:$0xff] }
 0x223   : > { %11247 = vst [vmem:[#allocation279_spill] sm:$0xff] %v7752_v11  ;;  %11248 = vst [vmem:[#allocation280_spill] sm:$0xff] %v7755_v8  ;;  %v7782_v42 = vadd.f32 %v3570_v6, %v6487_v12  ;;  %v7785_v37 = vadd.f32 %v3571_v61, %v11252_v50  ;;  %v1231_v7 = vmul.f32 %v7715_v2, %v643_v20  ;;  %v11256_v8 = vld [vmem:[#allocation247_spill] sm:$0xff] }
 0x224   : > { %11250 = vst [vmem:[#allocation245_spill] sm:$0xff] %v7779_v0  ;;  %v1232_v38 = vmul.f32 %v7717_v23, %v643_v20  ;;  %v2014_v39 = vmul.f32 %v7719_v33, %v643_v20  ;;  %v2015_v57 = vmul.f32 %v7721_v36, %v643_v20  ;;  %v2791_v31 = vmul.f32 %v7723_v10, %v643_v20 }
 0x225   : > { %11251 = vst [vmem:[#allocation281_spill] sm:$0xff] %v7782_v42  ;;  %11253 = vst [vmem:[#allocation246_spill] sm:$0xff] %v7785_v37  ;;  %v2792_v41 = vmul.f32 %v7725_v54, %v643_v20  ;;  %v3568_v28 = vmul.f32 %v7727_v53, %v643_v20  ;;  %v3569_v12 = vmul.f32 %v7729_v52, %v643_v20 }
 0x226   : > { %v1237_v59 = vmul.f32 %v7715_v2, %v655_v4  ;;  %v1238_v60 = vmul.f32 %v7717_v23, %v655_v4  ;;  %v2020_v13 = vmul.f32 %v7719_v33, %v655_v4  ;;  %v2021_v63 = vmul.f32 %v7721_v36, %v655_v4 }
 0x227   : > { %v2797_v6 = vmul.f32 %v7723_v10, %v655_v4  ;;  %v2798_v61 = vmul.f32 %v7725_v54, %v655_v4  ;;  %v3574_v56 = vmul.f32 %v7727_v53, %v655_v4  ;;  %v3575_v50 = vmul.f32 %v7729_v52, %v655_v4 }
 0x228   : > { %v7804_v44 = vadd.f32 %v1231_v7, %v6503_v30  ;;  %v7807_v20 = vadd.f32 %v1232_v38, %v6505_v27  ;;  %v7810_v11 = vadd.f32 %v2014_v39, %v11256_v8  ;;  %v7813_v25 = vadd.f32 %v2015_v57, %v11258_v47  ;;  %v11266_v30 = vld [vmem:[#allocation252_spill] sm:$0xff]  ;;  %v651_v27 = vpop.permute.xlu0 %650  ;;  %v11268_v38 = vld [vmem:[#allocation25_spill] sm:$0xff]  ;;  %v11270_v8 = vld [vmem:[#allocation26_spill] sm:$0xff] }
 0x229   : > { %v7816_v62 = vadd.f32 %v2791_v31, %v11260_v32  ;;  %v7819_v17 = vadd.f32 %v2792_v41, %v11262_v1  ;;  %v7822_v4 = vadd.f32 %v3568_v28, %v11264_v45  ;;  %v7825_v7 = vadd.f32 %v3569_v12, %v11266_v30  ;;  %v11272_v47 = vld [vmem:[#allocation27_spill] sm:$0xff]  ;;  %v11274_v32 = vld [vmem:[#allocation28_spill] sm:$0xff]  ;;  %v11276_v1 = vld [vmem:[#allocation29_spill] sm:$0xff] }
 0x22a   : > { %11254 = vst [vmem:[#allocation282_spill] sm:$0xff] %v7804_v44  ;;  %11255 = vst [vmem:[#allocation283_spill] sm:$0xff] %v7807_v20  ;;  %v7828_v16 = vadd.f32 %v1237_v59, %v11268_v38  ;;  %v7831_v39 = vadd.f32 %v1238_v60, %v11270_v8  ;;  %v7834_v57 = vadd.f32 %v2020_v13, %v11272_v47  ;;  %v11278_v45 = vld [vmem:[#allocation253_spill] sm:$0xff]  ;;  %v11280_v12 = vld [vmem:[#allocation254_spill] sm:$0xff]  ;;  %v714_v60 = vpop.permute.xlu1 %713 }
 0x22b   : > { %11257 = vst [vmem:[#allocation247_spill] sm:$0xff] %v7810_v11  ;;  %11259 = vst [vmem:[#allocation248_spill] sm:$0xff] %v7813_v25  ;;  %v7837_v31 = vadd.f32 %v2021_v63, %v11274_v32  ;;  %v7840_v41 = vadd.f32 %v2797_v6, %v11276_v1  ;;  %v7843_v28 = vadd.f32 %v2798_v61, %v11278_v45  ;;  %v11282_v59 = vld [vmem:[#allocation255_spill] sm:$0xff]  ;;  %v11315_v11 = vld [vmem:[#allocation136_spill] sm:$0xff] }
 0x22c   : > { %11261 = vst [vmem:[#allocation249_spill] sm:$0xff] %v7816_v62  ;;  %11263 = vst [vmem:[#allocation250_spill] sm:$0xff] %v7819_v17  ;;  %v7846_v30 = vadd.f32 %v3574_v56, %v11280_v12  ;;  %v7849_v38 = vadd.f32 %v3575_v50, %v11282_v59  ;;  %v1235_v8 = vmul.f32 %v7715_v2, %v651_v27  ;;  %v11314_v62 = vld [vmem:[#allocation135_spill] sm:$0xff]  ;;  %v11316_v44 = vld [vmem:[#allocation137_spill] sm:$0xff] }
 0x22d   : > { %11265 = vst [vmem:[#allocation251_spill] sm:$0xff] %v7822_v4  ;;  %11267 = vst [vmem:[#allocation252_spill] sm:$0xff] %v7825_v7  ;;  %v1236_v13 = vmul.f32 %v7717_v23, %v651_v27  ;;  %v2018_v63 = vmul.f32 %v7719_v33, %v651_v27  ;;  %v2019_v47 = vmul.f32 %v7721_v36, %v651_v27  ;;  %v11313_v4 = vld [vmem:[#allocation134_spill] sm:$0xff] }
 0x22e   : > { %11269 = vst [vmem:[#allocation25_spill] sm:$0xff] %v7828_v16  ;;  %11271 = vst [vmem:[#allocation26_spill] sm:$0xff] %v7831_v39  ;;  %v2795_v6 = vmul.f32 %v7723_v10, %v651_v27  ;;  %v2796_v61 = vmul.f32 %v7725_v54, %v651_v27  ;;  %v3572_v32 = vmul.f32 %v7727_v53, %v651_v27  ;;  %v11296_v16 = vld [vmem:[#allocation23_spill] sm:$0xff] }
 0x22f   : > { %11273 = vst [vmem:[#allocation27_spill] sm:$0xff] %v7834_v57  ;;  %11275 = vst [vmem:[#allocation28_spill] sm:$0xff] %v7837_v31  ;;  %v3573_v56 = vmul.f32 %v7729_v52, %v651_v27  ;;  %v1265_v50 = vmul.f32 %v7715_v2, %v714_v60  ;;  %v1266_v1 = vmul.f32 %v7717_v23, %v714_v60  ;;  %v11286_v27 = vld [vmem:[#allocation18_spill] sm:$0xff] }
 0x230   : > { %11277 = vst [vmem:[#allocation29_spill] sm:$0xff] %v7840_v41  ;;  %11279 = vst [vmem:[#allocation253_spill] sm:$0xff] %v7843_v28  ;;  %v2048_v45 = vmul.f32 %v7719_v33, %v714_v60  ;;  %v2049_v12 = vmul.f32 %v7721_v36, %v714_v60  ;;  %v2825_v59 = vmul.f32 %v7723_v10, %v714_v60  ;;  %v11292_v41 = vld [vmem:[#allocation21_spill] sm:$0xff]  ;;  %v11294_v57 = vld [vmem:[#allocation22_spill] sm:$0xff] }
 0x231   : > { %11281 = vst [vmem:[#allocation254_spill] sm:$0xff] %v7846_v30  ;;  %11283 = vst [vmem:[#allocation255_spill] sm:$0xff] %v7849_v38  ;;  %v2826_v14 = vmul.f32 %v7725_v54, %v714_v60  ;;  %v3602_v51 = vmul.f32 %v7727_v53, %v714_v60  ;;  %v3603_v26 = vmul.f32 %v7729_v52, %v714_v60  ;;  %v11290_v30 = vld [vmem:[#allocation20_spill] sm:$0xff] }
 0x232   : > { %v7868_v49 = vadd.f32 %v1235_v8, %v11284_v18  ;;  %v7871_v9 = vadd.f32 %v1236_v13, %v11286_v27  ;;  %v7874_v38 = vadd.f32 %v2018_v63, %v11288_v48  ;;  %v7877_v28 = vadd.f32 %v2019_v47, %v11290_v30  ;;  %v11298_v18 = vld [vmem:[#allocation24_spill] sm:$0xff]  ;;  %v710_v13 = vpop.permute.xlu0 %709 }
 0x233   : > { %v7880_v31 = vadd.f32 %v2795_v6, %v11292_v41  ;;  %v7883_v39 = vadd.f32 %v2796_v61, %v11294_v57  ;;  %v7886_v60 = vadd.f32 %v3572_v32, %v11296_v16  ;;  %v7889_v8 = vadd.f32 %v3573_v56, %v11298_v18  ;;  %v11300_v57 = vld [vmem:[#allocation126_spill] sm:$0xff]  ;;  %v11301_v16 = vld [vmem:[#allocation127_spill] sm:$0xff]  ;;  %v11302_v6 = vld [vmem:[#allocation128_spill] sm:$0xff] }
 0x234   : > { %11285 = vst [vmem:[#allocation17_spill] sm:$0xff] %v7868_v49  ;;  %11287 = vst [vmem:[#allocation18_spill] sm:$0xff] %v7871_v9  ;;  %v7892_v27 = vadd.f32 %v1265_v50, %v7119_v29  ;;  %v7895_v48 = vadd.f32 %v1266_v1, %v7121_v40  ;;  %v7898_v30 = vadd.f32 %v2048_v45, %v7123_v5  ;;  %v11303_v29 = vld [vmem:[#allocation129_spill] sm:$0xff] }
 0x235   : > { %11289 = vst [vmem:[#allocation19_spill] sm:$0xff] %v7874_v38  ;;  %11291 = vst [vmem:[#allocation20_spill] sm:$0xff] %v7877_v28  ;;  %v7901_v41 = vadd.f32 %v2049_v12, %v7125_v43  ;;  %v7904_v63 = vadd.f32 %v2825_v59, %v11300_v57  ;;  %v7907_v47 = vadd.f32 %v2826_v14, %v11301_v16  ;;  %v11311_v38 = vld [vmem:[#allocation132_spill] sm:$0xff]  ;;  %v11312_v49 = vld [vmem:[#allocation133_spill] sm:$0xff] }
 0x236   : > { %11293 = vst [vmem:[#allocation21_spill] sm:$0xff] %v7880_v31  ;;  %11295 = vst [vmem:[#allocation22_spill] sm:$0xff] %v7883_v39  ;;  %v7910_v61 = vadd.f32 %v3602_v51, %v11302_v6  ;;  %v7913_v32 = vadd.f32 %v3603_v26, %v11303_v29  ;;  %v1263_v40 = vmul.f32 %v7715_v2, %v710_v13  ;;  %v846_v6 = vpop.permute.xlu1 %845  ;;  %v11309_v31 = vld [vmem:[#allocation130_spill] sm:$0xff]  ;;  %v718_v42 = vpop.permute.xlu0 %717 }
 0x237   : > { %11297 = vst [vmem:[#allocation23_spill] sm:$0xff] %v7886_v60  ;;  %11299 = vst [vmem:[#allocation24_spill] sm:$0xff] %v7889_v8  ;;  %v1264_v5 = vmul.f32 %v7717_v23, %v710_v13  ;;  %v2046_v56 = vmul.f32 %v7719_v33, %v710_v13  ;;  %v2047_v43 = vmul.f32 %v7721_v36, %v710_v13 }
 0x238   : > { %v2823_v50 = vmul.f32 %v7723_v10, %v710_v13  ;;  %v2824_v1 = vmul.f32 %v7725_v54, %v710_v13  ;;  %v3600_v14 = vmul.f32 %v7727_v53, %v710_v13  ;;  %v3601_v51 = vmul.f32 %v7729_v52, %v710_v13 }
 0x239   : > { %v1362_v26 = vrot.slane %v7696_v58, %v7758_v15  ;;  %v1366_v45 = vrot.slane %v7696_v58, %v7761_v35  ;;  %v2145_v12 = vrot.slane %v7701_v55, %v7758_v15  ;;  %v2149_v59 = vrot.slane %v7701_v55, %v7761_v35 }
 0x23a   : > { %v2922_v18 = vrot.slane %v7706_v21, %v7758_v15  ;;  %v2926_v57 = vrot.slane %v7706_v21, %v7761_v35  ;;  %v3699_v13 = vrot.slane %v7711_v19, %v7758_v15  ;;  %v3703_v16 = vrot.slane %v7711_v19, %v7761_v35 }
 0x23b   : > { %v7940_v58 = vrot.slane %v1362_v26, %v7758_v15  ;;  %v7943_v29 = vrot.slane %v1366_v45, %v7758_v15  ;;  %v7946_v55 = vrot.slane %v2145_v12, %v7758_v15  ;;  %v7949_v8 = vrot.slane %v2149_v59, %v7758_v15 }
 0x23c   : > { %v7952_v21 = vrot.slane %v2922_v18, %v7758_v15  ;;  %v7955_v60 = vrot.slane %v2926_v57, %v7758_v15  ;;  %v7958_v19 = vrot.slane %v3699_v13, %v7758_v15  ;;  %v7961_v35 = vrot.slane %v3703_v16, %v7758_v15  ;;  %v11310_v15 = vld [vmem:[#allocation131_spill] sm:$0xff] }
 0x23d   : > { %11304 = vst [vmem:[#allocation126_spill] sm:$0xff] %v7949_v8  ;;  %v1409_v26 = vmul.f32 %v7940_v58, %v846_v6  ;;  %v1410_v45 = vmul.f32 %v7943_v29, %v846_v6  ;;  %v2192_v12 = vmul.f32 %v7946_v55, %v846_v6  ;;  %v2193_v59 = vmul.f32 %v7949_v8, %v846_v6 }
 0x23e   : > { %11305 = vst [vmem:[#allocation127_spill] sm:$0xff] %v7952_v21  ;;  %11306 = vst [vmem:[#allocation128_spill] sm:$0xff] %v7955_v60  ;;  %v2969_v18 = vmul.f32 %v7952_v21, %v846_v6  ;;  %v2970_v39 = vmul.f32 %v7955_v60, %v846_v6  ;;  %v3746_v57 = vmul.f32 %v7958_v19, %v846_v6 }
 0x23f   : > { %11307 = vst [vmem:[#allocation129_spill] sm:$0xff] %v7958_v19  ;;  %11308 = vst [vmem:[#allocation284_spill] sm:$0xff] %v7961_v35  ;;  %v3747_v13 = vmul.f32 %v7961_v35, %v846_v6  ;;  %v1327_v28 = vadd.f32 %v1263_v40, %v11309_v31  ;;  %v1328_v16 = vadd.f32 %v1264_v5, %v11310_v15  ;;  %v11325_v15 = vld [vmem:[#allocation150_spill] sm:$0xff] }
 0x240   : > { %v2110_v9 = vadd.f32 %v2046_v56, %v11311_v38  ;;  %v2111_v7 = vadd.f32 %v2047_v43, %v11312_v49  ;;  %v2887_v17 = vadd.f32 %v2823_v50, %v11313_v4  ;;  %v2888_v25 = vadd.f32 %v2824_v1, %v11314_v62  ;;  %v11327_v50 = vld [vmem:[#allocation151_spill] sm:$0xff] }
 0x241   : > { %v3664_v20 = vadd.f32 %v3600_v14, %v11315_v11  ;;  %v3665_v37 = vadd.f32 %v3601_v51, %v11316_v44  ;;  %v7979_v0 = vadd.f32 %v1409_v26, %v1327_v28  ;;  %v7981_v6 = vadd.f32 %v1410_v45, %v1328_v16  ;;  %v722_v51 = vpop.permute.xlu1 %721  ;;  %v11317_v26 = vld [vmem:[#allocation146_spill] sm:$0xff]  ;;  %v11329_v14 = vld [vmem:[#allocation152_spill] sm:$0xff] }
 0x242   : > { %v7983_v31 = vadd.f32 %v2192_v12, %v2110_v9  ;;  %v7985_v40 = vadd.f32 %v2193_v59, %v2111_v7  ;;  %v7987_v38 = vadd.f32 %v2969_v18, %v2887_v17  ;;  %v7989_v49 = vadd.f32 %v2970_v39, %v2888_v25  ;;  %v11321_v59 = vld [vmem:[#allocation148_spill] sm:$0xff] }
 0x243   : > { %v7991_v4 = vadd.f32 %v3746_v57, %v3664_v20  ;;  %v7993_v62 = vadd.f32 %v3747_v13, %v3665_v37  ;;  %v1267_v11 = vmul.f32 %v7715_v2, %v718_v42  ;;  %v1268_v44 = vmul.f32 %v7717_v23, %v718_v42  ;;  %v11323_v57 = vld [vmem:[#allocation149_spill] sm:$0xff] }
 0x244   : > { %v2050_v28 = vmul.f32 %v7719_v33, %v718_v42  ;;  %v2051_v5 = vmul.f32 %v7721_v36, %v718_v42  ;;  %v2827_v9 = vmul.f32 %v7723_v10, %v718_v42  ;;  %v2828_v7 = vmul.f32 %v7725_v54, %v718_v42 }
 0x245   : > { %v3604_v17 = vmul.f32 %v7727_v53, %v718_v42  ;;  %v3605_v25 = vmul.f32 %v7729_v52, %v718_v42  ;;  %v8012_v45 = vadd.f32 %v1267_v11, %v11317_v26  ;;  %v11319_v42 = vld [vmem:[#allocation147_spill] sm:$0xff]  ;;  %v11331_v11 = vld [vmem:[#allocation153_spill] sm:$0xff] }
 0x246   : > { %v8015_v12 = vadd.f32 %v1268_v44, %v11319_v42  ;;  %v8018_v18 = vadd.f32 %v2050_v28, %v11321_v59  ;;  %v8021_v13 = vadd.f32 %v2051_v5, %v11323_v57  ;;  %v8024_v16 = vadd.f32 %v2827_v9, %v11325_v15  ;;  %v850_v44 = vpop.permute.xlu0 %849 }
 0x247   : > { %11318 = vst [vmem:[#allocation130_spill] sm:$0xff] %v8012_v45  ;;  %v8027_v1 = vadd.f32 %v2828_v7, %v11327_v50  ;;  %v8030_v43 = vadd.f32 %v3604_v17, %v11329_v14  ;;  %v8033_v26 = vadd.f32 %v3605_v25, %v11331_v11  ;;  %v1269_v42 = vmul.f32 %v7715_v2, %v722_v51  ;;  %v11359_v45 = vld [vmem:[#allocation252_spill] sm:$0xff] }
 0x248   : > { %11320 = vst [vmem:[#allocation131_spill] sm:$0xff] %v8015_v12  ;;  %11322 = vst [vmem:[#allocation132_spill] sm:$0xff] %v8018_v18  ;;  %v1270_v28 = vmul.f32 %v7717_v23, %v722_v51  ;;  %v2052_v5 = vmul.f32 %v7719_v33, %v722_v51  ;;  %v2053_v59 = vmul.f32 %v7721_v36, %v722_v51  ;;  %v11358_v18 = vld [vmem:[#allocation251_spill] sm:$0xff] }
 0x249   : > { %11324 = vst [vmem:[#allocation133_spill] sm:$0xff] %v8021_v13  ;;  %11326 = vst [vmem:[#allocation134_spill] sm:$0xff] %v8024_v16  ;;  %v2829_v9 = vmul.f32 %v7723_v10, %v722_v51  ;;  %v2830_v7 = vmul.f32 %v7725_v54, %v722_v51  ;;  %v3606_v50 = vmul.f32 %v7727_v53, %v722_v51 }
 0x24a   : > { %11328 = vst [vmem:[#allocation135_spill] sm:$0xff] %v8027_v1  ;;  %11330 = vst [vmem:[#allocation136_spill] sm:$0xff] %v8030_v43  ;;  %v3607_v17 = vmul.f32 %v7729_v52, %v722_v51  ;;  %v1411_v25 = vmul.f32 %v7940_v58, %v850_v44  ;;  %v1412_v14 = vmul.f32 %v7943_v29, %v850_v44 }
 0x24b   : > { %11332 = vst [vmem:[#allocation137_spill] sm:$0xff] %v8033_v26  ;;  %v2194_v57 = vmul.f32 %v7946_v55, %v850_v44  ;;  %v2195_v15 = vmul.f32 %v7949_v8, %v850_v44  ;;  %v2971_v11 = vmul.f32 %v7952_v21, %v850_v44  ;;  %v2972_v56 = vmul.f32 %v7955_v60, %v850_v44 }
 0x24c   : > { %v3748_v39 = vmul.f32 %v7958_v19, %v850_v44  ;;  %v3749_v37 = vmul.f32 %v7961_v35, %v850_v44  ;;  %v8052_v20 = vadd.f32 %v1411_v25, %v7892_v27  ;;  %v8055_v51 = vadd.f32 %v1412_v14, %v7895_v48  ;;  %v11333_v48 = vld [vmem:[#allocation138_spill] sm:$0xff] }
 0x24d   : > { %v8058_v26 = vadd.f32 %v2194_v57, %v7898_v30  ;;  %v8061_v43 = vadd.f32 %v2195_v15, %v7901_v41  ;;  %v8064_v1 = vadd.f32 %v2971_v11, %v7904_v63  ;;  %v8067_v16 = vadd.f32 %v2972_v56, %v7907_v47  ;;  %v11335_v30 = vld [vmem:[#allocation139_spill] sm:$0xff]  ;;  %v11337_v41 = vld [vmem:[#allocation140_spill] sm:$0xff]  ;;  %v11339_v63 = vld [vmem:[#allocation141_spill] sm:$0xff] }
 0x24e   : > { %v8070_v44 = vadd.f32 %v3748_v39, %v7910_v61  ;;  %v8073_v27 = vadd.f32 %v3749_v37, %v7913_v32  ;;  %v8076_v25 = vadd.f32 %v1269_v42, %v11333_v48  ;;  %v8079_v14 = vadd.f32 %v1270_v28, %v11335_v30  ;;  %v11341_v47 = vld [vmem:[#allocation142_spill] sm:$0xff]  ;;  %v11343_v61 = vld [vmem:[#allocation143_spill] sm:$0xff]  ;;  %v11345_v32 = vld [vmem:[#allocation144_spill] sm:$0xff]  ;;  %v783_v28 = vpop.permute.xlu1 %782 }
 0x24f   : > { %v8082_v57 = vadd.f32 %v2052_v5, %v11337_v41  ;;  %v8085_v15 = vadd.f32 %v2053_v59, %v11339_v63  ;;  %v8088_v56 = vadd.f32 %v2829_v9, %v11341_v47  ;;  %v8091_v39 = vadd.f32 %v2830_v7, %v11343_v61  ;;  %v11347_v42 = vld [vmem:[#allocation145_spill] sm:$0xff] }
 0x250   : > { %11334 = vst [vmem:[#allocation146_spill] sm:$0xff] %v8076_v25  ;;  %11336 = vst [vmem:[#allocation147_spill] sm:$0xff] %v8079_v14  ;;  %v8094_v37 = vadd.f32 %v3606_v50, %v11345_v32  ;;  %v8097_v11 = vadd.f32 %v3607_v17, %v11347_v42  ;;  %v1379_v17 = vmul.f32 %v7940_v58, %v783_v28  ;;  %v11349_v48 = vld [vmem:[#allocation245_spill] sm:$0xff] }
 0x251   : > { %11338 = vst [vmem:[#allocation148_spill] sm:$0xff] %v8082_v57  ;;  %11340 = vst [vmem:[#allocation149_spill] sm:$0xff] %v8085_v15  ;;  %v1380_v63 = vmul.f32 %v7943_v29, %v783_v28  ;;  %v2162_v47 = vmul.f32 %v7946_v55, %v783_v28  ;;  %v2163_v61 = vmul.f32 %v7949_v8, %v783_v28  ;;  %v779_v57 = vpop.permute.xlu0 %778 }
 0x252   : > { %11342 = vst [vmem:[#allocation150_spill] sm:$0xff] %v8088_v56  ;;  %11344 = vst [vmem:[#allocation151_spill] sm:$0xff] %v8091_v39  ;;  %v2939_v32 = vmul.f32 %v7952_v21, %v783_v28  ;;  %v2940_v42 = vmul.f32 %v7955_v60, %v783_v28  ;;  %v3716_v9 = vmul.f32 %v7958_v19, %v783_v28  ;;  %v11351_v56 = vld [vmem:[#allocation246_spill] sm:$0xff] }
 0x253   : > { %11346 = vst [vmem:[#allocation152_spill] sm:$0xff] %v8094_v37  ;;  %11348 = vst [vmem:[#allocation153_spill] sm:$0xff] %v8097_v11  ;;  %v3717_v7 = vmul.f32 %v7961_v35, %v783_v28  ;;  %v1443_v41 = vadd.f32 %v1379_v17, %v7764_v34  ;;  %v1444_v50 = vadd.f32 %v1380_v63, %v7767_v22  ;;  %v11350_v37 = vld [vmem:[#allocation281_spill] sm:$0xff] }
 0x254   : > { %v2226_v30 = vadd.f32 %v2162_v47, %v7770_v3  ;;  %v2227_v59 = vadd.f32 %v2163_v61, %v7773_v24  ;;  %v3003_v5 = vadd.f32 %v2939_v32, %v7776_v46  ;;  %v3004_v11 = vadd.f32 %v2940_v42, %v11349_v48  ;;  %v11356_v47 = vld [vmem:[#allocation249_spill] sm:$0xff]  ;;  %v11357_v32 = vld [vmem:[#allocation250_spill] sm:$0xff] }
 0x255   : > { %v3780_v39 = vadd.f32 %v3716_v9, %v11350_v37  ;;  %v3781_v15 = vadd.f32 %v3717_v7, %v11351_v56  ;;  %v1507_v14 = vmax.f32 %v1443_v41, 0.0  ;;  %v1508_v25 = vmax.f32 %v1444_v50, 0.0  ;;  %v11355_v41 = vld [vmem:[#allocation248_spill] sm:$0xff] }
 0x256   : > { %v2290_v28 = vmax.f32 %v2226_v30, 0.0  ;;  %v2291_v13 = vmax.f32 %v2227_v59, 0.0  ;;  %v3067_v34 = vmax.f32 %v3003_v5, 0.0  ;;  %v3068_v17 = vmax.f32 %v3004_v11, 0.0  ;;  %v11352_v5 = vld [vmem:[#allocation282_spill] sm:$0xff]  ;;  %v11354_v30 = vld [vmem:[#allocation247_spill] sm:$0xff] }
 0x257   : > { %v3844_v22 = vmax.f32 %v3780_v39, 0.0  ;;  %v3845_v63 = vmax.f32 %v3781_v15, 0.0  ;;  %v1377_v3 = vmul.f32 %v7940_v58, %v779_v57  ;;  %v1378_v24 = vmul.f32 %v7943_v29, %v779_v57  ;;  %v11353_v39 = vld [vmem:[#allocation283_spill] sm:$0xff] }
 0x258   : > { %v2160_v46 = vmul.f32 %v7946_v55, %v779_v57  ;;  %v2161_v48 = vmul.f32 %v7949_v8, %v779_v57  ;;  %v2937_v37 = vmul.f32 %v7952_v21, %v779_v57  ;;  %v2938_v56 = vmul.f32 %v7955_v60, %v779_v57 }
 0x259   : > { %v3714_v9 = vmul.f32 %v7958_v19, %v779_v57  ;;  %v3715_v59 = vmul.f32 %v7961_v35, %v779_v57  ;;  %v1441_v11 = vadd.f32 %v1377_v3, %v11352_v5  ;;  %v1442_v15 = vadd.f32 %v1378_v24, %v11353_v39 }
 0x25a   : > { %v2224_v7 = vadd.f32 %v2160_v46, %v11354_v30  ;;  %v2225_v50 = vadd.f32 %v2161_v48, %v11355_v41  ;;  %v3001_v61 = vadd.f32 %v2937_v37, %v11356_v47  ;;  %v3002_v42 = vadd.f32 %v2938_v56, %v11357_v32  ;;  %v11376_v47 = vld [vmem:[#allocation126_spill] sm:$0xff]  ;;  %v11377_v32 = vld [vmem:[#allocation127_spill] sm:$0xff] }
 0x25b   : > { %v3778_v12 = vadd.f32 %v3714_v9, %v11358_v18  ;;  %v3779_v60 = vadd.f32 %v3715_v59, %v11359_v45  ;;  %v1505_v21 = vmax.f32 %v1441_v11, 0.0  ;;  %v1506_v19 = vmax.f32 %v1442_v15, 0.0  ;;  %v726_v59 = vpop.permute.xlu1 %725 }
 0x25c   : > { %v2288_v8 = vmax.f32 %v2224_v7, 0.0  ;;  %v2289_v57 = vmax.f32 %v2225_v50, 0.0  ;;  %v3065_v35 = vmax.f32 %v3001_v61, 0.0  ;;  %v3066_v3 = vmax.f32 %v3002_v42, 0.0 }
 0x25d   : > { %v3842_v5 = vmax.f32 %v3778_v12, 0.0  ;;  %v3843_v24 = vmax.f32 %v3779_v60, 0.0  ;;  %v8139_v39 = vadd.f32 %v1507_v14, %v1505_v21  ;;  %v8141_v46 = vadd.f32 %v1508_v25, %v1506_v19 }
 0x25e   : > { %v8143_v48 = vadd.f32 %v2290_v28, %v2288_v8  ;;  %v8145_v37 = vadd.f32 %v2291_v13, %v2289_v57  ;;  %v8147_v56 = vadd.f32 %v3067_v34, %v3065_v35  ;;  %v8149_v18 = vadd.f32 %v3068_v17, %v3066_v3  ;;  %v11378_v57 = vld [vmem:[#allocation128_spill] sm:$0xff] }
 0x25f   : > { %v8151_v45 = vadd.f32 %v3844_v22, %v3842_v5  ;;  %v8153_v9 = vadd.f32 %v3845_v63, %v3843_v24  ;;  %v11360_v12 = vmax.f32 %v7979_v0, 0.0  ;;  %v11361_v60 = vmax.f32 %v8052_v20, 0.0  ;;  %v11379_v5 = vld [vmem:[#allocation129_spill] sm:$0xff] }
 0x260   : > { %v11362_v8 = vmax.f32 %v7981_v6, 0.0  ;;  %v11363_v19 = vmax.f32 %v8055_v51, 0.0  ;;  %v11364_v35 = vmax.f32 %v7983_v31, 0.0  ;;  %v11365_v25 = vmax.f32 %v8058_v26, 0.0 }
 0x261   : > { %v8159_v21 = vadd.f32 %v11361_v60, %v11360_v12  ;;  %v11366_v28 = vmax.f32 %v7985_v40, 0.0  ;;  %v11367_v0 = vmax.f32 %v8061_v43, 0.0  ;;  %v11368_v20 = vmax.f32 %v7987_v38, 0.0  ;;  %v11380_v12 = vld [vmem:[#allocation284_spill] sm:$0xff] }
 0x262   : > { %v8165_v13 = vadd.f32 %v11363_v19, %v11362_v8  ;;  %v8171_v14 = vadd.f32 %v11365_v25, %v11364_v35  ;;  %v11369_v6 = vmax.f32 %v8064_v1, 0.0  ;;  %v11370_v51 = vmax.f32 %v7989_v49, 0.0  ;;  %v854_v1 = vpop.permute.xlu0 %853  ;;  %v11381_v8 = vld [vmem:[#allocation130_spill] sm:$0xff]  ;;  %v11382_v35 = vld [vmem:[#allocation131_spill] sm:$0xff]  ;;  %v11383_v25 = vld [vmem:[#allocation132_spill] sm:$0xff] }
 0x263   : > { %v8177_v34 = vadd.f32 %v11367_v0, %v11366_v28  ;;  %v11371_v31 = vmax.f32 %v8067_v16, 0.0  ;;  %v11372_v26 = vmax.f32 %v7991_v4, 0.0  ;;  %v11373_v40 = vmax.f32 %v8070_v44, 0.0  ;;  %v11384_v0 = vld [vmem:[#allocation133_spill] sm:$0xff] }
 0x264   : > { %v8183_v17 = vadd.f32 %v11369_v6, %v11368_v20  ;;  %v11374_v43 = vmax.f32 %v7993_v62, 0.0  ;;  %v11375_v38 = vmax.f32 %v8073_v27, 0.0  ;;  %v1271_v15 = vmul.f32 %v7715_v2, %v726_v59  ;;  %v11385_v6 = vld [vmem:[#allocation134_spill] sm:$0xff] }
 0x265   : > { %v8189_v22 = vadd.f32 %v11371_v31, %v11370_v51  ;;  %v8195_v63 = vadd.f32 %v11373_v40, %v11372_v26  ;;  %v1272_v49 = vmul.f32 %v7717_v23, %v726_v59  ;;  %v2054_v16 = vmul.f32 %v7719_v33, %v726_v59  ;;  %v11386_v31 = vld [vmem:[#allocation135_spill] sm:$0xff]  ;;  %v11387_v40 = vld [vmem:[#allocation136_spill] sm:$0xff] }
 0x266   : > { %v8201_v11 = vadd.f32 %v11375_v38, %v11374_v43  ;;  %v2055_v30 = vmul.f32 %v7721_v36, %v726_v59  ;;  %v2831_v4 = vmul.f32 %v7723_v10, %v726_v59  ;;  %v2832_v44 = vmul.f32 %v7725_v54, %v726_v59  ;;  %v11388_v38 = vld [vmem:[#allocation137_spill] sm:$0xff] }
 0x267   : > { %v3608_v7 = vmul.f32 %v7727_v53, %v726_v59  ;;  %v3609_v62 = vmul.f32 %v7729_v52, %v726_v59  ;;  %v1413_v27 = vmul.f32 %v7940_v58, %v854_v1  ;;  %v1414_v41 = vmul.f32 %v7943_v29, %v854_v1  ;;  %v11389_v53 = vld [vmem:[#allocation162_spill] sm:$0xff] }
 0x268   : > { %v2196_v50 = vmul.f32 %v7946_v55, %v854_v1  ;;  %v2197_v61 = vmul.f32 %v11376_v47, %v854_v1  ;;  %v2973_v42 = vmul.f32 %v11377_v32, %v854_v1  ;;  %v2974_v3 = vmul.f32 %v11378_v57, %v854_v1 }
 0x269   : > { %v3750_v24 = vmul.f32 %v11379_v5, %v854_v1  ;;  %v3751_v60 = vmul.f32 %v11380_v12, %v854_v1  ;;  %v1477_v19 = vadd.f32 %v1413_v27, %v11381_v8  ;;  %v1478_v59 = vadd.f32 %v1414_v41, %v11382_v35  ;;  %v11391_v1 = vld [vmem:[#allocation163_spill] sm:$0xff]  ;;  %v11393_v27 = vld [vmem:[#allocation164_spill] sm:$0xff] }
 0x26a   : > { %v2260_v28 = vadd.f32 %v2196_v50, %v11383_v25  ;;  %v2261_v20 = vadd.f32 %v2197_v61, %v11384_v0  ;;  %v3037_v51 = vadd.f32 %v2973_v42, %v11385_v6  ;;  %v3038_v26 = vadd.f32 %v2974_v3, %v11386_v31  ;;  %v11395_v50 = vld [vmem:[#allocation165_spill] sm:$0xff]  ;;  %v11397_v61 = vld [vmem:[#allocation166_spill] sm:$0xff]  ;;  %v11399_v3 = vld [vmem:[#allocation167_spill] sm:$0xff] }
 0x26b   : > { %v3814_v43 = vadd.f32 %v3750_v24, %v11387_v40  ;;  %v3815_v52 = vadd.f32 %v3751_v60, %v11388_v38  ;;  %v8228_v54 = vadd.f32 %v1271_v15, %v11389_v53  ;;  %v8231_v10 = vadd.f32 %v1272_v49, %v11391_v1  ;;  %v11401_v24 = vld [vmem:[#allocation168_spill] sm:$0xff]  ;;  %v11403_v53 = vld [vmem:[#allocation169_spill] sm:$0xff]  ;;  %v858_v49 = vpop.permute.xlu1 %857 }
 0x26c   : > { %v8234_v41 = vadd.f32 %v2054_v16, %v11393_v27  ;;  %v8237_v8 = vadd.f32 %v2055_v30, %v11395_v50  ;;  %v8240_v42 = vadd.f32 %v2831_v4, %v11397_v61  ;;  %v8243_v35 = vadd.f32 %v2832_v44, %v11399_v3  ;;  %v11408_v50 = vld [vmem:[#allocation149_spill] sm:$0xff]  ;;  %v11409_v3 = vld [vmem:[#allocation150_spill] sm:$0xff] }
 0x26d   : > { %11390 = vst [vmem:[#allocation138_spill] sm:$0xff] %v8228_v54  ;;  %11392 = vst [vmem:[#allocation139_spill] sm:$0xff] %v8231_v10  ;;  %v8246_v60 = vadd.f32 %v3608_v7, %v11401_v24  ;;  %v8249_v15 = vadd.f32 %v3609_v62, %v11403_v53  ;;  %v1541_v25 = vmax.f32 %v1477_v19, 0.0  ;;  %v1542_v0 = vmax.f32 %v1478_v59, 0.0  ;;  %v11410_v53 = vld [vmem:[#allocation151_spill] sm:$0xff] }
 0x26e   : > { %11394 = vst [vmem:[#allocation140_spill] sm:$0xff] %v8234_v41  ;;  %11396 = vst [vmem:[#allocation141_spill] sm:$0xff] %v8237_v8  ;;  %v2324_v16 = vmax.f32 %v2260_v28, 0.0  ;;  %v2325_v6 = vmax.f32 %v2261_v20, 0.0  ;;  %v3101_v31 = vmax.f32 %v3037_v51, 0.0  ;;  %v3102_v30 = vmax.f32 %v3038_v26, 0.0 }
 0x26f   : > { %11398 = vst [vmem:[#allocation142_spill] sm:$0xff] %v8240_v42  ;;  %11400 = vst [vmem:[#allocation143_spill] sm:$0xff] %v8243_v35  ;;  %v3878_v40 = vmax.f32 %v3814_v43, 0.0  ;;  %v3879_v38 = vmax.f32 %v3815_v52, 0.0  ;;  %v1415_v4 = vmul.f32 %v7940_v58, %v858_v49  ;;  %v1416_v44 = vmul.f32 %v7943_v29, %v858_v49  ;;  %v11405_v28 = vld [vmem:[#allocation146_spill] sm:$0xff]  ;;  %v11406_v52 = vld [vmem:[#allocation147_spill] sm:$0xff] }
 0x270   : > { %11402 = vst [vmem:[#allocation144_spill] sm:$0xff] %v8246_v60  ;;  %11404 = vst [vmem:[#allocation145_spill] sm:$0xff] %v8249_v15  ;;  %v2198_v1 = vmul.f32 %v7946_v55, %v858_v49  ;;  %v2199_v7 = vmul.f32 %v11376_v47, %v858_v49  ;;  %v2975_v62 = vmul.f32 %v11377_v32, %v858_v49  ;;  %v11407_v26 = vld [vmem:[#allocation148_spill] sm:$0xff] }
 0x271   : > { %v2976_v27 = vmul.f32 %v11378_v57, %v858_v49  ;;  %v3752_v19 = vmul.f32 %v11379_v5, %v858_v49  ;;  %v3753_v59 = vmul.f32 %v11380_v12, %v858_v49  ;;  %v8260_v20 = vadd.f32 %v1415_v4, %v11405_v28  ;;  %v11411_v60 = vld [vmem:[#allocation152_spill] sm:$0xff]  ;;  %v11412_v4 = vld [vmem:[#allocation153_spill] sm:$0xff] }
 0x272   : > { %v8263_v51 = vadd.f32 %v1416_v44, %v11406_v52  ;;  %v8266_v43 = vadd.f32 %v2198_v1, %v11407_v26  ;;  %v8269_v61 = vadd.f32 %v2199_v7, %v11408_v50  ;;  %v8272_v24 = vadd.f32 %v2975_v62, %v11409_v3  ;;  %v11420_v42 = vld [vmem:[#allocation24_spill] sm:$0xff] }
 0x273   : > { %v8275_v15 = vadd.f32 %v2976_v27, %v11410_v53  ;;  %v8278_v49 = vadd.f32 %v3752_v19, %v11411_v60  ;;  %v8281_v28 = vadd.f32 %v3753_v59, %v11412_v4  ;;  %v1613_v44 = vadd.f32 %v8159_v21, %v1541_v25  ;;  %v787_v19 = vpop.permute.xlu0 %786 }
 0x274   : > { %v1634_v1 = vadd.f32 %v8165_v13, %v1542_v0  ;;  %v2396_v52 = vadd.f32 %v8171_v14, %v2324_v16  ;;  %v2417_v7 = vadd.f32 %v8177_v34, %v2325_v6  ;;  %v3173_v62 = vadd.f32 %v8183_v17, %v3101_v31 }
 0x275   : > { %v3194_v26 = vadd.f32 %v8189_v22, %v3102_v30  ;;  %v3950_v27 = vadd.f32 %v8195_v63, %v3878_v40  ;;  %v3971_v60 = vadd.f32 %v8201_v11, %v3879_v38  ;;  %v1543_v59 = vmax.f32 %v8260_v20, 0.0  ;;  %v11413_v30 = vld [vmem:[#allocation17_spill] sm:$0xff]  ;;  %v11414_v38 = vld [vmem:[#allocation18_spill] sm:$0xff] }
 0x276   : > { %v1544_v50 = vmax.f32 %v8263_v51, 0.0  ;;  %v2326_v21 = vmax.f32 %v8266_v43, 0.0  ;;  %v2327_v13 = vmax.f32 %v8269_v61, 0.0  ;;  %v3103_v14 = vmax.f32 %v8272_v24, 0.0  ;;  %v11415_v51 = vld [vmem:[#allocation19_spill] sm:$0xff]  ;;  %v11416_v61 = vld [vmem:[#allocation20_spill] sm:$0xff] }
 0x277   : > { %v3104_v34 = vmax.f32 %v8275_v15, 0.0  ;;  %v3880_v17 = vmax.f32 %v8278_v49, 0.0  ;;  %v3881_v22 = vmax.f32 %v8281_v28, 0.0  ;;  %v1381_v63 = vmul.f32 %v7940_v58, %v787_v19  ;;  %v11417_v24 = vld [vmem:[#allocation21_spill] sm:$0xff]  ;;  %v11418_v49 = vld [vmem:[#allocation22_spill] sm:$0xff]  ;;  %v11419_v28 = vld [vmem:[#allocation23_spill] sm:$0xff] }
 0x278   : > { %v1382_v11 = vmul.f32 %v7943_v29, %v787_v19  ;;  %v2164_v25 = vmul.f32 %v7946_v55, %v787_v19  ;;  %v2165_v0 = vmul.f32 %v11376_v47, %v787_v19  ;;  %v2941_v16 = vmul.f32 %v11377_v32, %v787_v19 }
 0x279   : > { %v2942_v6 = vmul.f32 %v11378_v57, %v787_v19  ;;  %v3718_v31 = vmul.f32 %v11379_v5, %v787_v19  ;;  %v3719_v15 = vmul.f32 %v11380_v12, %v787_v19  ;;  %v1445_v40 = vadd.f32 %v1381_v63, %v11413_v30 }
 0x27a   : > { %v1446_v20 = vadd.f32 %v1382_v11, %v11414_v38  ;;  %v2228_v43 = vadd.f32 %v2164_v25, %v11415_v51  ;;  %v2229_v3 = vadd.f32 %v2165_v0, %v11416_v61  ;;  %v3005_v53 = vadd.f32 %v2941_v16, %v11417_v24  ;;  %v730_v38 = vpop.permute.xlu1 %729 }
 0x27b   : > { %v3006_v4 = vadd.f32 %v2942_v6, %v11418_v49  ;;  %v3782_v35 = vadd.f32 %v3718_v31, %v11419_v28  ;;  %v3783_v8 = vadd.f32 %v3719_v15, %v11420_v42  ;;  %v1509_v41 = vmax.f32 %v1445_v40, 0.0  ;;  %v11424_v15 = vld [vmem:[#allocation274_spill] sm:$0xff] }
 0x27c   : > { %v1510_v10 = vmax.f32 %v1446_v20, 0.0  ;;  %v2292_v54 = vmax.f32 %v2228_v43, 0.0  ;;  %v2293_v19 = vmax.f32 %v2229_v3, 0.0  ;;  %v3069_v12 = vmax.f32 %v3005_v53, 0.0  ;;  %v659_v53 = vpop.permute.xlu0 %658  ;;  %v11425_v49 = vld [vmem:[#allocation154_spill] sm:$0xff] }
 0x27d   : > { %v3070_v63 = vmax.f32 %v3006_v4, 0.0  ;;  %v3846_v30 = vmax.f32 %v3782_v35, 0.0  ;;  %v3847_v11 = vmax.f32 %v3783_v8, 0.0  ;;  %v8316_v25 = vadd.f32 %v8139_v39, %v1509_v41 }
 0x27e   : > { %v8319_v0 = vadd.f32 %v8141_v46, %v1510_v10  ;;  %v8322_v16 = vadd.f32 %v8143_v48, %v2292_v54  ;;  %v8325_v42 = vadd.f32 %v8145_v37, %v2293_v19  ;;  %v8328_v6 = vadd.f32 %v8147_v56, %v3069_v12  ;;  %v11421_v37 = vld [vmem:[#allocation271_spill] sm:$0xff]  ;;  %v11422_v12 = vld [vmem:[#allocation272_spill] sm:$0xff] }
 0x27f   : > { %v8331_v31 = vadd.f32 %v8149_v18, %v3070_v63  ;;  %v8334_v8 = vadd.f32 %v8151_v45, %v3846_v30  ;;  %v8337_v39 = vadd.f32 %v8153_v9, %v3847_v11  ;;  %v1273_v10 = vmul.f32 %v7715_v2, %v730_v38  ;;  %v11423_v18 = vld [vmem:[#allocation273_spill] sm:$0xff] }
 0x280   : > { %v1274_v54 = vmul.f32 %v7717_v23, %v730_v38  ;;  %v2056_v46 = vmul.f32 %v7719_v33, %v730_v38  ;;  %v2057_v48 = vmul.f32 %v7721_v36, %v730_v38  ;;  %v2833_v56 = vmul.f32 %v11421_v37, %v730_v38 }
 0x281   : > { %v2834_v41 = vmul.f32 %v11422_v12, %v730_v38  ;;  %v3610_v35 = vmul.f32 %v11423_v18, %v730_v38  ;;  %v3611_v45 = vmul.f32 %v11424_v15, %v730_v38  ;;  %v8347_v40 = vadd.f32 %v1613_v44, %v1543_v59  ;;  %v11427_v44 = vld [vmem:[#allocation155_spill] sm:$0xff] }
 0x282   : > { %v8349_v9 = vadd.f32 %v1634_v1, %v1544_v50  ;;  %v8351_v20 = vadd.f32 %v2396_v52, %v2326_v21  ;;  %v8353_v51 = vadd.f32 %v2417_v7, %v2327_v13  ;;  %v8355_v43 = vadd.f32 %v3173_v62, %v3103_v14  ;;  %v11429_v1 = vld [vmem:[#allocation156_spill] sm:$0xff]  ;;  %v11431_v7 = vld [vmem:[#allocation157_spill] sm:$0xff]  ;;  %v11433_v62 = vld [vmem:[#allocation158_spill] sm:$0xff] }
 0x283   : > { %v8357_v61 = vadd.f32 %v3194_v26, %v3104_v34  ;;  %v8359_v3 = vadd.f32 %v3950_v27, %v3880_v17  ;;  %v8361_v24 = vadd.f32 %v3971_v60, %v3881_v22  ;;  %v8364_v4 = vadd.f32 %v1273_v10, %v11425_v49  ;;  %v11435_v27 = vld [vmem:[#allocation159_spill] sm:$0xff]  ;;  %v11437_v60 = vld [vmem:[#allocation160_spill] sm:$0xff]  ;;  %v11439_v14 = vld [vmem:[#allocation161_spill] sm:$0xff]  ;;  %v862_v17 = vpop.permute.xlu1 %861 }
 0x284   : > { %v8367_v59 = vadd.f32 %v1274_v54, %v11427_v44  ;;  %v8370_v52 = vadd.f32 %v2056_v46, %v11429_v1  ;;  %v8373_v50 = vadd.f32 %v2057_v48, %v11431_v7  ;;  %v8376_v26 = vadd.f32 %v2833_v56, %v11433_v62  ;;  %v11441_v49 = vld [vmem:[#allocation284_spill] sm:$0xff]  ;;  %v11442_v1 = vld [vmem:[#allocation138_spill] sm:$0xff] }
 0x285   : > { %11426 = vst [vmem:[#allocation245_spill] sm:$0xff] %v8364_v4  ;;  %v8379_v21 = vadd.f32 %v2834_v41, %v11435_v27  ;;  %v8382_v13 = vadd.f32 %v3610_v35, %v11437_v60  ;;  %v8385_v34 = vadd.f32 %v3611_v45, %v11439_v14  ;;  %v1239_v22 = vmul.f32 %v7715_v2, %v659_v53  ;;  %v11444_v27 = vld [vmem:[#allocation140_spill] sm:$0xff]  ;;  %v11445_v14 = vld [vmem:[#allocation141_spill] sm:$0xff]  ;;  %v11473_v4 = vld [vmem:[#allocation255_spill] sm:$0xff] }
 0x286   : > { %11428 = vst [vmem:[#allocation281_spill] sm:$0xff] %v8367_v59  ;;  %11430 = vst [vmem:[#allocation246_spill] sm:$0xff] %v8370_v52  ;;  %v1240_v28 = vmul.f32 %v7717_v23, %v659_v53  ;;  %v2022_v19 = vmul.f32 %v7719_v33, %v659_v53  ;;  %v2023_v63 = vmul.f32 %v7721_v36, %v659_v53  ;;  %v11448_v52 = vld [vmem:[#allocation144_spill] sm:$0xff] }
 0x287   : > { %11432 = vst [vmem:[#allocation282_spill] sm:$0xff] %v8373_v50  ;;  %11434 = vst [vmem:[#allocation283_spill] sm:$0xff] %v8376_v26  ;;  %v2799_v30 = vmul.f32 %v11421_v37, %v659_v53  ;;  %v2800_v11 = vmul.f32 %v11422_v12, %v659_v53  ;;  %v3576_v38 = vmul.f32 %v11423_v18, %v659_v53  ;;  %v11447_v26 = vld [vmem:[#allocation143_spill] sm:$0xff] }
 0x288   : > { %11436 = vst [vmem:[#allocation247_spill] sm:$0xff] %v8379_v21  ;;  %11438 = vst [vmem:[#allocation248_spill] sm:$0xff] %v8382_v13  ;;  %v3577_v10 = vmul.f32 %v11424_v15, %v659_v53  ;;  %v1417_v54 = vmul.f32 %v7940_v58, %v862_v17  ;;  %v1418_v46 = vmul.f32 %v7943_v29, %v862_v17  ;;  %v11443_v53 = vld [vmem:[#allocation139_spill] sm:$0xff]  ;;  %v11446_v13 = vld [vmem:[#allocation142_spill] sm:$0xff] }
 0x289   : > { %11440 = vst [vmem:[#allocation249_spill] sm:$0xff] %v8385_v34  ;;  %v2200_v48 = vmul.f32 %v7946_v55, %v862_v17  ;;  %v2201_v56 = vmul.f32 %v11376_v47, %v862_v17  ;;  %v2977_v41 = vmul.f32 %v11377_v32, %v862_v17  ;;  %v2978_v35 = vmul.f32 %v11378_v57, %v862_v17 }
 0x28a   : > { %v3754_v45 = vmul.f32 %v11379_v5, %v862_v17  ;;  %v3755_v44 = vmul.f32 %v11441_v49, %v862_v17  ;;  %v8404_v7 = vadd.f32 %v1417_v54, %v11442_v1  ;;  %v8407_v62 = vadd.f32 %v1418_v46, %v11443_v53  ;;  %v11449_v54 = vld [vmem:[#allocation145_spill] sm:$0xff]  ;;  %v11450_v46 = vld [vmem:[#allocation38_spill] sm:$0xff] }
 0x28b   : > { %v8410_v60 = vadd.f32 %v2200_v48, %v11444_v27  ;;  %v8413_v34 = vadd.f32 %v2201_v56, %v11445_v14  ;;  %v8416_v21 = vadd.f32 %v2977_v41, %v11446_v13  ;;  %v8419_v50 = vadd.f32 %v2978_v35, %v11447_v26  ;;  %v11452_v48 = vld [vmem:[#allocation39_spill] sm:$0xff]  ;;  %v11454_v56 = vld [vmem:[#allocation40_spill] sm:$0xff]  ;;  %v11456_v13 = vld [vmem:[#allocation41_spill] sm:$0xff] }
 0x28c   : > { %v8422_v17 = vadd.f32 %v3754_v45, %v11448_v52  ;;  %v8425_v1 = vadd.f32 %v3755_v44, %v11449_v54  ;;  %v8428_v53 = vadd.f32 %v1239_v22, %v11450_v46  ;;  %v8431_v27 = vadd.f32 %v1240_v28, %v11452_v48  ;;  %v11458_v26 = vld [vmem:[#allocation42_spill] sm:$0xff]  ;;  %v11460_v52 = vld [vmem:[#allocation43_spill] sm:$0xff]  ;;  %v11462_v44 = vld [vmem:[#allocation44_spill] sm:$0xff]  ;;  %v791_v28 = vpop.permute.xlu0 %790 }
 0x28d   : > { %v8434_v14 = vadd.f32 %v2022_v19, %v11454_v56  ;;  %v8437_v41 = vadd.f32 %v2023_v63, %v11456_v13  ;;  %v8440_v35 = vadd.f32 %v2799_v30, %v11458_v26  ;;  %v8443_v45 = vadd.f32 %v2800_v11, %v11460_v52  ;;  %v11464_v22 = vld [vmem:[#allocation45_spill] sm:$0xff] }
 0x28e   : > { %11451 = vst [vmem:[#allocation250_spill] sm:$0xff] %v8428_v53  ;;  %11453 = vst [vmem:[#allocation251_spill] sm:$0xff] %v8431_v27  ;;  %v8446_v54 = vadd.f32 %v3576_v38, %v11462_v44  ;;  %v8449_v46 = vadd.f32 %v3577_v10, %v11464_v22  ;;  %v1545_v48 = vmax.f32 %v8404_v7, 0.0  ;;  %v1546_v19 = vmax.f32 %v8407_v62, 0.0  ;;  %v11466_v52 = vld [vmem:[#allocation25_spill] sm:$0xff]  ;;  %v11467_v44 = vld [vmem:[#allocation26_spill] sm:$0xff] }
 0x28f   : > { %11455 = vst [vmem:[#allocation252_spill] sm:$0xff] %v8434_v14  ;;  %11457 = vst [vmem:[#allocation130_spill] sm:$0xff] %v8437_v41  ;;  %v2328_v63 = vmax.f32 %v8410_v60, 0.0  ;;  %v2329_v56 = vmax.f32 %v8413_v34, 0.0  ;;  %v3105_v30 = vmax.f32 %v8416_v21, 0.0  ;;  %v3106_v11 = vmax.f32 %v8419_v50, 0.0 }
 0x290   : > { %11459 = vst [vmem:[#allocation131_spill] sm:$0xff] %v8440_v35  ;;  %11461 = vst [vmem:[#allocation132_spill] sm:$0xff] %v8443_v45  ;;  %v3882_v13 = vmax.f32 %v8422_v17, 0.0  ;;  %v3883_v38 = vmax.f32 %v8425_v1, 0.0  ;;  %v1383_v10 = vmul.f32 %v7940_v58, %v791_v28  ;;  %v1384_v26 = vmul.f32 %v7943_v29, %v791_v28  ;;  %v11468_v22 = vld [vmem:[#allocation27_spill] sm:$0xff]  ;;  %v11470_v35 = vld [vmem:[#allocation29_spill] sm:$0xff] }
 0x291   : > { %11463 = vst [vmem:[#allocation133_spill] sm:$0xff] %v8446_v54  ;;  %11465 = vst [vmem:[#allocation134_spill] sm:$0xff] %v8449_v46  ;;  %v2166_v7 = vmul.f32 %v7946_v55, %v791_v28  ;;  %v2167_v62 = vmul.f32 %v11376_v47, %v791_v28  ;;  %v2943_v60 = vmul.f32 %v11377_v32, %v791_v28  ;;  %v11469_v54 = vld [vmem:[#allocation28_spill] sm:$0xff]  ;;  %v11471_v14 = vld [vmem:[#allocation253_spill] sm:$0xff] }
 0x292   : > { %v2944_v34 = vmul.f32 %v11378_v57, %v791_v28  ;;  %v3720_v21 = vmul.f32 %v11379_v5, %v791_v28  ;;  %v3721_v50 = vmul.f32 %v11441_v49, %v791_v28  ;;  %v1447_v17 = vadd.f32 %v1383_v10, %v11466_v52  ;;  %v11472_v53 = vld [vmem:[#allocation254_spill] sm:$0xff] }
 0x293   : > { %v1448_v1 = vadd.f32 %v1384_v26, %v11467_v44  ;;  %v2230_v46 = vadd.f32 %v2166_v7, %v11468_v22  ;;  %v2231_v45 = vadd.f32 %v2167_v62, %v11469_v54  ;;  %v3007_v41 = vadd.f32 %v2943_v60, %v11470_v35  ;;  %v734_v44 = vpop.permute.xlu1 %733 }
 0x294   : > { %v3008_v27 = vadd.f32 %v2944_v34, %v11471_v14  ;;  %v3784_v59 = vadd.f32 %v3720_v21, %v11472_v53  ;;  %v3785_v57 = vadd.f32 %v3721_v50, %v11473_v4  ;;  %v1511_v32 = vmax.f32 %v1447_v17, 0.0 }
 0x295   : > { %v1512_v5 = vmax.f32 %v1448_v1, 0.0  ;;  %v2294_v47 = vmax.f32 %v2230_v46, 0.0  ;;  %v2295_v28 = vmax.f32 %v2231_v45, 0.0  ;;  %v3071_v49 = vmax.f32 %v3007_v41, 0.0  ;;  %v11474_v46 = vld [vmem:[#allocation178_spill] sm:$0xff] }
 0x296   : > { %v3072_v10 = vmax.f32 %v3008_v27, 0.0  ;;  %v3848_v52 = vmax.f32 %v3784_v59, 0.0  ;;  %v3849_v26 = vmax.f32 %v3785_v57, 0.0  ;;  %v8476_v7 = vadd.f32 %v8316_v25, %v1511_v32 }
 0x297   : > { %v8479_v35 = vadd.f32 %v8319_v0, %v1512_v5  ;;  %v8482_v14 = vadd.f32 %v8322_v16, %v2294_v47  ;;  %v8485_v4 = vadd.f32 %v8325_v42, %v2295_v28  ;;  %v8488_v53 = vadd.f32 %v8328_v6, %v3071_v49  ;;  %v866_v60 = vpop.permute.xlu1 %865 }
 0x298   : > { %v8491_v27 = vadd.f32 %v8331_v31, %v3072_v10  ;;  %v8494_v57 = vadd.f32 %v8334_v8, %v3848_v52  ;;  %v8497_v32 = vadd.f32 %v8337_v39, %v3849_v26  ;;  %v1275_v5 = vmul.f32 %v7715_v2, %v734_v44 }
 0x299   : > { %v1276_v47 = vmul.f32 %v7717_v23, %v734_v44  ;;  %v2058_v25 = vmul.f32 %v7719_v33, %v734_v44  ;;  %v2059_v0 = vmul.f32 %v7721_v36, %v734_v44  ;;  %v2835_v16 = vmul.f32 %v11421_v37, %v734_v44 }
 0x29a   : > { %v2836_v42 = vmul.f32 %v11422_v12, %v734_v44  ;;  %v3612_v6 = vmul.f32 %v11423_v18, %v734_v44  ;;  %v3613_v31 = vmul.f32 %v11424_v15, %v734_v44  ;;  %v8508_v8 = vadd.f32 %v8347_v40, %v1545_v48 }
 0x29b   : > { %v8511_v39 = vadd.f32 %v8349_v9, %v1546_v19  ;;  %v8514_v59 = vadd.f32 %v8351_v20, %v2328_v63  ;;  %v8517_v49 = vadd.f32 %v8353_v51, %v2329_v56  ;;  %v8520_v41 = vadd.f32 %v8355_v43, %v3105_v30  ;;  %v663_v9 = vpop.permute.xlu0 %662  ;;  %v11476_v20 = vld [vmem:[#allocation179_spill] sm:$0xff]  ;;  %v11478_v51 = vld [vmem:[#allocation180_spill] sm:$0xff]  ;;  %v11480_v43 = vld [vmem:[#allocation181_spill] sm:$0xff] }
 0x29c   : > { %v8523_v45 = vadd.f32 %v8357_v61, %v3106_v11  ;;  %v8526_v54 = vadd.f32 %v8359_v3, %v3882_v13  ;;  %v8529_v40 = vadd.f32 %v8361_v24, %v3883_v38  ;;  %v8532_v48 = vadd.f32 %v1275_v5, %v11474_v46  ;;  %v11482_v61 = vld [vmem:[#allocation182_spill] sm:$0xff]  ;;  %v11484_v3 = vld [vmem:[#allocation183_spill] sm:$0xff]  ;;  %v11486_v24 = vld [vmem:[#allocation184_spill] sm:$0xff] }
 0x29d   : > { %v8535_v19 = vadd.f32 %v1276_v47, %v11476_v20  ;;  %v8538_v63 = vadd.f32 %v2058_v25, %v11478_v51  ;;  %v8541_v56 = vadd.f32 %v2059_v0, %v11480_v43  ;;  %v8544_v30 = vadd.f32 %v2835_v16, %v11482_v61  ;;  %v11488_v38 = vld [vmem:[#allocation185_spill] sm:$0xff]  ;;  %v11490_v5 = vld [vmem:[#allocation126_spill] sm:$0xff]  ;;  %v11491_v25 = vld [vmem:[#allocation127_spill] sm:$0xff] }
 0x29e   : > { %11475 = vst [vmem:[#allocation135_spill] sm:$0xff] %v8532_v48  ;;  %v8547_v11 = vadd.f32 %v2836_v42, %v11484_v3  ;;  %v8550_v13 = vadd.f32 %v3612_v6, %v11486_v24  ;;  %v8553_v62 = vadd.f32 %v3613_v31, %v11488_v38  ;;  %v1241_v34 = vmul.f32 %v7715_v2, %v663_v9  ;;  %v11492_v16 = vld [vmem:[#allocation128_spill] sm:$0xff]  ;;  %v11493_v6 = vld [vmem:[#allocation129_spill] sm:$0xff]  ;;  %v11497_v3 = vld [vmem:[#allocation246_spill] sm:$0xff] }
 0x29f   : > { %11477 = vst [vmem:[#allocation136_spill] sm:$0xff] %v8535_v19  ;;  %11479 = vst [vmem:[#allocation137_spill] sm:$0xff] %v8538_v63  ;;  %v1242_v21 = vmul.f32 %v7717_v23, %v663_v9  ;;  %v2024_v50 = vmul.f32 %v7719_v33, %v663_v9  ;;  %v2025_v17 = vmul.f32 %v7721_v36, %v663_v9  ;;  %v11494_v46 = vld [vmem:[#allocation284_spill] sm:$0xff]  ;;  %v11495_v51 = vld [vmem:[#allocation245_spill] sm:$0xff] }
 0x2a0   : > { %11481 = vst [vmem:[#allocation162_spill] sm:$0xff] %v8541_v56  ;;  %11483 = vst [vmem:[#allocation163_spill] sm:$0xff] %v8544_v30  ;;  %v2801_v1 = vmul.f32 %v11421_v37, %v663_v9  ;;  %v2802_v22 = vmul.f32 %v11422_v12, %v663_v9  ;;  %v3578_v28 = vmul.f32 %v11423_v18, %v663_v9  ;;  %v11498_v38 = vld [vmem:[#allocation282_spill] sm:$0xff]  ;;  %v11500_v30 = vld [vmem:[#allocation247_spill] sm:$0xff] }
 0x2a1   : > { %11485 = vst [vmem:[#allocation164_spill] sm:$0xff] %v8547_v11  ;;  %11487 = vst [vmem:[#allocation165_spill] sm:$0xff] %v8550_v13  ;;  %v3579_v10 = vmul.f32 %v11424_v15, %v663_v9  ;;  %v1419_v52 = vmul.f32 %v7940_v58, %v866_v60  ;;  %v1420_v26 = vmul.f32 %v7943_v29, %v866_v60  ;;  %v11496_v9 = vld [vmem:[#allocation281_spill] sm:$0xff]  ;;  %v11499_v13 = vld [vmem:[#allocation283_spill] sm:$0xff] }
 0x2a2   : > { %11489 = vst [vmem:[#allocation166_spill] sm:$0xff] %v8553_v62  ;;  %v2202_v44 = vmul.f32 %v7946_v55, %v866_v60  ;;  %v2203_v47 = vmul.f32 %v11490_v5, %v866_v60  ;;  %v2979_v0 = vmul.f32 %v11491_v25, %v866_v60  ;;  %v2980_v42 = vmul.f32 %v11492_v16, %v866_v60  ;;  %v11501_v63 = vld [vmem:[#allocation248_spill] sm:$0xff]  ;;  %v11526_v48 = vld [vmem:[#allocation134_spill] sm:$0xff] }
 0x2a3   : > { %v3756_v31 = vmul.f32 %v11493_v6, %v866_v60  ;;  %v3757_v20 = vmul.f32 %v11494_v46, %v866_v60  ;;  %v8572_v43 = vadd.f32 %v1419_v52, %v11495_v51  ;;  %v8575_v61 = vadd.f32 %v1420_v26, %v11496_v9  ;;  %v11502_v52 = vld [vmem:[#allocation249_spill] sm:$0xff]  ;;  %v11503_v26 = vld [vmem:[#allocation30_spill] sm:$0xff] }
 0x2a4   : > { %v8578_v24 = vadd.f32 %v2202_v44, %v11497_v3  ;;  %v8581_v62 = vadd.f32 %v2203_v47, %v11498_v38  ;;  %v8584_v11 = vadd.f32 %v2979_v0, %v11499_v13  ;;  %v8587_v56 = vadd.f32 %v2980_v42, %v11500_v30  ;;  %v11505_v44 = vld [vmem:[#allocation31_spill] sm:$0xff]  ;;  %v11507_v47 = vld [vmem:[#allocation32_spill] sm:$0xff]  ;;  %v11509_v13 = vld [vmem:[#allocation33_spill] sm:$0xff] }
 0x2a5   : > { %v8590_v60 = vadd.f32 %v3756_v31, %v11501_v63  ;;  %v8593_v51 = vadd.f32 %v3757_v20, %v11502_v52  ;;  %v8596_v9 = vadd.f32 %v1241_v34, %v11503_v26  ;;  %v8599_v3 = vadd.f32 %v1242_v21, %v11505_v44  ;;  %v11511_v30 = vld [vmem:[#allocation34_spill] sm:$0xff]  ;;  %v11513_v63 = vld [vmem:[#allocation35_spill] sm:$0xff]  ;;  %v11515_v20 = vld [vmem:[#allocation36_spill] sm:$0xff]  ;;  %v795_v21 = vpop.permute.xlu0 %794 }
 0x2a6   : > { %v8602_v38 = vadd.f32 %v2024_v50, %v11507_v47  ;;  %v8605_v0 = vadd.f32 %v2025_v17, %v11509_v13  ;;  %v8608_v42 = vadd.f32 %v2801_v1, %v11511_v30  ;;  %v8611_v31 = vadd.f32 %v2802_v22, %v11513_v63  ;;  %v11517_v34 = vld [vmem:[#allocation37_spill] sm:$0xff]  ;;  %v11519_v63 = vld [vmem:[#allocation250_spill] sm:$0xff] }
 0x2a7   : > { %11504 = vst [vmem:[#allocation167_spill] sm:$0xff] %v8596_v9  ;;  %11506 = vst [vmem:[#allocation168_spill] sm:$0xff] %v8599_v3  ;;  %v8614_v52 = vadd.f32 %v3578_v28, %v11515_v20  ;;  %v8617_v26 = vadd.f32 %v3579_v10, %v11517_v34  ;;  %v1547_v44 = vmax.f32 %v8572_v43, 0.0  ;;  %v1548_v50 = vmax.f32 %v8575_v61, 0.0  ;;  %v11520_v20 = vld [vmem:[#allocation251_spill] sm:$0xff]  ;;  %v11521_v34 = vld [vmem:[#allocation252_spill] sm:$0xff] }
 0x2a8   : > { %11508 = vst [vmem:[#allocation169_spill] sm:$0xff] %v8602_v38  ;;  %11510 = vst [vmem:[#allocation146_spill] sm:$0xff] %v8605_v0  ;;  %v2330_v17 = vmax.f32 %v8578_v24, 0.0  ;;  %v2331_v47 = vmax.f32 %v8581_v62, 0.0  ;;  %v3107_v1 = vmax.f32 %v8584_v11, 0.0  ;;  %v3108_v22 = vmax.f32 %v8587_v56, 0.0 }
 0x2a9   : > { %11512 = vst [vmem:[#allocation147_spill] sm:$0xff] %v8608_v42  ;;  %11514 = vst [vmem:[#allocation148_spill] sm:$0xff] %v8611_v31  ;;  %v3884_v13 = vmax.f32 %v8590_v60, 0.0  ;;  %v3885_v28 = vmax.f32 %v8593_v51, 0.0  ;;  %v1385_v10 = vmul.f32 %v7940_v58, %v795_v21  ;;  %v1386_v30 = vmul.f32 %v7943_v29, %v795_v21  ;;  %v11523_v42 = vld [vmem:[#allocation131_spill] sm:$0xff]  ;;  %v11524_v38 = vld [vmem:[#allocation132_spill] sm:$0xff] }
 0x2aa   : > { %11516 = vst [vmem:[#allocation149_spill] sm:$0xff] %v8614_v52  ;;  %11518 = vst [vmem:[#allocation150_spill] sm:$0xff] %v8617_v26  ;;  %v2168_v43 = vmul.f32 %v7946_v55, %v795_v21  ;;  %v2169_v61 = vmul.f32 %v11490_v5, %v795_v21  ;;  %v2945_v24 = vmul.f32 %v11491_v25, %v795_v21  ;;  %v11522_v52 = vld [vmem:[#allocation130_spill] sm:$0xff]  ;;  %v11525_v9 = vld [vmem:[#allocation133_spill] sm:$0xff] }
 0x2ab   : > { %v2946_v62 = vmul.f32 %v11492_v16, %v795_v21  ;;  %v3722_v11 = vmul.f32 %v11493_v6, %v795_v21  ;;  %v3723_v56 = vmul.f32 %v11494_v46, %v795_v21  ;;  %v1449_v60 = vadd.f32 %v1385_v10, %v11519_v63 }
 0x2ac   : > { %v1450_v51 = vadd.f32 %v1386_v30, %v11520_v20  ;;  %v2232_v26 = vadd.f32 %v2168_v43, %v11521_v34  ;;  %v2233_v31 = vadd.f32 %v2169_v61, %v11522_v52  ;;  %v3009_v0 = vadd.f32 %v2945_v24, %v11523_v42  ;;  %v738_v20 = vpop.permute.xlu1 %737  ;;  %v667_v61 = vpop.permute.xlu0 %666 }
 0x2ad   : > { %v3010_v3 = vadd.f32 %v2946_v62, %v11524_v38  ;;  %v3786_v19 = vadd.f32 %v3722_v11, %v11525_v9  ;;  %v3787_v16 = vadd.f32 %v3723_v56, %v11526_v48  ;;  %v1513_v25 = vmax.f32 %v1449_v60, 0.0 }
 0x2ae   : > { %v1514_v6 = vmax.f32 %v1450_v51, 0.0  ;;  %v2296_v5 = vmax.f32 %v2232_v26, 0.0  ;;  %v2297_v21 = vmax.f32 %v2233_v31, 0.0  ;;  %v3073_v46 = vmax.f32 %v3009_v0, 0.0 }
 0x2af   : > { %v3074_v10 = vmax.f32 %v3010_v3, 0.0  ;;  %v3850_v63 = vmax.f32 %v3786_v19, 0.0  ;;  %v3851_v30 = vmax.f32 %v3787_v16, 0.0  ;;  %v8644_v43 = vadd.f32 %v8476_v7, %v1513_v25 }
 0x2b0   : > { %v8647_v42 = vadd.f32 %v8479_v35, %v1514_v6  ;;  %v8650_v38 = vadd.f32 %v8482_v14, %v2296_v5  ;;  %v8653_v48 = vadd.f32 %v8485_v4, %v2297_v21  ;;  %v8656_v9 = vadd.f32 %v8488_v53, %v3073_v46  ;;  %v870_v24 = vpop.permute.xlu1 %869 }
 0x2b1   : > { %v8659_v3 = vadd.f32 %v8491_v27, %v3074_v10  ;;  %v8662_v19 = vadd.f32 %v8494_v57, %v3850_v63  ;;  %v8665_v7 = vadd.f32 %v8497_v32, %v3851_v30  ;;  %v1277_v35 = vmul.f32 %v7715_v2, %v738_v20 }
 0x2b2   : > { %v1278_v14 = vmul.f32 %v7717_v23, %v738_v20  ;;  %v2060_v5 = vmul.f32 %v7719_v33, %v738_v20  ;;  %v2061_v4 = vmul.f32 %v7721_v36, %v738_v20  ;;  %v2837_v53 = vmul.f32 %v11421_v37, %v738_v20 }
 0x2b3   : > { %v2838_v25 = vmul.f32 %v11422_v12, %v738_v20  ;;  %v3614_v27 = vmul.f32 %v11423_v18, %v738_v20  ;;  %v3615_v57 = vmul.f32 %v11424_v15, %v738_v20  ;;  %v8676_v16 = vadd.f32 %v8508_v8, %v1547_v44  ;;  %v11528_v8 = vld [vmem:[#allocation170_spill] sm:$0xff] }
 0x2b4   : > { %v8679_v32 = vadd.f32 %v8511_v39, %v1548_v50  ;;  %v8682_v6 = vadd.f32 %v8514_v59, %v2330_v17  ;;  %v8685_v46 = vadd.f32 %v8517_v49, %v2331_v47  ;;  %v3176_v0 = vadd.f32 %v8520_v41, %v3107_v1  ;;  %v11530_v39 = vld [vmem:[#allocation171_spill] sm:$0xff]  ;;  %v11532_v59 = vld [vmem:[#allocation172_spill] sm:$0xff]  ;;  %v11534_v49 = vld [vmem:[#allocation173_spill] sm:$0xff] }
 0x2b5   : > { %v3197_v31 = vadd.f32 %v8523_v45, %v3108_v22  ;;  %v3953_v52 = vadd.f32 %v8526_v54, %v3884_v13  ;;  %v3974_v26 = vadd.f32 %v8529_v40, %v3885_v28  ;;  %v8692_v44 = vadd.f32 %v1277_v35, %v11528_v8  ;;  %v11536_v41 = vld [vmem:[#allocation174_spill] sm:$0xff]  ;;  %v11538_v45 = vld [vmem:[#allocation175_spill] sm:$0xff]  ;;  %v11540_v40 = vld [vmem:[#allocation176_spill] sm:$0xff] }
 0x2b6   : > { %11527 = vst [vmem:[#allocation151_spill] sm:$0xff] %v8685_v46  ;;  %v8695_v50 = vadd.f32 %v1278_v14, %v11530_v39  ;;  %v8698_v17 = vadd.f32 %v2060_v5, %v11532_v59  ;;  %v8701_v47 = vadd.f32 %v2061_v4, %v11534_v49  ;;  %v8704_v1 = vadd.f32 %v2837_v53, %v11536_v41  ;;  %v11542_v13 = vld [vmem:[#allocation177_spill] sm:$0xff]  ;;  %v11544_v35 = vld [vmem:[#allocation126_spill] sm:$0xff]  ;;  %v11545_v5 = vld [vmem:[#allocation127_spill] sm:$0xff] }
 0x2b7   : > { %11529 = vst [vmem:[#allocation152_spill] sm:$0xff] %v8692_v44  ;;  %v8707_v54 = vadd.f32 %v2838_v25, %v11538_v45  ;;  %v8710_v22 = vadd.f32 %v3614_v27, %v11540_v40  ;;  %v8713_v28 = vadd.f32 %v3615_v57, %v11542_v13  ;;  %v1243_v62 = vmul.f32 %v7715_v2, %v667_v61  ;;  %v11546_v53 = vld [vmem:[#allocation128_spill] sm:$0xff]  ;;  %v11547_v27 = vld [vmem:[#allocation129_spill] sm:$0xff]  ;;  %v11549_v59 = vld [vmem:[#allocation135_spill] sm:$0xff] }
 0x2b8   : > { %11531 = vst [vmem:[#allocation153_spill] sm:$0xff] %v8695_v50  ;;  %11533 = vst [vmem:[#allocation17_spill] sm:$0xff] %v8698_v17  ;;  %v1244_v11 = vmul.f32 %v7717_v23, %v667_v61  ;;  %v2026_v56 = vmul.f32 %v7719_v33, %v667_v61  ;;  %v2027_v60 = vmul.f32 %v7721_v36, %v667_v61  ;;  %v11548_v8 = vld [vmem:[#allocation284_spill] sm:$0xff]  ;;  %v11551_v45 = vld [vmem:[#allocation137_spill] sm:$0xff] }
 0x2b9   : > { %11535 = vst [vmem:[#allocation18_spill] sm:$0xff] %v8701_v47  ;;  %11537 = vst [vmem:[#allocation19_spill] sm:$0xff] %v8704_v1  ;;  %v8720_v51 = vmul.f32 %v11421_v37, %v667_v61  ;;  %v8723_v34 = vmul.f32 %v11422_v12, %v667_v61  ;;  %v8726_v21 = vmul.f32 %v11423_v18, %v667_v61  ;;  %v11552_v13 = vld [vmem:[#allocation162_spill] sm:$0xff]  ;;  %v11554_v1 = vld [vmem:[#allocation164_spill] sm:$0xff] }
 0x2ba   : > { %11539 = vst [vmem:[#allocation20_spill] sm:$0xff] %v8707_v54  ;;  %11541 = vst [vmem:[#allocation21_spill] sm:$0xff] %v8710_v22  ;;  %v8729_v10 = vmul.f32 %v11424_v15, %v667_v61  ;;  %v1421_v63 = vmul.f32 %v7940_v58, %v870_v24  ;;  %v1422_v30 = vmul.f32 %v7943_v29, %v870_v24  ;;  %v11550_v61 = vld [vmem:[#allocation136_spill] sm:$0xff]  ;;  %v11553_v22 = vld [vmem:[#allocation163_spill] sm:$0xff] }
 0x2bb   : > { %11543 = vst [vmem:[#allocation22_spill] sm:$0xff] %v8713_v28  ;;  %v2204_v20 = vmul.f32 %v7946_v55, %v870_v24  ;;  %v2205_v14 = vmul.f32 %v11544_v35, %v870_v24  ;;  %v2981_v4 = vmul.f32 %v11545_v5, %v870_v24  ;;  %v2982_v25 = vmul.f32 %v11546_v53, %v870_v24  ;;  %v11555_v17 = vld [vmem:[#allocation165_spill] sm:$0xff]  ;;  %v11556_v44 = vld [vmem:[#allocation166_spill] sm:$0xff] }
 0x2bc   : > { %v3758_v57 = vmul.f32 %v11547_v27, %v870_v24  ;;  %v3759_v39 = vmul.f32 %v11548_v8, %v870_v24  ;;  %v8740_v49 = vadd.f32 %v1421_v63, %v11549_v59  ;;  %v8743_v41 = vadd.f32 %v1422_v30, %v11550_v61  ;;  %v11557_v46 = vld [vmem:[#allocation54_spill] sm:$0xff]  ;;  %v11559_v59 = vld [vmem:[#allocation55_spill] sm:$0xff]  ;;  %v11561_v61 = vld [vmem:[#allocation56_spill] sm:$0xff] }
 0x2bd   : > { %v8746_v40 = vadd.f32 %v2204_v20, %v11551_v45  ;;  %v8749_v28 = vadd.f32 %v2205_v14, %v11552_v13  ;;  %v3045_v54 = vadd.f32 %v2981_v4, %v11553_v22  ;;  %v3046_v47 = vadd.f32 %v2982_v25, %v11554_v1  ;;  %v11563_v45 = vld [vmem:[#allocation57_spill] sm:$0xff]  ;;  %v799_v25 = vpop.permute.xlu0 %798 }
 0x2be   : > { %v3822_v50 = vadd.f32 %v3758_v57, %v11555_v17  ;;  %v3823_v24 = vadd.f32 %v3759_v39, %v11556_v44  ;;  %v8756_v63 = vadd.f32 %v1243_v62, %v11557_v46  ;;  %v8759_v30 = vadd.f32 %v1244_v11, %v11559_v59 }
 0x2bf   : > { %v8762_v20 = vadd.f32 %v2026_v56, %v11561_v61  ;;  %v8765_v14 = vadd.f32 %v2027_v60, %v11563_v45  ;;  %v3109_v13 = vmax.f32 %v3045_v54, 0.0  ;;  %v3110_v22 = vmax.f32 %v3046_v47, 0.0  ;;  %v11572_v61 = vld [vmem:[#allocation146_spill] sm:$0xff] }
 0x2c0   : > { %11558 = vst [vmem:[#allocation23_spill] sm:$0xff] %v8756_v63  ;;  %11560 = vst [vmem:[#allocation24_spill] sm:$0xff] %v8759_v30  ;;  %v3886_v4 = vmax.f32 %v3822_v50, 0.0  ;;  %v3887_v1 = vmax.f32 %v3823_v24, 0.0  ;;  %v1549_v17 = vmax.f32 %v8740_v49, 0.0  ;;  %v1550_v44 = vmax.f32 %v8743_v41, 0.0 }
 0x2c1   : > { %11562 = vst [vmem:[#allocation271_spill] sm:$0xff] %v8762_v20  ;;  %11564 = vst [vmem:[#allocation272_spill] sm:$0xff] %v8765_v14  ;;  %v2332_v46 = vmax.f32 %v8746_v40, 0.0  ;;  %v2333_v62 = vmax.f32 %v8749_v28, 0.0  ;;  %v8771_v11 = vadd.f32 %v3176_v0, %v3109_v13  ;;  %v8773_v56 = vadd.f32 %v3197_v31, %v3110_v22  ;;  %v11571_v24 = vld [vmem:[#allocation169_spill] sm:$0xff]  ;;  %v11573_v13 = vld [vmem:[#allocation147_spill] sm:$0xff] }
 0x2c2   : > { %v8775_v57 = vadd.f32 %v3953_v52, %v3886_v4  ;;  %v8777_v60 = vadd.f32 %v3974_v26, %v3887_v1  ;;  %v1387_v50 = vmul.f32 %v7940_v58, %v799_v25  ;;  %v1388_v47 = vmul.f32 %v7943_v29, %v799_v25  ;;  %v11569_v52 = vld [vmem:[#allocation167_spill] sm:$0xff]  ;;  %v11570_v26 = vld [vmem:[#allocation168_spill] sm:$0xff] }
 0x2c3   : > { %11565 = vst [vmem:[#allocation273_spill] sm:$0xff] %v8771_v11  ;;  %11566 = vst [vmem:[#allocation274_spill] sm:$0xff] %v8773_v56  ;;  %v2170_v54 = vmul.f32 %v7946_v55, %v799_v25  ;;  %v2171_v39 = vmul.f32 %v11544_v35, %v799_v25  ;;  %v2947_v49 = vmul.f32 %v11545_v5, %v799_v25  ;;  %v11574_v4 = vld [vmem:[#allocation148_spill] sm:$0xff]  ;;  %v11576_v56 = vld [vmem:[#allocation150_spill] sm:$0xff] }
 0x2c4   : > { %11567 = vst [vmem:[#allocation154_spill] sm:$0xff] %v8775_v57  ;;  %11568 = vst [vmem:[#allocation155_spill] sm:$0xff] %v8777_v60  ;;  %v2948_v28 = vmul.f32 %v11546_v53, %v799_v25  ;;  %v3724_v0 = vmul.f32 %v11547_v27, %v799_v25  ;;  %v3725_v31 = vmul.f32 %v11548_v8, %v799_v25  ;;  %v11575_v60 = vld [vmem:[#allocation149_spill] sm:$0xff] }
 0x2c5   : > { %v1451_v41 = vadd.f32 %v1387_v50, %v11569_v52  ;;  %v1452_v40 = vadd.f32 %v1388_v47, %v11570_v26  ;;  %v2234_v59 = vadd.f32 %v2170_v54, %v11571_v24  ;;  %v2235_v45 = vadd.f32 %v2171_v39, %v11572_v61  ;;  %v742_v26 = vpop.permute.xlu1 %741  ;;  %v11581_v61 = vld [vmem:[#allocation151_spill] sm:$0xff] }
 0x2c6   : > { %v3011_v22 = vadd.f32 %v2947_v49, %v11573_v13  ;;  %v3012_v1 = vadd.f32 %v2948_v28, %v11574_v4  ;;  %v3788_v57 = vadd.f32 %v3724_v0, %v11575_v60  ;;  %v3789_v11 = vadd.f32 %v3725_v31, %v11576_v56  ;;  %v11579_v0 = vld [vmem:[#allocation60_spill] sm:$0xff]  ;;  %v11582_v13 = vld [vmem:[#allocation194_spill] sm:$0xff] }
 0x2c7   : > { %v1515_v14 = vmax.f32 %v1451_v41, 0.0  ;;  %v1516_v20 = vmax.f32 %v1452_v40, 0.0  ;;  %v2298_v30 = vmax.f32 %v2234_v59, 0.0  ;;  %v2299_v25 = vmax.f32 %v2235_v45, 0.0  ;;  %v11580_v41 = vld [vmem:[#allocation61_spill] sm:$0xff]  ;;  %v671_v45 = vpop.permute.xlu0 %670 }
 0x2c8   : > { %v3075_v63 = vmax.f32 %v3011_v22, 0.0  ;;  %v3076_v50 = vmax.f32 %v3012_v1, 0.0  ;;  %v3852_v52 = vmax.f32 %v3788_v57, 0.0  ;;  %v3853_v47 = vmax.f32 %v3789_v11, 0.0  ;;  %v11584_v22 = vld [vmem:[#allocation195_spill] sm:$0xff] }
 0x2c9   : > { %v8796_v54 = vadd.f32 %v8644_v43, %v1515_v14  ;;  %v8799_v39 = vadd.f32 %v8647_v42, %v1516_v20  ;;  %v8802_v49 = vadd.f32 %v8650_v38, %v2298_v30  ;;  %v8805_v56 = vadd.f32 %v8653_v48, %v2299_v25  ;;  %v11577_v20 = vld [vmem:[#allocation58_spill] sm:$0xff]  ;;  %v11578_v14 = vld [vmem:[#allocation59_spill] sm:$0xff] }
 0x2ca   : > { %v8808_v60 = vadd.f32 %v8656_v9, %v3075_v63  ;;  %v8811_v28 = vadd.f32 %v8659_v3, %v3076_v50  ;;  %v8814_v11 = vadd.f32 %v8662_v19, %v3852_v52  ;;  %v8817_v43 = vadd.f32 %v8665_v7, %v3853_v47  ;;  %v11596_v50 = vld [vmem:[#allocation201_spill] sm:$0xff]  ;;  %v874_v47 = vpop.permute.xlu1 %873 }
 0x2cb   : > { %v1279_v42 = vmul.f32 %v7715_v2, %v742_v26  ;;  %v1280_v38 = vmul.f32 %v7717_v23, %v742_v26  ;;  %v2062_v30 = vmul.f32 %v7719_v33, %v742_v26  ;;  %v2063_v48 = vmul.f32 %v7721_v36, %v742_v26 }
 0x2cc   : > { %v2839_v9 = vmul.f32 %v11421_v37, %v742_v26  ;;  %v2840_v63 = vmul.f32 %v11422_v12, %v742_v26  ;;  %v3616_v3 = vmul.f32 %v11423_v18, %v742_v26  ;;  %v3617_v19 = vmul.f32 %v11424_v15, %v742_v26 }
 0x2cd   : > { %v8829_v7 = vadd.f32 %v8720_v51, %v11577_v20  ;;  %v8833_v57 = vadd.f32 %v8723_v34, %v11578_v14  ;;  %v8837_v31 = vadd.f32 %v8726_v21, %v11579_v0  ;;  %v8841_v40 = vadd.f32 %v8729_v10, %v11580_v41  ;;  %v11586_v10 = vld [vmem:[#allocation196_spill] sm:$0xff] }
 0x2ce   : > { %v8844_v24 = vadd.f32 %v8676_v16, %v1549_v17  ;;  %v8847_v59 = vadd.f32 %v8679_v32, %v1550_v44  ;;  %v8850_v51 = vadd.f32 %v8682_v6, %v2332_v46  ;;  %v8853_v34 = vadd.f32 %v11581_v61, %v2333_v62  ;;  %v11588_v16 = vld [vmem:[#allocation197_spill] sm:$0xff]  ;;  %v11590_v32 = vld [vmem:[#allocation198_spill] sm:$0xff]  ;;  %v11592_v6 = vld [vmem:[#allocation199_spill] sm:$0xff] }
 0x2cf   : > { %v8856_v21 = vadd.f32 %v1279_v42, %v11582_v13  ;;  %v8859_v4 = vadd.f32 %v1280_v38, %v11584_v22  ;;  %v8862_v1 = vadd.f32 %v2062_v30, %v11586_v10  ;;  %v8865_v17 = vadd.f32 %v2063_v48, %v11588_v16  ;;  %v11594_v62 = vld [vmem:[#allocation200_spill] sm:$0xff] }
 0x2d0   : > { %v8868_v44 = vadd.f32 %v2839_v9, %v11590_v32  ;;  %v8871_v46 = vadd.f32 %v2840_v63, %v11592_v6  ;;  %v8874_v25 = vadd.f32 %v3616_v3, %v11594_v62  ;;  %v8877_v52 = vadd.f32 %v3617_v19, %v11596_v50  ;;  %v11598_v10 = vld [vmem:[#allocation152_spill] sm:$0xff]  ;;  %v11600_v6 = vld [vmem:[#allocation17_spill] sm:$0xff]  ;;  %v11601_v50 = vld [vmem:[#allocation18_spill] sm:$0xff] }
 0x2d1   : > { %11583 = vst [vmem:[#allocation156_spill] sm:$0xff] %v8856_v21  ;;  %11585 = vst [vmem:[#allocation157_spill] sm:$0xff] %v8859_v4  ;;  %v1245_v26 = vmul.f32 %v7715_v2, %v671_v45  ;;  %v1246_v42 = vmul.f32 %v7717_v23, %v671_v45  ;;  %v2028_v38 = vmul.f32 %v7719_v33, %v671_v45 }
 0x2d2   : > { %11587 = vst [vmem:[#allocation158_spill] sm:$0xff] %v8862_v1  ;;  %11589 = vst [vmem:[#allocation159_spill] sm:$0xff] %v8865_v17  ;;  %v2029_v30 = vmul.f32 %v7721_v36, %v671_v45  ;;  %v2805_v48 = vmul.f32 %v11421_v37, %v671_v45  ;;  %v2806_v9 = vmul.f32 %v11422_v12, %v671_v45  ;;  %v11604_v1 = vld [vmem:[#allocation21_spill] sm:$0xff] }
 0x2d3   : > { %11591 = vst [vmem:[#allocation160_spill] sm:$0xff] %v8868_v44  ;;  %11593 = vst [vmem:[#allocation161_spill] sm:$0xff] %v8871_v46  ;;  %v3582_v63 = vmul.f32 %v11423_v18, %v671_v45  ;;  %v3583_v3 = vmul.f32 %v11424_v15, %v671_v45  ;;  %v1423_v19 = vmul.f32 %v7940_v58, %v874_v47  ;;  %v11599_v45 = vld [vmem:[#allocation153_spill] sm:$0xff]  ;;  %v11603_v44 = vld [vmem:[#allocation20_spill] sm:$0xff] }
 0x2d4   : > { %11595 = vst [vmem:[#allocation138_spill] sm:$0xff] %v8874_v25  ;;  %11597 = vst [vmem:[#allocation139_spill] sm:$0xff] %v8877_v52  ;;  %v1424_v20 = vmul.f32 %v7943_v29, %v874_v47  ;;  %v2206_v14 = vmul.f32 %v7946_v55, %v874_v47  ;;  %v2207_v0 = vmul.f32 %v11544_v35, %v874_v47  ;;  %v11602_v25 = vld [vmem:[#allocation19_spill] sm:$0xff] }
 0x2d5   : > { %v2983_v41 = vmul.f32 %v11545_v5, %v874_v47  ;;  %v2984_v61 = vmul.f32 %v11546_v53, %v874_v47  ;;  %v3760_v13 = vmul.f32 %v11547_v27, %v874_v47  ;;  %v3761_v22 = vmul.f32 %v11548_v8, %v874_v47 }
 0x2d6   : > { %v8896_v16 = vadd.f32 %v1423_v19, %v11598_v10  ;;  %v8899_v32 = vadd.f32 %v1424_v20, %v11599_v45  ;;  %v8902_v62 = vadd.f32 %v2206_v14, %v11600_v6  ;;  %v8905_v52 = vadd.f32 %v2207_v0, %v11601_v50  ;;  %v11605_v19 = vld [vmem:[#allocation22_spill] sm:$0xff]  ;;  %v11608_v14 = vld [vmem:[#allocation47_spill] sm:$0xff]  ;;  %v11610_v0 = vld [vmem:[#allocation48_spill] sm:$0xff] }
 0x2d7   : > { %v8908_v46 = vadd.f32 %v2983_v41, %v11602_v25  ;;  %v8911_v17 = vadd.f32 %v2984_v61, %v11603_v44  ;;  %v8914_v47 = vadd.f32 %v3760_v13, %v11604_v1  ;;  %v8917_v10 = vadd.f32 %v3761_v22, %v11605_v19  ;;  %v11606_v20 = vld [vmem:[#allocation46_spill] sm:$0xff]  ;;  %v11612_v25 = vld [vmem:[#allocation49_spill] sm:$0xff]  ;;  %v11616_v1 = vld [vmem:[#allocation51_spill] sm:$0xff] }
 0x2d8   : > { %v8920_v45 = vadd.f32 %v1245_v26, %v11606_v20  ;;  %v8923_v6 = vadd.f32 %v1246_v42, %v11608_v14  ;;  %v8926_v50 = vadd.f32 %v2028_v38, %v11610_v0  ;;  %v8929_v41 = vadd.f32 %v2029_v30, %v11612_v25  ;;  %v11614_v44 = vld [vmem:[#allocation50_spill] sm:$0xff]  ;;  %v11618_v22 = vld [vmem:[#allocation52_spill] sm:$0xff]  ;;  %v11620_v26 = vld [vmem:[#allocation53_spill] sm:$0xff]  ;;  %v803_v42 = vpop.permute.xlu0 %802 }
 0x2d9   : > { %v8932_v61 = vadd.f32 %v2805_v48, %v11614_v44  ;;  %v8935_v13 = vadd.f32 %v2806_v9, %v11616_v1  ;;  %v8938_v19 = vadd.f32 %v3582_v63, %v11618_v22  ;;  %v8941_v20 = vadd.f32 %v3583_v3, %v11620_v26  ;;  %v11622_v1 = vld [vmem:[#allocation23_spill] sm:$0xff]  ;;  %v11623_v22 = vld [vmem:[#allocation24_spill] sm:$0xff] }
 0x2da   : > { %11607 = vst [vmem:[#allocation140_spill] sm:$0xff] %v8920_v45  ;;  %11609 = vst [vmem:[#allocation141_spill] sm:$0xff] %v8923_v6  ;;  %v1551_v14 = vmax.f32 %v8896_v16, 0.0  ;;  %v1552_v38 = vmax.f32 %v8899_v32, 0.0  ;;  %v2334_v30 = vmax.f32 %v8902_v62, 0.0  ;;  %v2335_v0 = vmax.f32 %v8905_v52, 0.0 }
 0x2db   : > { %11611 = vst [vmem:[#allocation142_spill] sm:$0xff] %v8926_v50  ;;  %11613 = vst [vmem:[#allocation143_spill] sm:$0xff] %v8929_v41  ;;  %v3111_v48 = vmax.f32 %v8908_v46, 0.0  ;;  %v3112_v9 = vmax.f32 %v8911_v17, 0.0  ;;  %v3888_v25 = vmax.f32 %v8914_v47, 0.0  ;;  %v3889_v63 = vmax.f32 %v8917_v10, 0.0 }
 0x2dc   : > { %11615 = vst [vmem:[#allocation144_spill] sm:$0xff] %v8932_v61  ;;  %11617 = vst [vmem:[#allocation145_spill] sm:$0xff] %v8935_v13  ;;  %v1389_v3 = vmul.f32 %v7940_v58, %v803_v42  ;;  %v1390_v44 = vmul.f32 %v7943_v29, %v803_v42  ;;  %v2172_v16 = vmul.f32 %v7946_v55, %v803_v42  ;;  %v11624_v26 = vld [vmem:[#allocation271_spill] sm:$0xff] }
 0x2dd   : > { %11619 = vst [vmem:[#allocation38_spill] sm:$0xff] %v8938_v19  ;;  %11621 = vst [vmem:[#allocation39_spill] sm:$0xff] %v8941_v20  ;;  %v2173_v32 = vmul.f32 %v11544_v35, %v803_v42  ;;  %v2949_v62 = vmul.f32 %v11545_v5, %v803_v42  ;;  %v2950_v52 = vmul.f32 %v11546_v53, %v803_v42  ;;  %v11625_v19 = vld [vmem:[#allocation272_spill] sm:$0xff] }
 0x2de   : > { %v3726_v46 = vmul.f32 %v11547_v27, %v803_v42  ;;  %v3727_v17 = vmul.f32 %v11548_v8, %v803_v42  ;;  %v1453_v47 = vadd.f32 %v1389_v3, %v11622_v1  ;;  %v1454_v10 = vadd.f32 %v1390_v44, %v11623_v22  ;;  %v746_v22 = vpop.permute.xlu1 %745 }
 0x2df   : > { %v2236_v20 = vadd.f32 %v2172_v16, %v11624_v26  ;;  %v2237_v13 = vadd.f32 %v2173_v32, %v11625_v19  ;;  %v3013_v61 = vadd.f32 %v2949_v62, %v8829_v7  ;;  %v3014_v41 = vadd.f32 %v2950_v52, %v8833_v57  ;;  %v11627_v19 = vld [vmem:[#allocation274_spill] sm:$0xff]  ;;  %v11644_v26 = vld [vmem:[#allocation193_spill] sm:$0xff] }
 0x2e0   : > { %v3790_v50 = vadd.f32 %v3726_v46, %v8837_v31  ;;  %v3791_v6 = vadd.f32 %v3727_v17, %v8841_v40  ;;  %v1517_v45 = vmax.f32 %v1453_v47, 0.0  ;;  %v1518_v4 = vmax.f32 %v1454_v10, 0.0  ;;  %v11628_v32 = vld [vmem:[#allocation154_spill] sm:$0xff] }
 0x2e1   : > { %v2300_v21 = vmax.f32 %v2236_v20, 0.0  ;;  %v2301_v42 = vmax.f32 %v2237_v13, 0.0  ;;  %v3077_v8 = vmax.f32 %v3013_v61, 0.0  ;;  %v3078_v3 = vmax.f32 %v3014_v41, 0.0  ;;  %v11626_v61 = vld [vmem:[#allocation273_spill] sm:$0xff] }
 0x2e2   : > { %v3854_v1 = vmax.f32 %v3790_v50, 0.0  ;;  %v3855_v44 = vmax.f32 %v3791_v6, 0.0  ;;  %v8968_v16 = vadd.f32 %v8796_v54, %v1517_v45  ;;  %v8971_v7 = vadd.f32 %v8799_v39, %v1518_v4 }
 0x2e3   : > { %v8974_v57 = vadd.f32 %v8802_v49, %v2300_v21  ;;  %v8977_v31 = vadd.f32 %v8805_v56, %v2301_v42  ;;  %v8980_v40 = vadd.f32 %v8808_v60, %v3077_v8  ;;  %v8983_v41 = vadd.f32 %v8811_v28, %v3078_v3  ;;  %v878_v3 = vpop.permute.xlu1 %877 }
 0x2e4   : > { %v8986_v6 = vadd.f32 %v8814_v11, %v3854_v1  ;;  %v8989_v54 = vadd.f32 %v8817_v43, %v3855_v44  ;;  %v1281_v39 = vmul.f32 %v7715_v2, %v746_v22  ;;  %v1282_v49 = vmul.f32 %v7717_v23, %v746_v22 }
 0x2e5   : > { %v2064_v21 = vmul.f32 %v7719_v33, %v746_v22  ;;  %v2065_v56 = vmul.f32 %v7721_v36, %v746_v22  ;;  %v2841_v8 = vmul.f32 %v11421_v37, %v746_v22  ;;  %v2842_v60 = vmul.f32 %v11422_v12, %v746_v22 }
 0x2e6   : > { %v3618_v28 = vmul.f32 %v11423_v18, %v746_v22  ;;  %v3619_v11 = vmul.f32 %v11424_v15, %v746_v22  ;;  %v9000_v4 = vadd.f32 %v8844_v24, %v1551_v14  ;;  %v9003_v43 = vadd.f32 %v8847_v59, %v1552_v38  ;;  %v11629_v24 = vld [vmem:[#allocation155_spill] sm:$0xff]  ;;  %v675_v59 = vpop.permute.xlu0 %674  ;;  %v11630_v38 = vld [vmem:[#allocation186_spill] sm:$0xff] }
 0x2e7   : > { %v9006_v45 = vadd.f32 %v8850_v51, %v2334_v30  ;;  %v9009_v50 = vadd.f32 %v8853_v34, %v2335_v0  ;;  %v9012_v13 = vadd.f32 %v11626_v61, %v3111_v48  ;;  %v9015_v20 = vadd.f32 %v11627_v19, %v3112_v9  ;;  %v11632_v51 = vld [vmem:[#allocation187_spill] sm:$0xff]  ;;  %v11634_v34 = vld [vmem:[#allocation188_spill] sm:$0xff]  ;;  %v11636_v48 = vld [vmem:[#allocation189_spill] sm:$0xff] }
 0x2e8   : > { %v9018_v62 = vadd.f32 %v11628_v32, %v3888_v25  ;;  %v9021_v14 = vadd.f32 %v11629_v24, %v3889_v63  ;;  %v9024_v52 = vadd.f32 %v1281_v39, %v11630_v38  ;;  %v9027_v30 = vadd.f32 %v1282_v49, %v11632_v51  ;;  %v11638_v9 = vld [vmem:[#allocation190_spill] sm:$0xff]  ;;  %v11640_v25 = vld [vmem:[#allocation191_spill] sm:$0xff]  ;;  %v11642_v63 = vld [vmem:[#allocation192_spill] sm:$0xff] }
 0x2e9   : > { %v9030_v0 = vadd.f32 %v2064_v21, %v11634_v34  ;;  %v9033_v46 = vadd.f32 %v2065_v56, %v11636_v48  ;;  %v9036_v17 = vadd.f32 %v2841_v8, %v11638_v9  ;;  %v9039_v47 = vadd.f32 %v2842_v60, %v11640_v25  ;;  %v11646_v38 = vld [vmem:[#allocation284_spill] sm:$0xff]  ;;  %v11649_v25 = vld [vmem:[#allocation158_spill] sm:$0xff] }
 0x2ea   : > { %11631 = vst [vmem:[#allocation40_spill] sm:$0xff] %v9024_v52  ;;  %11633 = vst [vmem:[#allocation41_spill] sm:$0xff] %v9027_v30  ;;  %v9042_v10 = vadd.f32 %v3618_v28, %v11642_v63  ;;  %v9045_v42 = vadd.f32 %v3619_v11, %v11644_v26  ;;  %v1247_v1 = vmul.f32 %v7715_v2, %v675_v59  ;;  %v11647_v34 = vld [vmem:[#allocation156_spill] sm:$0xff]  ;;  %v11650_v26 = vld [vmem:[#allocation159_spill] sm:$0xff] }
 0x2eb   : > { %11635 = vst [vmem:[#allocation42_spill] sm:$0xff] %v9030_v0  ;;  %11637 = vst [vmem:[#allocation43_spill] sm:$0xff] %v9033_v46  ;;  %v1248_v44 = vmul.f32 %v7717_v23, %v675_v59  ;;  %v2030_v22 = vmul.f32 %v7719_v33, %v675_v59  ;;  %v2031_v39 = vmul.f32 %v7721_v36, %v675_v59  ;;  %v11653_v0 = vld [vmem:[#allocation138_spill] sm:$0xff]  ;;  %v11678_v52 = vld [vmem:[#allocation39_spill] sm:$0xff] }
 0x2ec   : > { %11639 = vst [vmem:[#allocation44_spill] sm:$0xff] %v9036_v17  ;;  %11641 = vst [vmem:[#allocation45_spill] sm:$0xff] %v9039_v47  ;;  %v2807_v49 = vmul.f32 %v11421_v37, %v675_v59  ;;  %v2808_v21 = vmul.f32 %v11422_v12, %v675_v59  ;;  %v3584_v56 = vmul.f32 %v11423_v18, %v675_v59  ;;  %v11652_v17 = vld [vmem:[#allocation161_spill] sm:$0xff] }
 0x2ed   : > { %11643 = vst [vmem:[#allocation25_spill] sm:$0xff] %v9042_v10  ;;  %11645 = vst [vmem:[#allocation26_spill] sm:$0xff] %v9045_v42  ;;  %v3585_v8 = vmul.f32 %v11424_v15, %v675_v59  ;;  %v1425_v60 = vmul.f32 %v7940_v58, %v878_v3  ;;  %v1426_v28 = vmul.f32 %v7943_v29, %v878_v3  ;;  %v11648_v59 = vld [vmem:[#allocation157_spill] sm:$0xff]  ;;  %v11651_v10 = vld [vmem:[#allocation160_spill] sm:$0xff] }
 0x2ee   : > { %v2208_v11 = vmul.f32 %v7946_v55, %v878_v3  ;;  %v2209_v61 = vmul.f32 %v11544_v35, %v878_v3  ;;  %v2985_v19 = vmul.f32 %v11545_v5, %v878_v3  ;;  %v2986_v32 = vmul.f32 %v11546_v53, %v878_v3 }
 0x2ef   : > { %v3762_v24 = vmul.f32 %v11547_v27, %v878_v3  ;;  %v3763_v51 = vmul.f32 %v11646_v38, %v878_v3  ;;  %v9064_v48 = vadd.f32 %v1425_v60, %v11647_v34  ;;  %v9067_v9 = vadd.f32 %v1426_v28, %v11648_v59  ;;  %v11654_v60 = vld [vmem:[#allocation139_spill] sm:$0xff]  ;;  %v11655_v28 = vld [vmem:[#allocation70_spill] sm:$0xff] }
 0x2f0   : > { %v9070_v63 = vadd.f32 %v2208_v11, %v11649_v25  ;;  %v9073_v42 = vadd.f32 %v2209_v61, %v11650_v26  ;;  %v9076_v47 = vadd.f32 %v2985_v19, %v11651_v10  ;;  %v9079_v46 = vadd.f32 %v2986_v32, %v11652_v17  ;;  %v11657_v11 = vld [vmem:[#allocation71_spill] sm:$0xff]  ;;  %v11659_v61 = vld [vmem:[#allocation72_spill] sm:$0xff]  ;;  %v11661_v10 = vld [vmem:[#allocation73_spill] sm:$0xff] }
 0x2f1   : > { %v9082_v3 = vadd.f32 %v3762_v24, %v11653_v0  ;;  %v9085_v34 = vadd.f32 %v3763_v51, %v11654_v60  ;;  %v9088_v59 = vadd.f32 %v1247_v1, %v11655_v28  ;;  %v9091_v25 = vadd.f32 %v1248_v44, %v11657_v11  ;;  %v11663_v17 = vld [vmem:[#allocation74_spill] sm:$0xff]  ;;  %v11665_v0 = vld [vmem:[#allocation75_spill] sm:$0xff]  ;;  %v11667_v51 = vld [vmem:[#allocation76_spill] sm:$0xff]  ;;  %v807_v44 = vpop.permute.xlu0 %806 }
 0x2f2   : > { %v9094_v26 = vadd.f32 %v2030_v22, %v11659_v61  ;;  %v9097_v19 = vadd.f32 %v2031_v39, %v11661_v10  ;;  %v9100_v32 = vadd.f32 %v2807_v49, %v11663_v17  ;;  %v9103_v24 = vadd.f32 %v2808_v21, %v11665_v0  ;;  %v11669_v1 = vld [vmem:[#allocation77_spill] sm:$0xff]  ;;  %v11671_v0 = vld [vmem:[#allocation140_spill] sm:$0xff] }
 0x2f3   : > { %11656 = vst [vmem:[#allocation27_spill] sm:$0xff] %v9088_v59  ;;  %11658 = vst [vmem:[#allocation28_spill] sm:$0xff] %v9091_v25  ;;  %v9106_v60 = vadd.f32 %v3584_v56, %v11667_v51  ;;  %v9109_v28 = vadd.f32 %v3585_v8, %v11669_v1  ;;  %v1553_v11 = vmax.f32 %v9064_v48, 0.0  ;;  %v1554_v22 = vmax.f32 %v9067_v9, 0.0  ;;  %v11672_v51 = vld [vmem:[#allocation141_spill] sm:$0xff]  ;;  %v11673_v1 = vld [vmem:[#allocation142_spill] sm:$0xff] }
 0x2f4   : > { %11660 = vst [vmem:[#allocation29_spill] sm:$0xff] %v9094_v26  ;;  %11662 = vst [vmem:[#allocation253_spill] sm:$0xff] %v9097_v19  ;;  %v2336_v39 = vmax.f32 %v9070_v63, 0.0  ;;  %v2337_v61 = vmax.f32 %v9073_v42, 0.0  ;;  %v3113_v49 = vmax.f32 %v9076_v47, 0.0  ;;  %v3114_v21 = vmax.f32 %v9079_v46, 0.0 }
 0x2f5   : > { %11664 = vst [vmem:[#allocation254_spill] sm:$0xff] %v9100_v32  ;;  %11666 = vst [vmem:[#allocation255_spill] sm:$0xff] %v9103_v24  ;;  %v3890_v10 = vmax.f32 %v9082_v3, 0.0  ;;  %v3891_v56 = vmax.f32 %v9085_v34, 0.0  ;;  %v1391_v8 = vmul.f32 %v7940_v58, %v807_v44  ;;  %v1392_v17 = vmul.f32 %v7943_v29, %v807_v44  ;;  %v11675_v32 = vld [vmem:[#allocation144_spill] sm:$0xff]  ;;  %v11676_v26 = vld [vmem:[#allocation145_spill] sm:$0xff] }
 0x2f6   : > { %11668 = vst [vmem:[#allocation178_spill] sm:$0xff] %v9106_v60  ;;  %11670 = vst [vmem:[#allocation179_spill] sm:$0xff] %v9109_v28  ;;  %v2174_v48 = vmul.f32 %v7946_v55, %v807_v44  ;;  %v2175_v9 = vmul.f32 %v11544_v35, %v807_v44  ;;  %v2951_v63 = vmul.f32 %v11545_v5, %v807_v44  ;;  %v11674_v60 = vld [vmem:[#allocation143_spill] sm:$0xff]  ;;  %v11677_v59 = vld [vmem:[#allocation38_spill] sm:$0xff] }
 0x2f7   : > { %v2952_v42 = vmul.f32 %v11546_v53, %v807_v44  ;;  %v3728_v47 = vmul.f32 %v11547_v27, %v807_v44  ;;  %v3729_v46 = vmul.f32 %v11646_v38, %v807_v44  ;;  %v1455_v3 = vadd.f32 %v1391_v8, %v11671_v0 }
 0x2f8   : > { %v1456_v34 = vadd.f32 %v1392_v17, %v11672_v51  ;;  %v2238_v28 = vadd.f32 %v2174_v48, %v11673_v1  ;;  %v2239_v24 = vadd.f32 %v2175_v9, %v11674_v60  ;;  %v3015_v19 = vadd.f32 %v2951_v63, %v11675_v32  ;;  %v750_v51 = vpop.permute.xlu1 %749 }
 0x2f9   : > { %v3016_v25 = vadd.f32 %v2952_v42, %v11676_v26  ;;  %v3792_v30 = vadd.f32 %v3728_v47, %v11677_v59  ;;  %v3793_v53 = vadd.f32 %v3729_v46, %v11678_v52  ;;  %v1519_v5 = vmax.f32 %v1455_v3, 0.0 }
 0x2fa   : > { %v1520_v27 = vmax.f32 %v1456_v34, 0.0  ;;  %v2302_v35 = vmax.f32 %v2238_v28, 0.0  ;;  %v2303_v44 = vmax.f32 %v2239_v24, 0.0  ;;  %v3079_v38 = vmax.f32 %v3015_v19, 0.0  ;;  %v11679_v28 = vld [vmem:[#allocation210_spill] sm:$0xff] }
 0x2fb   : > { %v3080_v8 = vmax.f32 %v3016_v25, 0.0  ;;  %v3856_v0 = vmax.f32 %v3792_v30, 0.0  ;;  %v3857_v17 = vmax.f32 %v3793_v53, 0.0  ;;  %v9136_v48 = vadd.f32 %v8968_v16, %v1519_v5 }
 0x2fc   : > { %v9139_v32 = vadd.f32 %v8971_v7, %v1520_v27  ;;  %v9142_v26 = vadd.f32 %v8974_v57, %v2302_v35  ;;  %v9145_v52 = vadd.f32 %v8977_v31, %v2303_v44  ;;  %v9148_v59 = vadd.f32 %v8980_v40, %v3079_v38  ;;  %v882_v63 = vpop.permute.xlu1 %881 }
 0x2fd   : > { %v9151_v25 = vadd.f32 %v8983_v41, %v3080_v8  ;;  %v9154_v53 = vadd.f32 %v8986_v6, %v3856_v0  ;;  %v9157_v5 = vadd.f32 %v8989_v54, %v3857_v17  ;;  %v1283_v27 = vmul.f32 %v7715_v2, %v750_v51 }
 0x2fe   : > { %v1284_v35 = vmul.f32 %v7717_v23, %v750_v51  ;;  %v2066_v16 = vmul.f32 %v7719_v33, %v750_v51  ;;  %v2067_v7 = vmul.f32 %v7721_v36, %v750_v51  ;;  %v2843_v57 = vmul.f32 %v11421_v37, %v750_v51 }
 0x2ff   : > { %v2844_v31 = vmul.f32 %v11422_v12, %v750_v51  ;;  %v3620_v40 = vmul.f32 %v11423_v18, %v750_v51  ;;  %v3621_v41 = vmul.f32 %v11424_v15, %v750_v51  ;;  %v9168_v6 = vadd.f32 %v9000_v4, %v1553_v11 }
 0x300   : > { %v9171_v54 = vadd.f32 %v9003_v43, %v1554_v22  ;;  %v9174_v30 = vadd.f32 %v9006_v45, %v2336_v39  ;;  %v9177_v38 = vadd.f32 %v9009_v50, %v2337_v61  ;;  %v9180_v19 = vadd.f32 %v9012_v13, %v3113_v49  ;;  %v679_v43 = vpop.permute.xlu0 %678  ;;  %v11681_v45 = vld [vmem:[#allocation211_spill] sm:$0xff]  ;;  %v11683_v50 = vld [vmem:[#allocation212_spill] sm:$0xff]  ;;  %v11685_v13 = vld [vmem:[#allocation213_spill] sm:$0xff] }
 0x301   : > { %v9183_v24 = vadd.f32 %v9015_v20, %v3114_v21  ;;  %v9186_v60 = vadd.f32 %v9018_v62, %v3890_v10  ;;  %v9189_v4 = vadd.f32 %v9021_v14, %v3891_v56  ;;  %v9192_v11 = vadd.f32 %v1283_v27, %v11679_v28  ;;  %v11687_v20 = vld [vmem:[#allocation214_spill] sm:$0xff]  ;;  %v11689_v62 = vld [vmem:[#allocation215_spill] sm:$0xff]  ;;  %v11691_v14 = vld [vmem:[#allocation216_spill] sm:$0xff] }
 0x302   : > { %v9195_v22 = vadd.f32 %v1284_v35, %v11681_v45  ;;  %v9198_v39 = vadd.f32 %v2066_v16, %v11683_v50  ;;  %v9201_v61 = vadd.f32 %v2067_v7, %v11685_v13  ;;  %v9204_v49 = vadd.f32 %v2843_v57, %v11687_v20  ;;  %v11693_v56 = vld [vmem:[#allocation217_spill] sm:$0xff]  ;;  %v11695_v27 = vld [vmem:[#allocation126_spill] sm:$0xff]  ;;  %v11696_v16 = vld [vmem:[#allocation127_spill] sm:$0xff] }
 0x303   : > { %11680 = vst [vmem:[#allocation180_spill] sm:$0xff] %v9192_v11  ;;  %v9207_v21 = vadd.f32 %v2844_v31, %v11689_v62  ;;  %v9210_v10 = vadd.f32 %v3620_v40, %v11691_v14  ;;  %v9213_v9 = vadd.f32 %v3621_v41, %v11693_v56  ;;  %v1249_v42 = vmul.f32 %v7715_v2, %v679_v43  ;;  %v11697_v57 = vld [vmem:[#allocation128_spill] sm:$0xff]  ;;  %v11698_v40 = vld [vmem:[#allocation129_spill] sm:$0xff]  ;;  %v11702_v62 = vld [vmem:[#allocation42_spill] sm:$0xff] }
 0x304   : > { %11682 = vst [vmem:[#allocation181_spill] sm:$0xff] %v9195_v22  ;;  %11684 = vst [vmem:[#allocation182_spill] sm:$0xff] %v9198_v39  ;;  %v1250_v47 = vmul.f32 %v7717_v23, %v679_v43  ;;  %v2032_v46 = vmul.f32 %v7719_v33, %v679_v43  ;;  %v2033_v3 = vmul.f32 %v7721_v36, %v679_v43  ;;  %v11699_v28 = vld [vmem:[#allocation284_spill] sm:$0xff]  ;;  %v11703_v56 = vld [vmem:[#allocation43_spill] sm:$0xff] }
 0x305   : > { %11686 = vst [vmem:[#allocation183_spill] sm:$0xff] %v9201_v61  ;;  %11688 = vst [vmem:[#allocation184_spill] sm:$0xff] %v9204_v49  ;;  %v2809_v34 = vmul.f32 %v11421_v37, %v679_v43  ;;  %v2810_v1 = vmul.f32 %v11422_v12, %v679_v43  ;;  %v3586_v44 = vmul.f32 %v11423_v18, %v679_v43  ;;  %v11700_v50 = vld [vmem:[#allocation40_spill] sm:$0xff]  ;;  %v11705_v49 = vld [vmem:[#allocation45_spill] sm:$0xff] }
 0x306   : > { %11690 = vst [vmem:[#allocation185_spill] sm:$0xff] %v9207_v21  ;;  %11692 = vst [vmem:[#allocation245_spill] sm:$0xff] %v9210_v10  ;;  %v3587_v8 = vmul.f32 %v11424_v15, %v679_v43  ;;  %v1427_v0 = vmul.f32 %v7940_v58, %v882_v63  ;;  %v1428_v17 = vmul.f32 %v7943_v29, %v882_v63  ;;  %v11701_v43 = vld [vmem:[#allocation41_spill] sm:$0xff]  ;;  %v11704_v10 = vld [vmem:[#allocation44_spill] sm:$0xff] }
 0x307   : > { %11694 = vst [vmem:[#allocation281_spill] sm:$0xff] %v9213_v9  ;;  %v2210_v51 = vmul.f32 %v7946_v55, %v882_v63  ;;  %v2211_v35 = vmul.f32 %v11695_v27, %v882_v63  ;;  %v2987_v7 = vmul.f32 %v11696_v16, %v882_v63  ;;  %v2988_v31 = vmul.f32 %v11697_v57, %v882_v63  ;;  %v11706_v39 = vld [vmem:[#allocation25_spill] sm:$0xff]  ;;  %v11731_v11 = vld [vmem:[#allocation179_spill] sm:$0xff] }
 0x308   : > { %v3764_v41 = vmul.f32 %v11698_v40, %v882_v63  ;;  %v3765_v45 = vmul.f32 %v11699_v28, %v882_v63  ;;  %v9232_v13 = vadd.f32 %v1427_v0, %v11700_v50  ;;  %v9235_v20 = vadd.f32 %v1428_v17, %v11701_v43  ;;  %v11707_v0 = vld [vmem:[#allocation26_spill] sm:$0xff] }
 0x309   : > { %v9238_v14 = vadd.f32 %v2210_v51, %v11702_v62  ;;  %v9241_v9 = vadd.f32 %v2211_v35, %v11703_v56  ;;  %v9244_v21 = vadd.f32 %v2987_v7, %v11704_v10  ;;  %v9247_v61 = vadd.f32 %v2988_v31, %v11705_v49  ;;  %v11708_v17 = vld [vmem:[#allocation62_spill] sm:$0xff]  ;;  %v11710_v51 = vld [vmem:[#allocation63_spill] sm:$0xff]  ;;  %v11712_v35 = vld [vmem:[#allocation64_spill] sm:$0xff] }
 0x30a   : > { %v9250_v63 = vadd.f32 %v3764_v41, %v11706_v39  ;;  %v9253_v50 = vadd.f32 %v3765_v45, %v11707_v0  ;;  %v9256_v43 = vadd.f32 %v1249_v42, %v11708_v17  ;;  %v9259_v62 = vadd.f32 %v1250_v47, %v11710_v51  ;;  %v11714_v10 = vld [vmem:[#allocation65_spill] sm:$0xff]  ;;  %v11716_v49 = vld [vmem:[#allocation66_spill] sm:$0xff]  ;;  %v11718_v39 = vld [vmem:[#allocation67_spill] sm:$0xff]  ;;  %v811_v47 = vpop.permute.xlu0 %810 }
 0x30b   : > { %v9262_v56 = vadd.f32 %v2032_v46, %v11712_v35  ;;  %v9265_v7 = vadd.f32 %v2033_v3, %v11714_v10  ;;  %v9268_v31 = vadd.f32 %v2809_v34, %v11716_v49  ;;  %v9271_v41 = vadd.f32 %v2810_v1, %v11718_v39  ;;  %v11720_v45 = vld [vmem:[#allocation68_spill] sm:$0xff]  ;;  %v11722_v42 = vld [vmem:[#allocation69_spill] sm:$0xff]  ;;  %v11724_v39 = vld [vmem:[#allocation27_spill] sm:$0xff] }
 0x30c   : > { %11709 = vst [vmem:[#allocation246_spill] sm:$0xff] %v9256_v43  ;;  %11711 = vst [vmem:[#allocation282_spill] sm:$0xff] %v9259_v62  ;;  %v9274_v0 = vadd.f32 %v3586_v44, %v11720_v45  ;;  %v9277_v17 = vadd.f32 %v3587_v8, %v11722_v42  ;;  %v1555_v51 = vmax.f32 %v9232_v13, 0.0  ;;  %v1556_v46 = vmax.f32 %v9235_v20, 0.0  ;;  %v11725_v45 = vld [vmem:[#allocation28_spill] sm:$0xff]  ;;  %v11726_v42 = vld [vmem:[#allocation29_spill] sm:$0xff] }
 0x30d   : > { %11713 = vst [vmem:[#allocation283_spill] sm:$0xff] %v9262_v56  ;;  %11715 = vst [vmem:[#allocation247_spill] sm:$0xff] %v9265_v7  ;;  %v2338_v3 = vmax.f32 %v9238_v14, 0.0  ;;  %v2339_v35 = vmax.f32 %v9241_v9, 0.0  ;;  %v3115_v34 = vmax.f32 %v9244_v21, 0.0  ;;  %v3116_v1 = vmax.f32 %v9247_v61, 0.0 }
 0x30e   : > { %11717 = vst [vmem:[#allocation248_spill] sm:$0xff] %v9268_v31  ;;  %11719 = vst [vmem:[#allocation249_spill] sm:$0xff] %v9271_v41  ;;  %v3892_v10 = vmax.f32 %v9250_v63, 0.0  ;;  %v3893_v44 = vmax.f32 %v9253_v50, 0.0  ;;  %v1393_v8 = vmul.f32 %v7940_v58, %v811_v47  ;;  %v1394_v49 = vmul.f32 %v7943_v29, %v811_v47  ;;  %v11728_v31 = vld [vmem:[#allocation254_spill] sm:$0xff]  ;;  %v11729_v56 = vld [vmem:[#allocation255_spill] sm:$0xff] }
 0x30f   : > { %11721 = vst [vmem:[#allocation30_spill] sm:$0xff] %v9274_v0  ;;  %11723 = vst [vmem:[#allocation31_spill] sm:$0xff] %v9277_v17  ;;  %v2176_v13 = vmul.f32 %v7946_v55, %v811_v47  ;;  %v2177_v20 = vmul.f32 %v11695_v27, %v811_v47  ;;  %v2953_v14 = vmul.f32 %v11696_v16, %v811_v47  ;;  %v11727_v0 = vld [vmem:[#allocation253_spill] sm:$0xff]  ;;  %v11730_v43 = vld [vmem:[#allocation178_spill] sm:$0xff] }
 0x310   : > { %v2954_v9 = vmul.f32 %v11697_v57, %v811_v47  ;;  %v3730_v21 = vmul.f32 %v11698_v40, %v811_v47  ;;  %v3731_v61 = vmul.f32 %v11699_v28, %v811_v47  ;;  %v1457_v63 = vadd.f32 %v1393_v8, %v11724_v39 }
 0x311   : > { %v1458_v50 = vadd.f32 %v1394_v49, %v11725_v45  ;;  %v2240_v17 = vadd.f32 %v2176_v13, %v11726_v42  ;;  %v2241_v41 = vadd.f32 %v2177_v20, %v11727_v0  ;;  %v3017_v7 = vadd.f32 %v2953_v14, %v11728_v31  ;;  %v754_v45 = vpop.permute.xlu1 %753 }
 0x312   : > { %v3018_v62 = vadd.f32 %v2954_v9, %v11729_v56  ;;  %v3794_v22 = vadd.f32 %v3730_v21, %v11730_v43  ;;  %v3795_v57 = vadd.f32 %v3731_v61, %v11731_v11  ;;  %v1521_v16 = vmax.f32 %v1457_v63, 0.0 }
 0x313   : > { %v1522_v40 = vmax.f32 %v1458_v50, 0.0  ;;  %v2304_v27 = vmax.f32 %v2240_v17, 0.0  ;;  %v2305_v47 = vmax.f32 %v2241_v41, 0.0  ;;  %v3081_v28 = vmax.f32 %v3017_v7, 0.0  ;;  %v11732_v17 = vld [vmem:[#allocation202_spill] sm:$0xff] }
 0x314   : > { %v3082_v8 = vmax.f32 %v3018_v62, 0.0  ;;  %v3858_v39 = vmax.f32 %v3794_v22, 0.0  ;;  %v3859_v49 = vmax.f32 %v3795_v57, 0.0  ;;  %v9304_v13 = vadd.f32 %v9136_v48, %v1521_v16 }
 0x315   : > { %v9307_v31 = vadd.f32 %v9139_v32, %v1522_v40  ;;  %v9310_v56 = vadd.f32 %v9142_v26, %v2304_v27  ;;  %v9313_v11 = vadd.f32 %v9145_v52, %v2305_v47  ;;  %v9316_v43 = vadd.f32 %v9148_v59, %v3081_v28  ;;  %v886_v14 = vpop.permute.xlu1 %885 }
 0x316   : > { %v9319_v62 = vadd.f32 %v9151_v25, %v3082_v8  ;;  %v9322_v22 = vadd.f32 %v9154_v53, %v3858_v39  ;;  %v9325_v48 = vadd.f32 %v9157_v5, %v3859_v49  ;;  %v1285_v32 = vmul.f32 %v7715_v2, %v754_v45 }
 0x317   : > { %v1286_v26 = vmul.f32 %v7717_v23, %v754_v45  ;;  %v2068_v27 = vmul.f32 %v7719_v33, %v754_v45  ;;  %v2069_v52 = vmul.f32 %v7721_v36, %v754_v45  ;;  %v2845_v59 = vmul.f32 %v11421_v37, %v754_v45 }
 0x318   : > { %v2846_v16 = vmul.f32 %v11422_v12, %v754_v45  ;;  %v3622_v25 = vmul.f32 %v11423_v18, %v754_v45  ;;  %v3623_v53 = vmul.f32 %v11424_v15, %v754_v45  ;;  %v9336_v57 = vadd.f32 %v9168_v6, %v1555_v51 }
 0x319   : > { %v9339_v5 = vadd.f32 %v9171_v54, %v1556_v46  ;;  %v9342_v40 = vadd.f32 %v9174_v30, %v2338_v3  ;;  %v9345_v28 = vadd.f32 %v9177_v38, %v2339_v35  ;;  %v9348_v7 = vadd.f32 %v9180_v19, %v3115_v34  ;;  %v683_v54 = vpop.permute.xlu0 %682  ;;  %v11734_v30 = vld [vmem:[#allocation203_spill] sm:$0xff]  ;;  %v11736_v38 = vld [vmem:[#allocation204_spill] sm:$0xff]  ;;  %v11738_v19 = vld [vmem:[#allocation205_spill] sm:$0xff] }
 0x31a   : > { %v9351_v41 = vadd.f32 %v9183_v24, %v3116_v1  ;;  %v9354_v0 = vadd.f32 %v9186_v60, %v3892_v10  ;;  %v9357_v6 = vadd.f32 %v9189_v4, %v3893_v44  ;;  %v9360_v51 = vadd.f32 %v1285_v32, %v11732_v17  ;;  %v11740_v24 = vld [vmem:[#allocation206_spill] sm:$0xff]  ;;  %v11742_v60 = vld [vmem:[#allocation207_spill] sm:$0xff]  ;;  %v11744_v4 = vld [vmem:[#allocation208_spill] sm:$0xff] }
 0x31b   : > { %v9363_v46 = vadd.f32 %v1286_v26, %v11734_v30  ;;  %v9366_v3 = vadd.f32 %v2068_v27, %v11736_v38  ;;  %v9369_v35 = vadd.f32 %v2069_v52, %v11738_v19  ;;  %v9372_v34 = vadd.f32 %v2845_v59, %v11740_v24  ;;  %v11746_v44 = vld [vmem:[#allocation209_spill] sm:$0xff]  ;;  %v11748_v32 = vld [vmem:[#allocation126_spill] sm:$0xff]  ;;  %v11749_v27 = vld [vmem:[#allocation127_spill] sm:$0xff] }
 0x31c   : > { %11733 = vst [vmem:[#allocation32_spill] sm:$0xff] %v9360_v51  ;;  %v9375_v1 = vadd.f32 %v2846_v16, %v11742_v60  ;;  %v9378_v10 = vadd.f32 %v3622_v25, %v11744_v4  ;;  %v9381_v20 = vadd.f32 %v3623_v53, %v11746_v44  ;;  %v1251_v9 = vmul.f32 %v7715_v2, %v683_v54  ;;  %v11750_v59 = vld [vmem:[#allocation128_spill] sm:$0xff]  ;;  %v11751_v25 = vld [vmem:[#allocation129_spill] sm:$0xff]  ;;  %v11755_v60 = vld [vmem:[#allocation182_spill] sm:$0xff] }
 0x31d   : > { %11735 = vst [vmem:[#allocation33_spill] sm:$0xff] %v9363_v46  ;;  %11737 = vst [vmem:[#allocation34_spill] sm:$0xff] %v9366_v3  ;;  %v1252_v21 = vmul.f32 %v7717_v23, %v683_v54  ;;  %v2034_v61 = vmul.f32 %v7719_v33, %v683_v54  ;;  %v2035_v63 = vmul.f32 %v7721_v36, %v683_v54  ;;  %v11752_v17 = vld [vmem:[#allocation284_spill] sm:$0xff]  ;;  %v11756_v44 = vld [vmem:[#allocation183_spill] sm:$0xff] }
 0x31e   : > { %11739 = vst [vmem:[#allocation35_spill] sm:$0xff] %v9369_v35  ;;  %11741 = vst [vmem:[#allocation36_spill] sm:$0xff] %v9372_v34  ;;  %v2811_v50 = vmul.f32 %v11421_v37, %v683_v54  ;;  %v2812_v42 = vmul.f32 %v11422_v12, %v683_v54  ;;  %v3588_v47 = vmul.f32 %v11423_v18, %v683_v54  ;;  %v11753_v38 = vld [vmem:[#allocation180_spill] sm:$0xff]  ;;  %v11758_v34 = vld [vmem:[#allocation185_spill] sm:$0xff] }
 0x31f   : > { %11743 = vst [vmem:[#allocation37_spill] sm:$0xff] %v9375_v1  ;;  %11745 = vst [vmem:[#allocation250_spill] sm:$0xff] %v9378_v10  ;;  %v3589_v8 = vmul.f32 %v11424_v15, %v683_v54  ;;  %v1429_v39 = vmul.f32 %v7940_v58, %v886_v14  ;;  %v1430_v49 = vmul.f32 %v7943_v29, %v886_v14  ;;  %v11754_v54 = vld [vmem:[#allocation181_spill] sm:$0xff]  ;;  %v11757_v10 = vld [vmem:[#allocation184_spill] sm:$0xff] }
 0x320   : > { %11747 = vst [vmem:[#allocation251_spill] sm:$0xff] %v9381_v20  ;;  %v2212_v45 = vmul.f32 %v7946_v55, %v886_v14  ;;  %v2213_v26 = vmul.f32 %v11748_v32, %v886_v14  ;;  %v2989_v52 = vmul.f32 %v11749_v27, %v886_v14  ;;  %v2990_v16 = vmul.f32 %v11750_v59, %v886_v14  ;;  %v11759_v3 = vld [vmem:[#allocation245_spill] sm:$0xff]  ;;  %v11784_v51 = vld [vmem:[#allocation31_spill] sm:$0xff] }
 0x321   : > { %v3766_v53 = vmul.f32 %v11751_v25, %v886_v14  ;;  %v3767_v30 = vmul.f32 %v11752_v17, %v886_v14  ;;  %v9400_v19 = vadd.f32 %v1429_v39, %v11753_v38  ;;  %v9403_v24 = vadd.f32 %v1430_v49, %v11754_v54  ;;  %v11760_v39 = vld [vmem:[#allocation281_spill] sm:$0xff]  ;;  %v11761_v49 = vld [vmem:[#allocation86_spill] sm:$0xff] }
 0x322   : > { %v9406_v4 = vadd.f32 %v2212_v45, %v11755_v60  ;;  %v9409_v20 = vadd.f32 %v2213_v26, %v11756_v44  ;;  %v9412_v1 = vadd.f32 %v2989_v52, %v11757_v10  ;;  %v9415_v35 = vadd.f32 %v2990_v16, %v11758_v34  ;;  %v11763_v45 = vld [vmem:[#allocation87_spill] sm:$0xff]  ;;  %v11765_v26 = vld [vmem:[#allocation88_spill] sm:$0xff]  ;;  %v11767_v10 = vld [vmem:[#allocation89_spill] sm:$0xff] }
 0x323   : > { %v9418_v14 = vadd.f32 %v3766_v53, %v11759_v3  ;;  %v9421_v38 = vadd.f32 %v3767_v30, %v11760_v39  ;;  %v9424_v54 = vadd.f32 %v1251_v9, %v11761_v49  ;;  %v9427_v60 = vadd.f32 %v1252_v21, %v11763_v45  ;;  %v11769_v34 = vld [vmem:[#allocation90_spill] sm:$0xff]  ;;  %v11771_v3 = vld [vmem:[#allocation91_spill] sm:$0xff]  ;;  %v11773_v30 = vld [vmem:[#allocation92_spill] sm:$0xff]  ;;  %v815_v21 = vpop.permute.xlu0 %814 }
 0x324   : > { %v9430_v44 = vadd.f32 %v2034_v61, %v11765_v26  ;;  %v9433_v52 = vadd.f32 %v2035_v63, %v11767_v10  ;;  %v9436_v16 = vadd.f32 %v2811_v50, %v11769_v34  ;;  %v9439_v53 = vadd.f32 %v2812_v42, %v11771_v3  ;;  %v11775_v9 = vld [vmem:[#allocation93_spill] sm:$0xff]  ;;  %v11777_v3 = vld [vmem:[#allocation246_spill] sm:$0xff] }
 0x325   : > { %11762 = vst [vmem:[#allocation252_spill] sm:$0xff] %v9424_v54  ;;  %11764 = vst [vmem:[#allocation130_spill] sm:$0xff] %v9427_v60  ;;  %v9442_v39 = vadd.f32 %v3588_v47, %v11773_v30  ;;  %v9445_v49 = vadd.f32 %v3589_v8, %v11775_v9  ;;  %v1557_v45 = vmax.f32 %v9400_v19, 0.0  ;;  %v1558_v61 = vmax.f32 %v9403_v24, 0.0  ;;  %v11778_v30 = vld [vmem:[#allocation282_spill] sm:$0xff]  ;;  %v11779_v9 = vld [vmem:[#allocation283_spill] sm:$0xff] }
 0x326   : > { %11766 = vst [vmem:[#allocation131_spill] sm:$0xff] %v9430_v44  ;;  %11768 = vst [vmem:[#allocation132_spill] sm:$0xff] %v9433_v52  ;;  %v2340_v63 = vmax.f32 %v9406_v4, 0.0  ;;  %v2341_v26 = vmax.f32 %v9409_v20, 0.0  ;;  %v3117_v50 = vmax.f32 %v9412_v1, 0.0  ;;  %v3118_v42 = vmax.f32 %v9415_v35, 0.0 }
 0x327   : > { %11770 = vst [vmem:[#allocation133_spill] sm:$0xff] %v9436_v16  ;;  %11772 = vst [vmem:[#allocation134_spill] sm:$0xff] %v9439_v53  ;;  %v3894_v10 = vmax.f32 %v9418_v14, 0.0  ;;  %v3895_v47 = vmax.f32 %v9421_v38, 0.0  ;;  %v1395_v8 = vmul.f32 %v7940_v58, %v815_v21  ;;  %v1396_v34 = vmul.f32 %v7943_v29, %v815_v21  ;;  %v11781_v16 = vld [vmem:[#allocation248_spill] sm:$0xff]  ;;  %v11782_v44 = vld [vmem:[#allocation249_spill] sm:$0xff] }
 0x328   : > { %11774 = vst [vmem:[#allocation170_spill] sm:$0xff] %v9442_v39  ;;  %11776 = vst [vmem:[#allocation171_spill] sm:$0xff] %v9445_v49  ;;  %v2178_v19 = vmul.f32 %v7946_v55, %v815_v21  ;;  %v2179_v24 = vmul.f32 %v11748_v32, %v815_v21  ;;  %v2955_v4 = vmul.f32 %v11749_v27, %v815_v21  ;;  %v11780_v39 = vld [vmem:[#allocation247_spill] sm:$0xff]  ;;  %v11783_v54 = vld [vmem:[#allocation30_spill] sm:$0xff] }
 0x329   : > { %v2956_v20 = vmul.f32 %v11750_v59, %v815_v21  ;;  %v3732_v1 = vmul.f32 %v11751_v25, %v815_v21  ;;  %v3733_v35 = vmul.f32 %v11752_v17, %v815_v21  ;;  %v1459_v14 = vadd.f32 %v1395_v8, %v11777_v3 }
 0x32a   : > { %v1460_v38 = vadd.f32 %v1396_v34, %v11778_v30  ;;  %v2242_v49 = vadd.f32 %v2178_v19, %v11779_v9  ;;  %v2243_v53 = vadd.f32 %v2179_v24, %v11780_v39  ;;  %v3019_v52 = vadd.f32 %v2955_v4, %v11781_v16  ;;  %v758_v30 = vpop.permute.xlu1 %757 }
 0x32b   : > { %v3020_v60 = vadd.f32 %v2956_v20, %v11782_v44  ;;  %v3796_v46 = vadd.f32 %v3732_v1, %v11783_v54  ;;  %v3797_v59 = vadd.f32 %v3733_v35, %v11784_v51  ;;  %v1523_v27 = vmax.f32 %v1459_v14, 0.0 }
 0x32c   : > { %v1524_v25 = vmax.f32 %v1460_v38, 0.0  ;;  %v2306_v32 = vmax.f32 %v2242_v49, 0.0  ;;  %v2307_v21 = vmax.f32 %v2243_v53, 0.0  ;;  %v3083_v17 = vmax.f32 %v3019_v52, 0.0  ;;  %v11785_v49 = vld [vmem:[#allocation226_spill] sm:$0xff] }
 0x32d   : > { %v3084_v8 = vmax.f32 %v3020_v60, 0.0  ;;  %v3860_v3 = vmax.f32 %v3796_v46, 0.0  ;;  %v3861_v34 = vmax.f32 %v3797_v59, 0.0  ;;  %v9472_v19 = vadd.f32 %v9304_v13, %v1523_v27 }
 0x32e   : > { %v9475_v16 = vadd.f32 %v9307_v31, %v1524_v25  ;;  %v9478_v44 = vadd.f32 %v9310_v56, %v2306_v32  ;;  %v9481_v51 = vadd.f32 %v9313_v11, %v2307_v21  ;;  %v9484_v54 = vadd.f32 %v9316_v43, %v3083_v17  ;;  %v890_v4 = vpop.permute.xlu1 %889 }
 0x32f   : > { %v9487_v60 = vadd.f32 %v9319_v62, %v3084_v8  ;;  %v9490_v46 = vadd.f32 %v9322_v22, %v3860_v3  ;;  %v9493_v13 = vadd.f32 %v9325_v48, %v3861_v34  ;;  %v1287_v31 = vmul.f32 %v7715_v2, %v758_v30 }
 0x330   : > { %v1288_v56 = vmul.f32 %v7717_v23, %v758_v30  ;;  %v2070_v32 = vmul.f32 %v7719_v33, %v758_v30  ;;  %v2071_v11 = vmul.f32 %v7721_v36, %v758_v30  ;;  %v2847_v43 = vmul.f32 %v11421_v37, %v758_v30 }
 0x331   : > { %v2848_v27 = vmul.f32 %v11422_v12, %v758_v30  ;;  %v3624_v62 = vmul.f32 %v11423_v18, %v758_v30  ;;  %v3625_v22 = vmul.f32 %v11424_v15, %v758_v30  ;;  %v9504_v59 = vadd.f32 %v9336_v57, %v1557_v45 }
 0x332   : > { %v9507_v48 = vadd.f32 %v9339_v5, %v1558_v61  ;;  %v9510_v25 = vadd.f32 %v9342_v40, %v2340_v63  ;;  %v9513_v17 = vadd.f32 %v9345_v28, %v2341_v26  ;;  %v9516_v52 = vadd.f32 %v9348_v7, %v3117_v50  ;;  %v687_v5 = vpop.permute.xlu0 %686  ;;  %v11787_v40 = vld [vmem:[#allocation227_spill] sm:$0xff]  ;;  %v11789_v28 = vld [vmem:[#allocation228_spill] sm:$0xff]  ;;  %v11791_v7 = vld [vmem:[#allocation229_spill] sm:$0xff] }
 0x333   : > { %v9519_v53 = vadd.f32 %v9351_v41, %v3118_v42  ;;  %v9522_v39 = vadd.f32 %v9354_v0, %v3894_v10  ;;  %v9525_v57 = vadd.f32 %v9357_v6, %v3895_v47  ;;  %v9528_v45 = vadd.f32 %v1287_v31, %v11785_v49  ;;  %v11793_v41 = vld [vmem:[#allocation230_spill] sm:$0xff]  ;;  %v11795_v0 = vld [vmem:[#allocation231_spill] sm:$0xff]  ;;  %v11797_v6 = vld [vmem:[#allocation232_spill] sm:$0xff] }
 0x334   : > { %v9531_v61 = vadd.f32 %v1288_v56, %v11787_v40  ;;  %v9534_v63 = vadd.f32 %v2070_v32, %v11789_v28  ;;  %v9537_v26 = vadd.f32 %v2071_v11, %v11791_v7  ;;  %v9540_v50 = vadd.f32 %v2847_v43, %v11793_v41  ;;  %v11799_v47 = vld [vmem:[#allocation233_spill] sm:$0xff]  ;;  %v11801_v31 = vld [vmem:[#allocation126_spill] sm:$0xff]  ;;  %v11802_v32 = vld [vmem:[#allocation127_spill] sm:$0xff] }
 0x335   : > { %11786 = vst [vmem:[#allocation172_spill] sm:$0xff] %v9528_v45  ;;  %v9543_v42 = vadd.f32 %v2848_v27, %v11795_v0  ;;  %v9546_v10 = vadd.f32 %v3624_v62, %v11797_v6  ;;  %v9549_v24 = vadd.f32 %v3625_v22, %v11799_v47  ;;  %v1253_v20 = vmul.f32 %v7715_v2, %v687_v5  ;;  %v11803_v43 = vld [vmem:[#allocation128_spill] sm:$0xff]  ;;  %v11804_v62 = vld [vmem:[#allocation129_spill] sm:$0xff]  ;;  %v11808_v0 = vld [vmem:[#allocation34_spill] sm:$0xff] }
 0x336   : > { %11788 = vst [vmem:[#allocation173_spill] sm:$0xff] %v9531_v61  ;;  %11790 = vst [vmem:[#allocation174_spill] sm:$0xff] %v9534_v63  ;;  %v1254_v1 = vmul.f32 %v7717_v23, %v687_v5  ;;  %v2036_v35 = vmul.f32 %v7719_v33, %v687_v5  ;;  %v2037_v14 = vmul.f32 %v7721_v36, %v687_v5  ;;  %v11805_v49 = vld [vmem:[#allocation284_spill] sm:$0xff]  ;;  %v11809_v47 = vld [vmem:[#allocation35_spill] sm:$0xff] }
 0x337   : > { %11792 = vst [vmem:[#allocation175_spill] sm:$0xff] %v9537_v26  ;;  %11794 = vst [vmem:[#allocation176_spill] sm:$0xff] %v9540_v50  ;;  %v2813_v38 = vmul.f32 %v11421_v37, %v687_v5  ;;  %v2814_v9 = vmul.f32 %v11422_v12, %v687_v5  ;;  %v3590_v21 = vmul.f32 %v11423_v18, %v687_v5  ;;  %v11806_v28 = vld [vmem:[#allocation32_spill] sm:$0xff]  ;;  %v11811_v50 = vld [vmem:[#allocation37_spill] sm:$0xff] }
 0x338   : > { %11796 = vst [vmem:[#allocation177_spill] sm:$0xff] %v9543_v42  ;;  %11798 = vst [vmem:[#allocation135_spill] sm:$0xff] %v9546_v10  ;;  %v3591_v8 = vmul.f32 %v11424_v15, %v687_v5  ;;  %v1431_v3 = vmul.f32 %v7940_v58, %v890_v4  ;;  %v1432_v34 = vmul.f32 %v7943_v29, %v890_v4  ;;  %v11807_v5 = vld [vmem:[#allocation33_spill] sm:$0xff]  ;;  %v11810_v10 = vld [vmem:[#allocation36_spill] sm:$0xff] }
 0x339   : > { %11800 = vst [vmem:[#allocation136_spill] sm:$0xff] %v9549_v24  ;;  %v2214_v30 = vmul.f32 %v7946_v55, %v890_v4  ;;  %v2215_v56 = vmul.f32 %v11801_v31, %v890_v4  ;;  %v2991_v11 = vmul.f32 %v11802_v32, %v890_v4  ;;  %v2992_v27 = vmul.f32 %v11803_v43, %v890_v4  ;;  %v11812_v63 = vld [vmem:[#allocation250_spill] sm:$0xff]  ;;  %v11837_v45 = vld [vmem:[#allocation171_spill] sm:$0xff] }
 0x33a   : > { %v3768_v22 = vmul.f32 %v11804_v62, %v890_v4  ;;  %v3769_v40 = vmul.f32 %v11805_v49, %v890_v4  ;;  %v9568_v7 = vadd.f32 %v1431_v3, %v11806_v28  ;;  %v9571_v41 = vadd.f32 %v1432_v34, %v11807_v5  ;;  %v11813_v3 = vld [vmem:[#allocation251_spill] sm:$0xff]  ;;  %v11814_v34 = vld [vmem:[#allocation78_spill] sm:$0xff] }
 0x33b   : > { %v9574_v6 = vadd.f32 %v2214_v30, %v11808_v0  ;;  %v9577_v24 = vadd.f32 %v2215_v56, %v11809_v47  ;;  %v9580_v42 = vadd.f32 %v2991_v11, %v11810_v10  ;;  %v9583_v26 = vadd.f32 %v2992_v27, %v11811_v50  ;;  %v11816_v30 = vld [vmem:[#allocation79_spill] sm:$0xff]  ;;  %v11818_v56 = vld [vmem:[#allocation80_spill] sm:$0xff]  ;;  %v11820_v10 = vld [vmem:[#allocation81_spill] sm:$0xff] }
 0x33c   : > { %v9586_v4 = vadd.f32 %v3768_v22, %v11812_v63  ;;  %v9589_v28 = vadd.f32 %v3769_v40, %v11813_v3  ;;  %v9592_v5 = vadd.f32 %v1253_v20, %v11814_v34  ;;  %v9595_v0 = vadd.f32 %v1254_v1, %v11816_v30  ;;  %v11822_v50 = vld [vmem:[#allocation82_spill] sm:$0xff]  ;;  %v11824_v63 = vld [vmem:[#allocation83_spill] sm:$0xff]  ;;  %v11826_v40 = vld [vmem:[#allocation84_spill] sm:$0xff]  ;;  %v819_v1 = vpop.permute.xlu0 %818 }
 0x33d   : > { %v9598_v47 = vadd.f32 %v2036_v35, %v11818_v56  ;;  %v9601_v11 = vadd.f32 %v2037_v14, %v11820_v10  ;;  %v9604_v27 = vadd.f32 %v2813_v38, %v11822_v50  ;;  %v9607_v22 = vadd.f32 %v2814_v9, %v11824_v63  ;;  %v11828_v20 = vld [vmem:[#allocation85_spill] sm:$0xff]  ;;  %v11830_v63 = vld [vmem:[#allocation252_spill] sm:$0xff] }
 0x33e   : > { %11815 = vst [vmem:[#allocation137_spill] sm:$0xff] %v9592_v5  ;;  %11817 = vst [vmem:[#allocation162_spill] sm:$0xff] %v9595_v0  ;;  %v9610_v3 = vadd.f32 %v3590_v21, %v11826_v40  ;;  %v9613_v34 = vadd.f32 %v3591_v8, %v11828_v20  ;;  %v1559_v30 = vmax.f32 %v9568_v7, 0.0  ;;  %v1560_v35 = vmax.f32 %v9571_v41, 0.0  ;;  %v11831_v40 = vld [vmem:[#allocation130_spill] sm:$0xff]  ;;  %v11832_v20 = vld [vmem:[#allocation131_spill] sm:$0xff] }
 0x33f   : > { %11819 = vst [vmem:[#allocation163_spill] sm:$0xff] %v9598_v47  ;;  %11821 = vst [vmem:[#allocation164_spill] sm:$0xff] %v9601_v11  ;;  %v2342_v14 = vmax.f32 %v9574_v6, 0.0  ;;  %v2343_v56 = vmax.f32 %v9577_v24, 0.0  ;;  %v3119_v38 = vmax.f32 %v9580_v42, 0.0  ;;  %v3120_v9 = vmax.f32 %v9583_v26, 0.0 }
 0x340   : > { %11823 = vst [vmem:[#allocation165_spill] sm:$0xff] %v9604_v27  ;;  %11825 = vst [vmem:[#allocation166_spill] sm:$0xff] %v9607_v22  ;;  %v3896_v10 = vmax.f32 %v9586_v4, 0.0  ;;  %v3897_v21 = vmax.f32 %v9589_v28, 0.0  ;;  %v1397_v8 = vmul.f32 %v7940_v58, %v819_v1  ;;  %v1398_v50 = vmul.f32 %v7943_v29, %v819_v1  ;;  %v11834_v27 = vld [vmem:[#allocation133_spill] sm:$0xff]  ;;  %v11835_v47 = vld [vmem:[#allocation134_spill] sm:$0xff] }
 0x341   : > { %11827 = vst [vmem:[#allocation54_spill] sm:$0xff] %v9610_v3  ;;  %11829 = vst [vmem:[#allocation55_spill] sm:$0xff] %v9613_v34  ;;  %v2180_v7 = vmul.f32 %v7946_v55, %v819_v1  ;;  %v2181_v41 = vmul.f32 %v11801_v31, %v819_v1  ;;  %v2957_v6 = vmul.f32 %v11802_v32, %v819_v1  ;;  %v11833_v3 = vld [vmem:[#allocation132_spill] sm:$0xff]  ;;  %v11836_v5 = vld [vmem:[#allocation170_spill] sm:$0xff] }
 0x342   : > { %v2958_v24 = vmul.f32 %v11803_v43, %v819_v1  ;;  %v3734_v42 = vmul.f32 %v11804_v62, %v819_v1  ;;  %v3735_v26 = vmul.f32 %v11805_v49, %v819_v1  ;;  %v1461_v4 = vadd.f32 %v1397_v8, %v11830_v63 }
 0x343   : > { %v1462_v28 = vadd.f32 %v1398_v50, %v11831_v40  ;;  %v2244_v34 = vadd.f32 %v2180_v7, %v11832_v20  ;;  %v2245_v22 = vadd.f32 %v2181_v41, %v11833_v3  ;;  %v3021_v11 = vadd.f32 %v2957_v6, %v11834_v27  ;;  %v762_v40 = vpop.permute.xlu1 %761 }
 0x344   : > { %v3022_v0 = vadd.f32 %v2958_v24, %v11835_v47  ;;  %v3798_v61 = vadd.f32 %v3734_v42, %v11836_v5  ;;  %v3799_v43 = vadd.f32 %v3735_v26, %v11837_v45  ;;  %v1525_v32 = vmax.f32 %v1461_v4, 0.0 }
 0x345   : > { %v1526_v62 = vmax.f32 %v1462_v28, 0.0  ;;  %v2308_v31 = vmax.f32 %v2244_v34, 0.0  ;;  %v2309_v1 = vmax.f32 %v2245_v22, 0.0  ;;  %v3085_v49 = vmax.f32 %v3021_v11, 0.0  ;;  %v11838_v34 = vld [vmem:[#allocation218_spill] sm:$0xff] }
 0x346   : > { %v3086_v8 = vmax.f32 %v3022_v0, 0.0  ;;  %v3862_v63 = vmax.f32 %v3798_v61, 0.0  ;;  %v3863_v50 = vmax.f32 %v3799_v43, 0.0  ;;  %v9640_v7 = vadd.f32 %v9472_v19, %v1525_v32 }
 0x347   : > { %v9643_v27 = vadd.f32 %v9475_v16, %v1526_v62  ;;  %v9646_v47 = vadd.f32 %v9478_v44, %v2308_v31  ;;  %v9649_v45 = vadd.f32 %v9481_v51, %v2309_v1  ;;  %v9652_v5 = vadd.f32 %v9484_v54, %v3085_v49  ;;  %v894_v6 = vpop.permute.xlu1 %893 }
 0x348   : > { %v9655_v0 = vadd.f32 %v9487_v60, %v3086_v8  ;;  %v9658_v61 = vadd.f32 %v9490_v46, %v3862_v63  ;;  %v9661_v19 = vadd.f32 %v9493_v13, %v3863_v50  ;;  %v1289_v16 = vmul.f32 %v7715_v2, %v762_v40 }
 0x349   : > { %v1290_v44 = vmul.f32 %v7717_v23, %v762_v40  ;;  %v2072_v31 = vmul.f32 %v7719_v33, %v762_v40  ;;  %v2073_v51 = vmul.f32 %v7721_v36, %v762_v40  ;;  %v2849_v54 = vmul.f32 %v11421_v37, %v762_v40 }
 0x34a   : > { %v2850_v32 = vmul.f32 %v11422_v12, %v762_v40  ;;  %v3626_v60 = vmul.f32 %v11423_v18, %v762_v40  ;;  %v3627_v46 = vmul.f32 %v11424_v15, %v762_v40  ;;  %v9672_v43 = vadd.f32 %v9504_v59, %v1559_v30 }
 0x34b   : > { %v9675_v13 = vadd.f32 %v9507_v48, %v1560_v35  ;;  %v9678_v62 = vadd.f32 %v9510_v25, %v2342_v14  ;;  %v9681_v49 = vadd.f32 %v9513_v17, %v2343_v56  ;;  %v9684_v11 = vadd.f32 %v9516_v52, %v3119_v38  ;;  %v691_v48 = vpop.permute.xlu0 %690  ;;  %v11840_v25 = vld [vmem:[#allocation219_spill] sm:$0xff]  ;;  %v11842_v17 = vld [vmem:[#allocation220_spill] sm:$0xff]  ;;  %v11844_v52 = vld [vmem:[#allocation221_spill] sm:$0xff] }
 0x34c   : > { %v9687_v22 = vadd.f32 %v9519_v53, %v3120_v9  ;;  %v9690_v3 = vadd.f32 %v9522_v39, %v3896_v10  ;;  %v9693_v59 = vadd.f32 %v9525_v57, %v3897_v21  ;;  %v9696_v30 = vadd.f32 %v1289_v16, %v11838_v34  ;;  %v11846_v53 = vld [vmem:[#allocation222_spill] sm:$0xff]  ;;  %v11848_v39 = vld [vmem:[#allocation223_spill] sm:$0xff]  ;;  %v11850_v57 = vld [vmem:[#allocation224_spill] sm:$0xff] }
 0x34d   : > { %v9699_v35 = vadd.f32 %v1290_v44, %v11840_v25  ;;  %v9702_v14 = vadd.f32 %v2072_v31, %v11842_v17  ;;  %v9705_v56 = vadd.f32 %v2073_v51, %v11844_v52  ;;  %v9708_v38 = vadd.f32 %v2849_v54, %v11846_v53  ;;  %v11852_v21 = vld [vmem:[#allocation225_spill] sm:$0xff]  ;;  %v11854_v16 = vld [vmem:[#allocation126_spill] sm:$0xff]  ;;  %v11855_v31 = vld [vmem:[#allocation127_spill] sm:$0xff] }
 0x34e   : > { %11839 = vst [vmem:[#allocation56_spill] sm:$0xff] %v9696_v30  ;;  %v9711_v9 = vadd.f32 %v2850_v32, %v11848_v39  ;;  %v9714_v10 = vadd.f32 %v3626_v60, %v11850_v57  ;;  %v9717_v41 = vadd.f32 %v3627_v46, %v11852_v21  ;;  %v1255_v24 = vmul.f32 %v7715_v2, %v691_v48  ;;  %v11856_v54 = vld [vmem:[#allocation128_spill] sm:$0xff]  ;;  %v11857_v60 = vld [vmem:[#allocation129_spill] sm:$0xff]  ;;  %v11861_v39 = vld [vmem:[#allocation174_spill] sm:$0xff] }
 0x34f   : > { %11841 = vst [vmem:[#allocation57_spill] sm:$0xff] %v9699_v35  ;;  %11843 = vst [vmem:[#allocation167_spill] sm:$0xff] %v9702_v14  ;;  %v1256_v42 = vmul.f32 %v7717_v23, %v691_v48  ;;  %v2038_v26 = vmul.f32 %v7719_v33, %v691_v48  ;;  %v2039_v4 = vmul.f32 %v7721_v36, %v691_v48  ;;  %v11858_v34 = vld [vmem:[#allocation284_spill] sm:$0xff]  ;;  %v11862_v21 = vld [vmem:[#allocation175_spill] sm:$0xff] }
 0x350   : > { %11845 = vst [vmem:[#allocation168_spill] sm:$0xff] %v9705_v56  ;;  %11847 = vst [vmem:[#allocation169_spill] sm:$0xff] %v9708_v38  ;;  %v2815_v28 = vmul.f32 %v11421_v37, %v691_v48  ;;  %v2816_v20 = vmul.f32 %v11422_v12, %v691_v48  ;;  %v3592_v1 = vmul.f32 %v11423_v18, %v691_v48  ;;  %v11859_v17 = vld [vmem:[#allocation172_spill] sm:$0xff]  ;;  %v11864_v38 = vld [vmem:[#allocation177_spill] sm:$0xff] }
 0x351   : > { %11849 = vst [vmem:[#allocation146_spill] sm:$0xff] %v9711_v9  ;;  %11851 = vst [vmem:[#allocation147_spill] sm:$0xff] %v9714_v10  ;;  %v3593_v8 = vmul.f32 %v11424_v15, %v691_v48  ;;  %v1433_v63 = vmul.f32 %v7940_v58, %v894_v6  ;;  %v1434_v50 = vmul.f32 %v7943_v29, %v894_v6  ;;  %v11860_v48 = vld [vmem:[#allocation173_spill] sm:$0xff]  ;;  %v11863_v10 = vld [vmem:[#allocation176_spill] sm:$0xff] }
 0x352   : > { %11853 = vst [vmem:[#allocation148_spill] sm:$0xff] %v9717_v41  ;;  %v2216_v40 = vmul.f32 %v7946_v55, %v894_v6  ;;  %v2217_v44 = vmul.f32 %v11854_v16, %v894_v6  ;;  %v2993_v51 = vmul.f32 %v11855_v31, %v894_v6  ;;  %v2994_v32 = vmul.f32 %v11856_v54, %v894_v6  ;;  %v11865_v14 = vld [vmem:[#allocation135_spill] sm:$0xff] }
 0x353   : > { %v3770_v46 = vmul.f32 %v11857_v60, %v894_v6  ;;  %v3771_v25 = vmul.f32 %v11858_v34, %v894_v6  ;;  %v9736_v52 = vadd.f32 %v1433_v63, %v11859_v17  ;;  %v9739_v53 = vadd.f32 %v1434_v50, %v11860_v48  ;;  %v11866_v63 = vld [vmem:[#allocation136_spill] sm:$0xff]  ;;  %v11867_v50 = vld [vmem:[#allocation102_spill] sm:$0xff]  ;;  %v11890_v30 = vld [vmem:[#allocation55_spill] sm:$0xff] }
 0x354   : > { %v9742_v57 = vadd.f32 %v2216_v40, %v11861_v39  ;;  %v9745_v41 = vadd.f32 %v2217_v44, %v11862_v21  ;;  %v9748_v9 = vadd.f32 %v2993_v51, %v11863_v10  ;;  %v9751_v56 = vadd.f32 %v2994_v32, %v11864_v38  ;;  %v11869_v40 = vld [vmem:[#allocation103_spill] sm:$0xff]  ;;  %v11871_v44 = vld [vmem:[#allocation104_spill] sm:$0xff]  ;;  %v11873_v10 = vld [vmem:[#allocation105_spill] sm:$0xff] }
 0x355   : > { %v9754_v6 = vadd.f32 %v3770_v46, %v11865_v14  ;;  %v9757_v17 = vadd.f32 %v3771_v25, %v11866_v63  ;;  %v9760_v48 = vadd.f32 %v1255_v24, %v11867_v50  ;;  %v9763_v39 = vadd.f32 %v1256_v42, %v11869_v40  ;;  %v11875_v38 = vld [vmem:[#allocation106_spill] sm:$0xff]  ;;  %v11877_v14 = vld [vmem:[#allocation107_spill] sm:$0xff]  ;;  %v11879_v25 = vld [vmem:[#allocation108_spill] sm:$0xff]  ;;  %v823_v42 = vpop.permute.xlu0 %822 }
 0x356   : > { %v9766_v21 = vadd.f32 %v2038_v26, %v11871_v44  ;;  %v9769_v51 = vadd.f32 %v2039_v4, %v11873_v10  ;;  %v9772_v32 = vadd.f32 %v2815_v28, %v11875_v38  ;;  %v9775_v46 = vadd.f32 %v2816_v20, %v11877_v14  ;;  %v11881_v24 = vld [vmem:[#allocation109_spill] sm:$0xff] }
 0x357   : > { %11868 = vst [vmem:[#allocation149_spill] sm:$0xff] %v9760_v48  ;;  %11870 = vst [vmem:[#allocation150_spill] sm:$0xff] %v9763_v39  ;;  %v9778_v63 = vadd.f32 %v3592_v1, %v11879_v25  ;;  %v9781_v50 = vadd.f32 %v3593_v8, %v11881_v24  ;;  %v1561_v40 = vmax.f32 %v9736_v52, 0.0  ;;  %v1562_v26 = vmax.f32 %v9739_v53, 0.0  ;;  %v11883_v14 = vld [vmem:[#allocation137_spill] sm:$0xff]  ;;  %v11884_v25 = vld [vmem:[#allocation162_spill] sm:$0xff] }
 0x358   : > { %11872 = vst [vmem:[#allocation58_spill] sm:$0xff] %v9766_v21  ;;  %11874 = vst [vmem:[#allocation59_spill] sm:$0xff] %v9769_v51  ;;  %v2344_v4 = vmax.f32 %v9742_v57, 0.0  ;;  %v2345_v44 = vmax.f32 %v9745_v41, 0.0  ;;  %v3121_v28 = vmax.f32 %v9748_v9, 0.0  ;;  %v3122_v20 = vmax.f32 %v9751_v56, 0.0 }
 0x359   : > { %11876 = vst [vmem:[#allocation60_spill] sm:$0xff] %v9772_v32  ;;  %11878 = vst [vmem:[#allocation61_spill] sm:$0xff] %v9775_v46  ;;  %v3898_v10 = vmax.f32 %v9754_v6, 0.0  ;;  %v3899_v1 = vmax.f32 %v9757_v17, 0.0  ;;  %v1399_v8 = vmul.f32 %v7940_v58, %v823_v42  ;;  %v1400_v38 = vmul.f32 %v7943_v29, %v823_v42  ;;  %v11885_v24 = vld [vmem:[#allocation163_spill] sm:$0xff]  ;;  %v11887_v32 = vld [vmem:[#allocation165_spill] sm:$0xff] }
 0x35a   : > { %11880 = vst [vmem:[#allocation151_spill] sm:$0xff] %v9778_v63  ;;  %11882 = vst [vmem:[#allocation194_spill] sm:$0xff] %v9781_v50  ;;  %v2182_v52 = vmul.f32 %v7946_v55, %v823_v42  ;;  %v2183_v53 = vmul.f32 %v11854_v16, %v823_v42  ;;  %v2959_v57 = vmul.f32 %v11855_v31, %v823_v42  ;;  %v11886_v63 = vld [vmem:[#allocation164_spill] sm:$0xff]  ;;  %v11888_v21 = vld [vmem:[#allocation166_spill] sm:$0xff] }
 0x35b   : > { %v2960_v41 = vmul.f32 %v11856_v54, %v823_v42  ;;  %v3736_v9 = vmul.f32 %v11857_v60, %v823_v42  ;;  %v3737_v56 = vmul.f32 %v11858_v34, %v823_v42  ;;  %v1463_v6 = vadd.f32 %v1399_v8, %v11883_v14  ;;  %v11889_v48 = vld [vmem:[#allocation54_spill] sm:$0xff] }
 0x35c   : > { %v1464_v17 = vadd.f32 %v1400_v38, %v11884_v25  ;;  %v2246_v50 = vadd.f32 %v2182_v52, %v11885_v24  ;;  %v2247_v46 = vadd.f32 %v2183_v53, %v11886_v63  ;;  %v3023_v51 = vadd.f32 %v2959_v57, %v11887_v32  ;;  %v766_v25 = vpop.permute.xlu1 %765 }
 0x35d   : > { %v3024_v39 = vadd.f32 %v2960_v41, %v11888_v21  ;;  %v3800_v35 = vadd.f32 %v3736_v9, %v11889_v48  ;;  %v3801_v54 = vadd.f32 %v3737_v56, %v11890_v30  ;;  %v1527_v31 = vmax.f32 %v1463_v6, 0.0 }
 0x35e   : > { %v1528_v60 = vmax.f32 %v1464_v17, 0.0  ;;  %v2310_v16 = vmax.f32 %v2246_v50, 0.0  ;;  %v2311_v42 = vmax.f32 %v2247_v46, 0.0  ;;  %v3087_v34 = vmax.f32 %v3023_v51, 0.0  ;;  %v11899_v50 = vld [vmem:[#allocation269_spill] sm:$0xff] }
 0x35f   : > { %v3088_v8 = vmax.f32 %v3024_v39, 0.0  ;;  %v3864_v14 = vmax.f32 %v3800_v35, 0.0  ;;  %v3865_v38 = vmax.f32 %v3801_v54, 0.0  ;;  %v9808_v52 = vadd.f32 %v9640_v7, %v1527_v31 }
 0x360   : > { %v9811_v32 = vadd.f32 %v9643_v27, %v1528_v60  ;;  %v9814_v21 = vadd.f32 %v9646_v47, %v2310_v16  ;;  %v9817_v30 = vadd.f32 %v9649_v45, %v2311_v42  ;;  %v9820_v48 = vadd.f32 %v9652_v5, %v3087_v34  ;;  %v898_v57 = vpop.permute.xlu1 %897 }
 0x361   : > { %v9823_v39 = vadd.f32 %v9655_v0, %v3088_v8  ;;  %v9826_v35 = vadd.f32 %v9658_v61, %v3864_v14  ;;  %v9829_v7 = vadd.f32 %v9661_v19, %v3865_v38  ;;  %v1291_v27 = vmul.f32 %v7715_v2, %v766_v25 }
 0x362   : > { %v1292_v47 = vmul.f32 %v7717_v23, %v766_v25  ;;  %v2074_v16 = vmul.f32 %v7719_v33, %v766_v25  ;;  %v2075_v45 = vmul.f32 %v7721_v36, %v766_v25  ;;  %v2851_v5 = vmul.f32 %v11421_v37, %v766_v25 }
 0x363   : > { %v2852_v31 = vmul.f32 %v11422_v12, %v766_v25  ;;  %v3628_v0 = vmul.f32 %v11423_v18, %v766_v25  ;;  %v3629_v61 = vmul.f32 %v11424_v15, %v766_v25  ;;  %v9840_v54 = vadd.f32 %v9672_v43, %v1561_v40 }
 0x364   : > { %v9843_v19 = vadd.f32 %v9675_v13, %v1562_v26  ;;  %v9846_v60 = vadd.f32 %v9678_v62, %v2344_v4  ;;  %v9849_v34 = vadd.f32 %v9681_v49, %v2345_v44  ;;  %v9852_v51 = vadd.f32 %v9684_v11, %v3121_v28  ;;  %v695_v13 = vpop.permute.xlu0 %694  ;;  %v11900_v62 = vld [vmem:[#allocation270_spill] sm:$0xff]  ;;  %v11901_v49 = vld [vmem:[#allocation275_spill] sm:$0xff]  ;;  %v11902_v11 = vld [vmem:[#allocation276_spill] sm:$0xff] }
 0x365   : > { %11891 = vst [vmem:[#allocation195_spill] sm:$0xff] %v9840_v54  ;;  %v9855_v46 = vadd.f32 %v9687_v22, %v3122_v20  ;;  %v9858_v63 = vadd.f32 %v9690_v3, %v3898_v10  ;;  %v9861_v43 = vadd.f32 %v9693_v59, %v3899_v1  ;;  %v9864_v40 = vadd.f32 %v1291_v27, %v11899_v50  ;;  %v11904_v22 = vld [vmem:[#allocation277_spill] sm:$0xff]  ;;  %v11906_v3 = vld [vmem:[#allocation278_spill] sm:$0xff]  ;;  %v11908_v59 = vld [vmem:[#allocation279_spill] sm:$0xff] }
 0x366   : > { %11892 = vst [vmem:[#allocation196_spill] sm:$0xff] %v9843_v19  ;;  %11893 = vst [vmem:[#allocation197_spill] sm:$0xff] %v9846_v60  ;;  %v9867_v26 = vadd.f32 %v1292_v47, %v11900_v62  ;;  %v9870_v4 = vadd.f32 %v2074_v16, %v11901_v49  ;;  %v9873_v44 = vadd.f32 %v2075_v45, %v11902_v11  ;;  %v11910_v1 = vld [vmem:[#allocation280_spill] sm:$0xff]  ;;  %v11912_v27 = vld [vmem:[#allocation126_spill] sm:$0xff] }
 0x367   : > { %11894 = vst [vmem:[#allocation198_spill] sm:$0xff] %v9849_v34  ;;  %11895 = vst [vmem:[#allocation199_spill] sm:$0xff] %v9852_v51  ;;  %v9876_v28 = vadd.f32 %v2851_v5, %v11904_v22  ;;  %v9879_v20 = vadd.f32 %v2852_v31, %v11906_v3  ;;  %v9882_v10 = vadd.f32 %v3628_v0, %v11908_v59  ;;  %v11913_v16 = vld [vmem:[#allocation127_spill] sm:$0xff]  ;;  %v11914_v5 = vld [vmem:[#allocation128_spill] sm:$0xff] }
 0x368   : > { %11896 = vst [vmem:[#allocation200_spill] sm:$0xff] %v9855_v46  ;;  %11897 = vst [vmem:[#allocation201_spill] sm:$0xff] %v9858_v63  ;;  %v9885_v53 = vadd.f32 %v3629_v61, %v11910_v1  ;;  %v1257_v41 = vmul.f32 %v7715_v2, %v695_v13  ;;  %v1258_v9 = vmul.f32 %v7717_v23, %v695_v13  ;;  %v11915_v0 = vld [vmem:[#allocation129_spill] sm:$0xff]  ;;  %v11916_v50 = vld [vmem:[#allocation284_spill] sm:$0xff] }
 0x369   : > { %11898 = vst [vmem:[#allocation152_spill] sm:$0xff] %v9861_v43  ;;  %11903 = vst [vmem:[#allocation153_spill] sm:$0xff] %v9873_v44  ;;  %v2040_v56 = vmul.f32 %v7719_v33, %v695_v13  ;;  %v2041_v6 = vmul.f32 %v7721_v36, %v695_v13  ;;  %v2817_v17 = vmul.f32 %v11421_v37, %v695_v13  ;;  %v11917_v49 = vld [vmem:[#allocation94_spill] sm:$0xff]  ;;  %v11921_v3 = vld [vmem:[#allocation96_spill] sm:$0xff] }
 0x36a   : > { %11905 = vst [vmem:[#allocation17_spill] sm:$0xff] %v9876_v28  ;;  %11907 = vst [vmem:[#allocation18_spill] sm:$0xff] %v9879_v20  ;;  %v2818_v24 = vmul.f32 %v11422_v12, %v695_v13  ;;  %v3594_v42 = vmul.f32 %v11423_v18, %v695_v13  ;;  %v3595_v8 = vmul.f32 %v11424_v15, %v695_v13  ;;  %v11919_v13 = vld [vmem:[#allocation95_spill] sm:$0xff]  ;;  %v11923_v1 = vld [vmem:[#allocation97_spill] sm:$0xff] }
 0x36b   : > { %11909 = vst [vmem:[#allocation19_spill] sm:$0xff] %v9882_v10  ;;  %11911 = vst [vmem:[#allocation20_spill] sm:$0xff] %v9885_v53  ;;  %v1435_v14 = vmul.f32 %v7940_v58, %v898_v57  ;;  %v1436_v38 = vmul.f32 %v7943_v29, %v898_v57  ;;  %v2218_v25 = vmul.f32 %v7946_v55, %v898_v57  ;;  %v11925_v63 = vld [vmem:[#allocation98_spill] sm:$0xff]  ;;  %v11927_v51 = vld [vmem:[#allocation99_spill] sm:$0xff] }
 0x36c   : > { %v2219_v47 = vmul.f32 %v11912_v27, %v898_v57  ;;  %v2995_v45 = vmul.f32 %v11913_v16, %v898_v57  ;;  %v2996_v31 = vmul.f32 %v11914_v5, %v898_v57  ;;  %v3772_v61 = vmul.f32 %v11915_v0, %v898_v57  ;;  %v11929_v60 = vld [vmem:[#allocation100_spill] sm:$0xff]  ;;  %v11952_v54 = vld [vmem:[#allocation59_spill] sm:$0xff] }
 0x36d   : > { %v3773_v62 = vmul.f32 %v11916_v50, %v898_v57  ;;  %v9904_v11 = vadd.f32 %v1257_v41, %v11917_v49  ;;  %v9907_v22 = vadd.f32 %v1258_v9, %v11919_v13  ;;  %v9910_v59 = vadd.f32 %v2040_v56, %v11921_v3  ;;  %v11931_v41 = vld [vmem:[#allocation101_spill] sm:$0xff]  ;;  %v827_v9 = vpop.permute.xlu0 %826  ;;  %v11933_v13 = vld [vmem:[#allocation56_spill] sm:$0xff] }
 0x36e   : > { %v9913_v43 = vadd.f32 %v2041_v6, %v11923_v1  ;;  %v9916_v46 = vadd.f32 %v2817_v17, %v11925_v63  ;;  %v9919_v34 = vadd.f32 %v2818_v24, %v11927_v51  ;;  %v9922_v57 = vadd.f32 %v3594_v42, %v11929_v60  ;;  %v11935_v56 = vld [vmem:[#allocation57_spill] sm:$0xff]  ;;  %v11937_v6 = vld [vmem:[#allocation167_spill] sm:$0xff]  ;;  %v11939_v63 = vld [vmem:[#allocation168_spill] sm:$0xff] }
 0x36f   : > { %11918 = vst [vmem:[#allocation21_spill] sm:$0xff] %v9904_v11  ;;  %11920 = vst [vmem:[#allocation22_spill] sm:$0xff] %v9907_v22  ;;  %v9925_v49 = vadd.f32 %v3595_v8, %v11931_v41  ;;  %v9928_v19 = vadd.f32 %v1435_v14, %v11933_v13  ;;  %v9931_v3 = vadd.f32 %v1436_v38, %v11935_v56  ;;  %v11941_v51 = vld [vmem:[#allocation169_spill] sm:$0xff]  ;;  %v11943_v60 = vld [vmem:[#allocation146_spill] sm:$0xff] }
 0x370   : > { %11922 = vst [vmem:[#allocation46_spill] sm:$0xff] %v9910_v59  ;;  %11924 = vst [vmem:[#allocation47_spill] sm:$0xff] %v9913_v43  ;;  %v9934_v1 = vadd.f32 %v2218_v25, %v11937_v6  ;;  %v9937_v17 = vadd.f32 %v2219_v47, %v11939_v63  ;;  %v9940_v24 = vadd.f32 %v2995_v45, %v11941_v51  ;;  %v11945_v8 = vld [vmem:[#allocation147_spill] sm:$0xff]  ;;  %v11947_v14 = vld [vmem:[#allocation148_spill] sm:$0xff] }
 0x371   : > { %11926 = vst [vmem:[#allocation48_spill] sm:$0xff] %v9916_v46  ;;  %11928 = vst [vmem:[#allocation49_spill] sm:$0xff] %v9919_v34  ;;  %v9943_v42 = vadd.f32 %v2996_v31, %v11943_v60  ;;  %v9946_v41 = vadd.f32 %v3772_v61, %v11945_v8  ;;  %v9949_v13 = vadd.f32 %v3773_v62, %v11947_v14  ;;  %v11949_v63 = vld [vmem:[#allocation149_spill] sm:$0xff]  ;;  %v11950_v62 = vld [vmem:[#allocation150_spill] sm:$0xff] }
 0x372   : > { %11930 = vst [vmem:[#allocation50_spill] sm:$0xff] %v9922_v57  ;;  %11932 = vst [vmem:[#allocation51_spill] sm:$0xff] %v9925_v49  ;;  %v1401_v38 = vmul.f32 %v7940_v58, %v827_v9  ;;  %v1402_v25 = vmul.f32 %v7943_v29, %v827_v9  ;;  %v2184_v56 = vmul.f32 %v7946_v55, %v827_v9  ;;  %v11951_v8 = vld [vmem:[#allocation58_spill] sm:$0xff]  ;;  %v11953_v57 = vld [vmem:[#allocation60_spill] sm:$0xff] }
 0x373   : > { %11934 = vst [vmem:[#allocation52_spill] sm:$0xff] %v9928_v19  ;;  %11936 = vst [vmem:[#allocation53_spill] sm:$0xff] %v9931_v3  ;;  %v2185_v47 = vmul.f32 %v11912_v27, %v827_v9  ;;  %v2961_v45 = vmul.f32 %v11913_v16, %v827_v9  ;;  %v2962_v6 = vmul.f32 %v11914_v5, %v827_v9  ;;  %v11954_v46 = vld [vmem:[#allocation61_spill] sm:$0xff]  ;;  %v11955_v59 = vld [vmem:[#allocation151_spill] sm:$0xff] }
 0x374   : > { %11938 = vst [vmem:[#allocation23_spill] sm:$0xff] %v9934_v1  ;;  %11940 = vst [vmem:[#allocation24_spill] sm:$0xff] %v9937_v17  ;;  %v3738_v31 = vmul.f32 %v11915_v0, %v827_v9  ;;  %v3739_v61 = vmul.f32 %v11916_v50, %v827_v9  ;;  %v1465_v51 = vadd.f32 %v1401_v38, %v11949_v63  ;;  %v11956_v11 = vld [vmem:[#allocation194_spill] sm:$0xff]  ;;  %v11973_v17 = vld [vmem:[#allocation125_spill] sm:$0xff] }
 0x375   : > { %11942 = vst [vmem:[#allocation271_spill] sm:$0xff] %v9940_v24  ;;  %11944 = vst [vmem:[#allocation272_spill] sm:$0xff] %v9943_v42  ;;  %v1466_v60 = vadd.f32 %v1402_v25, %v11950_v62  ;;  %v2248_v14 = vadd.f32 %v2184_v56, %v11951_v8  ;;  %v2249_v49 = vadd.f32 %v2185_v47, %v11952_v54  ;;  %v770_v62 = vpop.permute.xlu1 %769  ;;  %v11971_v24 = vld [vmem:[#allocation123_spill] sm:$0xff]  ;;  %v12005_v3 = vld [vmem:[#allocation114_spill] sm:$0xff] }
 0x376   : > { %11946 = vst [vmem:[#allocation273_spill] sm:$0xff] %v9946_v41  ;;  %11948 = vst [vmem:[#allocation274_spill] sm:$0xff] %v9949_v13  ;;  %v3025_v34 = vadd.f32 %v2961_v45, %v11953_v57  ;;  %v3026_v43 = vadd.f32 %v2962_v6, %v11954_v46  ;;  %v3802_v22 = vadd.f32 %v3738_v31, %v11955_v59  ;;  %v1529_v10 = vmax.f32 %v1465_v51, 0.0  ;;  %v12010_v19 = vld [vmem:[#allocation116_spill] sm:$0xff] }
 0x377   : > { %v3803_v53 = vadd.f32 %v3739_v61, %v11956_v11  ;;  %v1530_v20 = vmax.f32 %v1466_v60, 0.0  ;;  %v2312_v28 = vmax.f32 %v2248_v14, 0.0  ;;  %v2313_v9 = vmax.f32 %v2249_v49, 0.0 }
 0x378   : > { %v3089_v44 = vmax.f32 %v3025_v34, 0.0  ;;  %v3090_v38 = vmax.f32 %v3026_v43, 0.0  ;;  %v3866_v63 = vmax.f32 %v3802_v22, 0.0  ;;  %v9968_v56 = vadd.f32 %v9808_v52, %v1529_v10 }
 0x379   : > { %v3867_v25 = vmax.f32 %v3803_v53, 0.0  ;;  %v9971_v54 = vadd.f32 %v9811_v32, %v1530_v20  ;;  %v9974_v46 = vadd.f32 %v9814_v21, %v2312_v28  ;;  %v9977_v11 = vadd.f32 %v9817_v30, %v2313_v9  ;;  %v699_v20 = vpop.permute.xlu0 %698  ;;  %v902_v6 = vpop.permute.xlu1 %901  ;;  %v11966_v28 = vld [vmem:[#allocation118_spill] sm:$0xff]  ;;  %v11967_v32 = vld [vmem:[#allocation119_spill] sm:$0xff] }
 0x37a   : > { %v9980_v59 = vadd.f32 %v9820_v48, %v3089_v44  ;;  %v9983_v34 = vadd.f32 %v9823_v39, %v3090_v38  ;;  %v9986_v43 = vadd.f32 %v9826_v35, %v3866_v63  ;;  %v10003_v10 = vmul.f32 %v7717_v23, %v770_v62 }
 0x37b   : > { %v9989_v52 = vadd.f32 %v9829_v7, %v3867_v25  ;;  %v10000_v7 = vmul.f32 %v7715_v2, %v770_v62  ;;  %v10006_v53 = vmul.f32 %v7719_v33, %v770_v62  ;;  %v10009_v22 = vmul.f32 %v7721_v36, %v770_v62 }
 0x37c   : > { %11959 = vst [vmem:[#allocation186_spill] sm:$0xff] %v10003_v10  ;;  %v10012_v57 = vmul.f32 %v11421_v37, %v770_v62  ;;  %v10015_v49 = vmul.f32 %v11422_v12, %v770_v62  ;;  %v10018_v47 = vmul.f32 %v11423_v18, %v770_v62  ;;  %v10021_v45 = vmul.f32 %v11424_v15, %v770_v62 }
 0x37d   : > { %11957 = vst [vmem:[#allocation154_spill] sm:$0xff] %v9989_v52  ;;  %11958 = vst [vmem:[#allocation155_spill] sm:$0xff] %v10000_v7  ;;  %v1259_v31 = vmul.f32 %v7715_v2, %v699_v20  ;;  %v1260_v61 = vmul.f32 %v7717_v23, %v699_v20  ;;  %v2042_v51 = vmul.f32 %v7719_v33, %v699_v20  ;;  %v831_v1 = vpop.permute.xlu0 %830 }
 0x37e   : > { %11960 = vst [vmem:[#allocation187_spill] sm:$0xff] %v10006_v53  ;;  %11961 = vst [vmem:[#allocation188_spill] sm:$0xff] %v10009_v22  ;;  %v2043_v60 = vmul.f32 %v7721_v36, %v699_v20  ;;  %v2819_v8 = vmul.f32 %v11421_v37, %v699_v20  ;;  %v2820_v14 = vmul.f32 %v11422_v12, %v699_v20  ;;  %v11972_v22 = vld [vmem:[#allocation124_spill] sm:$0xff] }
 0x37f   : > { %11962 = vst [vmem:[#allocation189_spill] sm:$0xff] %v10012_v57  ;;  %11963 = vst [vmem:[#allocation190_spill] sm:$0xff] %v10015_v49  ;;  %v3596_v9 = vmul.f32 %v11423_v18, %v699_v20  ;;  %v3597_v38 = vmul.f32 %v11424_v15, %v699_v20  ;;  %v1437_v63 = vmul.f32 %v7940_v58, %v902_v6  ;;  %v11970_v49 = vld [vmem:[#allocation122_spill] sm:$0xff] }
 0x380   : > { %11964 = vst [vmem:[#allocation191_spill] sm:$0xff] %v10018_v47  ;;  %11965 = vst [vmem:[#allocation192_spill] sm:$0xff] %v10021_v45  ;;  %v1438_v25 = vmul.f32 %v7943_v29, %v902_v6  ;;  %v2220_v62 = vmul.f32 %v7946_v55, %v902_v6  ;;  %v2221_v35 = vmul.f32 %v11912_v27, %v902_v6  ;;  %v11968_v45 = vld [vmem:[#allocation120_spill] sm:$0xff]  ;;  %v11969_v47 = vld [vmem:[#allocation121_spill] sm:$0xff] }
 0x381   : > { %v2997_v39 = vmul.f32 %v11913_v16, %v902_v6  ;;  %v2998_v44 = vmul.f32 %v11914_v5, %v902_v6  ;;  %v3774_v48 = vmul.f32 %v11915_v0, %v902_v6  ;;  %v3775_v30 = vmul.f32 %v11916_v50, %v902_v6 }
 0x382   : > { %v1323_v21 = vadd.f32 %v1259_v31, %v11966_v28  ;;  %v1324_v20 = vadd.f32 %v1260_v61, %v11967_v32  ;;  %v2106_v13 = vadd.f32 %v2042_v51, %v11968_v45  ;;  %v2107_v41 = vadd.f32 %v2043_v60, %v11969_v47  ;;  %v11977_v45 = vld [vmem:[#allocation153_spill] sm:$0xff] }
 0x383   : > { %v2883_v42 = vadd.f32 %v2819_v8, %v11970_v49  ;;  %v2884_v57 = vadd.f32 %v2820_v14, %v11971_v24  ;;  %v3660_v53 = vadd.f32 %v3596_v9, %v11972_v22  ;;  %v3661_v10 = vadd.f32 %v3597_v38, %v11973_v17  ;;  %v11979_v49 = vld [vmem:[#allocation17_spill] sm:$0xff]  ;;  %v11981_v24 = vld [vmem:[#allocation18_spill] sm:$0xff]  ;;  %v11983_v17 = vld [vmem:[#allocation19_spill] sm:$0xff] }
 0x384   : > { %v10048_v7 = vadd.f32 %v1437_v63, %v9864_v40  ;;  %v10051_v28 = vadd.f32 %v1438_v25, %v9867_v26  ;;  %v10054_v32 = vadd.f32 %v2220_v62, %v9870_v4  ;;  %v10057_v47 = vadd.f32 %v2221_v35, %v11977_v45  ;;  %v11985_v40 = vld [vmem:[#allocation20_spill] sm:$0xff]  ;;  %v11987_v8 = vld [vmem:[#allocation21_spill] sm:$0xff]  ;;  %v11989_v38 = vld [vmem:[#allocation46_spill] sm:$0xff] }
 0x385   : > { %v10060_v6 = vadd.f32 %v2997_v39, %v11979_v49  ;;  %v10063_v22 = vadd.f32 %v2998_v44, %v11981_v24  ;;  %v10066_v31 = vadd.f32 %v3774_v48, %v11983_v17  ;;  %v10069_v61 = vadd.f32 %v3775_v30, %v11985_v40  ;;  %v11988_v30 = vld [vmem:[#allocation22_spill] sm:$0xff]  ;;  %v11990_v25 = vld [vmem:[#allocation47_spill] sm:$0xff]  ;;  %v11991_v17 = vld [vmem:[#allocation48_spill] sm:$0xff]  ;;  %v835_v40 = vpop.permute.xlu1 %834 }
 0x386   : > { %11974 = vst [vmem:[#allocation193_spill] sm:$0xff] %v10048_v7  ;;  %11975 = vst [vmem:[#allocation156_spill] sm:$0xff] %v10051_v28  ;;  %v1403_v26 = vmul.f32 %v7940_v58, %v831_v1  ;;  %v1404_v4 = vmul.f32 %v7943_v29, %v831_v1  ;;  %v2186_v51 = vmul.f32 %v7946_v55, %v831_v1 }
 0x387   : > { %11976 = vst [vmem:[#allocation157_spill] sm:$0xff] %v10054_v32  ;;  %11978 = vst [vmem:[#allocation158_spill] sm:$0xff] %v10057_v47  ;;  %v2187_v35 = vmul.f32 %v11912_v27, %v831_v1  ;;  %v2963_v39 = vmul.f32 %v11913_v16, %v831_v1  ;;  %v2964_v60 = vmul.f32 %v11914_v5, %v831_v1 }
 0x388   : > { %11980 = vst [vmem:[#allocation159_spill] sm:$0xff] %v10060_v6  ;;  %11982 = vst [vmem:[#allocation160_spill] sm:$0xff] %v10063_v22  ;;  %v3740_v44 = vmul.f32 %v11915_v0, %v831_v1  ;;  %v3741_v48 = vmul.f32 %v11916_v50, %v831_v1  ;;  %v10080_v14 = vadd.f32 %v1403_v26, %v11987_v8  ;;  %v12011_v22 = vld [vmem:[#allocation15_spill] sm:$0xff]  ;;  %v12013_v6 = vld [vmem:[#allocation258_spill] sm:$0xff] }
 0x389   : > { %11984 = vst [vmem:[#allocation161_spill] sm:$0xff] %v10066_v31  ;;  %11986 = vst [vmem:[#allocation138_spill] sm:$0xff] %v10069_v61  ;;  %v10083_v9 = vadd.f32 %v1404_v4, %v11988_v30  ;;  %v10086_v63 = vadd.f32 %v2186_v51, %v11989_v38  ;;  %v10089_v62 = vadd.f32 %v2187_v35, %v11990_v25  ;;  %v11992_v4 = vld [vmem:[#allocation49_spill] sm:$0xff]  ;;  %v11993_v51 = vld [vmem:[#allocation50_spill] sm:$0xff]  ;;  %v703_v61 = vpop.permute.xlu0 %702 }
 0x38a   : > { %v10095_v1 = vadd.f32 %v2963_v39, %v11991_v17  ;;  %v10099_v8 = vadd.f32 %v2964_v60, %v11992_v4  ;;  %v10102_v30 = vadd.f32 %v3740_v44, %v11993_v51  ;;  %v11994_v35 = vld [vmem:[#allocation51_spill] sm:$0xff]  ;;  %v1405_v17 = vmul.f32 %v7940_v58, %v835_v40 }
 0x38b   : > { %v10105_v38 = vadd.f32 %v3741_v48, %v11994_v35  ;;  %v1532_v25 = vmax.f32 %v10083_v9, 0.0  ;;  %v1406_v45 = vmul.f32 %v7943_v29, %v835_v40  ;;  %v2188_v60 = vmul.f32 %v7946_v55, %v835_v40  ;;  %v12008_v31 = vld [vmem:[#allocation115_spill] sm:$0xff] }
 0x38c   : > { %v2189_v44 = vmul.f32 %v11912_v27, %v835_v40  ;;  %v2965_v4 = vmul.f32 %v11913_v16, %v835_v40  ;;  %v2966_v48 = vmul.f32 %v11914_v5, %v835_v40  ;;  %v3742_v9 = vmul.f32 %v11915_v0, %v835_v40 }
 0x38d   : > { %v3743_v51 = vmul.f32 %v11916_v50, %v835_v40  ;;  %v1469_v35 = vadd.f32 %v1405_v17, %v1323_v21  ;;  %v1470_v24 = vadd.f32 %v1406_v45, %v1324_v20  ;;  %v10119_v49 = vadd.f32 %v2188_v60, %v2106_v13  ;;  %v12001_v45 = vld [vmem:[#allocation112_spill] sm:$0xff] }
 0x38e   : > { %v10121_v39 = vadd.f32 %v2189_v44, %v2107_v41  ;;  %v10123_v26 = vadd.f32 %v2965_v4, %v2883_v42  ;;  %v10125_v32 = vadd.f32 %v2966_v48, %v2884_v57  ;;  %v10127_v28 = vadd.f32 %v3742_v9, %v3660_v53  ;;  %v11997_v48 = vld [vmem:[#allocation110_spill] sm:$0xff]  ;;  %v11998_v9 = vld [vmem:[#allocation9_spill] sm:$0xff]  ;;  %v12004_v21 = vld [vmem:[#allocation12_spill] sm:$0xff] }
 0x38f   : > { %v10129_v7 = vadd.f32 %v3743_v51, %v3661_v10  ;;  %v1533_v20 = vmax.f32 %v1469_v35, 0.0  ;;  %v1534_v13 = vmax.f32 %v1470_v24, 0.0  ;;  %v2316_v41 = vmax.f32 %v10119_v49, 0.0  ;;  %v12000_v35 = vld [vmem:[#allocation10_spill] sm:$0xff] }
 0x390   : > { %11995 = vst [vmem:[#allocation139_spill] sm:$0xff] %v10127_v28  ;;  %v2317_v42 = vmax.f32 %v10121_v39, 0.0  ;;  %v1261_v40 = vmul.f32 %v7715_v2, %v703_v61  ;;  %v1262_v17 = vmul.f32 %v7717_v23, %v703_v61  ;;  %v2044_v60 = vmul.f32 %v7719_v33, %v703_v61  ;;  %v11999_v2 = vld [vmem:[#allocation111_spill] sm:$0xff]  ;;  %v12019_v28 = vld [vmem:[#allocation262_spill] sm:$0xff] }
 0x391   : > { %11996 = vst [vmem:[#allocation70_spill] sm:$0xff] %v10129_v7  ;;  %v2045_v24 = vmul.f32 %v7721_v36, %v703_v61  ;;  %v2821_v49 = vmul.f32 %v11421_v37, %v703_v61  ;;  %v2822_v39 = vmul.f32 %v11422_v12, %v703_v61  ;;  %v10147_v44 = vmul.f32 %v11423_v18, %v703_v61  ;;  %v12002_v33 = vld [vmem:[#allocation11_spill] sm:$0xff]  ;;  %v12003_v36 = vld [vmem:[#allocation113_spill] sm:$0xff]  ;;  %v12007_v18 = vld [vmem:[#allocation256_spill] sm:$0xff] }
 0x392   : > { %v10150_v4 = vmul.f32 %v11424_v15, %v703_v61  ;;  %v1033_v51 = vadd.f32 %v11998_v9, %v11997_v48  ;;  %v1034_v23 = vadd.f32 %v12000_v35, %v11999_v2  ;;  %v1816_v10 = vadd.f32 %v12002_v33, %v12001_v45  ;;  %v12006_v12 = vld [vmem:[#allocation13_spill] sm:$0xff]  ;;  %v12009_v15 = vld [vmem:[#allocation14_spill] sm:$0xff]  ;;  %v10167_v9 = vpop.permute.xlu1 %838  ;;  %v12014_v33 = vld [vmem:[#allocation259_spill] sm:$0xff] }
 0x393   : > { %v1817_v37 = vadd.f32 %v12004_v21, %v12003_v36  ;;  %v2593_v53 = vadd.f32 %v12006_v12, %v12005_v3  ;;  %v2594_v61 = vadd.f32 %v12009_v15, %v12008_v31  ;;  %v3370_v48 = vadd.f32 %v12011_v22, %v12010_v19  ;;  %v12012_v2 = vld [vmem:[#allocation257_spill] sm:$0xff]  ;;  %v12015_v21 = vld [vmem:[#allocation260_spill] sm:$0xff] }
 0x394   : > { %v1179_v57 = vadd.f32 %v12007_v18, %v1033_v51  ;;  %v1180_v35 = vadd.f32 %v12012_v2, %v1034_v23  ;;  %v1962_v45 = vadd.f32 %v12013_v6, %v1816_v10  ;;  %v12016_v7 = vld [vmem:[#allocation261_spill] sm:$0xff]  ;;  %v12018_v51 = vld [vmem:[#allocation16_spill] sm:$0xff]  ;;  %v1407_v19 = vmul.f32 %v7940_v58, %v10167_v9 }
 0x395   : > { %v1963_v47 = vadd.f32 %v12014_v33, %v1817_v37  ;;  %v2739_v36 = vadd.f32 %v12015_v21, %v2593_v53  ;;  %v2740_v3 = vadd.f32 %v12016_v7, %v2594_v61  ;;  %v12017_v12 = vld [vmem:[#allocation117_spill] sm:$0xff]  ;;  %v3516_v31 = vadd.f32 %v12019_v28, %v3370_v48  ;;  %v12021_v53 = vld [vmem:[#allocation263_spill] sm:$0xff] }
 0x396   : > { %v3371_v18 = vadd.f32 %v12018_v51, %v12017_v12  ;;  %v1325_v15 = vadd.f32 %v1261_v40, %v1179_v57  ;;  %v1326_v52 = vadd.f32 %v1262_v17, %v1180_v35  ;;  %v1408_v22 = vmul.f32 %v7943_v29, %v10167_v9 }
 0x397   : > { %v12020_v6 = vmax.f32 %v10080_v14, 0.0  ;;  %v1603_v7 = vadd.f32 %v9971_v54, %v1532_v25  ;;  %v2108_v37 = vadd.f32 %v2044_v60, %v1962_v45  ;;  %v2109_v61 = vadd.f32 %v2045_v24, %v1963_v47 }
 0x398   : > { %v3517_v23 = vadd.f32 %v12021_v53, %v3371_v18  ;;  %v1471_v2 = vadd.f32 %v1407_v19, %v1325_v15  ;;  %v1472_v28 = vadd.f32 %v1408_v22, %v1326_v52  ;;  %v2190_v40 = vmul.f32 %v7946_v55, %v10167_v9 }
 0x399   : > { %v1582_v10 = vadd.f32 %v9968_v56, %v12020_v6  ;;  %v1604_v17 = vadd.f32 %v1603_v7, %v1534_v13  ;;  %v2191_v48 = vmul.f32 %v11912_v27, %v10167_v9  ;;  %v12022_v14 = vmax.f32 %v10086_v63, 0.0 }
 0x39a   : > { %v12023_v35 = vmax.f32 %v10089_v62, 0.0  ;;  %v1535_v25 = vmax.f32 %v1471_v2, 0.0  ;;  %v1536_v47 = vmax.f32 %v1472_v28, 0.0  ;;  %v2254_v60 = vadd.f32 %v2190_v40, %v2108_v37 }
 0x39b   : > { %v1583_v57 = vadd.f32 %v1582_v10, %v1533_v20  ;;  %v2365_v56 = vadd.f32 %v9974_v46, %v12022_v14  ;;  %v2885_v52 = vadd.f32 %v2821_v49, %v2739_v36  ;;  %v2255_v20 = vadd.f32 %v2191_v48, %v2109_v61 }
 0x39c   : > { %v2386_v54 = vadd.f32 %v9977_v11, %v12023_v35  ;;  %v2886_v33 = vadd.f32 %v2822_v39, %v2740_v3  ;;  %v1605_v21 = vadd.f32 %v1604_v17, %v1536_v47  ;;  %v2318_v12 = vmax.f32 %v2254_v60, 0.0 }
 0x39d   : > { %v2366_v24 = vadd.f32 %v2365_v56, %v2316_v41  ;;  %v1584_v13 = vadd.f32 %v1583_v57, %v1535_v25  ;;  %v2967_v63 = vmul.f32 %v11913_v16, %v10167_v9  ;;  %v2319_v51 = vmax.f32 %v2255_v20, 0.0 }
 0x39e   : > { %v2387_v45 = vadd.f32 %v2386_v54, %v2317_v42  ;;  %v2968_v46 = vmul.f32 %v11914_v5, %v10167_v9  ;;  %v12024_v11 = vmax.f32 %v10095_v1, 0.0  ;;  %v12025_v49 = vmax.f32 %v10099_v8, 0.0 }
 0x39f   : > { %v1585_v42 = vrot.slane %v1584_v13, 4  ;;  %v1606_v39 = vrot.slane %v1605_v21, 4  ;;  %v2367_v36 = vadd.f32 %v2366_v24, %v2318_v12  ;;  %v3031_v3 = vadd.f32 %v2967_v63, %v2885_v52 }
 0x3a0   : > { %v3142_v62 = vadd.f32 %v9980_v59, %v12024_v11  ;;  %v3163_v41 = vadd.f32 %v9983_v34, %v12025_v49  ;;  %v2388_v18 = vadd.f32 %v2387_v45, %v2319_v51  ;;  %v3032_v15 = vadd.f32 %v2968_v46, %v2886_v33  ;;  %v12030_v49 = vld [vmem:[#allocation154_spill] sm:$0xff] }
 0x3a1   : > { %v12026_v19 = vmax.f32 %v10123_v26, 0.0  ;;  %v12027_v6 = vmax.f32 %v10125_v32, 0.0  ;;  %v1586_v53 = vadd.f32 %v1585_v42, %v1584_v13  ;;  %v1607_v1 = vadd.f32 %v1606_v39, %v1605_v21 }
 0x3a2   : > { %v2368_v7 = vrot.slane %v2367_v36, 4  ;;  %v3095_v59 = vmax.f32 %v3031_v3, 0.0  ;;  %v2389_v37 = vrot.slane %v2388_v18, 4  ;;  %v3096_v8 = vmax.f32 %v3032_v15, 0.0 }
 0x3a3   : > { %v3143_v22 = vadd.f32 %v3142_v62, %v12026_v19  ;;  %v3164_v10 = vadd.f32 %v3163_v41, %v12027_v6  ;;  %v3662_v34 = vadd.f32 %v10147_v44, %v3516_v31  ;;  %v3663_v61 = vadd.f32 %v10150_v4, %v3517_v23 }
 0x3a4   : > { %v1587_v2 = vrot.slane %v1586_v53, 2  ;;  %v1608_v28 = vrot.slane %v1607_v1, 2  ;;  %v2369_v57 = vadd.f32 %v2368_v7, %v2367_v36  ;;  %v2390_v17 = vadd.f32 %v2389_v37, %v2388_v18  ;;  %v12036_v7 = vld [vmem:[#allocation159_spill] sm:$0xff]  ;;  %v12037_v37 = vld [vmem:[#allocation160_spill] sm:$0xff] }
 0x3a5   : > { %v3144_v40 = vadd.f32 %v3143_v22, %v3095_v59  ;;  %v3165_v26 = vadd.f32 %v3164_v10, %v3096_v8  ;;  %v3744_v32 = vmul.f32 %v11915_v0, %v10167_v9  ;;  %v3745_v48 = vmul.f32 %v11916_v50, %v10167_v9  ;;  %v12031_v22 = vld [vmem:[#allocation139_spill] sm:$0xff]  ;;  %v12033_v10 = vld [vmem:[#allocation70_spill] sm:$0xff] }
 0x3a6   : > { %v1588_v14 = vadd.f32 %v1587_v2, %v1586_v53  ;;  %v1609_v56 = vadd.f32 %v1608_v28, %v1607_v1  ;;  %v2370_v35 = vrot.slane %v2369_v57, 2  ;;  %v2391_v25 = vrot.slane %v2390_v17, 2 }
 0x3a7   : > { %v3145_v54 = vrot.slane %v3144_v40, 4  ;;  %v3166_v44 = vrot.slane %v3165_v26, 4  ;;  %v3808_v31 = vadd.f32 %v3744_v32, %v3662_v34  ;;  %v3809_v4 = vadd.f32 %v3745_v48, %v3663_v61  ;;  %v12040_v48 = vld [vmem:[#allocation195_spill] sm:$0xff] }
 0x3a8   : > { %v1589_v23 = vrot.slane %v1588_v14, 1  ;;  %v1610_v47 = vrot.slane %v1609_v56, 1  ;;  %v2371_v60 = vadd.f32 %v2370_v35, %v2369_v57  ;;  %v2392_v20 = vadd.f32 %v2391_v25, %v2390_v17 }
 0x3a9   : > { %v3146_v52 = vadd.f32 %v3145_v54, %v3144_v40  ;;  %v3167_v24 = vadd.f32 %v3166_v44, %v3165_v26  ;;  %v3872_v45 = vmax.f32 %v3808_v31, 0.0  ;;  %v3873_v33 = vmax.f32 %v3809_v4, 0.0  ;;  %v12038_v26 = vld [vmem:[#allocation52_spill] sm:$0xff]  ;;  %v12044_v44 = vld [vmem:[#allocation161_spill] sm:$0xff] }
 0x3aa   : > { %v10216_v13 = vadd.f32 %v1589_v23, %v1588_v14  ;;  %v10218_v21 = vadd.f32 %v1610_v47, %v1609_v56  ;;  %v2372_v9 = vrot.slane %v2371_v60, 1  ;;  %v2393_v63 = vrot.slane %v2392_v20, 1  ;;  %v12041_v56 = vld [vmem:[#allocation53_spill] sm:$0xff]  ;;  %v12043_v54 = vld [vmem:[#allocation196_spill] sm:$0xff] }
 0x3ab   : > { %v3147_v12 = vrot.slane %v3146_v52, 2  ;;  %v3168_v51 = vrot.slane %v3167_v24, 2  ;;  %v12028_v46 = vmax.f32 %v10102_v30, 0.0  ;;  %v12029_v62 = vmax.f32 %v10105_v38, 0.0  ;;  %v12035_v38 = vld [vmem:[#allocation158_spill] sm:$0xff] }
 0x3ac   : > { %v5338_v42 = vmov 1983009808   ;;  %v1658_v36 = vcombine.low %v10216_v13, %v10218_v21  ;;  %v10228_v3 = vadd.f32 %v2372_v9, %v2371_v60  ;;  %v10230_v15 = vadd.f32 %v2393_v63, %v2392_v20  ;;  %v12045_v60 = vld [vmem:[#allocation138_spill] sm:$0xff]  ;;  %v12046_v20 = vld [vmem:[#allocation237_spill] sm:$0xff]  ;;  %v12050_v63 = vld [vmem:[#allocation156_spill] sm:$0xff] }
 0x3ad   : > { %v3919_v11 = vadd.f32 %v9986_v43, %v12028_v46  ;;  %v3940_v41 = vadd.f32 %v12030_v49, %v12029_v62  ;;  %v1660_v39 = vunpack.c.l.s4 %v5338_v42  ;;  %v3148_v18 = vadd.f32 %v3147_v12, %v3146_v52  ;;  %v12053_v42 = vld [vmem:[#allocation235_spill] sm:$0xff] }
 0x3ae   : > { %v3169_v19 = vadd.f32 %v3168_v51, %v3167_v24  ;;  %v12032_v6 = vmax.f32 %v12031_v22, 0.0  ;;  %v12034_v43 = vmax.f32 %v12033_v10, 0.0  ;;  %v2349_v1 = vmax.f32 %v12035_v38, 0.0  ;;  %v12047_v24 = vld [vmem:[#allocation234_spill] sm:$0xff]  ;;  %v12055_v22 = vld [vmem:[#allocation155_spill] sm:$0xff]  ;;  %v12057_v10 = vld [vmem:[#allocation236_spill] sm:$0xff] }
 0x3af   : > { %v3125_v59 = vmax.f32 %v12036_v7, 0.0  ;;  %v3126_v8 = vmax.f32 %v12037_v37, 0.0  ;;  %v3149_v34 = vrot.slane %v3148_v18, 1  ;;  %v2441_v61 = vcombine.low %v10228_v3, %v10230_v15  ;;  %v12060_v7 = vld [vmem:[#allocation197_spill] sm:$0xff] }
 0x3b0   : > { %v3920_v30 = vadd.f32 %v3919_v11, %v12032_v6  ;;  %v3941_v53 = vadd.f32 %v3940_v41, %v12034_v43  ;;  %v3170_v2 = vrot.slane %v3169_v19, 1  ;;  %v1661_v40 = vunpack.c.0.s8 %v1660_v39  ;;  %v12052_v41 = vld [vmem:[#allocation238_spill] sm:$0xff] }
 0x3b1   : > { %v10241_v17 = vadd.f32 %v3149_v34, %v3148_v18  ;;  %v12039_v32 = vmax.f32 %v12038_v26, 0.0  ;;  %v12042_v35 = vmax.f32 %v12041_v56, 0.0  ;;  %v3902_v31 = vmax.f32 %v12044_v44, 0.0  ;;  %v12054_v18 = vld [vmem:[#allocation8_spill] sm:$0xff]  ;;  %v12061_v26 = vld [vmem:[#allocation186_spill] sm:$0xff]  ;;  %v12068_v44 = vld [vmem:[#allocation157_spill] sm:$0xff] }
 0x3b2   : > { %v3921_v28 = vadd.f32 %v3920_v30, %v3872_v45  ;;  %v3942_v57 = vadd.f32 %v3941_v53, %v3873_v33  ;;  %v10250_v4 = vadd.f32 %v3170_v2, %v3169_v19  ;;  %v3903_v52 = vmax.f32 %v12045_v60, 0.0  ;;  %v12048_v33 = vld [vmem:[#allocation193_spill] sm:$0xff]  ;;  %v12056_v30 = vld [vmem:[#allocation239_spill] sm:$0xff]  ;;  %v12065_v56 = vld [vmem:[#allocation240_spill] sm:$0xff] }
 0x3b3   : > { %v1624_v14 = vadd.f32 %v12040_v48, %v12039_v32  ;;  %v1645_v25 = vadd.f32 %v12043_v54, %v12042_v35  ;;  %v1211_v45 = vadd.f32 %v12047_v24, %v12046_v20  ;;  %v12049_v9 = vmax.f32 %v12048_v33, 0.0  ;;  %v12058_v53 = vld [vmem:[#allocation23_spill] sm:$0xff]  ;;  %v12064_v48 = vld [vmem:[#allocation198_spill] sm:$0xff]  ;;  %v12070_v60 = vld [vmem:[#allocation241_spill] sm:$0xff] }
 0x3b4   : > { %v3922_v23 = vrot.slane %v3921_v28, 4  ;;  %v3943_v47 = vrot.slane %v3942_v57, 4  ;;  %v12051_v51 = vmax.f32 %v12050_v63, 0.0  ;;  %v3218_v11 = vcombine.low %v10241_v17, %v10250_v4  ;;  %v12067_v54 = vld [vmem:[#allocation187_spill] sm:$0xff]  ;;  %v12071_v20 = vld [vmem:[#allocation265_spill] sm:$0xff]  ;;  %v12072_v63 = vld [vmem:[#allocation242_spill] sm:$0xff] }
 0x3b5   : > { %v10257_v12 = vadd.f32 %v1624_v14, %v12049_v9  ;;  %v1212_v39 = vadd.f32 %v12053_v42, %v12052_v41  ;;  %v10268_v19 = vsub.s32 %v1661_v40, %v12054_v18  ;;  %v1357_v6 = vadd.f32 %v12055_v22, %v1211_v45  ;;  %v12066_v40 = vld [vmem:[#allocation264_spill] sm:$0xff]  ;;  %v12075_v18 = vld [vmem:[#allocation189_spill] sm:$0xff] }
 0x3b6   : > { %v10261_v46 = vadd.f32 %v1645_v25, %v12051_v51  ;;  %v3923_v62 = vadd.f32 %v3922_v23, %v3921_v28  ;;  %v3944_v49 = vadd.f32 %v3943_v47, %v3942_v57  ;;  %v1994_v43 = vadd.f32 %v12057_v10, %v12056_v30  ;;  %v12062_v57 = vld [vmem:[#allocation24_spill] sm:$0xff]  ;;  %v12073_v51 = vld [vmem:[#allocation266_spill] sm:$0xff]  ;;  %v12076_v30 = vld [vmem:[#allocation271_spill] sm:$0xff] }
 0x3b7   : > { %v12059_v38 = vmax.f32 %v12058_v53, 0.0  ;;  %v1358_v28 = vadd.f32 %v12061_v26, %v1212_v39  ;;  %v12063_v32 = vmax.f32 %v12062_v57, 0.0  ;;  %v1995_v35 = vadd.f32 %v12066_v40, %v12065_v56  ;;  %v12074_v42 = vld [vmem:[#allocation188_spill] sm:$0xff]  ;;  %v12078_v53 = vld [vmem:[#allocation199_spill] sm:$0xff] }
 0x3b8   : > { %v3924_v34 = vrot.slane %v3923_v62, 2  ;;  %v3945_v2 = vrot.slane %v3944_v49, 2  ;;  %v2140_v25 = vadd.f32 %v12067_v54, %v1994_v43  ;;  %v12069_v23 = vmax.f32 %v12068_v44, 0.0  ;;  %v12085_v40 = vld [vmem:[#allocation244_spill] sm:$0xff]  ;;  %v12087_v44 = vld [vmem:[#allocation273_spill] sm:$0xff] }
 0x3b9   : > { %v2407_v37 = vadd.f32 %v12060_v7, %v12059_v38  ;;  %v2428_v14 = vadd.f32 %v12064_v48, %v12063_v32  ;;  %v2771_v24 = vadd.f32 %v12071_v20, %v12070_v60  ;;  %v2772_v41 = vadd.f32 %v12073_v51, %v12072_v63  ;;  %v12079_v38 = vld [vmem:[#allocation272_spill] sm:$0xff]  ;;  %v906_v48 = vpop.permute.xlu0 %905  ;;  %v12089_v60 = vld [vmem:[#allocation201_spill] sm:$0xff]  ;;  %v12090_v51 = vld [vmem:[#allocation191_spill] sm:$0xff] }
 0x3ba   : > { %v3925_v45 = vadd.f32 %v3924_v34, %v3923_v62  ;;  %v3946_v33 = vadd.f32 %v3945_v2, %v3944_v49  ;;  %v2141_v39 = vadd.f32 %v12074_v42, %v1995_v35  ;;  %v12077_v10 = vmax.f32 %v12076_v30, 0.0  ;;  %v12082_v62 = vld [vmem:[#allocation190_spill] sm:$0xff]  ;;  %v12084_v34 = vld [vmem:[#allocation267_spill] sm:$0xff]  ;;  %v12086_v35 = vld [vmem:[#allocation268_spill] sm:$0xff] }
 0x3bb   : > { %v2408_v47 = vadd.f32 %v2407_v37, %v12069_v23  ;;  %v2429_v9 = vadd.f32 %v2428_v14, %v2349_v1  ;;  %v2917_v22 = vadd.f32 %v12075_v18, %v2771_v24  ;;  %v12080_v7 = vmax.f32 %v12079_v38, 0.0  ;;  %v12081_v37 = vld [vmem:[#allocation200_spill] sm:$0xff]  ;;  %v12083_v1 = vld [vmem:[#allocation243_spill] sm:$0xff] }
 0x3bc   : > { %v3184_v43 = vadd.f32 %v12078_v53, %v12077_v10  ;;  %v3926_v57 = vrot.slane %v3925_v45, 1  ;;  %v3947_v32 = vrot.slane %v3946_v33, 1  ;;  %v2918_v49 = vadd.f32 %v12082_v62, %v2772_v41  ;;  %v12091_v41 = vld [vmem:[#allocation274_spill] sm:$0xff]  ;;  %v12093_v30 = vld [vmem:[#allocation152_spill] sm:$0xff] }
 0x3bd   : > { %v3205_v26 = vadd.f32 %v12081_v37, %v12080_v7  ;;  %v3548_v2 = vadd.f32 %v12084_v34, %v12083_v1  ;;  %v3549_v54 = vadd.f32 %v12086_v35, %v12085_v40  ;;  %v12088_v23 = vmax.f32 %v12087_v44, 0.0 }
 0x3be   : > { %v3185_v14 = vadd.f32 %v3184_v43, %v3125_v59  ;;  %v10305_v24 = vadd.f32 %v3926_v57, %v3925_v45  ;;  %v10307_v63 = vadd.f32 %v3947_v32, %v3946_v33  ;;  %v12092_v18 = vmax.f32 %v12091_v41, 0.0 }
 0x3bf   : > { %v3206_v56 = vadd.f32 %v3205_v26, %v3126_v8  ;;  %v3961_v20 = vadd.f32 %v12089_v60, %v12088_v23  ;;  %v3694_v42 = vadd.f32 %v12090_v51, %v3548_v2  ;;  %v1439_v59 = vmul.f32 %v7940_v58, %v906_v48 }
 0x3c0   : > { %v3982_v10 = vadd.f32 %v12093_v30, %v12092_v18  ;;  %v1440_v8 = vmul.f32 %v7943_v29, %v906_v48  ;;  %v2222_v43 = vmul.f32 %v7946_v55, %v906_v48  ;;  %v3995_v38 = vcombine.low %v10305_v24, %v10307_v63 }
 0x3c1   : > { %v3962_v53 = vadd.f32 %v3961_v20, %v3902_v31  ;;  %v2223_v33 = vmul.f32 %v11912_v27, %v906_v48  ;;  %v2999_v7 = vmul.f32 %v11913_v16, %v906_v48  ;;  %v1503_v37 = vadd.f32 %v1439_v59, %v1357_v6  ;;  %v12094_v31 = vld [vmem:[#allocation192_spill] sm:$0xff] }
 0x3c2   : > { %v3983_v45 = vadd.f32 %v3982_v10, %v3903_v52  ;;  %v1504_v26 = vadd.f32 %v1440_v8, %v1358_v28  ;;  %v2286_v57 = vadd.f32 %v2222_v43, %v2140_v25  ;;  %v3000_v32 = vmul.f32 %v11914_v5, %v906_v48 }
 0x3c3   : > { %v3695_v62 = vadd.f32 %v12094_v31, %v3549_v54  ;;  %v2287_v58 = vadd.f32 %v2223_v33, %v2141_v39  ;;  %v3063_v1 = vadd.f32 %v2999_v7, %v2917_v22  ;;  %v3776_v29 = vmul.f32 %v11915_v0, %v906_v48 }
 0x3c4   : > { %v1567_v55 = vmax.f32 %v1503_v37, 0.0  ;;  %v1568_v34 = vmax.f32 %v1504_v26, 0.0  ;;  %v2350_v2 = vmax.f32 %v2286_v57, 0.0  ;;  %v3064_v40 = vadd.f32 %v3000_v32, %v2918_v49 }
 0x3c5   : > { %v2351_v52 = vmax.f32 %v2287_v58, 0.0  ;;  %v3127_v35 = vmax.f32 %v3063_v1, 0.0  ;;  %v3777_v27 = vmul.f32 %v11916_v50, %v906_v48  ;;  %v3840_v16 = vadd.f32 %v3776_v29, %v3694_v42 }
 0x3c6   : > { %v1626_v6 = vadd.f32 %v10257_v12, %v1567_v55  ;;  %v1647_v28 = vadd.f32 %v10261_v46, %v1568_v34  ;;  %v2409_v5 = vadd.f32 %v2408_v47, %v2350_v2  ;;  %v3128_v25 = vmax.f32 %v3064_v40, 0.0 }
 0x3c7   : > { %v2430_v54 = vadd.f32 %v2429_v9, %v2351_v52  ;;  %v3186_v39 = vadd.f32 %v3185_v14, %v3127_v35  ;;  %v3841_v22 = vadd.f32 %v3777_v27, %v3695_v62  ;;  %v3904_v44 = vmax.f32 %v3840_v16, 0.0 }
 0x3c8   : > { %v1627_v0 = vrot.slane %v1626_v6, 4  ;;  %v1648_v23 = vrot.slane %v1647_v28, 4  ;;  %v2410_v60 = vrot.slane %v2409_v5, 4  ;;  %v3207_v20 = vadd.f32 %v3206_v56, %v3128_v25 }
 0x3c9   : > { %v2431_v49 = vrot.slane %v2430_v54, 4  ;;  %v3187_v51 = vrot.slane %v3186_v39, 4  ;;  %v3905_v41 = vmax.f32 %v3841_v22, 0.0  ;;  %v3963_v18 = vadd.f32 %v3962_v53, %v3904_v44 }
 0x3ca   : > { %v1628_v50 = vadd.f32 %v1627_v0, %v1626_v6  ;;  %v1649_v48 = vadd.f32 %v1648_v23, %v1647_v28  ;;  %v2411_v42 = vadd.f32 %v2410_v60, %v2409_v5  ;;  %v3208_v12 = vrot.slane %v3207_v20, 4 }
 0x3cb   : > { %v2432_v30 = vadd.f32 %v2431_v49, %v2430_v54  ;;  %v3188_v46 = vadd.f32 %v3187_v51, %v3186_v39  ;;  %v3964_v47 = vrot.slane %v3963_v18, 4  ;;  %v3984_v10 = vadd.f32 %v3983_v45, %v3905_v41 }
 0x3cc   : > { %v1629_v9 = vrot.slane %v1628_v50, 2  ;;  %v1650_v14 = vrot.slane %v1649_v48, 2  ;;  %v2412_v59 = vrot.slane %v2411_v42, 2  ;;  %v3209_v8 = vadd.f32 %v3208_v12, %v3207_v20 }
 0x3cd   : > { %v2433_v43 = vrot.slane %v2432_v30, 2  ;;  %v3189_v33 = vrot.slane %v3188_v46, 2  ;;  %v3965_v7 = vadd.f32 %v3964_v47, %v3963_v18  ;;  %v3985_v56 = vrot.slane %v3984_v10, 4 }
 0x3ce   : > { %v1630_v37 = vadd.f32 %v1629_v9, %v1628_v50  ;;  %v1651_v26 = vadd.f32 %v1650_v14, %v1649_v48  ;;  %v2413_v57 = vadd.f32 %v2412_v59, %v2411_v42  ;;  %v3210_v53 = vrot.slane %v3209_v8, 2 }
 0x3cf   : > { %v2434_v32 = vadd.f32 %v2433_v43, %v2432_v30  ;;  %v3190_v31 = vadd.f32 %v3189_v33, %v3188_v46  ;;  %v3966_v62 = vrot.slane %v3965_v7, 2  ;;  %v3986_v58 = vadd.f32 %v3985_v56, %v3984_v10  ;;  %v3129_v10 = vld [vmem:[#allocation2 + $0x8] sm:$0xf]  ;;  %v3906_v56 = vld [vmem:[#allocation2 + $0xc] sm:$0xf] }
 0x3d0   : > { %v1631_v1 = vrot.slane %v1630_v37, 1  ;;  %v1652_v29 = vrot.slane %v1651_v26, 1  ;;  %v2414_v55 = vrot.slane %v2413_v57, 1  ;;  %v3211_v45 = vadd.f32 %v3210_v53, %v3209_v8 }
 0x3d1   : > { %v2435_v34 = vrot.slane %v2434_v32, 1  ;;  %v3191_v2 = vrot.slane %v3190_v31, 1  ;;  %v3967_v40 = vadd.f32 %v3966_v62, %v3965_v7  ;;  %v3987_v52 = vrot.slane %v3986_v58, 2  ;;  %v5159_v62 = vld [vmem:[%s5500_s25 + $0xc0] sm:$0xff] (!%p4909_p7)  }
 0x3d2   : > { %v1632_v35 = vadd.f32 %v1631_v1, %v1630_v37  ;;  %v1653_v27 = vadd.f32 %v1652_v29, %v1651_v26  ;;  %v2415_v16 = vadd.f32 %v2414_v55, %v2413_v57  ;;  %v3212_v6 = vrot.slane %v3211_v45, 1  ;;  %4999 = vmatprep.subr.bf16.mxu1 (!%p4909_p7), %v5159_v62  ;;  %v5161_v1 = vld [vmem:[%s5500_s25 + $0x80] sm:$0xff] (!%p4909_p7)   ;;  %v5162_v29 = vld [vmem:[%s5500_s25 + $0x48] sm:$0xff] (!%p4909_p7)  }
 0x3d3   : > { %v2436_v28 = vadd.f32 %v2435_v34, %v2434_v32  ;;  %v3192_v5 = vadd.f32 %v3191_v2, %v3190_v31  ;;  %v3968_v25 = vrot.slane %v3967_v40, 1  ;;  %v3988_v54 = vadd.f32 %v3987_v52, %v3986_v58  ;;  %v5158_v31 = vld [vmem:[%s5500_s25 + $0x40] sm:$0xff] (!%p4909_p7)   ;;  %5000 = vmatpush3.bf16.msra.mxu1 (!%p4909_p7), %v5161_v1  ;;  %v5163_v55 = vld [vmem:[%s5500_s25 + $0xc8] sm:$0xff] (!%p4909_p7)   ;;  %v5166_v2 = vld [vmem:[%s5500_s25 + $0x50] sm:$0xff] (!%p4909_p7)  }
 0x3d4   : > { %v1666_v39 = vcombine.low %v1632_v35, %v1653_v27  ;;  %v3213_v22 = vadd.f32 %v3212_v6, %v3211_v45  ;;  %v1665_v41 = vrot.slane %v1658_v36, %v10268_v19  ;;  %v2448_v48 = vrot.slane %v2441_v61, %v10268_v19  ;;  %v1569_v36 = vld [vmem:[#allocation2] sm:$0xf]  ;;  %v2352_v61 = vld [vmem:[#allocation2 + $0x4] sm:$0xf]  ;;  %4977 = vmatprep.subr.bf16.mxu0 (!%p4909_p7), %v5158_v31  ;;  %v5164_v45 = vld [vmem:[%s5500_s25 + $0x8] sm:$0xff] (!%p4909_p7)  }
 0x3d5   : > { %v2449_v44 = vcombine.low %v2415_v16, %v2436_v28  ;;  %v3969_v0 = vadd.f32 %v3968_v25, %v3967_v40  ;;  %v3989_v23 = vrot.slane %v3988_v54, 1  ;;  %v3225_v30 = vrot.slane %v3218_v11, %v10268_v19  ;;  %v5160_v58 = vld [vmem:[%s5500_s25] sm:$0xff] (!%p4909_p7)   ;;  %5001 = vmatprep.subr.bf16.mxu1 (!%p4909_p7), %v5163_v55  ;;  %v5165_v34 = vld [vmem:[%s5500_s25 + $0x88] sm:$0xff] (!%p4909_p7)   ;;  %v5167_v40 = vld [vmem:[%s5500_s25 + $0xd0] sm:$0xff] (!%p4909_p7)  }
 0x3d6   : > { %v1673_v60 = vrot.slane %v1666_v39, %v10268_v19  ;;  %v3226_v20 = vcombine.low %v3192_v5, %v3213_v22  ;;  %v4002_v15 = vrot.slane %v3995_v38, %v10268_v19  ;;  %4978 = vmatpush3.bf16.msra.mxu0 (!%p4909_p7), %v5160_v58  ;;  %v5168_v52 = vld [vmem:[%s5500_s25 + $0x10] sm:$0xff] (!%p4909_p7)   ;;  %v5170_v27 = vld [vmem:[%s5500_s25 + $0x58] sm:$0xff] (!%p4909_p7)   ;;  %v5174_v5 = vld [vmem:[%s5500_s25 + $0x60] sm:$0xff] (!%p4909_p7)  }
 0x3d7   : > { %v2456_v49 = vrot.slane %v2449_v44, %v10268_v19  ;;  %v3990_v51 = vadd.f32 %v3989_v23, %v3988_v54  ;;  %4979 = vmatprep.subr.bf16.mxu0 (!%p4909_p7), %v5162_v29  ;;  %5002 = vmatpush3.bf16.msra.mxu1 (!%p4909_p7), %v5165_v34  ;;  %v5169_v35 = vld [vmem:[%s5500_s25 + $0x90] sm:$0xff] (!%p4909_p7)   ;;  %v5171_v16 = vld [vmem:[%s5500_s25 + $0xd8] sm:$0xff] (!%p4909_p7)   ;;  %v5175_v25 = vld [vmem:[%s5500_s25 + $0xe0] sm:$0xff] (!%p4909_p7)  }
 0x3d8   : > { %v1678_v18 = vrot.slane %v1673_v60, 7  ;;  %v3233_v50 = vrot.slane %v3226_v20, %v10268_v19  ;;  %5003 = vmatprep.subr.bf16.mxu1 (!%p4909_p7), %v5167_v40  ;;  %v5172_v6 = vld [vmem:[%s5500_s25 + $0x18] sm:$0xff] (!%p4909_p7)   ;;  %v5176_v54 = vld [vmem:[%s5500_s25 + $0x20] sm:$0xff] (!%p4909_p7)   ;;  %v5178_v22 = vld [vmem:[%s5500_s25 + $0x68] sm:$0xff] (!%p4909_p7)  }
 0x3d9   : > { %v2459_v42 = vrot.slane %v2456_v49, 7  ;;  %v4003_v12 = vcombine.low %v3969_v0, %v3990_v51  ;;  %v5173_v28 = vld [vmem:[%s5500_s25 + $0x98] sm:$0xff] (!%p4909_p7)   ;;  %v5177_v39 = vld [vmem:[%s5500_s25 + $0xa0] sm:$0xff] (!%p4909_p7)   ;;  %v5179_v44 = vld [vmem:[%s5500_s25 + $0xe8] sm:$0xff] (!%p4909_p7)  }
 0x3da   : > { %v1680_v13 = vsel %vm1679_vm0, %v1678_v18, %v1665_v41  ;;  %v3236_v21 = vrot.slane %v3233_v50, 7  ;;  %4980 = vmatpush3.bf16.msra.mxu0 (!%p4909_p7), %v5164_v45  ;;  %v5180_v0 = vld [vmem:[%s5500_s25 + $0x28] sm:$0xff] (!%p4909_p7)   ;;  %v5182_v60 = vld [vmem:[%s5500_s25 + $0x70] sm:$0xff] (!%p4909_p7)   ;;  %v5186_v41 = vld [vmem:[%s5500_s25 + $0x78] sm:$0xff] (!%p4909_p7)  }
 0x3db   : > { %v1682_v46 = vsel %vm1681_vm1, %v1678_v18, %v1680_v13  ;;  %v2460_v47 = vsel %vm1679_vm0, %v2459_v42, %v2448_v48  ;;  %v4010_v3 = vrot.slane %v4003_v12, %v10268_v19  ;;  %4981 = vmatprep.subr.bf16.mxu0 (!%p4909_p7), %v5166_v2  ;;  %5004 = vmatpush3.bf16.msra.mxu1 (!%p4909_p7), %v5169_v35  ;;  %v5181_v23 = vld [vmem:[%s5500_s25 + $0xa8] sm:$0xff] (!%p4909_p7)   ;;  %v5183_v20 = vld [vmem:[%s5500_s25 + $0xf0] sm:$0xff] (!%p4909_p7)   ;;  %v5188_v50 = vld [vmem:[%s5500_s25 + $0x38] sm:$0xff] (!%p4909_p7)  }
 0x3dc   : > { %v1684_v17 = vsel %vm1683_vm2, %v1678_v18, %v1682_v46  ;;  %v2461_v4 = vsel %vm1681_vm1, %v2459_v42, %v2460_v47  ;;  %v3237_v11 = vsel %vm1679_vm0, %v3236_v21, %v3225_v30  ;;  %5005 = vmatprep.subr.bf16.mxu1 (!%p4909_p7), %v5171_v16  ;;  %v5184_v49 = vld [vmem:[%s5500_s25 + $0x30] sm:$0xff] (!%p4909_p7)   ;;  %v5189_v48 = vld [vmem:[%s5500_s25 + $0xb8] sm:$0xff] (!%p4909_p7)   ;;  %v5190_v30 = vld [vmem:[%s5500_s25 + $0x140] sm:$0xff] (!%p4909_p7)  }
 0x3dd   : > { %v1686_v9 = vsel %vm1685_vm3, %v1678_v18, %v1684_v17  ;;  %v2462_v14 = vsel %vm1683_vm2, %v2459_v42, %v2461_v4  ;;  %v3238_v59 = vsel %vm1681_vm1, %v3236_v21, %v3237_v11  ;;  %v4013_v8 = vrot.slane %v4010_v3, 7  ;;  %v5185_v51 = vld [vmem:[%s5500_s25 + $0xb0] sm:$0xff] (!%p4909_p7)   ;;  %v5187_v18 = vld [vmem:[%s5500_s25 + $0xf8] sm:$0xff] (!%p4909_p7)   ;;  %v5191_v13 = vld [vmem:[%s5500_s25 + $0x1c0] sm:$0xff] (!%p4909_p7)  }
 0x3de   : > { %v1688_v43 = vadd.f32 %v1686_v9, %v1569_v36  ;;  %v2463_v33 = vsel %vm1685_vm3, %v2459_v42, %v2462_v14  ;;  %v3239_v24 = vsel %vm1683_vm2, %v3236_v21, %v3238_v59  ;;  %4982 = vmatpush3.bf16.msra.mxu0 (!%p4909_p7), %v5168_v52  ;;  %v5192_v17 = vld [vmem:[%s5500_s25 + $0x100] sm:$0xff] (!%p4909_p7)   ;;  %v5194_v11 = vld [vmem:[%s5500_s25 + $0x148] sm:$0xff] (!%p4909_p7)   ;;  %v5214_v1 = vld [vmem:[%s5500_s25 + $0x170] sm:$0xff] (!%p4909_p7)  }
 0x3df   : > { %v2465_v63 = vadd.f32 %v2463_v33, %v2352_v61  ;;  %v3240_v38 = vsel %vm1685_vm3, %v3236_v21, %v3239_v24  ;;  %v4014_v7 = vsel %vm1679_vm0, %v4013_v8, %v4002_v15  ;;  %4024 = sbr.rel (%p4909_p7) target bundleno = 1265 (0x4f1), region = 89  ;;  %4983 = vmatprep.subr.bf16.mxu0 (!%p4909_p7), %v5170_v27  ;;  %5006 = vmatpush3.bf16.msra.mxu1 (!%p4909_p7), %v5173_v28  ;;  %v5193_v9 = vld [vmem:[%s5500_s25 + $0x180] sm:$0xff] (!%p4909_p7)   ;;  %v5195_v14 = vld [vmem:[%s5500_s25 + $0x1c8] sm:$0xff] (!%p4909_p7)   ;;  %v5199_v33 = vld [vmem:[%s5500_s25 + $0x1d0] sm:$0xff] (!%p4909_p7)  }
 0x3e0   : > { %1689 = vst [vmem:[#allocation2] sm:$0xf] %v1688_v43  ;;  %v3242_v37 = vadd.f32 %v3240_v38, %v3129_v10  ;;  %v4015_v26 = vsel %vm1681_vm1, %v4013_v8, %v4014_v7  ;;  %5007 = vmatprep.subr.bf16.mxu1 (!%p4909_p7), %v5175_v25  ;;  %v5196_v59 = vld [vmem:[%s5500_s25 + $0x108] sm:$0xff] (!%p4909_p7)   ;;  %v5200_v24 = vld [vmem:[%s5500_s25 + $0x110] sm:$0xff] (!%p4909_p7)   ;;  %v5203_v7 = vld [vmem:[%s5500_s25 + $0x1d8] sm:$0xff] (!%p4909_p7)  }
 0x3e1   : > { %2466 = vst [vmem:[#allocation2 + $0x4] sm:$0xf] %v2465_v63  ;;  %v4016_v57 = vsel %vm1683_vm2, %v4013_v8, %v4015_v26  ;;  %v5197_v43 = vld [vmem:[%s5500_s25 + $0x188] sm:$0xff] (!%p4909_p7)   ;;  %v5202_v63 = vld [vmem:[%s5500_s25 + $0x158] sm:$0xff] (!%p4909_p7)   ;;  %v5201_v38 = vld [vmem:[%s5500_s25 + $0x190] sm:$0xff] (!%p4909_p7)  }
 0x3e2   : > { %3243 = vst [vmem:[#allocation2 + $0x8] sm:$0xf] %v3242_v37  ;;  %v4017_v53 = vsel %vm1685_vm3, %v4013_v8, %v4016_v57  ;;  %4984 = vmatpush3.bf16.msra.mxu0 (!%p4909_p7), %v5172_v6  ;;  %v5198_v8 = vld [vmem:[%s5500_s25 + $0x150] sm:$0xff] (!%p4909_p7)   ;;  %v5206_v37 = vld [vmem:[%s5500_s25 + $0x160] sm:$0xff] (!%p4909_p7)   ;;  %v5205_v26 = vld [vmem:[%s5500_s25 + $0x198] sm:$0xff] (!%p4909_p7)  }
 0x3e3   : > { %v4019_v32 = vadd.f32 %v4017_v53, %v3906_v56  ;;  %4985 = vmatprep.subr.bf16.mxu0 (!%p4909_p7), %v5174_v5  ;;  %5008 = vmatpush3.bf16.msra.mxu1 (!%p4909_p7), %v5177_v39  ;;  %v5204_v56 = vld [vmem:[%s5500_s25 + $0x118] sm:$0xff] (!%p4909_p7)   ;;  %v5207_v57 = vld [vmem:[%s5500_s25 + $0x1e0] sm:$0xff] (!%p4909_p7)   ;;  %v5211_v62 = vld [vmem:[%s5500_s25 + $0x1e8] sm:$0xff] (!%p4909_p7)  }
 0x3e4   : > { %5009 = vmatprep.subr.bf16.mxu1 (!%p4909_p7), %v5179_v44  ;;  %v5208_v53 = vld [vmem:[%s5500_s25 + $0x120] sm:$0xff] (!%p4909_p7)   ;;  %v5212_v58 = vld [vmem:[%s5500_s25 + $0x128] sm:$0xff] (!%p4909_p7)   ;;  %v5215_v55 = vld [vmem:[%s5500_s25 + $0x1f0] sm:$0xff] (!%p4909_p7)  }
 0x3e5   : > { %4020 = vst [vmem:[#allocation2 + $0xc] sm:$0xf] %v4019_v32  ;;  %v5210_v32 = vld [vmem:[%s5500_s25 + $0x168] sm:$0xff] (!%p4909_p7)   ;;  %v5209_v31 = vld [vmem:[%s5500_s25 + $0x1a0] sm:$0xff] (!%p4909_p7)   ;;  %v5216_v45 = vld [vmem:[%s5500_s25 + $0x130] sm:$0xff] (!%p4909_p7)  }
 0x3e6   : > { %4986 = vmatpush3.bf16.msra.mxu0 %v5176_v54  ;;  %v5213_v29 = vld [vmem:[%s5500_s25 + $0x1a8] sm:$0xff]   ;;  %v5218_v34 = vld [vmem:[%s5500_s25 + $0x178] sm:$0xff]   ;;  %v5217_v40 = vld [vmem:[%s5500_s25 + $0x1b0] sm:$0xff]  }
 0x3e7   : > { %4987 = vmatprep.subr.bf16.mxu0 %v5178_v22  ;;  %5010 = vmatpush3.bf16.msra.mxu1 %v5181_v23  ;;  %v5219_v35 = vld [vmem:[%s5500_s25 + $0x1f8] sm:$0xff]  }
 0x3e8   : > { %5011 = vmatprep.subr.bf16.mxu1 %v5183_v20  ;;  %v4025_v42 = vld [vmem:[#allocation2] sm:$0xff]  ;;  %v5220_v27 = vld [vmem:[%s5500_s25 + $0x138] sm:$0xff]  }
 0x3e9   : > { %v4027_v12 = vmul.f32 0.00390625, %v4025_v42  ;;  %v5221_v28 = vld [vmem:[%s5500_s25 + $0x1b8] sm:$0xff]  }
 0x3ea   : > { %4988 = vmatpush3.bf16.msra.mxu0 %v5180_v0 }
 0x3eb   : > { %4989 = vmatprep.subr.bf16.mxu0 %v5182_v60  ;;  %5012 = vmatpush3.bf16.msra.mxu1 %v5185_v51  ;;  %v4038_v21 = vrot.slane %v4027_v12, %v10268_v19  ;;  %v4031_v36 = vcombine.high %v4027_v12, %v4027_v12 }
 0x3ec   : > { %5013 = vmatprep.subr.bf16.mxu1 %v5187_v18  ;;  %v4026_v2 = vld [vmem:[#allocation2 + $0x8] sm:$0xff] }
 0x3ed   : > { %v4046_v46 = vcombine.high %v4038_v21, %v4038_v21  ;;  %v4045_v47 = vrot.slane %v4031_v36, %v10268_v19  ;;  %v4073_v3 = vpack.c.bf16 %v4038_v21, %v4038_v21  ;;  %v4028_v52 = vmul.f32 0.00390625, %v4026_v2 }
 0x3ee   : > { %4990 = vmatpush3.bf16.msra.mxu0 %v5184_v49 }
 0x3ef   : > { %4991 = vmatprep.subr.bf16.mxu0 %v5186_v41  ;;  %5014 = vmatpush3.bf16.msra.mxu1 %v5189_v48  ;;  %v4074_v15 = vpack.c.bf16 %v4046_v46, %v4046_v46  ;;  %v4047_v61 = vcombine.high %v4045_v47, %v4045_v47  ;;  %v4075_v4 = vpack.c.bf16 %v4045_v47, %v4045_v47 }
 0x3f0   : > { %5043 = vmatprep.subr.bf16.mxu1 %v5191_v13  ;;  %v4055_v16 = vrot.slane %v4028_v52, %v10268_v19  ;;  %v4048_v6 = vcombine.high %v4028_v52, %v4028_v52 }
 0x3f1   : > { %4625 = vmatprep.mubr.bf16.mxu0 %v4074_v15  ;;  %v4076_v10 = vpack.c.bf16 %v4047_v61, %v4047_v61 }
 0x3f2   : > { %4992 = vmatpush3.bf16.msra.mxu0 %v5188_v50  ;;  %v4063_v5 = vcombine.high %v4055_v16, %v4055_v16  ;;  %v4062_v25 = vrot.slane %v4048_v6, %v10268_v19  ;;  %v4077_v54 = vpack.c.bf16 %v4055_v16, %v4055_v16 }
 0x3f3   : > { %5021 = vmatprep.subr.bf16.mxu0 %v5190_v30  ;;  %4665 = vmatprep.mubr.bf16.mxu1 %v4076_v10 }
 0x3f4   : > { %4666 = vmatmul.mubr.bf16.vlgmr.msra.gmra.mrb[0].mxu1 %v4075_v4  ;;  %v4078_v39 = vpack.c.bf16 %v4063_v5, %v4063_v5  ;;  %v4064_v22 = vcombine.high %v4062_v25, %v4062_v25  ;;  %v4079_v44 = vpack.c.bf16 %v4062_v25, %v4062_v25 }
 0x3f5   : > { %4626 = vmatmul.mubr.bf16.vlgmr.msra.gmra.mrb[0].mxu0 %v4073_v3  ;;  %5044 = vmatpush3.bf16.msra.mxu1 %v5193_v9 }
 0x3f6   : > { %5022 = vmatpush3.bf16.msra.mxu0 %v5192_v17  ;;  %5045 = vmatprep.subr.bf16.mxu1 %v5195_v14  ;;  %v4080_v0 = vpack.c.bf16 %v4064_v22, %v4064_v22 }
 0x3f7   : > { %5023 = vmatprep.subr.bf16.mxu0 %v5194_v11  ;;  %4705 = vmatprep.mubr.bf16.mxu0 %v4078_v39 }
 0x3f8   : > { %4745 = vmatprep.mubr.bf16.mxu1 %v4080_v0 }
 0x3f9   : > { %5046 = vmatpush3.bf16.msra.mxu1 %v5197_v43 }
 0x3fa   : > { %5024 = vmatpush3.bf16.msra.mxu0 %v5196_v59  ;;  %5047 = vmatprep.subr.bf16.mxu1 %v5199_v33 }
 0x3fb   : > { %5025 = vmatprep.subr.bf16.mxu0 %v5198_v8 }
 0x3fd   : > { %5048 = vmatpush3.bf16.msra.mxu1 %v5201_v38 }
 0x3fe   : > { %5026 = vmatpush3.bf16.msra.mxu0 %v5200_v24  ;;  %5049 = vmatprep.subr.bf16.mxu1 %v5203_v7 }
 0x3ff   : > { %5027 = vmatprep.subr.bf16.mxu0 %v5202_v63 }
 0x401   : > { %5050 = vmatpush3.bf16.msra.mxu1 %v5205_v26 }
 0x402   : > { %5028 = vmatpush3.bf16.msra.mxu0 %v5204_v56  ;;  %5051 = vmatprep.subr.bf16.mxu1 %v5207_v57 }
 0x403   : > { %5029 = vmatprep.subr.bf16.mxu0 %v5206_v37 }
 0x405   : > { %5052 = vmatpush3.bf16.msra.mxu1 %v5209_v31 }
 0x406   : > { %5030 = vmatpush3.bf16.msra.mxu0 %v5208_v53  ;;  %5053 = vmatprep.subr.bf16.mxu1 %v5211_v62 }
 0x407   : > { %5031 = vmatprep.subr.bf16.mxu0 %v5210_v32 }
 0x409   : > { %5054 = vmatpush3.bf16.msra.mxu1 %v5213_v29 }
 0x40a   : > { %5032 = vmatpush3.bf16.msra.mxu0 %v5212_v58  ;;  %5055 = vmatprep.subr.bf16.mxu1 %v5215_v55 }
 0x40b   : > { %5033 = vmatprep.subr.bf16.mxu0 %v5214_v1 }
 0x40d   : > { %5056 = vmatpush3.bf16.msra.mxu1 %v5217_v40 }
 0x40e   : > { %5034 = vmatpush3.bf16.msra.mxu0 %v5216_v45  ;;  %5057 = vmatprep.subr.bf16.mxu1 %v5219_v35 }
 0x40f   : > { %5035 = vmatprep.subr.bf16.mxu0 %v5218_v34 }
 0x411   : > { %5058 = vmatpush3.bf16.msra.mxu1 %v5221_v28 }
 0x412   : > { %5036 = vmatpush3.bf16.msra.mxu0 %v5220_v27 }
 0x414   : > { %4746 = vmatmul.mubr.bf16.vlgmr.msra.gmra.mrb[4].mxu1 %v4079_v44 }
 0x415   : > { %4706 = vmatmul.mubr.bf16.vlgmr.msra.gmra.mrb[4].mxu0 %v4077_v54 }
 0x4c7   : > { %v5015_v20 = vpop.f32.mrb[0].mxu1 }
 0x4c8   : > { %v4993_v23 = vpop.f32.mrb[0].mxu0  ;;  %v5016_v41 = vpop.f32.mrb[1].mxu1 }
 0x4c9   : > { %v4994_v60 = vpop.f32.mrb[1].mxu0  ;;  %v5017_v19 = vadd.f32 %v5016_v41, %v5015_v20  ;;  %v5018_v50 = vpop.f32.mrb[2].mxu1 }
 0x4ca   : > { %v4995_v49 = vadd.f32 %v4994_v60, %v4993_v23  ;;  %v4996_v51 = vpop.f32.mrb[2].mxu0  ;;  %v5019_v48 = vpop.f32.mrb[3].mxu1 }
 0x4cb   : > { %v4997_v18 = vpop.f32.mrb[3].mxu0 }
 0x4cc   : > { %v4668_v42 = vadd.f32 %v5017_v19, %v4995_v49 }
 0x4e7   : > { %v5059_v13 = vpop.f32.mrb[4].mxu1 }
 0x4e8   : > { %v5037_v12 = vpop.f32.mrb[4].mxu0  ;;  %v5060_v46 = vpop.f32.mrb[5].mxu1 }
 0x4e9   : > { %v5038_v30 = vpop.f32.mrb[5].mxu0  ;;  %v5061_v15 = vadd.f32 %v5060_v46, %v5059_v13  ;;  %v5062_v61 = vpop.f32.mrb[6].mxu1 }
 0x4ea   : > { %v5039_v21 = vadd.f32 %v5038_v30, %v5037_v12  ;;  %v5040_v36 = vpop.f32.mrb[6].mxu0  ;;  %v5063_v17 = vpop.f32.mrb[7].mxu1 }
 0x4eb   : > { %v5041_v47 = vpop.f32.mrb[7].mxu0 }
 0x4ec   : > { %v4708_v3 = vadd.f32 %v5039_v21, %v4668_v42 }
 0x4ee   : > { %v4748_v4 = vadd.f32 %v5061_v15, %v4708_v3 }
 0x4f0   : > { %4753 = vst [vmem:[%s5522_s29] sm:$0x3] %v4748_v4 }
 0x4f1 PF: > { %s17_s24 = sadd.s32 1, %s5332_s24   ;;  %s12095_s5 = sld [smem:[#allocation7_spill]] }
 0x4f2   : > { %p14_p8 = scmp.ge.s32.totalorder %s17_s24, 6   ;;  %s12096_s15 = smov %s5300_s16 }
 0x4f3   : > { %s12097_s16 = smov %s5304_s17  ;;  %s12098_s17 = smov %s5447_s9 }
 0x4f4   : > { %s12099_s18 = smov %s5312_s19  ;;  %s12100_s19 = smov %s5434_s6 }
 0x4f5   : > { %s12101_s20 = smov %s5324_s22  ;;  %s12102_s21 = smov %s5328_s23 }
 0x4f6   : > { %s12103_s22 = smov %s12106_s26  ;;  %16 = sbr.rel (!%p14_p8) target bundleno = 6 (0x6), region = 139 }
 0x4f7   : > { %s12104_s23 = smov %s12095_s5 }
 0x4fd   :  { %4779 = vsyncpa [#allocation5], 1 }
 0x4fe   :  { %4781 = vsyncpa [#allocation5 + $0x1], 1 }

</bundles_post_ra>
